<compile_context>
chip_gen: v5e
topology: v5e:2x2
jax: 0.10.0
libtpu: 0.0.40
codegen_flags: <defaults>
</compile_context>

<pallas_src>
import functools

import jax
import jax.numpy as jnp
from jax.experimental import pallas as pl
from jax.experimental.pallas import tpu as pltpu

EPS = 1e-5
NEG_SLOPE = 0.2
N_CLASSES = 9
OC_PAD = 128                    # lane-dense conv output channels
FC_TK_TARGET = 2048             # K tile for the fc1 reduction grid (review)
CONV_ROW_CHUNK = 256            # output rows per conv grid step
VMEM_LIMIT = 32 * 1024 * 1024   # safe scoped-VMEM request on v5e/v6e/v7x


def _round_up(x, m):
    return ((x + m - 1) // m) * m


def _leaky(x):
    return jnp.where(x > 0, x, NEG_SLOPE * x)


def _stream_spec(block_shape, index_map, n_steps):
    """BlockSpec with 3-deep buffering on long streamed axes (fc1 weight/x)."""
    if n_steps >= 4:
        try:
            return pl.BlockSpec(block_shape, index_map,
                                pipeline_mode=pl.Buffered(3))
        except Exception:               # older API: fall back to default 2-deep
            pass
    return pl.BlockSpec(block_shape, index_map)


# --------------------------------------------------------------------- conv
def _conv_kernel(x_ref, w_ref, b_ref, sc_ref, sh_ref, y_ref, st_ref, *,
                 A, WP, OH, OW, chunk, halo, apply_prologue):
    """Grid = (N, n_chunks), both 'parallel'.

    x_ref : (1, R_in, C4)   resident flattened phase-space input (raw), f32/bf16
    w_ref : (A*A*C4, OCp)   tap-folded conv weights, bf16 (resident)
    b_ref : (1, OCp)        conv bias, f32 (resident)
    sc/sh : (1, C4)         previous block's BN scale/shift (tiled x4), f32
    y_ref : (1, chunk, OCp) raw conv output rows for this chunk, bf16
    st_ref: (1, 1, 2, OCp)  masked per-column [sum, sum_of_squares], f32
    """
    c_idx = pl.program_id(1)
    r0 = pl.multiple_of(c_idx * chunk, chunk)

    # Hoisted prologue: load the chunk+halo window once, apply the previous
    # block's BatchNorm + LeakyReLU once, cast to bf16 once.
    win = x_ref[0, pl.ds(r0, chunk + halo), :].astype(jnp.float32)
    if apply_prologue:
        win = _leaky(win * sc_ref[...] + sh_ref[...])
    winb = win.astype(jnp.bfloat16)

    # Fold all A*A taps into the matmul K dimension (single implicit GEMM).
    pieces = []
    for da in range(A):
        for db in range(A):
            off = da * WP + db
            pieces.append(winb[off:off + chunk, :])
    xcat = jnp.concatenate(pieces, axis=1) if len(pieces) > 1 else pieces[0]

    acc = jnp.dot(xcat, w_ref[...],
                  preferred_element_type=jnp.float32) + b_ref[...]
    y_ref[0, :, :] = acc.astype(y_ref.dtype)

    # Masked BN statistics: only rows mapping to a valid (oh, ow) count.
    ids = r0 + jax.lax.broadcasted_iota(jnp.int32, (chunk, 1), 0)
    valid = jnp.logical_and(ids % WP < OW, ids < OH * WP)
    st_ref[0, 0, 0:1, :] = jnp.sum(jnp.where(valid, acc, 0.0),
                                   axis=0, keepdims=True)
    st_ref[0, 0, 1:2, :] = jnp.sum(jnp.where(valid, acc * acc, 0.0),
                                   axis=0, keepdims=True)


def _space_to_depth_flat(x, A, chunk):
    """(N,H,W,C) -> zero-padded flat phase tensor (N, R_in, 4C) + layout info."""
    N, H, W, C = x.shape
    Hp, Wp = H + (H % 2), W + (W % 2)
    if (Hp, Wp) != (H, W):
        x = jnp.pad(x, ((0, 0), (0, Hp - H), (0, Wp - W), (0, 0)))
    HP, WP = Hp // 2, Wp // 2
    xp = x.reshape(N, HP, 2, WP, 2, C).transpose(0, 1, 3, 2, 4, 5)
    xp = xp.reshape(N, HP * WP, 4 * C)
    M = HP * WP
    n_chunks = (M + chunk - 1) // chunk
    halo = (A - 1) * WP + (A - 1)              # room for the tap shifts
    R_in = n_chunks * chunk + halo
    xp = jnp.pad(xp, ((0, 0), (0, R_in - M), (0, 0)))
    return xp, HP, WP, n_chunks, halo


def conv_block(x_raw, prev_scale, prev_shift, wp, bp, gamma, beta, ksize, oc):
    """Conv2d(stride=2) on raw NHWC input (previous block's BN + LeakyReLU is
    fused as the prologue).  Returns (raw bf16 NHWC output, bn_scale,
    bn_shift) where scale/shift normalize this block's output."""
    N, H, W, C = x_raw.shape
    A = (ksize + 1) // 2
    OH, OW = (H - ksize) // 2 + 1, (W - ksize) // 2 + 1
    chunk = CONV_ROW_CHUNK
    xflat, HP, WP, n_chunks, halo = _space_to_depth_flat(x_raw, A, chunk)
    C4 = 4 * C
    R_in = xflat.shape[1]
    KT = A * A * C4
    OCp = wp.shape[-1]
    apply_prologue = prev_scale is not None
    if apply_prologue:
        sc4 = jnp.tile(prev_scale, 4).reshape(1, C4).astype(jnp.float32)
        sh4 = jnp.tile(prev_shift, 4).reshape(1, C4).astype(jnp.float32)
    else:
        sc4 = jnp.ones((1, C4), jnp.float32)
        sh4 = jnp.zeros((1, C4), jnp.float32)

    kernel = functools.partial(
        _conv_kernel, A=A, WP=WP, OH=OH, OW=OW, chunk=chunk, halo=halo,
        apply_prologue=apply_prologue)

    M_out = n_chunks * chunk
    yflat, stats = pl.pallas_call(
        kernel,
        out_shape=(jax.ShapeDtypeStruct((N, M_out, OCp), jnp.bfloat16),
                   jax.ShapeDtypeStruct((N, n_chunks, 2, OCp), jnp.float32)),
        grid=(N, n_chunks),
        in_specs=[
            pl.BlockSpec((1, R_in, C4), lambda n, c: (n, 0, 0)),
            pl.BlockSpec((KT, OCp), lambda n, c: (0, 0)),
            pl.BlockSpec((1, OCp), lambda n, c: (0, 0)),
            pl.BlockSpec((1, C4), lambda n, c: (0, 0)),
            pl.BlockSpec((1, C4), lambda n, c: (0, 0)),
        ],
        out_specs=(
            pl.BlockSpec((1, chunk, OCp), lambda n, c: (n, c, 0)),
            pl.BlockSpec((1, 1, 2, OCp), lambda n, c: (n, c, 0, 0)),
        ),
        compiler_params=pltpu.CompilerParams(
            dimension_semantics=("parallel", "parallel"),
            vmem_limit_bytes=VMEM_LIMIT),
    )(xflat, wp, bp, sc4, sh4)

    # Two-phase BatchNorm: finish the tiny OC-sized global statistics over all
    # N*OH*OW rows in f32 (training-mode forward, biased variance).
    count = N * OH * OW
    s = jnp.sum(stats[:, :, 0, :oc], axis=(0, 1))
    q = jnp.sum(stats[:, :, 1, :oc], axis=(0, 1))
    mean = s / count
    var = jnp.maximum(q / count - mean * mean, 0.0)
    inv = jax.lax.rsqrt(var + EPS)
    scale = gamma * inv
    shift = beta - mean * scale

    y_raw = yflat[:, :HP * WP, :].reshape(N, HP, WP, OCp)[:, :OH, :OW, :oc]
    return y_raw, scale, shift


# ----------------------------------------------------------------- fc head
def _fc_head_kernel(x_ref, sc_ref, sh_ref, w1_ref, b1_ref, w2_ref, b2_ref,
                    w3_ref, b3_ref, o_ref, acc_ref, *, reps):
    """K-tiled fc1 (conv3 BN+LReLU fused into the prologue); fc2 -> fc3 ->
    softmax run as the epilogue on the last K step."""
    k = pl.program_id(0)

    @pl.when(k == 0)
    def _():
        acc_ref[...] = jnp.zeros_like(acc_ref)

    # conv3 BN + LeakyReLU: the 128-wide scale/shift are tiled in-kernel
    # (features are in (h, w, c) order with c = 128), no (F,)-length streams.
    sc = jnp.tile(sc_ref[...], (1, reps))
    sh = jnp.tile(sh_ref[...], (1, reps))
    h = _leaky(x_ref[...].astype(jnp.float32) * sc + sh)
    acc_ref[...] += jnp.dot(h.astype(jnp.bfloat16), w1_ref[...],
                            preferred_element_type=jnp.float32)

    @pl.when(k == pl.num_programs(0) - 1)
    def _():
        h1 = _leaky(acc_ref[...] + b1_ref[...])
        h2 = jnp.dot(h1.astype(jnp.bfloat16), w2_ref[...],
                     preferred_element_type=jnp.float32) + b2_ref[...]
        h2 = _leaky(h2)
        logits = jnp.dot(h2.astype(jnp.bfloat16), w3_ref[...],
                         preferred_element_type=jnp.float32) + b3_ref[...]
        m = jnp.max(logits, axis=1, keepdims=True)
        e = jnp.exp(logits - m)
        o_ref[...] = e / jnp.sum(e, axis=1, keepdims=True)   # exact softmax


def fc_head(xf, scale_c, shift_c, w1_t, b1, w2_t, b2, w3_p, b3_p):
    N, F = xf.shape
    cdim = scale_c.shape[0]                       # 128 (conv3 channels)
    tk = min(FC_TK_TARGET, _round_up(F, 256))     # big K tiles (review item)
    Fp = _round_up(F, tk)
    if Fp != F:
        xf = jnp.pad(xf, ((0, 0), (0, Fp - F)))
        w1_t = jnp.pad(w1_t, ((0, Fp - F), (0, 0)))
    H1, H2, CP = w1_t.shape[1], w2_t.shape[1], w3_p.shape[1]
    n_steps = Fp // tk
    reps = tk // cdim
    kernel = functools.partial(_fc_head_kernel, reps=reps)
    return pl.pallas_call(
        kernel,
        out_shape=jax.ShapeDtypeStruct((N, CP), jnp.float32),
        grid=(n_steps,),
        in_specs=[
            _stream_spec((N, tk), lambda k: (0, k), n_steps),
            pl.BlockSpec((1, cdim), lambda k: (0, 0)),
            pl.BlockSpec((1, cdim), lambda k: (0, 0)),
            _stream_spec((tk, H1), lambda k: (k, 0), n_steps),
            pl.BlockSpec((1, H1), lambda k: (0, 0)),
            pl.BlockSpec((H1, H2), lambda k: (0, 0)),
            pl.BlockSpec((1, H2), lambda k: (0, 0)),
            pl.BlockSpec((H2, CP), lambda k: (0, 0)),
            pl.BlockSpec((1, CP), lambda k: (0, 0)),
        ],
        out_specs=pl.BlockSpec((N, CP), lambda k: (0, 0)),
        scratch_shapes=[pltpu.VMEM((N, H1), jnp.float32)],
        compiler_params=pltpu.CompilerParams(
            dimension_semantics=("arbitrary",),
            vmem_limit_bytes=VMEM_LIMIT),
    )(xf.astype(jnp.bfloat16),
      scale_c.reshape(1, cdim).astype(jnp.float32),
      shift_c.reshape(1, cdim).astype(jnp.float32),
      w1_t.astype(jnp.bfloat16), b1.reshape(1, H1).astype(jnp.float32),
      w2_t.astype(jnp.bfloat16), b2.reshape(1, H2).astype(jnp.float32),
      w3_p.astype(jnp.bfloat16), b3_p.reshape(1, CP).astype(jnp.float32))


# ------------------------------------------------------ params & weight prep
def init_conv(key, oc, ic, kh, kw):
    k1, k2 = jax.random.split(key)
    bound = 1.0 / (ic * kh * kw) ** 0.5
    w = jax.random.uniform(k1, (oc, ic, kh, kw), jnp.float32, -bound, bound)
    b = jax.random.uniform(k2, (oc,), jnp.float32, -bound, bound)
    return w, b


def init_linear(key, in_f, out_f):
    k1, k2 = jax.random.split(key)
    bound = 1.0 / in_f ** 0.5
    w = jax.random.uniform(k1, (out_f, in_f), jnp.float32, -bound, bound)
    b = jax.random.uniform(k2, (out_f,), jnp.float32, -bound, bound)
    return w, b


def init_params(key, fc_in):
    keys = jax.random.split(key, 6)
    p = {}
    p["conv1_w"], p["conv1_b"] = init_conv(keys[0], 32, 3, 5, 5)
    p["conv2_w"], p["conv2_b"] = init_conv(keys[1], 64, 32, 3, 3)
    p["conv3_w"], p["conv3_b"] = init_conv(keys[2], 128, 64, 3, 3)
    for c, n in ((32, 1), (64, 2), (128, 3)):
        p[f"bn{n}_g"] = jnp.ones((c,), jnp.float32)
        p[f"bn{n}_b"] = jnp.zeros((c,), jnp.float32)
    p["fc1_w"], p["fc1_b"] = init_linear(keys[3], fc_in, 512)
    p["fc2_w"], p["fc2_b"] = init_linear(keys[4], 512, 256)
    p["fc3_w"], p["fc3_b"] = init_linear(keys[5], 256, N_CLASSES)
    return p


def _prep_conv(w, b, ksize, oc_pad):
    """(OC,C,K,K) torch conv weight -> tap-folded (A*A*4*C, OC_pad) bf16."""
    oc, c, _, _ = w.shape
    A = (ksize + 1) // 2
    w_pad = jnp.pad(w, ((0, 0), (0, 0), (0, 2 * A - ksize), (0, 2 * A - ksize)))
    wp = w_pad.reshape(oc, c, A, 2, A, 2).transpose(2, 4, 3, 5, 1, 0)
    wp = wp.reshape(A * A * 4 * c, oc)
    wp = jnp.pad(wp, ((0, 0), (0, oc_pad - oc)))
    bp = jnp.pad(b, (0, oc_pad - oc)).reshape(1, oc_pad)
    return wp.astype(jnp.bfloat16), bp.astype(jnp.float32)


def prepare_params(params, oh3, ow3, cp=128):
    """One-time weight repacking: tap-folded conv weights (OC padded to 128
    for lane-dense stores), fc1 columns permuted from torch's (C,H,W) flatten
    order to NHWC (H,W,C), fc3 padded to a lane-dense 128-wide output."""
    prep = {}
    prep["c1_w"], prep["c1_b"] = _prep_conv(params["conv1_w"], params["conv1_b"], 5, OC_PAD)
    prep["c2_w"], prep["c2_b"] = _prep_conv(params["conv2_w"], params["conv2_b"], 3, OC_PAD)
    prep["c3_w"], prep["c3_b"] = _prep_conv(params["conv3_w"], params["conv3_b"], 3, OC_PAD)
    for n in (1, 2, 3):
        prep[f"bn{n}_g"] = params[f"bn{n}_g"]
        prep[f"bn{n}_b"] = params[f"bn{n}_b"]
    c3 = params["conv3_w"].shape[0]
    w1 = params["fc1_w"].reshape(-1, c3, oh3, ow3).transpose(0, 2, 3, 1)
    prep["fc1_w"] = w1.reshape(w1.shape[0], -1).T            # (F, 512), NHWC order
    prep["fc1_b"] = params["fc1_b"]
    prep["fc2_w"] = params["fc2_w"].T                        # (512, 256)
    prep["fc2_b"] = params["fc2_b"]
    w3 = params["fc3_w"].T                                   # (256, 9)
    prep["fc3_w"] = jnp.pad(w3, ((0, 0), (0, cp - N_CLASSES)))
    prep["fc3_b"] = jnp.concatenate(
        [params["fc3_b"], jnp.full((cp - N_CLASSES,), -1e30, jnp.float32)])
    return prep


# ------------------------------------------------------------------ forward
def classification_network_forward(prep, observation):
    """observation: (N, 3, H, W) float32 (NCHW, like nn.Conv2d) -> (N, 9)."""
    x = observation.transpose(0, 2, 3, 1)            # one-time NCHW -> NHWC

    # conv blocks; BN + LeakyReLU of block i is fused into block i+1 / fc1
    y1, s1, t1 = conv_block(x, None, None, prep["c1_w"], prep["c1_b"],
                            prep["bn1_g"], prep["bn1_b"], ksize=5, oc=32)
    y2, s2, t2 = conv_block(y1, s1, t1, prep["c2_w"], prep["c2_b"],
                            prep["bn2_g"], prep["bn2_b"], ksize=3, oc=64)
    y3, s3, t3 = conv_block(y2, s2, t2, prep["c3_w"], prep["c3_b"],
                            prep["bn3_g"], prep["bn3_b"], ksize=3, oc=128)

    n, oh3, ow3, c3 = y3.shape
    xf = y3.reshape(n, oh3 * ow3 * c3)               # NHWC flatten (h, w, c)

    probs = fc_head(xf, s3, t3,
                    prep["fc1_w"], prep["fc1_b"],
                    prep["fc2_w"], prep["fc2_b"],
                    prep["fc3_w"], prep["fc3_b"])
    return probs[:, :N_CLASSES]


# TODO(synk): BatchNorm running_mean/running_var buffer updates (a training
# side effect, not part of the returned value) are not reproduced.

if __name__ == "__main__":
    key = jax.random.PRNGKey(0)
    k_obs, k_par = jax.random.split(key)

    # small input consistent with the module: NCHW, 3 channels
    N, C, H, W = 2, 3, 30, 40
    obs = jax.random.normal(k_obs, (N, C, H, W), jnp.float32)

    # derive conv output spatial size -> FC input dim (analogue of 128*38*28)
    oh1, ow1 = (H - 5) // 2 + 1, (W - 5) // 2 + 1
    oh2, ow2 = (oh1 - 3) // 2 + 1, (ow1 - 3) // 2 + 1
    oh3, ow3 = (oh2 - 3) // 2 + 1, (ow2 - 3) // 2 + 1
    fc_in = 128 * oh3 * ow3

    params = init_params(k_par, fc_in)
    prep = prepare_params(params, oh3, ow3)

    fwd = jax.jit(classification_network_forward)
    out = jax.block_until_ready(fwd(prep, obs))

    assert out.shape == (N, N_CLASSES)
    assert bool(jnp.all(jnp.isfinite(out)))
    assert bool(jnp.allclose(jnp.sum(out, axis=1), 1.0, atol=5e-3))
    print("KERNEL_OK")
</pallas_src>

<mosaic_0001>
module attributes {stable_mosaic.version = 11 : i64} {
  func.func @_conv_kernel(%arg0: i32, %arg1: i32, %arg2: memref<1x554x12xf32, #tpu.memory_space<vmem>>, %arg3: memref<108x128xbf16, #tpu.memory_space<vmem>>, %arg4: memref<1x128xf32, #tpu.memory_space<vmem>>, %arg5: memref<1x12xf32, #tpu.memory_space<vmem>>, %arg6: memref<1x12xf32, #tpu.memory_space<vmem>>, %arg7: memref<1x256x128xbf16, #tpu.memory_space<vmem>>, %arg8: memref<1x1x2x128xf32, #tpu.memory_space<vmem>>) attributes {dimension_semantics = [#tpu.dimension_semantics<parallel>, #tpu.dimension_semantics<parallel>], iteration_bounds = array<i64: 2, 2>, scalar_prefetch = 0 : i64, scratch_operands = 0 : i64, tpu.core_type = #tpu.core_type<tc>, window_params = [{transform_indices = @transform_0, window_bounds = array<i64: 1, 554, 12>}, {pipeline_mode = #tpu.pipeline_mode<synchronous>, transform_indices = @transform_1, window_bounds = array<i64: 108, 128>}, {pipeline_mode = #tpu.pipeline_mode<synchronous>, transform_indices = @transform_2, window_bounds = array<i64: 1, 128>}, {pipeline_mode = #tpu.pipeline_mode<synchronous>, transform_indices = @transform_3, window_bounds = array<i64: 1, 12>}, {pipeline_mode = #tpu.pipeline_mode<synchronous>, transform_indices = @transform_4, window_bounds = array<i64: 1, 12>}, {transform_indices = @transform_5, window_bounds = array<i64: 1, 256, 128>}, {transform_indices = @transform_6, window_bounds = array<i64: 1, 1, 2, 128>}]} {
    %c256_i32 = arith.constant 256 : i32
    %0 = arith.muli %arg1, %c256_i32 : i32
    %1 = tpu.assume_multiple %0, 256 : i32
    %c0 = arith.constant 0 : index
    %2 = arith.index_cast %1 : i32 to index
    %c0_0 = arith.constant 0 : index
    %3 = vector.load %arg2[%c0, %2, %c0_0] : memref<1x554x12xf32, #tpu.memory_space<vmem>>, vector<1x298x12xf32>
    %4 = vector.shape_cast %3 : vector<1x298x12xf32> to vector<298x12xf32>
    %5 = arith.truncf %4 : vector<298x12xf32> to vector<298x12xbf16>
    %6 = vector.extract_strided_slice %5 {offsets = [0, 0], sizes = [256, 12], strides = [1, 1]} : vector<298x12xbf16> to vector<256x12xbf16>
    %7 = vector.extract_strided_slice %5 {offsets = [1, 0], sizes = [256, 12], strides = [1, 1]} : vector<298x12xbf16> to vector<256x12xbf16>
    %8 = vector.extract_strided_slice %5 {offsets = [2, 0], sizes = [256, 12], strides = [1, 1]} : vector<298x12xbf16> to vector<256x12xbf16>
    %9 = vector.extract_strided_slice %5 {offsets = [20, 0], sizes = [256, 12], strides = [1, 1]} : vector<298x12xbf16> to vector<256x12xbf16>
    %10 = vector.extract_strided_slice %5 {offsets = [21, 0], sizes = [256, 12], strides = [1, 1]} : vector<298x12xbf16> to vector<256x12xbf16>
    %11 = vector.extract_strided_slice %5 {offsets = [22, 0], sizes = [256, 12], strides = [1, 1]} : vector<298x12xbf16> to vector<256x12xbf16>
    %12 = vector.extract_strided_slice %5 {offsets = [40, 0], sizes = [256, 12], strides = [1, 1]} : vector<298x12xbf16> to vector<256x12xbf16>
    %13 = vector.extract_strided_slice %5 {offsets = [41, 0], sizes = [256, 12], strides = [1, 1]} : vector<298x12xbf16> to vector<256x12xbf16>
    %14 = vector.extract_strided_slice %5 {offsets = [42, 0], sizes = [256, 12], strides = [1, 1]} : vector<298x12xbf16> to vector<256x12xbf16>
    %15 = tpu.concatenate %6, %7, %8, %9, %10, %11, %12, %13, %14 in 1 : vector<256x12xbf16>, vector<256x12xbf16>, vector<256x12xbf16>, vector<256x12xbf16>, vector<256x12xbf16>, vector<256x12xbf16>, vector<256x12xbf16>, vector<256x12xbf16>, vector<256x12xbf16> -> vector<256x108xbf16>
    %c0_1 = arith.constant 0 : index
    %c0_2 = arith.constant 0 : index
    %16 = vector.load %arg3[%c0_1, %c0_2] : memref<108x128xbf16, #tpu.memory_space<vmem>>, vector<108x128xbf16>
    %cst = arith.constant dense<0.000000e+00> : vector<256x128xf32>
    %17 = tpu.matmul %15, %16, %cst {dimension_numbers = #tpu.dot_dimension_numbers<[1], [0], [0], [1], [0, 0, 1, 1], [], []>} : vector<256x108xbf16>, vector<108x128xbf16>, vector<256x128xf32> -> vector<256x128xf32>
    %c0_3 = arith.constant 0 : index
    %c0_4 = arith.constant 0 : index
    %18 = vector.load %arg4[%c0_3, %c0_4] : memref<1x128xf32, #tpu.memory_space<vmem>>, vector<1x128xf32>
    %19 = vector.broadcast %18 : vector<1x128xf32> to vector<256x128xf32>
    %20 = arith.addf %17, %19 : vector<256x128xf32>
    %21 = arith.truncf %20 : vector<256x128xf32> to vector<256x128xbf16>
    %c0_5 = arith.constant 0 : index
    %c0_6 = arith.constant 0 : index
    %c0_7 = arith.constant 0 : index
    %22 = vector.load %arg7[%c0_5, %c0_6, %c0_7] : memref<1x256x128xbf16, #tpu.memory_space<vmem>>, vector<1x256x128xbf16>
    %23 = vector.shape_cast %22 : vector<1x256x128xbf16> to vector<256x128xbf16>
    %24 = vector.shape_cast %21 : vector<256x128xbf16> to vector<1x256x128xbf16>
    tpu.vector_store %arg7[%c0_5, %c0_6, %c0_7], %24 {strides = array<i32>} : memref<1x256x128xbf16, #tpu.memory_space<vmem>>, vector<1x256x128xbf16>,
    %25 = tpu.iota {dimensions = array<i32: 0>} : vector<256x1xi32>
    %26 = vector.broadcast %1 : i32 to vector<256x1xi32>
    %27 = arith.addi %26, %25 : vector<256x1xi32>
    %c20_i32 = arith.constant 20 : i32
    %c0_i32 = arith.constant 0 : i32
    %28 = arith.cmpi eq, %c20_i32, %c0_i32 : i32
    %c1_i32 = arith.constant 1 : i32
    %29 = arith.select %28, %c1_i32, %c20_i32 : i32
    %30 = vector.broadcast %29 : i32 to vector<256x1xi32>
    %31 = arith.remsi %27, %30 : vector<256x1xi32>
    %c0_i32_8 = arith.constant 0 : i32
    %32 = vector.broadcast %c0_i32_8 : i32 to vector<256x1xi32>
    %33 = arith.cmpi ne, %31, %32 : vector<256x1xi32>
    %c0_i32_9 = arith.constant 0 : i32
    %34 = vector.broadcast %c0_i32_9 : i32 to vector<256x1xi32>
    %35 = arith.cmpi slt, %31, %34 : vector<256x1xi32>
    %c0_i32_10 = arith.constant 0 : i32
    %36 = arith.cmpi slt, %29, %c0_i32_10 : i32
    %37 = vector.broadcast %36 : i1 to vector<256x1xi1>
    %38 = vector.broadcast %37 : vector<256x1xi1> to vector<256x1xi1>
    %39 = arith.xori %35, %38 : vector<256x1xi1>
    %40 = arith.andi %39, %33 : vector<256x1xi1>
    %41 = vector.broadcast %29 : i32 to vector<256x1xi32>
    %42 = arith.addi %31, %41 : vector<256x1xi32>
    %43 = arith.select %40, %42, %31 : vector<256x1xi1>, vector<256x1xi32>
    %c18_i32 = arith.constant 18 : i32
    %44 = vector.broadcast %c18_i32 : i32 to vector<256x1xi32>
    %45 = arith.cmpi slt, %43, %44 : vector<256x1xi32>
    %c260_i32 = arith.constant 260 : i32
    %46 = vector.broadcast %c260_i32 : i32 to vector<256x1xi32>
    %47 = arith.cmpi slt, %27, %46 : vector<256x1xi32>
    %48 = arith.andi %45, %47 : vector<256x1xi1>
    %cst_11 = arith.constant 0.000000e+00 : f32
    %49 = vector.shape_cast %48 : vector<256x1xi1> to vector<256x1xi1>
    %50 = vector.broadcast %49 : vector<256x1xi1> to vector<256x128xi1>
    %51 = vector.broadcast %cst_11 : f32 to vector<256x128xf32>
    %52 = arith.select %50, %20, %51 : vector<256x128xi1>, vector<256x128xf32>
    %cst_12 = arith.constant dense<0.000000e+00> : vector<128xf32>
    %53 = vector.multi_reduction <add>, %52, %cst_12 [0] : vector<256x128xf32> to vector<128xf32>
    %54 = vector.shape_cast %53 : vector<128xf32> to vector<1x128xf32>
    %c0_13 = arith.constant 0 : index
    %c0_14 = arith.constant 0 : index
    %c0_15 = arith.constant 0 : index
    %c0_16 = arith.constant 0 : index
    %55 = vector.load %arg8[%c0_13, %c0_14, %c0_15, %c0_16] : memref<1x1x2x128xf32, #tpu.memory_space<vmem>>, vector<1x1x1x128xf32>
    %56 = vector.shape_cast %55 : vector<1x1x1x128xf32> to vector<1x128xf32>
    %57 = vector.shape_cast %54 : vector<1x128xf32> to vector<1x1x1x128xf32>
    tpu.vector_store %arg8[%c0_13, %c0_14, %c0_15, %c0_16], %57 {strides = array<i32>} : memref<1x1x2x128xf32, #tpu.memory_space<vmem>>, vector<1x1x1x128xf32>,
    %58 = arith.mulf %20, %20 : vector<256x128xf32>
    %cst_17 = arith.constant 0.000000e+00 : f32
    %59 = vector.shape_cast %48 : vector<256x1xi1> to vector<256x1xi1>
    %60 = vector.broadcast %59 : vector<256x1xi1> to vector<256x128xi1>
    %61 = vector.broadcast %cst_17 : f32 to vector<256x128xf32>
    %62 = arith.select %60, %58, %61 : vector<256x128xi1>, vector<256x128xf32>
    %cst_18 = arith.constant dense<0.000000e+00> : vector<128xf32>
    %63 = vector.multi_reduction <add>, %62, %cst_18 [0] : vector<256x128xf32> to vector<128xf32>
    %64 = vector.shape_cast %63 : vector<128xf32> to vector<1x128xf32>
    %c0_19 = arith.constant 0 : index
    %c0_20 = arith.constant 0 : index
    %c1 = arith.constant 1 : index
    %c0_21 = arith.constant 0 : index
    %65 = vector.load %arg8[%c0_19, %c0_20, %c1, %c0_21] : memref<1x1x2x128xf32, #tpu.memory_space<vmem>>, vector<1x1x1x128xf32>
    %66 = vector.shape_cast %65 : vector<1x1x1x128xf32> to vector<1x128xf32>
    %67 = vector.shape_cast %64 : vector<1x128xf32> to vector<1x1x1x128xf32>
    tpu.vector_store %arg8[%c0_19, %c0_20, %c1, %c0_21], %67 {strides = array<i32>} : memref<1x1x2x128xf32, #tpu.memory_space<vmem>>, vector<1x1x1x128xf32>,
    return
  }
  func.func @transform_0(%arg0: i32, %arg1: i32) -> (i32, i32, i32) {
    %c0_i32 = arith.constant 0 : i32
    %c0_i32_0 = arith.constant 0 : i32
    %c0_i32_1 = arith.constant 0 : i32
    return %arg0, %c0_i32, %c0_i32_0 : i32, i32, i32
  }
  func.func @transform_1(%arg0: i32, %arg1: i32) -> (i32, i32) {
    %c0_i32 = arith.constant 0 : i32
    %c0_i32_0 = arith.constant 0 : i32
    %c0_i32_1 = arith.constant 0 : i32
    return %c0_i32, %c0_i32_0 : i32, i32
  }
  func.func @transform_2(%arg0: i32, %arg1: i32) -> (i32, i32) {
    %c0_i32 = arith.constant 0 : i32
    %c0_i32_0 = arith.constant 0 : i32
    %c0_i32_1 = arith.constant 0 : i32
    return %c0_i32, %c0_i32_0 : i32, i32
  }
  func.func @transform_3(%arg0: i32, %arg1: i32) -> (i32, i32) {
    %c0_i32 = arith.constant 0 : i32
    %c0_i32_0 = arith.constant 0 : i32
    %c0_i32_1 = arith.constant 0 : i32
    return %c0_i32, %c0_i32_0 : i32, i32
  }
  func.func @transform_4(%arg0: i32, %arg1: i32) -> (i32, i32) {
    %c0_i32 = arith.constant 0 : i32
    %c0_i32_0 = arith.constant 0 : i32
    %c0_i32_1 = arith.constant 0 : i32
    return %c0_i32, %c0_i32_0 : i32, i32
  }
  func.func @transform_5(%arg0: i32, %arg1: i32) -> (i32, i32, i32) {
    %c0_i32 = arith.constant 0 : i32
    %c0_i32_0 = arith.constant 0 : i32
    return %arg0, %arg1, %c0_i32 : i32, i32, i32
  }
  func.func @transform_6(%arg0: i32, %arg1: i32) -> (i32, i32, i32, i32) {
    %c0_i32 = arith.constant 0 : i32
    %c0_i32_0 = arith.constant 0 : i32
    %c0_i32_1 = arith.constant 0 : i32
    return %arg0, %arg1, %c0_i32, %c0_i32_0 : i32, i32, i32, i32
  }
}

module attributes {stable_mosaic.version = 11 : i64} {
  func.func @_conv_kernel(%arg0: i32, %arg1: i32, %arg2: memref<1x266x128xbf16, #tpu.memory_space<vmem>>, %arg3: memref<512x128xbf16, #tpu.memory_space<vmem>>, %arg4: memref<1x128xf32, #tpu.memory_space<vmem>>, %arg5: memref<1x128xf32, #tpu.memory_space<vmem>>, %arg6: memref<1x128xf32, #tpu.memory_space<vmem>>, %arg7: memref<1x256x128xbf16, #tpu.memory_space<vmem>>, %arg8: memref<1x1x2x128xf32, #tpu.memory_space<vmem>>) attributes {dimension_semantics = [#tpu.dimension_semantics<parallel>, #tpu.dimension_semantics<parallel>], iteration_bounds = array<i64: 2, 1>, scalar_prefetch = 0 : i64, scratch_operands = 0 : i64, tpu.core_type = #tpu.core_type<tc>, window_params = [{transform_indices = @transform_0, window_bounds = array<i64: 1, 266, 128>}, {pipeline_mode = #tpu.pipeline_mode<synchronous>, transform_indices = @transform_1, window_bounds = array<i64: 512, 128>}, {pipeline_mode = #tpu.pipeline_mode<synchronous>, transform_indices = @transform_2, window_bounds = array<i64: 1, 128>}, {pipeline_mode = #tpu.pipeline_mode<synchronous>, transform_indices = @transform_3, window_bounds = array<i64: 1, 128>}, {pipeline_mode = #tpu.pipeline_mode<synchronous>, transform_indices = @transform_4, window_bounds = array<i64: 1, 128>}, {transform_indices = @transform_5, window_bounds = array<i64: 1, 256, 128>}, {transform_indices = @transform_6, window_bounds = array<i64: 1, 1, 2, 128>}]} {
    %c256_i32 = arith.constant 256 : i32
    %0 = arith.muli %arg1, %c256_i32 : i32
    %1 = tpu.assume_multiple %0, 256 : i32
    %c0 = arith.constant 0 : index
    %2 = arith.index_cast %1 : i32 to index
    %c0_0 = arith.constant 0 : index
    %3 = vector.load %arg2[%c0, %2, %c0_0] : memref<1x266x128xbf16, #tpu.memory_space<vmem>>, vector<1x266x128xbf16>
    %4 = vector.shape_cast %3 : vector<1x266x128xbf16> to vector<266x128xbf16>
    %5 = arith.extf %4 : vector<266x128xbf16> to vector<266x128xf32>
    %c0_1 = arith.constant 0 : index
    %c0_2 = arith.constant 0 : index
    %6 = vector.load %arg5[%c0_1, %c0_2] : memref<1x128xf32, #tpu.memory_space<vmem>>, vector<1x128xf32>
    %7 = vector.broadcast %6 : vector<1x128xf32> to vector<266x128xf32>
    %8 = arith.mulf %5, %7 : vector<266x128xf32>
    %c0_3 = arith.constant 0 : index
    %c0_4 = arith.constant 0 : index
    %9 = vector.load %arg6[%c0_3, %c0_4] : memref<1x128xf32, #tpu.memory_space<vmem>>, vector<1x128xf32>
    %10 = vector.broadcast %9 : vector<1x128xf32> to vector<266x128xf32>
    %11 = arith.addf %8, %10 : vector<266x128xf32>
    %cst = arith.constant 0.000000e+00 : f32
    %12 = vector.broadcast %cst : f32 to vector<266x128xf32>
    %13 = arith.cmpf ogt, %11, %12 : vector<266x128xf32>
    %cst_5 = arith.constant 2.000000e-01 : f32
    %14 = vector.broadcast %cst_5 : f32 to vector<266x128xf32>
    %15 = arith.mulf %14, %11 : vector<266x128xf32>
    %16 = arith.select %13, %11, %15 : vector<266x128xi1>, vector<266x128xf32>
    %17 = arith.truncf %16 : vector<266x128xf32> to vector<266x128xbf16>
    %18 = vector.extract_strided_slice %17 {offsets = [0, 0], sizes = [256, 128], strides = [1, 1]} : vector<266x128xbf16> to vector<256x128xbf16>
    %19 = vector.extract_strided_slice %17 {offsets = [1, 0], sizes = [256, 128], strides = [1, 1]} : vector<266x128xbf16> to vector<256x128xbf16>
    %20 = vector.extract_strided_slice %17 {offsets = [9, 0], sizes = [256, 128], strides = [1, 1]} : vector<266x128xbf16> to vector<256x128xbf16>
    %21 = vector.extract_strided_slice %17 {offsets = [10, 0], sizes = [256, 128], strides = [1, 1]} : vector<266x128xbf16> to vector<256x128xbf16>
    %22 = tpu.concatenate %18, %19, %20, %21 in 1 : vector<256x128xbf16>, vector<256x128xbf16>, vector<256x128xbf16>, vector<256x128xbf16> -> vector<256x512xbf16>
    %c0_6 = arith.constant 0 : index
    %c0_7 = arith.constant 0 : index
    %23 = vector.load %arg3[%c0_6, %c0_7] : memref<512x128xbf16, #tpu.memory_space<vmem>>, vector<512x128xbf16>
    %cst_8 = arith.constant dense<0.000000e+00> : vector<256x128xf32>
    %24 = tpu.matmul %22, %23, %cst_8 {dimension_numbers = #tpu.dot_dimension_numbers<[1], [0], [0], [1], [0, 0, 1, 1], [], []>} : vector<256x512xbf16>, vector<512x128xbf16>, vector<256x128xf32> -> vector<256x128xf32>
    %c0_9 = arith.constant 0 : index
    %c0_10 = arith.constant 0 : index
    %25 = vector.load %arg4[%c0_9, %c0_10] : memref<1x128xf32, #tpu.memory_space<vmem>>, vector<1x128xf32>
    %26 = vector.broadcast %25 : vector<1x128xf32> to vector<256x128xf32>
    %27 = arith.addf %24, %26 : vector<256x128xf32>
    %28 = arith.truncf %27 : vector<256x128xf32> to vector<256x128xbf16>
    %c0_11 = arith.constant 0 : index
    %c0_12 = arith.constant 0 : index
    %c0_13 = arith.constant 0 : index
    %29 = vector.load %arg7[%c0_11, %c0_12, %c0_13] : memref<1x256x128xbf16, #tpu.memory_space<vmem>>, vector<1x256x128xbf16>
    %30 = vector.shape_cast %29 : vector<1x256x128xbf16> to vector<256x128xbf16>
    %31 = vector.shape_cast %28 : vector<256x128xbf16> to vector<1x256x128xbf16>
    tpu.vector_store %arg7[%c0_11, %c0_12, %c0_13], %31 {strides = array<i32>} : memref<1x256x128xbf16, #tpu.memory_space<vmem>>, vector<1x256x128xbf16>,
    %32 = tpu.iota {dimensions = array<i32: 0>} : vector<256x1xi32>
    %33 = vector.broadcast %1 : i32 to vector<256x1xi32>
    %34 = arith.addi %33, %32 : vector<256x1xi32>
    %c9_i32 = arith.constant 9 : i32
    %c0_i32 = arith.constant 0 : i32
    %35 = arith.cmpi eq, %c9_i32, %c0_i32 : i32
    %c1_i32 = arith.constant 1 : i32
    %36 = arith.select %35, %c1_i32, %c9_i32 : i32
    %37 = vector.broadcast %36 : i32 to vector<256x1xi32>
    %38 = arith.remsi %34, %37 : vector<256x1xi32>
    %c0_i32_14 = arith.constant 0 : i32
    %39 = vector.broadcast %c0_i32_14 : i32 to vector<256x1xi32>
    %40 = arith.cmpi ne, %38, %39 : vector<256x1xi32>
    %c0_i32_15 = arith.constant 0 : i32
    %41 = vector.broadcast %c0_i32_15 : i32 to vector<256x1xi32>
    %42 = arith.cmpi slt, %38, %41 : vector<256x1xi32>
    %c0_i32_16 = arith.constant 0 : i32
    %43 = arith.cmpi slt, %36, %c0_i32_16 : i32
    %44 = vector.broadcast %43 : i1 to vector<256x1xi1>
    %45 = vector.broadcast %44 : vector<256x1xi1> to vector<256x1xi1>
    %46 = arith.xori %42, %45 : vector<256x1xi1>
    %47 = arith.andi %46, %40 : vector<256x1xi1>
    %48 = vector.broadcast %36 : i32 to vector<256x1xi32>
    %49 = arith.addi %38, %48 : vector<256x1xi32>
    %50 = arith.select %47, %49, %38 : vector<256x1xi1>, vector<256x1xi32>
    %c8_i32 = arith.constant 8 : i32
    %51 = vector.broadcast %c8_i32 : i32 to vector<256x1xi32>
    %52 = arith.cmpi slt, %50, %51 : vector<256x1xi32>
    %c54_i32 = arith.constant 54 : i32
    %53 = vector.broadcast %c54_i32 : i32 to vector<256x1xi32>
    %54 = arith.cmpi slt, %34, %53 : vector<256x1xi32>
    %55 = arith.andi %52, %54 : vector<256x1xi1>
    %cst_17 = arith.constant 0.000000e+00 : f32
    %56 = vector.shape_cast %55 : vector<256x1xi1> to vector<256x1xi1>
    %57 = vector.broadcast %56 : vector<256x1xi1> to vector<256x128xi1>
    %58 = vector.broadcast %cst_17 : f32 to vector<256x128xf32>
    %59 = arith.select %57, %27, %58 : vector<256x128xi1>, vector<256x128xf32>
    %cst_18 = arith.constant dense<0.000000e+00> : vector<128xf32>
    %60 = vector.multi_reduction <add>, %59, %cst_18 [0] : vector<256x128xf32> to vector<128xf32>
    %61 = vector.shape_cast %60 : vector<128xf32> to vector<1x128xf32>
    %c0_19 = arith.constant 0 : index
    %c0_20 = arith.constant 0 : index
    %c0_21 = arith.constant 0 : index
    %c0_22 = arith.constant 0 : index
    %62 = vector.load %arg8[%c0_19, %c0_20, %c0_21, %c0_22] : memref<1x1x2x128xf32, #tpu.memory_space<vmem>>, vector<1x1x1x128xf32>
    %63 = vector.shape_cast %62 : vector<1x1x1x128xf32> to vector<1x128xf32>
    %64 = vector.shape_cast %61 : vector<1x128xf32> to vector<1x1x1x128xf32>
    tpu.vector_store %arg8[%c0_19, %c0_20, %c0_21, %c0_22], %64 {strides = array<i32>} : memref<1x1x2x128xf32, #tpu.memory_space<vmem>>, vector<1x1x1x128xf32>,
    %65 = arith.mulf %27, %27 : vector<256x128xf32>
    %cst_23 = arith.constant 0.000000e+00 : f32
    %66 = vector.shape_cast %55 : vector<256x1xi1> to vector<256x1xi1>
    %67 = vector.broadcast %66 : vector<256x1xi1> to vector<256x128xi1>
    %68 = vector.broadcast %cst_23 : f32 to vector<256x128xf32>
    %69 = arith.select %67, %65, %68 : vector<256x128xi1>, vector<256x128xf32>
    %cst_24 = arith.constant dense<0.000000e+00> : vector<128xf32>
    %70 = vector.multi_reduction <add>, %69, %cst_24 [0] : vector<256x128xf32> to vector<128xf32>
    %71 = vector.shape_cast %70 : vector<128xf32> to vector<1x128xf32>
    %c0_25 = arith.constant 0 : index
    %c0_26 = arith.constant 0 : index
    %c1 = arith.constant 1 : index
    %c0_27 = arith.constant 0 : index
    %72 = vector.load %arg8[%c0_25, %c0_26, %c1, %c0_27] : memref<1x1x2x128xf32, #tpu.memory_space<vmem>>, vector<1x1x1x128xf32>
    %73 = vector.shape_cast %72 : vector<1x1x1x128xf32> to vector<1x128xf32>
    %74 = vector.shape_cast %71 : vector<1x128xf32> to vector<1x1x1x128xf32>
    tpu.vector_store %arg8[%c0_25, %c0_26, %c1, %c0_27], %74 {strides = array<i32>} : memref<1x1x2x128xf32, #tpu.memory_space<vmem>>, vector<1x1x1x128xf32>,
    return
  }
  func.func @transform_0(%arg0: i32, %arg1: i32) -> (i32, i32, i32) {
    %c0_i32 = arith.constant 0 : i32
    %c0_i32_0 = arith.constant 0 : i32
    %c0_i32_1 = arith.constant 0 : i32
    return %arg0, %c0_i32, %c0_i32_0 : i32, i32, i32
  }
  func.func @transform_1(%arg0: i32, %arg1: i32) -> (i32, i32) {
    %c0_i32 = arith.constant 0 : i32
    %c0_i32_0 = arith.constant 0 : i32
    %c0_i32_1 = arith.constant 0 : i32
    return %c0_i32, %c0_i32_0 : i32, i32
  }
  func.func @transform_2(%arg0: i32, %arg1: i32) -> (i32, i32) {
    %c0_i32 = arith.constant 0 : i32
    %c0_i32_0 = arith.constant 0 : i32
    %c0_i32_1 = arith.constant 0 : i32
    return %c0_i32, %c0_i32_0 : i32, i32
  }
  func.func @transform_3(%arg0: i32, %arg1: i32) -> (i32, i32) {
    %c0_i32 = arith.constant 0 : i32
    %c0_i32_0 = arith.constant 0 : i32
    %c0_i32_1 = arith.constant 0 : i32
    return %c0_i32, %c0_i32_0 : i32, i32
  }
  func.func @transform_4(%arg0: i32, %arg1: i32) -> (i32, i32) {
    %c0_i32 = arith.constant 0 : i32
    %c0_i32_0 = arith.constant 0 : i32
    %c0_i32_1 = arith.constant 0 : i32
    return %c0_i32, %c0_i32_0 : i32, i32
  }
  func.func @transform_5(%arg0: i32, %arg1: i32) -> (i32, i32, i32) {
    %c0_i32 = arith.constant 0 : i32
    %c0_i32_0 = arith.constant 0 : i32
    return %arg0, %arg1, %c0_i32 : i32, i32, i32
  }
  func.func @transform_6(%arg0: i32, %arg1: i32) -> (i32, i32, i32, i32) {
    %c0_i32 = arith.constant 0 : i32
    %c0_i32_0 = arith.constant 0 : i32
    %c0_i32_1 = arith.constant 0 : i32
    return %arg0, %arg1, %c0_i32, %c0_i32_0 : i32, i32, i32, i32
  }
}

module attributes {stable_mosaic.version = 11 : i64} {
  func.func @_conv_kernel(%arg0: i32, %arg1: i32, %arg2: memref<1x261x256xbf16, #tpu.memory_space<vmem>>, %arg3: memref<1024x128xbf16, #tpu.memory_space<vmem>>, %arg4: memref<1x128xf32, #tpu.memory_space<vmem>>, %arg5: memref<1x256xf32, #tpu.memory_space<vmem>>, %arg6: memref<1x256xf32, #tpu.memory_space<vmem>>, %arg7: memref<1x256x128xbf16, #tpu.memory_space<vmem>>, %arg8: memref<1x1x2x128xf32, #tpu.memory_space<vmem>>) attributes {dimension_semantics = [#tpu.dimension_semantics<parallel>, #tpu.dimension_semantics<parallel>], iteration_bounds = array<i64: 2, 1>, scalar_prefetch = 0 : i64, scratch_operands = 0 : i64, tpu.core_type = #tpu.core_type<tc>, window_params = [{transform_indices = @transform_0, window_bounds = array<i64: 1, 261, 256>}, {pipeline_mode = #tpu.pipeline_mode<synchronous>, transform_indices = @transform_1, window_bounds = array<i64: 1024, 128>}, {pipeline_mode = #tpu.pipeline_mode<synchronous>, transform_indices = @transform_2, window_bounds = array<i64: 1, 128>}, {pipeline_mode = #tpu.pipeline_mode<synchronous>, transform_indices = @transform_3, window_bounds = array<i64: 1, 256>}, {pipeline_mode = #tpu.pipeline_mode<synchronous>, transform_indices = @transform_4, window_bounds = array<i64: 1, 256>}, {transform_indices = @transform_5, window_bounds = array<i64: 1, 256, 128>}, {transform_indices = @transform_6, window_bounds = array<i64: 1, 1, 2, 128>}]} {
    %c256_i32 = arith.constant 256 : i32
    %0 = arith.muli %arg1, %c256_i32 : i32
    %1 = tpu.assume_multiple %0, 256 : i32
    %c0 = arith.constant 0 : index
    %2 = arith.index_cast %1 : i32 to index
    %c0_0 = arith.constant 0 : index
    %3 = vector.load %arg2[%c0, %2, %c0_0] : memref<1x261x256xbf16, #tpu.memory_space<vmem>>, vector<1x261x256xbf16>
    %4 = vector.shape_cast %3 : vector<1x261x256xbf16> to vector<261x256xbf16>
    %5 = arith.extf %4 : vector<261x256xbf16> to vector<261x256xf32>
    %c0_1 = arith.constant 0 : index
    %c0_2 = arith.constant 0 : index
    %6 = vector.load %arg5[%c0_1, %c0_2] : memref<1x256xf32, #tpu.memory_space<vmem>>, vector<1x256xf32>
    %7 = vector.broadcast %6 : vector<1x256xf32> to vector<261x256xf32>
    %8 = arith.mulf %5, %7 : vector<261x256xf32>
    %c0_3 = arith.constant 0 : index
    %c0_4 = arith.constant 0 : index
    %9 = vector.load %arg6[%c0_3, %c0_4] : memref<1x256xf32, #tpu.memory_space<vmem>>, vector<1x256xf32>
    %10 = vector.broadcast %9 : vector<1x256xf32> to vector<261x256xf32>
    %11 = arith.addf %8, %10 : vector<261x256xf32>
    %cst = arith.constant 0.000000e+00 : f32
    %12 = vector.broadcast %cst : f32 to vector<261x256xf32>
    %13 = arith.cmpf ogt, %11, %12 : vector<261x256xf32>
    %cst_5 = arith.constant 2.000000e-01 : f32
    %14 = vector.broadcast %cst_5 : f32 to vector<261x256xf32>
    %15 = arith.mulf %14, %11 : vector<261x256xf32>
    %16 = arith.select %13, %11, %15 : vector<261x256xi1>, vector<261x256xf32>
    %17 = arith.truncf %16 : vector<261x256xf32> to vector<261x256xbf16>
    %18 = vector.extract_strided_slice %17 {offsets = [0, 0], sizes = [256, 256], strides = [1, 1]} : vector<261x256xbf16> to vector<256x256xbf16>
    %19 = vector.extract_strided_slice %17 {offsets = [1, 0], sizes = [256, 256], strides = [1, 1]} : vector<261x256xbf16> to vector<256x256xbf16>
    %20 = vector.extract_strided_slice %17 {offsets = [4, 0], sizes = [256, 256], strides = [1, 1]} : vector<261x256xbf16> to vector<256x256xbf16>
    %21 = vector.extract_strided_slice %17 {offsets = [5, 0], sizes = [256, 256], strides = [1, 1]} : vector<261x256xbf16> to vector<256x256xbf16>
    %22 = tpu.concatenate %18, %19, %20, %21 in 1 : vector<256x256xbf16>, vector<256x256xbf16>, vector<256x256xbf16>, vector<256x256xbf16> -> vector<256x1024xbf16>
    %c0_6 = arith.constant 0 : index
    %c0_7 = arith.constant 0 : index
    %23 = vector.load %arg3[%c0_6, %c0_7] : memref<1024x128xbf16, #tpu.memory_space<vmem>>, vector<1024x128xbf16>
    %cst_8 = arith.constant dense<0.000000e+00> : vector<256x128xf32>
    %24 = tpu.matmul %22, %23, %cst_8 {dimension_numbers = #tpu.dot_dimension_numbers<[1], [0], [0], [1], [0, 0, 1, 1], [], []>} : vector<256x1024xbf16>, vector<1024x128xbf16>, vector<256x128xf32> -> vector<256x128xf32>
    %c0_9 = arith.constant 0 : index
    %c0_10 = arith.constant 0 : index
    %25 = vector.load %arg4[%c0_9, %c0_10] : memref<1x128xf32, #tpu.memory_space<vmem>>, vector<1x128xf32>
    %26 = vector.broadcast %25 : vector<1x128xf32> to vector<256x128xf32>
    %27 = arith.addf %24, %26 : vector<256x128xf32>
    %28 = arith.truncf %27 : vector<256x128xf32> to vector<256x128xbf16>
    %c0_11 = arith.constant 0 : index
    %c0_12 = arith.constant 0 : index
    %c0_13 = arith.constant 0 : index
    %29 = vector.load %arg7[%c0_11, %c0_12, %c0_13] : memref<1x256x128xbf16, #tpu.memory_space<vmem>>, vector<1x256x128xbf16>
    %30 = vector.shape_cast %29 : vector<1x256x128xbf16> to vector<256x128xbf16>
    %31 = vector.shape_cast %28 : vector<256x128xbf16> to vector<1x256x128xbf16>
    tpu.vector_store %arg7[%c0_11, %c0_12, %c0_13], %31 {strides = array<i32>} : memref<1x256x128xbf16, #tpu.memory_space<vmem>>, vector<1x256x128xbf16>,
    %32 = tpu.iota {dimensions = array<i32: 0>} : vector<256x1xi32>
    %33 = vector.broadcast %1 : i32 to vector<256x1xi32>
    %34 = arith.addi %33, %32 : vector<256x1xi32>
    %c4_i32 = arith.constant 4 : i32
    %c0_i32 = arith.constant 0 : i32
    %35 = arith.cmpi eq, %c4_i32, %c0_i32 : i32
    %c1_i32 = arith.constant 1 : i32
    %36 = arith.select %35, %c1_i32, %c4_i32 : i32
    %37 = vector.broadcast %36 : i32 to vector<256x1xi32>
    %38 = arith.remsi %34, %37 : vector<256x1xi32>
    %c0_i32_14 = arith.constant 0 : i32
    %39 = vector.broadcast %c0_i32_14 : i32 to vector<256x1xi32>
    %40 = arith.cmpi ne, %38, %39 : vector<256x1xi32>
    %c0_i32_15 = arith.constant 0 : i32
    %41 = vector.broadcast %c0_i32_15 : i32 to vector<256x1xi32>
    %42 = arith.cmpi slt, %38, %41 : vector<256x1xi32>
    %c0_i32_16 = arith.constant 0 : i32
    %43 = arith.cmpi slt, %36, %c0_i32_16 : i32
    %44 = vector.broadcast %43 : i1 to vector<256x1xi1>
    %45 = vector.broadcast %44 : vector<256x1xi1> to vector<256x1xi1>
    %46 = arith.xori %42, %45 : vector<256x1xi1>
    %47 = arith.andi %46, %40 : vector<256x1xi1>
    %48 = vector.broadcast %36 : i32 to vector<256x1xi32>
    %49 = arith.addi %38, %48 : vector<256x1xi32>
    %50 = arith.select %47, %49, %38 : vector<256x1xi1>, vector<256x1xi32>
    %c3_i32 = arith.constant 3 : i32
    %51 = vector.broadcast %c3_i32 : i32 to vector<256x1xi32>
    %52 = arith.cmpi slt, %50, %51 : vector<256x1xi32>
    %c8_i32 = arith.constant 8 : i32
    %53 = vector.broadcast %c8_i32 : i32 to vector<256x1xi32>
    %54 = arith.cmpi slt, %34, %53 : vector<256x1xi32>
    %55 = arith.andi %52, %54 : vector<256x1xi1>
    %cst_17 = arith.constant 0.000000e+00 : f32
    %56 = vector.shape_cast %55 : vector<256x1xi1> to vector<256x1xi1>
    %57 = vector.broadcast %56 : vector<256x1xi1> to vector<256x128xi1>
    %58 = vector.broadcast %cst_17 : f32 to vector<256x128xf32>
    %59 = arith.select %57, %27, %58 : vector<256x128xi1>, vector<256x128xf32>
    %cst_18 = arith.constant dense<0.000000e+00> : vector<128xf32>
    %60 = vector.multi_reduction <add>, %59, %cst_18 [0] : vector<256x128xf32> to vector<128xf32>
    %61 = vector.shape_cast %60 : vector<128xf32> to vector<1x128xf32>
    %c0_19 = arith.constant 0 : index
    %c0_20 = arith.constant 0 : index
    %c0_21 = arith.constant 0 : index
    %c0_22 = arith.constant 0 : index
    %62 = vector.load %arg8[%c0_19, %c0_20, %c0_21, %c0_22] : memref<1x1x2x128xf32, #tpu.memory_space<vmem>>, vector<1x1x1x128xf32>
    %63 = vector.shape_cast %62 : vector<1x1x1x128xf32> to vector<1x128xf32>
    %64 = vector.shape_cast %61 : vector<1x128xf32> to vector<1x1x1x128xf32>
    tpu.vector_store %arg8[%c0_19, %c0_20, %c0_21, %c0_22], %64 {strides = array<i32>} : memref<1x1x2x128xf32, #tpu.memory_space<vmem>>, vector<1x1x1x128xf32>,
    %65 = arith.mulf %27, %27 : vector<256x128xf32>
    %cst_23 = arith.constant 0.000000e+00 : f32
    %66 = vector.shape_cast %55 : vector<256x1xi1> to vector<256x1xi1>
    %67 = vector.broadcast %66 : vector<256x1xi1> to vector<256x128xi1>
    %68 = vector.broadcast %cst_23 : f32 to vector<256x128xf32>
    %69 = arith.select %67, %65, %68 : vector<256x128xi1>, vector<256x128xf32>
    %cst_24 = arith.constant dense<0.000000e+00> : vector<128xf32>
    %70 = vector.multi_reduction <add>, %69, %cst_24 [0] : vector<256x128xf32> to vector<128xf32>
    %71 = vector.shape_cast %70 : vector<128xf32> to vector<1x128xf32>
    %c0_25 = arith.constant 0 : index
    %c0_26 = arith.constant 0 : index
    %c1 = arith.constant 1 : index
    %c0_27 = arith.constant 0 : index
    %72 = vector.load %arg8[%c0_25, %c0_26, %c1, %c0_27] : memref<1x1x2x128xf32, #tpu.memory_space<vmem>>, vector<1x1x1x128xf32>
    %73 = vector.shape_cast %72 : vector<1x1x1x128xf32> to vector<1x128xf32>
    %74 = vector.shape_cast %71 : vector<1x128xf32> to vector<1x1x1x128xf32>
    tpu.vector_store %arg8[%c0_25, %c0_26, %c1, %c0_27], %74 {strides = array<i32>} : memref<1x1x2x128xf32, #tpu.memory_space<vmem>>, vector<1x1x1x128xf32>,
    return
  }
  func.func @transform_0(%arg0: i32, %arg1: i32) -> (i32, i32, i32) {
    %c0_i32 = arith.constant 0 : i32
    %c0_i32_0 = arith.constant 0 : i32
    %c0_i32_1 = arith.constant 0 : i32
    return %arg0, %c0_i32, %c0_i32_0 : i32, i32, i32
  }
  func.func @transform_1(%arg0: i32, %arg1: i32) -> (i32, i32) {
    %c0_i32 = arith.constant 0 : i32
    %c0_i32_0 = arith.constant 0 : i32
    %c0_i32_1 = arith.constant 0 : i32
    return %c0_i32, %c0_i32_0 : i32, i32
  }
  func.func @transform_2(%arg0: i32, %arg1: i32) -> (i32, i32) {
    %c0_i32 = arith.constant 0 : i32
    %c0_i32_0 = arith.constant 0 : i32
    %c0_i32_1 = arith.constant 0 : i32
    return %c0_i32, %c0_i32_0 : i32, i32
  }
  func.func @transform_3(%arg0: i32, %arg1: i32) -> (i32, i32) {
    %c0_i32 = arith.constant 0 : i32
    %c0_i32_0 = arith.constant 0 : i32
    %c0_i32_1 = arith.constant 0 : i32
    return %c0_i32, %c0_i32_0 : i32, i32
  }
  func.func @transform_4(%arg0: i32, %arg1: i32) -> (i32, i32) {
    %c0_i32 = arith.constant 0 : i32
    %c0_i32_0 = arith.constant 0 : i32
    %c0_i32_1 = arith.constant 0 : i32
    return %c0_i32, %c0_i32_0 : i32, i32
  }
  func.func @transform_5(%arg0: i32, %arg1: i32) -> (i32, i32, i32) {
    %c0_i32 = arith.constant 0 : i32
    %c0_i32_0 = arith.constant 0 : i32
    return %arg0, %arg1, %c0_i32 : i32, i32, i32
  }
  func.func @transform_6(%arg0: i32, %arg1: i32) -> (i32, i32, i32, i32) {
    %c0_i32 = arith.constant 0 : i32
    %c0_i32_0 = arith.constant 0 : i32
    %c0_i32_1 = arith.constant 0 : i32
    return %arg0, %arg1, %c0_i32, %c0_i32_0 : i32, i32, i32, i32
  }
}

module attributes {stable_mosaic.version = 11 : i64} {
  func.func @_fc_head_kernel(%arg0: i32, %arg1: memref<2x768xbf16, #tpu.memory_space<vmem>>, %arg2: memref<1x128xf32, #tpu.memory_space<vmem>>, %arg3: memref<1x128xf32, #tpu.memory_space<vmem>>, %arg4: memref<768x512xbf16, #tpu.memory_space<vmem>>, %arg5: memref<1x512xf32, #tpu.memory_space<vmem>>, %arg6: memref<512x256xbf16, #tpu.memory_space<vmem>>, %arg7: memref<1x256xf32, #tpu.memory_space<vmem>>, %arg8: memref<256x128xbf16, #tpu.memory_space<vmem>>, %arg9: memref<1x128xf32, #tpu.memory_space<vmem>>, %arg10: memref<2x128xf32, #tpu.memory_space<vmem>>, %arg11: memref<2x512xf32, #tpu.memory_space<vmem>>) attributes {dimension_semantics = [#tpu.dimension_semantics<arbitrary>], iteration_bounds = array<i64: 1>, scalar_prefetch = 0 : i64, scratch_operands = 1 : i64, tpu.core_type = #tpu.core_type<tc>, window_params = [{transform_indices = @transform_0, window_bounds = array<i64: 2, 768>}, {pipeline_mode = #tpu.pipeline_mode<synchronous>, transform_indices = @transform_1, window_bounds = array<i64: 1, 128>}, {pipeline_mode = #tpu.pipeline_mode<synchronous>, transform_indices = @transform_2, window_bounds = array<i64: 1, 128>}, {transform_indices = @transform_3, window_bounds = array<i64: 768, 512>}, {pipeline_mode = #tpu.pipeline_mode<synchronous>, transform_indices = @transform_4, window_bounds = array<i64: 1, 512>}, {pipeline_mode = #tpu.pipeline_mode<synchronous>, transform_indices = @transform_5, window_bounds = array<i64: 512, 256>}, {pipeline_mode = #tpu.pipeline_mode<synchronous>, transform_indices = @transform_6, window_bounds = array<i64: 1, 256>}, {pipeline_mode = #tpu.pipeline_mode<synchronous>, transform_indices = @transform_7, window_bounds = array<i64: 256, 128>}, {pipeline_mode = #tpu.pipeline_mode<synchronous>, transform_indices = @transform_8, window_bounds = array<i64: 1, 128>}, {pipeline_mode = #tpu.pipeline_mode<synchronous>, transform_indices = @transform_9, window_bounds = array<i64: 2, 128>}]} {
    %c0_i32 = arith.constant 0 : i32
    %0 = arith.cmpi eq, %arg0, %c0_i32 : i32
    %1 = arith.extui %0 : i1 to i32
    %c0_i32_0 = arith.constant 0 : i32
    %2 = arith.cmpi ne, %1, %c0_i32_0 : i32
    scf.if %2 {
      %cst_16 = arith.constant 0.000000e+00 : f32
      %27 = vector.broadcast %cst_16 : f32 to vector<2x512xf32>
      %c0_17 = arith.constant 0 : index
      %c0_18 = arith.constant 0 : index
      %28 = vector.load %arg11[%c0_17, %c0_18] : memref<2x512xf32, #tpu.memory_space<vmem>>, vector<2x512xf32>
      tpu.vector_store %arg11[%c0_17, %c0_18], %27 {strides = array<i32>} : memref<2x512xf32, #tpu.memory_space<vmem>>, vector<2x512xf32>,
    } else {
    }
    %c0 = arith.constant 0 : index
    %c0_1 = arith.constant 0 : index
    %3 = vector.load %arg2[%c0, %c0_1] : memref<1x128xf32, #tpu.memory_space<vmem>>, vector<1x128xf32>
    %4 = tpu.concatenate %3, %3, %3, %3, %3, %3 in 1 : vector<1x128xf32>, vector<1x128xf32>, vector<1x128xf32>, vector<1x128xf32>, vector<1x128xf32>, vector<1x128xf32> -> vector<1x768xf32>
    %c0_2 = arith.constant 0 : index
    %c0_3 = arith.constant 0 : index
    %5 = vector.load %arg3[%c0_2, %c0_3] : memref<1x128xf32, #tpu.memory_space<vmem>>, vector<1x128xf32>
    %6 = tpu.concatenate %5, %5, %5, %5, %5, %5 in 1 : vector<1x128xf32>, vector<1x128xf32>, vector<1x128xf32>, vector<1x128xf32>, vector<1x128xf32>, vector<1x128xf32> -> vector<1x768xf32>
    %c0_4 = arith.constant 0 : index
    %c0_5 = arith.constant 0 : index
    %7 = vector.load %arg1[%c0_4, %c0_5] : memref<2x768xbf16, #tpu.memory_space<vmem>>, vector<2x768xbf16>
    %8 = arith.extf %7 : vector<2x768xbf16> to vector<2x768xf32>
    %9 = vector.broadcast %4 : vector<1x768xf32> to vector<2x768xf32>
    %10 = arith.mulf %8, %9 : vector<2x768xf32>
    %11 = vector.broadcast %6 : vector<1x768xf32> to vector<2x768xf32>
    %12 = arith.addf %10, %11 : vector<2x768xf32>
    %cst = arith.constant 0.000000e+00 : f32
    %13 = vector.broadcast %cst : f32 to vector<2x768xf32>
    %14 = arith.cmpf ogt, %12, %13 : vector<2x768xf32>
    %cst_6 = arith.constant 2.000000e-01 : f32
    %15 = vector.broadcast %cst_6 : f32 to vector<2x768xf32>
    %16 = arith.mulf %15, %12 : vector<2x768xf32>
    %17 = arith.select %14, %12, %16 : vector<2x768xi1>, vector<2x768xf32>
    %c0_7 = arith.constant 0 : index
    %c0_8 = arith.constant 0 : index
    %18 = vector.load %arg11[%c0_7, %c0_8] : memref<2x512xf32, #tpu.memory_space<vmem>>, vector<2x512xf32>
    %19 = arith.truncf %17 : vector<2x768xf32> to vector<2x768xbf16>
    %c0_9 = arith.constant 0 : index
    %c0_10 = arith.constant 0 : index
    %20 = vector.load %arg4[%c0_9, %c0_10] : memref<768x512xbf16, #tpu.memory_space<vmem>>, vector<768x512xbf16>
    %cst_11 = arith.constant dense<0.000000e+00> : vector<2x512xf32>
    %21 = tpu.matmul %19, %20, %cst_11 {dimension_numbers = #tpu.dot_dimension_numbers<[1], [0], [0], [1], [0, 0, 1, 1], [], []>} : vector<2x768xbf16>, vector<768x512xbf16>, vector<2x512xf32> -> vector<2x512xf32>
    %22 = arith.addf %18, %21 : vector<2x512xf32>
    %c0_12 = arith.constant 0 : index
    %c0_13 = arith.constant 0 : index
    %23 = vector.load %arg11[%c0_12, %c0_13] : memref<2x512xf32, #tpu.memory_space<vmem>>, vector<2x512xf32>
    tpu.vector_store %arg11[%c0_12, %c0_13], %22 {strides = array<i32>} : memref<2x512xf32, #tpu.memory_space<vmem>>, vector<2x512xf32>,
    %c0_i32_14 = arith.constant 0 : i32
    %24 = arith.cmpi eq, %arg0, %c0_i32_14 : i32
    %25 = arith.extui %24 : i1 to i32
    %c0_i32_15 = arith.constant 0 : i32
    %26 = arith.cmpi ne, %25, %c0_i32_15 : i32
    scf.if %26 {
      %c0_16 = arith.constant 0 : index
      %c0_17 = arith.constant 0 : index
      %27 = vector.load %arg11[%c0_16, %c0_17] : memref<2x512xf32, #tpu.memory_space<vmem>>, vector<2x512xf32>
      %c0_18 = arith.constant 0 : index
      %c0_19 = arith.constant 0 : index
      %28 = vector.load %arg5[%c0_18, %c0_19] : memref<1x512xf32, #tpu.memory_space<vmem>>, vector<1x512xf32>
      %29 = vector.broadcast %28 : vector<1x512xf32> to vector<2x512xf32>
      %30 = arith.addf %27, %29 : vector<2x512xf32>
      %cst_20 = arith.constant 0.000000e+00 : f32
      %31 = vector.broadcast %cst_20 : f32 to vector<2x512xf32>
      %32 = arith.cmpf ogt, %30, %31 : vector<2x512xf32>
      %cst_21 = arith.constant 2.000000e-01 : f32
      %33 = vector.broadcast %cst_21 : f32 to vector<2x512xf32>
      %34 = arith.mulf %33, %30 : vector<2x512xf32>
      %35 = arith.select %32, %30, %34 : vector<2x512xi1>, vector<2x512xf32>
      %36 = arith.truncf %35 : vector<2x512xf32> to vector<2x512xbf16>
      %c0_22 = arith.constant 0 : index
      %c0_23 = arith.constant 0 : index
      %37 = vector.load %arg6[%c0_22, %c0_23] : memref<512x256xbf16, #tpu.memory_space<vmem>>, vector<512x256xbf16>
      %cst_24 = arith.constant dense<0.000000e+00> : vector<2x256xf32>
      %38 = tpu.matmul %36, %37, %cst_24 {dimension_numbers = #tpu.dot_dimension_numbers<[1], [0], [0], [1], [0, 0, 1, 1], [], []>} : vector<2x512xbf16>, vector<512x256xbf16>, vector<2x256xf32> -> vector<2x256xf32>
      %c0_25 = arith.constant 0 : index
      %c0_26 = arith.constant 0 : index
      %39 = vector.load %arg7[%c0_25, %c0_26] : memref<1x256xf32, #tpu.memory_space<vmem>>, vector<1x256xf32>
      %40 = vector.broadcast %39 : vector<1x256xf32> to vector<2x256xf32>
      %41 = arith.addf %38, %40 : vector<2x256xf32>
      %cst_27 = arith.constant 0.000000e+00 : f32
      %42 = vector.broadcast %cst_27 : f32 to vector<2x256xf32>
      %43 = arith.cmpf ogt, %41, %42 : vector<2x256xf32>
      %cst_28 = arith.constant 2.000000e-01 : f32
      %44 = vector.broadcast %cst_28 : f32 to vector<2x256xf32>
      %45 = arith.mulf %44, %41 : vector<2x256xf32>
      %46 = arith.select %43, %41, %45 : vector<2x256xi1>, vector<2x256xf32>
      %47 = arith.truncf %46 : vector<2x256xf32> to vector<2x256xbf16>
      %c0_29 = arith.constant 0 : index
      %c0_30 = arith.constant 0 : index
      %48 = vector.load %arg8[%c0_29, %c0_30] : memref<256x128xbf16, #tpu.memory_space<vmem>>, vector<256x128xbf16>
      %cst_31 = arith.constant dense<0.000000e+00> : vector<2x128xf32>
      %49 = tpu.matmul %47, %48, %cst_31 {dimension_numbers = #tpu.dot_dimension_numbers<[1], [0], [0], [1], [0, 0, 1, 1], [], []>} : vector<2x256xbf16>, vector<256x128xbf16>, vector<2x128xf32> -> vector<2x128xf32>
      %c0_32 = arith.constant 0 : index
      %c0_33 = arith.constant 0 : index
      %50 = vector.load %arg9[%c0_32, %c0_33] : memref<1x128xf32, #tpu.memory_space<vmem>>, vector<1x128xf32>
      %51 = vector.broadcast %50 : vector<1x128xf32> to vector<2x128xf32>
      %52 = arith.addf %49, %51 : vector<2x128xf32>
      %cst_34 = arith.constant dense<0xFF800000> : vector<2xf32>
      %53 = vector.multi_reduction <maximumf>, %52, %cst_34 [1] : vector<2x128xf32> to vector<2xf32>
      %54 = vector.shape_cast %53 : vector<2xf32> to vector<2x1xf32>
      %55 = vector.broadcast %54 : vector<2x1xf32> to vector<2x128xf32>
      %56 = arith.subf %52, %55 : vector<2x128xf32>
      %57 = math.exp %56 : vector<2x128xf32>
      %cst_35 = arith.constant dense<0.000000e+00> : vector<2xf32>
      %58 = vector.multi_reduction <add>, %57, %cst_35 [1] : vector<2x128xf32> to vector<2xf32>
      %59 = vector.shape_cast %58 : vector<2xf32> to vector<2x1xf32>
      %60 = vector.broadcast %59 : vector<2x1xf32> to vector<2x128xf32>
      %61 = arith.divf %57, %60 : vector<2x128xf32>
      %c0_36 = arith.constant 0 : index
      %c0_37 = arith.constant 0 : index
      %62 = vector.load %arg10[%c0_36, %c0_37] : memref<2x128xf32, #tpu.memory_space<vmem>>, vector<2x128xf32>
      tpu.vector_store %arg10[%c0_36, %c0_37], %61 {strides = array<i32>} : memref<2x128xf32, #tpu.memory_space<vmem>>, vector<2x128xf32>,
    } else {
    }
    return
  }
  func.func @transform_0(%arg0: i32) -> (i32, i32) {
    %c0_i32 = arith.constant 0 : i32
    %c0_i32_0 = arith.constant 0 : i32
    return %c0_i32, %arg0 : i32, i32
  }
  func.func @transform_1(%arg0: i32) -> (i32, i32) {
    %c0_i32 = arith.constant 0 : i32
    %c0_i32_0 = arith.constant 0 : i32
    %c0_i32_1 = arith.constant 0 : i32
    return %c0_i32, %c0_i32_0 : i32, i32
  }
  func.func @transform_2(%arg0: i32) -> (i32, i32) {
    %c0_i32 = arith.constant 0 : i32
    %c0_i32_0 = arith.constant 0 : i32
    %c0_i32_1 = arith.constant 0 : i32
    return %c0_i32, %c0_i32_0 : i32, i32
  }
  func.func @transform_3(%arg0: i32) -> (i32, i32) {
    %c0_i32 = arith.constant 0 : i32
    %c0_i32_0 = arith.constant 0 : i32
    return %arg0, %c0_i32 : i32, i32
  }
  func.func @transform_4(%arg0: i32) -> (i32, i32) {
    %c0_i32 = arith.constant 0 : i32
    %c0_i32_0 = arith.constant 0 : i32
    %c0_i32_1 = arith.constant 0 : i32
    return %c0_i32, %c0_i32_0 : i32, i32
  }
  func.func @transform_5(%arg0: i32) -> (i32, i32) {
    %c0_i32 = arith.constant 0 : i32
    %c0_i32_0 = arith.constant 0 : i32
    %c0_i32_1 = arith.constant 0 : i32
    return %c0_i32, %c0_i32_0 : i32, i32
  }
  func.func @transform_6(%arg0: i32) -> (i32, i32) {
    %c0_i32 = arith.constant 0 : i32
    %c0_i32_0 = arith.constant 0 : i32
    %c0_i32_1 = arith.constant 0 : i32
    return %c0_i32, %c0_i32_0 : i32, i32
  }
  func.func @transform_7(%arg0: i32) -> (i32, i32) {
    %c0_i32 = arith.constant 0 : i32
    %c0_i32_0 = arith.constant 0 : i32
    %c0_i32_1 = arith.constant 0 : i32
    return %c0_i32, %c0_i32_0 : i32, i32
  }
  func.func @transform_8(%arg0: i32) -> (i32, i32) {
    %c0_i32 = arith.constant 0 : i32
    %c0_i32_0 = arith.constant 0 : i32
    %c0_i32_1 = arith.constant 0 : i32
    return %c0_i32, %c0_i32_0 : i32, i32
  }
  func.func @transform_9(%arg0: i32) -> (i32, i32) {
    %c0_i32 = arith.constant 0 : i32
    %c0_i32_0 = arith.constant 0 : i32
    %c0_i32_1 = arith.constant 0 : i32
    return %c0_i32, %c0_i32_0 : i32, i32
  }
}

</mosaic_0001>

<bundles_post_ra>
// kernel: tile.23
= control target key start
LH: loop header
LB: loop body
LE: loop exit
PB: predicated region body
PF: predicated region fallthrough
CT: control target
= control target key end

     0   :  { %s22_s0 = inlined_call_operand.vmem [shape: f32[32], index: 0, kind: input, shape index: {}]   ;;  %s23_s1 = inlined_call_operand.vmem [shape: f32[4,32], index: 1, kind: output, shape index: {}]  }
   0x1   :  { %v4_v0 = vld [vmem:[%s22_s0] ss:$0 sm:$0xff] }
   0x2   :  { %5 = vst [vmem:[%s23_s1] sm:$0xf] %v4_v0 }

// kernel: tile.24
= control target key start
LH: loop header
LB: loop body
LE: loop exit
PB: predicated region body
PF: predicated region fallthrough
CT: control target
= control target key end

     0   :  { %s37_s8 = smov 32   ;;  %s38_s9 = smov 64   ;;  %vm7_vm0 = vcmask 261120   ;;  %vm13_vm1 = vcmask 1048320   ;;  %vm19_vm2 = vcmask 785920   ;;  %vm25_vm3 = vcmask 523520   ;;  %s55_s0 = inlined_call_operand.vmem [shape: f32[4,32], index: 0, kind: input, shape index: {}]   ;;  %s56_s1 = inlined_call_operand.vmem [shape: f32[1,128], index: 1, kind: output, shape index: {}]  }
   0x1   :  { %v4_v0 = vld [vmem:[%s55_s0] sm:$0xf]  ;;  %s36_s0 = smov 96  }
   0x2   :  { %5 = vst [vmem:[#allocation1] sm:$0xf] %v4_v0 }
   0x9   :  { %v10_v1 = vld [vmem:[#allocation1 + $0x3] sm:$0x1]   ;;  %v22_v2 = vld [vmem:[#allocation1 + $0x1] sm:$0x1]   ;;  %v16_v3 = vld [vmem:[#allocation1 + $0x2] sm:$0x1]  }
   0xa   :  { %11 = vrot.lane.b32.xlu0 %v10_v1, %s36_s0  ;;  %23 = vrot.lane.b32.xlu1 %v22_v2, %s37_s8  ;;  %v6_v4 = vld [vmem:[#allocation1] sm:$0x1]  }
   0xb   :  { %8 = vst.msk [vmem:[#allocation0] sm:$0x1] %vm7_vm0, %v6_v4  }
  0x12   :  { %17 = vrot.lane.b32.xlu0 %v16_v3, %s38_s9 }
  0x7c   :  { %v12_v5 = vpop.permute.xlu0 %11   ;;  %v24_v6 = vpop.permute.xlu1 %23  }
  0x7d   :  { %14 = vst.msk [vmem:[#allocation0] sm:$0x1] %vm13_vm1, %v12_v5  }
  0x84   :  { %v18_v7 = vpop.permute.xlu0 %17  }
  0x85   :  { %20 = vst.msk [vmem:[#allocation0] sm:$0x1] %vm19_vm2, %v18_v7  }
  0x86   :  { %26 = vst.msk [vmem:[#allocation0] sm:$0x1] %vm25_vm3, %v24_v6  }
  0x8d   :  { %v29_v8 = vld [vmem:[#allocation0] sm:$0x1] }
  0x8e   :  { %32 = vst [vmem:[%s56_s1] sm:$0x1] %v29_v8 }

// kernel: classification_network_forward.4
= control target key start
LH: loop header
LB: loop body
LE: loop exit
PB: predicated region body
PF: predicated region fallthrough
CT: control target
= control target key end

     0   :  { %s3671_s21 = smov 0   ;;  %s3673_s22 = smov 0   ;;  %s7006_s0 = inlined_call_operand.vmem [shape: f32[2,554,12], index: 0, kind: input, shape index: {}]   ;;  %s7007_s1 = inlined_call_operand.vmem [shape: bf16[108,128], index: 1, kind: input, shape index: {}]   ;;  %s7008_s2 = inlined_call_operand.vmem [shape: f32[1,128], index: 2, kind: input, shape index: {}]   ;;  %s7009_s3 = inlined_call_operand.vmem [shape: f32[1,12], index: 3, kind: input, shape index: {}]   ;;  %s7010_s4 = inlined_call_operand.vmem [shape: f32[1,12], index: 4, kind: input, shape index: {}]   ;;  %s7011_s5 = inlined_call_operand.vmem [shape: bf16[2,512,128], index: 5, kind: output, shape index: {0}]   ;;  %s7012_s6 = inlined_call_operand.vmem [shape: f32[2,2,2,128], index: 6, kind: output, shape index: {1}]  }
   0x1   :  { %s3675_s23 = smov 0   ;;  %s3677_s24 = smov 0  }
   0x2   :  { %s3679_s25 = smov 0  }
   0x3 LB: > { %s26_s3 = sadd.s32 1, %s3617_s23  ;;  %s29_s4 = sadd.s32 1, %s3621_s24  ;;  %s3625_s25 = sphi %s3679_s25, %s17_s25   ;;  %s3621_s24 = sphi %s3677_s24, %s7415_s24   ;;  %s3617_s23 = sphi %s3675_s23, %s7414_s23   ;;  %s3613_s22 = sphi %s3673_s22, %s7413_s22   ;;  %s3609_s21 = sphi %s3671_s21, %s7412_s21  }
   0x4   : > { %p27_p0 = scmp.ge.s32.totalorder %s26_s3, 2  ;;  %p3357_p1 = scmp.ge.s32.totalorder %s3625_s25, 1 }
   0x5   : > { %p231_p2 = scmp.lt.s32.totalorder %s3625_s25, 5 }
   0x6   : > { %s7417_s3 = smov (%p27_p0, %s26_s3), 0  ;;  %s7419_s4 = smov (!%p27_p0, %s29_s4), %s3621_s24 }
   0x7   : > { %p232_p3 = pnand %p3357_p1, %p231_p2  ;;  %p31_p4 = scmp.ge.s32.totalorder %s7419_s4, 2 }
   0x9   : > { %s7421_s4 = smov (%p31_p4, %s7419_s4), 0  ;;  %235 = sbr.rel (%p232_p3) target bundleno = 716 (0x2cc), region = 40 }
   0xe   : > { %p273_p5 = scmp.lt.s32.totalorder %s3613_s22, 1  ;;  %s3364_s27 = sshll.u32 %s3609_s21, 8  ;;  %vm458_vm0 = vsmask.f32 7424  ;;  %vm623_vm1 = vcmask 1046528   ;;  %vm871_vm3 = vcmask 1044480  }
   0xf   : > { %s3627_s8 = smov 12   ;;  %s3628_s9 = smov 24   ;;  %vm761_vm2 = vsmask.f32 5376  ;;  %vm695_vm4 = vcmask 1045504   ;;  %vm7078_vm5 = vcmask 195584  }
  0x10   : > { %s7423_s22 = smov (!%p273_p5, %s3613_s22), 1  ;;  %s3629_s10 = smov 60   ;;  %vm7079_vm6 = vcmask 97280   ;;  %vm1287_vm7 = vcmask 293888   ;;  %vm1320_vm8 = vcmask 392192   ;;  %vm1353_vm9 = vcmask 490496  }
  0x11   : > { %s3534_s26 = smul.u32 560, %s7423_s22  ;;  %s3630_s11 = smov 48   ;;  %vm7087_vm10 = vcmask 588800   ;;  %vm7086_vm11 = vcmask 687104   ;;  %vm7085_vm12 = vcmask 785408   ;;  %vm7082_vm13 = vcmask 883712  }
  0x12   : > { %s3631_s12 = smov 36   ;;  %s3632_s13 = smov 96  }
  0x13   : > { %s277_s30 = scalar_lea.vmem %s7006_s0, %s3534_s26  ;;  %s3633_s14 = smov 84  }
  0x14   : > { %s3712_s7 = scalar_lea.vmem %s277_s30, %s3364_s27  ;;  %s3634_s15 = smov 72  }
  0x15   : > { %v307_v0 = vld [vmem:[%s3712_s7 + $0x40] sm:$0xff]  ;;  %v308_v1 = vld [vmem:[%s3712_s7 + $0x48] sm:$0xff]  ;;  %v309_v2 = vld [vmem:[%s3712_s7 + $0x50] sm:$0xff]  ;;  %p290_p7 = scmp.lt.s32.totalorder %s3609_s21, 1  ;;  %s3362_s17 = sshll.u32 %s7423_s22, 1 }
  0x16   : > { %v310_v3 = vld [vmem:[%s3712_s7 + $0x58] sm:$0xff]  ;;  %v345_v4 = vpack.c.bf16 %v307_v0, %v307_v0  ;;  %v346_v5 = vpack.c.bf16 %v308_v1, %v308_v1  ;;  %v347_v6 = vpack.c.bf16 %v309_v2, %v309_v2  ;;  %v303_v7 = vld [vmem:[%s3712_s7 + $0x20] sm:$0xff]  ;;  %v304_v8 = vld [vmem:[%s3712_s7 + $0x28] sm:$0xff] }
  0x17   : > { %v348_v9 = vpack.c.bf16 %v310_v3, %v310_v3  ;;  %v305_v10 = vld [vmem:[%s3712_s7 + $0x30] sm:$0xff]  ;;  %v306_v11 = vld [vmem:[%s3712_s7 + $0x38] sm:$0xff]  ;;  %v341_v12 = vpack.c.bf16 %v303_v7, %v303_v7  ;;  %v342_v13 = vpack.c.bf16 %v304_v8, %v304_v8  ;;  %v299_v14 = vld [vmem:[%s3712_s7] sm:$0xff] }
  0x18   : > { %v3723_v15 = vunpack.c.l.b16 %v345_v4  ;;  %v3725_v16 = vunpack.c.l.b16 %v346_v5  ;;  %v3727_v17 = vunpack.c.l.b16 %v347_v6  ;;  %v343_v18 = vpack.c.bf16 %v305_v10, %v305_v10  ;;  %v300_v19 = vld [vmem:[%s3712_s7 + $0x8] sm:$0xff]  ;;  %v301_v20 = vld [vmem:[%s3712_s7 + $0x10] sm:$0xff]  ;;  %v302_v25 = vld [vmem:[%s3712_s7 + $0x18] sm:$0xff] }
  0x19   : > { %v3731_v21 = vunpack.c.l.b16 %v348_v9  ;;  %v344_v22 = vpack.c.bf16 %v306_v11, %v306_v11  ;;  %v411_v23 = vunpack.c.l.b16 %v341_v12  ;;  %v3733_v24 = vunpack.c.l.b16 %v342_v13  ;;  %v311_v38 = vld [vmem:[%s3712_s7 + $0x60] sm:$0xff]  ;;  %v312_v43 = vld [vmem:[%s3712_s7 + $0x68] sm:$0xff]  ;;  %v317_v2 = vld [vmem:[%s3712_s7 + $0x90] sm:$0xff] }
  0x1a   : > { %v3738_v26 = vpack.c.b16 %v3725_v16, %v3723_v15  ;;  %v3740_v27 = vunpack.c.l.b16 %v343_v18  ;;  %v337_v28 = vpack.c.bf16 %v299_v14, %v299_v14  ;;  %v338_v29 = vpack.c.bf16 %v300_v19, %v300_v19  ;;  %v315_v60 = vld [vmem:[%s3712_s7 + $0x80] sm:$0xff]  ;;  %v316_v1 = vld [vmem:[%s3712_s7 + $0x88] sm:$0xff]  ;;  %v318_v7 = vld [vmem:[%s3712_s7 + $0x98] sm:$0xff] }
  0x1b   : > { %v3744_v30 = vpack.c.b16 %v3731_v21, %v3727_v17  ;;  %v3746_v31 = vunpack.c.l.b16 %v344_v22  ;;  %v3749_v32 = vpack.c.b16 %v3733_v24, %v411_v23  ;;  %v339_v33 = vpack.c.bf16 %v301_v20, %v301_v20  ;;  %v313_v19 = vld [vmem:[%s3712_s7 + $0x70] sm:$0xff] }
  0x1c   : > { %v7016_v34 = vshll.u32 %v3738_v26, 16  ;;  %v7017_v35 = vshrl.u32 %v3738_v26, 16  ;;  %v340_v36 = vpack.c.bf16 %v302_v25, %v302_v25  ;;  %v407_v37 = vunpack.c.l.b16 %v337_v28  ;;  %v314_v28 = vld [vmem:[%s3712_s7 + $0x78] sm:$0xff] }
  0x1d   : > { %v7021_v39 = vshll.u32 %v3744_v30, 16  ;;  %v3757_v40 = vpack.c.b16 %v3746_v31, %v3740_v27  ;;  %v7033_v41 = vshll.u32 %v3749_v32, 16  ;;  %v479_v42 = vshrl.u32 %v3749_v32, 16 }
  0x1e   : > { %v493_v44 = vrot.slane %v7016_v34, 1  ;;  %v408_v45 = vunpack.c.l.b16 %v338_v29  ;;  %v409_v46 = vunpack.c.l.b16 %v339_v33  ;;  %v410_v47 = vunpack.c.l.b16 %v340_v36 }
  0x1f   : > { %v501_v48 = vrot.slane %v7021_v39, 1  ;;  %v477_v49 = vrot.slane %v7033_v41, 1  ;;  %v7028_v50 = vshll.u32 %v3757_v40, 16  ;;  %v349_v51 = vpack.c.bf16 %v311_v38, %v311_v38  ;;  %v321_v38 = vld [vmem:[%s3712_s7 + $0xb0] sm:$0xff]  ;;  %v326_v39 = vld [vmem:[%s3712_s7 + $0xd8] sm:$0xff] }
  0x20   : > { %v497_v52 = vor.u32 %v7017_v35, %v493_v44  ;;  %v3771_v53 = vpack.c.b16 %v408_v45, %v407_v37  ;;  %v3773_v54 = vpack.c.b16 %v410_v47, %v409_v46  ;;  %v350_v55 = vpack.c.bf16 %v312_v43, %v312_v43  ;;  %v322_v43 = vld [vmem:[%s3712_s7 + $0xb8] sm:$0xff] }
  0x21   : > { %v481_v56 = vor.u32 %v479_v42, %v477_v49  ;;  %v485_v57 = vrot.slane %v7028_v50, 1  ;;  %v3779_v58 = vunpack.c.l.b16 %v349_v51  ;;  %v7026_v59 = vshrl.u32 %v3744_v30, 16 }
  0x22   : > { %v502_v61 = vsel %vm458_vm0, %v497_v52, %v501_v48  ;;  %v460_v62 = vshrl.u32 %v3771_v53, 16  ;;  %v462_v63 = vshll.u32 %v3771_v53, 16  ;;  %v467_v0 = vshll.u32 %v3773_v54, 16 }
  0x23   : > { %599 = vrot.lane.b32.xlu2 %v502_v61, %s3627_s8  ;;  %v486_v3 = vsel %vm458_vm0, %v481_v56, %v485_v57  ;;  %v3791_v4 = vunpack.c.l.b16 %v350_v55  ;;  %v505_v5 = vor.u32 %v7026_v59, %v501_v48  ;;  %v7031_v6 = vshrl.u32 %v3757_v40, 16  ;;  %v323_v56 = vld [vmem:[%s3712_s7 + $0xc0] sm:$0xff] }
  0x24   : > { %595 = vrot.lane.b32.xlu1 %v486_v3, %s3627_s8  ;;  %v464_v8 = vrot.slane %v462_v63, 1  ;;  %v469_v9 = vrot.slane %v467_v0, 1  ;;  %v471_v10 = vshrl.u32 %v3773_v54, 16  ;;  %v353_v11 = vpack.c.bf16 %v315_v60, %v315_v60 }
  0x25   : > { %v3803_v12 = vpack.c.b16 %v3791_v4, %v3779_v58  ;;  %v489_v13 = vor.u32 %v7031_v6, %v485_v57  ;;  %v354_v14 = vpack.c.bf16 %v316_v1, %v316_v1  ;;  %v355_v18 = vpack.c.bf16 %v317_v2, %v317_v2  ;;  %v324_v57 = vld [vmem:[%s3712_s7 + $0xc8] sm:$0xff] }
  0x26   : > { %v465_v20 = vor.u32 %v464_v8, %v460_v62  ;;  %v473_v22 = vor.u32 %v471_v10, %v469_v9  ;;  %v356_v23 = vpack.c.bf16 %v318_v7, %v318_v7  ;;  %v3810_v25 = vunpack.c.l.b16 %v353_v11  ;;  %v319_v7 = vld [vmem:[%s3712_s7 + $0xa0] sm:$0xff] }
  0x27   : > { %v7019_v29 = vshll.u32 %v3803_v12, 16  ;;  %v494_v33 = vsel %vm458_vm0, %v489_v13, %v493_v44  ;;  %v3815_v36 = vunpack.c.l.b16 %v354_v14  ;;  %v3817_v37 = vunpack.c.l.b16 %v355_v18 }
  0x28   : > { %v470_v45 = vsel %vm458_vm0, %v465_v20, %v469_v9  ;;  %v478_v46 = vsel %vm458_vm0, %v473_v22, %v477_v49  ;;  %v3823_v47 = vunpack.c.l.b16 %v356_v23  ;;  %v351_v48 = vpack.c.bf16 %v313_v19, %v313_v19  ;;  %v320_v20 = vld [vmem:[%s3712_s7 + $0xa8] sm:$0xff] }
  0x29   : > { %591 = vrot.lane.b32.xlu0 %v470_v45, %s3627_s8  ;;  %v509_v51 = vrot.slane %v7019_v29, 1  ;;  %v3830_v44 = vpack.c.b16 %v3815_v36, %v3810_v25  ;;  %v352_v52 = vpack.c.bf16 %v314_v28, %v314_v28  ;;  %v7020_v55 = vshrl.u32 %v3803_v12, 16 }
  0x2a   : > { %v3837_v49 = vpack.c.b16 %v3823_v47, %v3817_v37  ;;  %v3839_v60 = vunpack.c.l.b16 %v351_v48  ;;  %v359_v61 = vpack.c.bf16 %v321_v38, %v321_v38  ;;  %v360_v62 = vpack.c.bf16 %v322_v43, %v322_v43 }
  0x2b   : > { %v510_v63 = vsel %vm458_vm0, %v505_v5, %v509_v51  ;;  %v7013_v1 = vshll.u32 %v3830_v44, 16  ;;  %v7014_v2 = vshrl.u32 %v3830_v44, 16  ;;  %v3844_v3 = vunpack.c.l.b16 %v352_v52 }
  0x2c   : > { %601 = vrot.lane.b32.xlu2 %v510_v63, %s3627_s8  ;;  %597 = vrot.lane.b32.xlu1 %v494_v33, %s3627_s8  ;;  %v7018_v8 = vshll.u32 %v3837_v49, 16  ;;  %v513_v9 = vor.u32 %v7020_v55, %v509_v51  ;;  %v361_v11 = vpack.c.bf16 %v323_v56, %v323_v56  ;;  %v362_v13 = vpack.c.bf16 %v324_v57, %v324_v57  ;;  %v327_v51 = vld [vmem:[%s3712_s7 + $0xe0] sm:$0xff]  ;;  %v325_v55 = vld [vmem:[%s3712_s7 + $0xd0] sm:$0xff] }
  0x2d   : > { %v525_v5 = vrot.slane %v7013_v1, 1  ;;  %v3856_v14 = vpack.c.b16 %v3844_v3, %v3839_v60  ;;  %v3858_v18 = vunpack.c.l.b16 %v359_v61  ;;  %v3860_v19 = vunpack.c.l.b16 %v360_v62  ;;  %v328_v61 = vld [vmem:[%s3712_s7 + $0xe8] sm:$0xff]  ;;  %v330_v1 = vld [vmem:[%s3712_s7 + $0xf8] sm:$0xff] }
  0x2e   : > { %v533_v22 = vrot.slane %v7018_v8, 1  ;;  %v3865_v23 = vunpack.c.l.b16 %v361_v11  ;;  %v3867_v28 = vunpack.c.l.b16 %v362_v13  ;;  %v357_v33 = vpack.c.bf16 %v319_v7, %v319_v7  ;;  %v329_v13 = vld [vmem:[%s3712_s7 + $0xf0] sm:$0xff] }
  0x2f   : > { %v529_v38 = vor.u32 %v7014_v2, %v525_v5  ;;  %v7015_v43 = vshll.u32 %v3856_v14, 16  ;;  %v7022_v45 = vshrl.u32 %v3856_v14, 16  ;;  %v3875_v48 = vpack.c.b16 %v3860_v19, %v3858_v18 }
  0x30   : > { %v3880_v52 = vpack.c.b16 %v3867_v28, %v3865_v23  ;;  %v358_v56 = vpack.c.bf16 %v320_v20, %v320_v20  ;;  %v3882_v57 = vunpack.c.l.b16 %v357_v33  ;;  %v7030_v2 = vshrl.u32 %v3837_v49, 16 }
  0x31   : > { %593 = vrot.lane.b32.xlu0 %v478_v46, %s3627_s8  ;;  %v534_v62 = vsel %vm458_vm0, %v529_v38, %v533_v22  ;;  %v517_v63 = vrot.slane %v7015_v43, 1  ;;  %v7024_v7 = vshll.u32 %v3875_v48, 16  ;;  %v7025_v11 = vshrl.u32 %v3875_v48, 16 }
  0x32   : > { %v7023_v20 = vshll.u32 %v3880_v52, 16  ;;  %v3894_v33 = vunpack.c.l.b16 %v358_v56  ;;  %v365_v46 = vpack.c.bf16 %v327_v51, %v327_v51  ;;  %v366_v35 = vpack.c.bf16 %v328_v61, %v328_v61 }
  0x33   : > { %v521_v38 = vor.u32 %v7022_v45, %v517_v63  ;;  %v518_v43 = vsel %vm458_vm0, %v513_v9, %v517_v63  ;;  %v549_v34 = vrot.slane %v7024_v7, 1  ;;  %v367_v29 = vpack.c.bf16 %v329_v13, %v329_v13 }
  0x34   : > { %607 = vrot.lane.b32.xlu2 %v534_v62, %s3627_s8  ;;  %v557_v8 = vrot.slane %v7023_v20, 1  ;;  %v3907_v56 = vpack.c.b16 %v3894_v33, %v3882_v57  ;;  %v368_v51 = vpack.c.bf16 %v330_v1, %v330_v1  ;;  %v3914_v63 = vunpack.c.l.b16 %v365_v46 }
  0x35   : > { %v526_v45 = vsel %vm458_vm0, %v521_v38, %v525_v5  ;;  %v553_v9 = vor.u32 %v7025_v11, %v549_v34  ;;  %v3916_v61 = vunpack.c.l.b16 %v366_v35  ;;  %v3921_v13 = vunpack.c.l.b16 %v367_v29 }
  0x36   : > { %7113 = vst [vmem:[#allocation2_spill] sm:$0xff] %v3914_v63  ;;  %605 = vrot.lane.b32.xlu1 %v526_v45, %s3627_s8  ;;  %v7027_v62 = vshll.u32 %v3907_v56, 16  ;;  %v7029_v20 = vshrl.u32 %v3907_v56, 16  ;;  %v3923_v1 = vunpack.c.l.b16 %v368_v51  ;;  %v363_v38 = vpack.c.bf16 %v325_v55, %v325_v55 }
  0x37   : > { %v3927_v5 = vpack.c.b16 %v3916_v61, %v3914_v63  ;;  %v364_v46 = vpack.c.bf16 %v326_v39, %v326_v39  ;;  %v558_v35 = vsel %vm458_vm0, %v553_v9, %v557_v8  ;;  %v331_v39 = vld [vmem:[%s3712_s7 + $0x100] sm:$0xff]  ;;  %v537_v9 = vor.u32 %v7030_v2, %v533_v22 }
  0x38   : > { %v541_v45 = vrot.slane %v7027_v62, 1  ;;  %v3934_v7 = vpack.c.b16 %v3923_v1, %v3921_v13  ;;  %v3939_v11 = vunpack.c.l.b16 %v363_v38  ;;  %v7035_v41 = vshrl.u32 %v3880_v52, 16 }
  0x39   : > { %603 = vrot.lane.b32.xlu0 %v518_v43, %s3627_s8  ;;  %v7032_v29 = vshll.u32 %v3927_v5, 16  ;;  %v7036_v51 = vshrl.u32 %v3927_v5, 16  ;;  %v3941_v59 = vunpack.c.l.b16 %v364_v46  ;;  %v369_v46 = vpack.c.bf16 %v331_v39, %v331_v39 }
  0x3a   : > { %7114 = vst [vmem:[#allocation3_spill] sm:$0xff] %v3934_v7  ;;  %v545_v55 = vor.u32 %v7029_v20, %v541_v45  ;;  %v7034_v62 = vshll.u32 %v3934_v7, 16  ;;  %v7138_v63 = vshll.u32 %v3856_v14, 16 }
  0x3b   : > { %7115 = vst [vmem:[#allocation4_spill] sm:$0xff] %v3941_v59  ;;  %v573_v43 = vrot.slane %v7032_v29, 1  ;;  %v3953_v50 = vpack.c.b16 %v3941_v59, %v3939_v11  ;;  %v542_v29 = vsel %vm458_vm0, %v537_v9, %v541_v45  ;;  %v3391_v59 = vld [vmem:[%s7007_s1 + $0x30] sm:$0xf] }
  0x3c   : > { %613 = vrot.lane.b32.xlu2 %v558_v35, %s3627_s8  ;;  %v550_v38 = vsel %vm458_vm0, %v545_v55, %v549_v34  ;;  %v581_v22 = vrot.slane %v7034_v62, 1  ;;  %v3966_v35 = vunpack.c.l.b16 %v369_v46  ;;  %v561_v62 = vor.u32 %v7035_v41, %v557_v8 }
  0x3d   : > { %v577_v20 = vor.u32 %v7036_v51, %v573_v43  ;;  %v7040_v2 = vshll.u32 %v3953_v50, 16  ;;  %v7042_v6 = vshrl.u32 %v3953_v50, 16  ;;  %v7037_v46 = vshrl.u32 %v3934_v7, 16 }
  0x3e   : > { %611 = vrot.lane.b32.xlu1 %v550_v38, %s3627_s8  ;;  %v3978_v45 = vpack.c.b16 %v3966_v35, %v3966_v35  ;;  %v625_v38 = vrot.slane %v3773_v54, 1  ;;  %v624_v41 = vrot.slane %v3771_v53, 1 }
  0x3f   : > { %v565_v34 = vrot.slane %v7040_v2, 1  ;;  %v582_v39 = vsel %vm458_vm0, %v577_v20, %v581_v22  ;;  %v4127_v2 = vpack.c.b16 %v3727_v17, %v3725_v16 }
  0x40   : > { %7116 = vst [vmem:[#allocation5_spill] sm:$0xff] %v3978_v45  ;;  %v587_v8 = vshll.u32 %v3978_v45, 16  ;;  %v626_v51 = vsel %vm623_vm1, %v624_v41, %v625_v38  ;;  %v762_v41 = vrot.slane %v471_v10, 2  ;;  %v639_v10 = vrot.slane %v3830_v44, 1 }
  0x41   : > { %609 = vrot.lane.b32.xlu0 %v542_v29, %s3627_s8  ;;  %v569_v55 = vor.u32 %v7042_v6, %v565_v34  ;;  %v627_v29 = vrot.slane %v3749_v32, 1  ;;  %v566_v20 = vsel %vm458_vm0, %v561_v62, %v565_v34  ;;  %v631_v62 = vrot.slane %v3738_v26, 1 }
  0x42   : > { %v633_v34 = vrot.slane %v3744_v30, 1 }
  0x43   : > { %v574_v9 = vsel %vm458_vm0, %v569_v55, %v573_v43  ;;  %v628_v43 = vsel %vm623_vm1, %v625_v38, %v627_v29  ;;  %v589_v55 = vrot.slane %v587_v8, 1  ;;  %v763_v38 = vrot.slane %v467_v0, 3 }
  0x44   : > { %619 = vrot.lane.b32.xlu2 %v582_v39, %s3627_s8  ;;  %v585_v39 = vor.u32 %v7037_v46, %v581_v22  ;;  %v634_v22 = vsel %vm623_vm1, %v631_v62, %v633_v34  ;;  %v765_v8 = vrot.slane %v479_v42, 2  ;;  %v637_v46 = vrot.slane %v3856_v14, 1 }
  0x46   : > { %617 = vrot.lane.b32.xlu1 %v574_v9, %s3627_s8  ;;  %v590_v9 = vsel %vm458_vm0, %v585_v39, %v589_v55  ;;  %v764_v55 = vor.u32 %v763_v38, %v762_v41  ;;  %v4027_v41 = vpack.c.b16 %v3723_v15, %v3746_v31 }
  0x49   : > { %615 = vrot.lane.b32.xlu0 %v566_v20, %s3627_s8  ;;  %v629_v20 = vrot.slane %v3757_v40, 1 }
  0x4b   : > { %v632_v39 = vsel %vm623_vm1, %v629_v20, %v631_v62  ;;  %v630_v0 = vsel %vm623_vm1, %v627_v29, %v629_v20  ;;  %v941_v62 = vpack.c.b16 %v3740_v27, %v3733_v24  ;;  %v1000_v20 = vshll.u32 %v4027_v41, 16 }
  0x4c   : > { %659 = vrot.lane.b32.xlu2 %v628_v43, %s3628_s9  ;;  %v7117_v43 = vshll.u32 %v3749_v32, 16  ;;  %v645_v24 = vrot.slane %v3875_v48, 1 }
  0x4d   : > { %v993_v38 = vshrl.u32 %v941_v62, 16  ;;  %v4034_v27 = vrot.slane %v1000_v20, 1 }
  0x4e   : > { %657 = vrot.lane.b32.xlu1 %v626_v51, %s3628_s9  ;;  %v766_v51 = vrot.slane %v7117_v43, 3  ;;  %v635_v43 = vrot.slane %v3803_v12, 1 }
  0x50   : > { %v638_v29 = vsel %vm623_vm1, %v635_v43, %v637_v46  ;;  %v636_v15 = vsel %vm623_vm1, %v633_v34, %v635_v43  ;;  %v647_v43 = vrot.slane %v3880_v52, 1 }
  0x51   : > { %621 = vrot.lane.b32.xlu0 %v590_v9, %s3627_s8  ;;  %v4012_v9 = vor.u32 %v766_v51, %v765_v8  ;;  %v995_v8 = vshll.u32 %v941_v62, 16 }
  0x53   : > { %v768_v42 = vsel %vm761_vm2, %v764_v55, %v4012_v9  ;;  %v997_v51 = vrot.slane %v995_v8, 1  ;;  %v641_v55 = vrot.slane %v3837_v49, 1  ;;  %v649_v8 = vrot.slane %v3953_v50, 1 }
  0x54   : > { %665 = vrot.lane.b32.xlu2 %v634_v22, %s3628_s9  ;;  %v640_v22 = vsel %vm623_vm1, %v637_v46, %v639_v10 }
  0x55   : > { %v998_v31 = vor.u32 %v997_v51, %v993_v38  ;;  %v642_v34 = vsel %vm623_vm1, %v639_v10, %v641_v55  ;;  %v650_v20 = vsel %vm623_vm1, %v647_v43, %v649_v8  ;;  %v873_v51 = vrot.slane %v3749_v32, 3 }
  0x56   : > { %663 = vrot.lane.b32.xlu1 %v632_v39, %s3628_s9  ;;  %v643_v39 = vrot.slane %v3907_v56, 1  ;;  %v872_v10 = vrot.slane %v3773_v54, 3 }
  0x57   : > { %v1003_v46 = vsel %vm458_vm0, %v998_v31, %v4034_v27  ;;  %v696_v31 = vrot.slane %v3773_v54, 2 }
  0x59   : > { %661 = vrot.lane.b32.xlu0 %v630_v0, %s3628_s9  ;;  %v646_v0 = vsel %vm623_vm1, %v643_v39, %v645_v24 }
  0x5c   : > { %671 = vrot.lane.b32.xlu2 %v640_v22, %s3628_s9  ;;  %v644_v22 = vsel %vm623_vm1, %v641_v55, %v643_v39  ;;  %v648_v39 = vsel %vm623_vm1, %v645_v24, %v647_v43  ;;  %v697_v55 = vrot.slane %v3749_v32, 2  ;;  %v7118_v43 = vshrl.u32 %v3757_v40, 16 }
  0x5e   : > { %669 = vrot.lane.b32.xlu1 %v638_v29, %s3628_s9  ;;  %v7038_v29 = vrot.slane %v3927_v5, 1  ;;  %v698_v24 = vsel %vm695_vm4, %v696_v31, %v697_v55  ;;  %v7045_v31 = vrot.slane %v3757_v40, 2 }
  0x60   : > { %v652_v38 = vsel %vm623_vm1, %v649_v8, %v7038_v29  ;;  %v7123_v29 = vshll.u32 %v3803_v12, 16 }
  0x61   : > { %667 = vrot.lane.b32.xlu0 %v636_v15, %s3628_s9  ;;  %v874_v15 = vsel %vm871_vm3, %v872_v10, %v873_v51  ;;  %v7046_v10 = vrot.slane %v3803_v12, 2 }
  0x64   : > { %677 = vrot.lane.b32.xlu2 %v646_v0, %s3628_s9  ;;  %v1156_v0 = vrot.slane %v941_v62, 1 }
  0x66   : > { %675 = vrot.lane.b32.xlu1 %v644_v22, %s3628_s9  ;;  %v1157_v22 = vrot.slane %v4027_v41, 1 }
  0x68   : > { %v1158_v8 = vsel %vm623_vm1, %v1156_v0, %v1157_v22  ;;  %v700_v0 = vsel %vm695_vm4, %v697_v55, %v7045_v31  ;;  %v7041_v55 = vrot.slane %v3744_v30, 3  ;;  %v4183_v31 = vpack.c.b16 %v3858_v18, %v3894_v33 }
  0x69   : > { %673 = vrot.lane.b32.xlu0 %v642_v34, %s3628_s9 }
  0x6a   : > { %7126 = vst [vmem:[#allocation6_spill] sm:$0xff] %v4183_v31 }
  0x6c   : > { %683 = vrot.lane.b32.xlu2 %v652_v38, %s3628_s9  ;;  %v7119_v38 = vshll.u32 %v3757_v40, 16 }
  0x6e   : > { %681 = vrot.lane.b32.xlu1 %v650_v20, %s3628_s9  ;;  %v770_v20 = vrot.slane %v7119_v38, 3  ;;  %v7122_v38 = vshrl.u32 %v3803_v12, 16 }
  0x71   : > { %679 = vrot.lane.b32.xlu0 %v648_v39, %s3628_s9  ;;  %v7039_v39 = vrot.slane %v3744_v30, 2 }
  0x74   : > { %905 = vrot.lane.b32.xlu2 %v874_v15, %s3629_s10 }
  0x76   : > { %839 = vrot.lane.b32.xlu1 %v768_v42, %s3630_s11  ;;  %v769_v42 = vrot.slane %v7118_v43, 2 }
  0x78   : > { %v4082_v15 = vor.u32 %v770_v20, %v769_v42  ;;  %v781_v20 = vrot.slane %v7122_v38, 2 }
  0x79   : > { %729 = vrot.lane.b32.xlu0 %v698_v24, %s3631_s12 }
  0x7a   : > { %v772_v24 = vsel %vm761_vm2, %v4012_v9, %v4082_v15  ;;  %v7121_v9 = vshll.u32 %v3744_v30, 16 }
  0x7c   : > { %1189 = vrot.lane.b32.xlu2 %v1158_v8, %s3632_s13  ;;  %v7120_v8 = vshrl.u32 %v3744_v30, 16  ;;  %v778_v42 = vrot.slane %v7121_v9, 3 }
  0x7d   : > { %v4073_v34 = vpop.permute.xlu2 %599 }
  0x7e   : > { %1124 = vrot.lane.b32.xlu1 %v1003_v46, %s3633_s14  ;;  %v706_v46 = vsel %vm695_vm4, %v7039_v39, %v7046_v10  ;;  %v777_v43 = vrot.slane %v7120_v8, 2  ;;  %v7043_v39 = vrot.slane %v3757_v40, 3 }
  0x80   : > { %v4118_v9 = vor.u32 %v778_v42, %v777_v43  ;;  %v1008_v43 = vshll.u32 %v4127_v2, 16 }
  0x81   : > { %957 = vrot.lane.b32.xlu0 %v941_v62, %s3634_s15 }
  0x82   : > { %v4143_v17 = vrot.slane %v1008_v43, 1  ;;  %v7049_v43 = vrot.slane %v4127_v2, 1 }
  0x84   : > { %841 = vrot.lane.b32.xlu2 %v772_v24, %s3630_s11  ;;  %v782_v24 = vrot.slane %v7123_v29, 3  ;;  %v876_v29 = vsel %vm871_vm3, %v873_v51, %v7043_v39  ;;  %v7125_v39 = vshll.u32 %v3837_v49, 16 }
  0x86   : > { %737 = vrot.lane.b32.xlu1 %v706_v46, %s3631_s12  ;;  %v4099_v62 = vpop.permute.xlu2 %601  ;;  %v7044_v46 = vrot.slane %v3803_v12, 3  ;;  %v4120_v38 = vor.u32 %v782_v24, %v781_v20  ;;  %v4151_v20 = vpack.c.b16 %v3810_v25, %v3844_v3 }
  0x88   : > { %v882_v8 = vsel %vm871_vm3, %v7041_v55, %v7044_v46  ;;  %v1004_v55 = vshrl.u32 %v4027_v41, 16  ;;  %v784_v51 = vsel %vm761_vm2, %v4118_v9, %v4120_v38  ;;  %v7048_v3 = vrot.slane %v4151_v20, 1 }
  0x89   : > { %731 = vrot.lane.b32.xlu0 %v700_v0, %s3631_s12  ;;  %v4132_v0 = vpack.c.b16 %v3839_v60, %v3791_v4  ;;  %v794_v46 = vrot.slane %v7125_v39, 3 }
  0x8a   : > { %v1006_v16 = vor.u32 %v1004_v55, %v4034_v27 }
  0x8b   : > { %v1024_v4 = vshll.u32 %v4132_v0, 16  ;;  %v7047_v25 = vrot.slane %v4132_v0, 1 }
  0x8c   : > { %913 = vrot.lane.b32.xlu2 %v882_v8, %s3629_s10  ;;  %v1011_v60 = vsel %vm458_vm0, %v1006_v16, %v4143_v17  ;;  %v1028_v8 = vshrl.u32 %v4132_v0, 16 }
  0x8d   : > { %v4154_v24 = vrot.slane %v1024_v4, 1  ;;  %v1166_v16 = vsel %vm623_vm1, %v7047_v25, %v7048_v3 }
  0x8e   : > { %907 = vrot.lane.b32.xlu1 %v876_v29, %s3629_s10  ;;  %v4140_v42 = vpop.permute.xlu2 %607  ;;  %v1032_v29 = vshll.u32 %v4151_v20, 16 }
  0x90   : > { %v4175_v4 = vrot.slane %v1032_v29, 1  ;;  %v7127_v29 = vshrl.u32 %v3907_v56, 16 }
  0x91   : > { %847 = vrot.lane.b32.xlu0 %v784_v51, %s3630_s11  ;;  %v1030_v51 = vor.u32 %v1028_v8, %v4154_v24  ;;  %v1160_v8 = vsel %vm623_vm1, %v1157_v22, %v7049_v43  ;;  %v1056_v22 = vshll.u32 %v4183_v31, 16 }
  0x92   : > { %v797_v25 = vrot.slane %v7127_v29, 2  ;;  %v4211_v29 = vpack.c.b16 %v3865_v23, %v3860_v19  ;;  %v1060_v19 = vshrl.u32 %v4183_v31, 16 }
  0x93   : > { %v1035_v18 = vsel %vm458_vm0, %v1030_v51, %v4175_v4 }
  0x94   : > { %1126 = vrot.lane.b32.xlu2 %v1011_v60, %s3633_s14  ;;  %v7124_v60 = vshrl.u32 %v3837_v49, 16 }
  0x96   : > { %965 = vrot.lane.b32.xlu1 %v4132_v0, %s3634_s15  ;;  %v4159_v27 = vpop.permute.xlu2 %613  ;;  %v4161_v55 = vpop.permute.xlu1 %595  ;;  %v793_v6 = vrot.slane %v7124_v60, 2  ;;  %v7128_v60 = vshll.u32 %v3907_v56, 16 }
  0x98   : > { %v798_v3 = vrot.slane %v7128_v60, 3  ;;  %v1064_v60 = vshll.u32 %v4211_v29, 16 }
  0x99   : > { %959 = vrot.lane.b32.xlu0 %v4027_v41, %s3634_s15  ;;  %v4204_v41 = vor.u32 %v794_v46, %v793_v6  ;;  %v7053_v46 = vrot.slane %v3837_v49, 2 }
  0x9a   : > { %v4207_v43 = vor.u32 %v798_v3, %v797_v25  ;;  %v7054_v25 = vrot.slane %v3907_v56, 2  ;;  %v4223_v3 = vrot.slane %v1056_v22, 1  ;;  %v4243_v45 = vrot.slane %v1064_v60, 1 }
  0x9b   : > { %v4185_v10 = vpop.permute.xlu0 %591  ;;  %7130 = vst [vmem:[#allocation8_spill] sm:$0xff] %v4204_v41 }
  0x9c   : > { %1197 = vrot.lane.b32.xlu2 %v1166_v16, %s3632_s13  ;;  %v7050_v16 = vrot.slane %v3837_v49, 3  ;;  %7131 = vst [vmem:[#allocation9_spill] sm:$0xff] %v4223_v3  ;;  %v800_v51 = vsel %vm761_vm2, %v4204_v41, %v4207_v43  ;;  %v714_v22 = vsel %vm695_vm4, %v7053_v46, %v7054_v25 }
  0x9e   : > { %1191 = vrot.lane.b32.xlu1 %v1160_v8, %s3632_s13  ;;  %v4200_v33 = vpop.permute.xlu2 %619  ;;  %v4202_v39 = vpop.permute.xlu1 %597  ;;  %v7051_v8 = vrot.slane %v3907_v56, 3 }
  0x9f   : > { %7129 = vst [vmem:[#allocation7_spill] sm:$0xff] %v4200_v33 }
  0xa0   : > { %v890_v6 = vsel %vm871_vm3, %v7050_v16, %v7051_v8  ;;  %v1062_v8 = vor.u32 %v1060_v19, %v4223_v3  ;;  %v7132_v19 = vshrl.u32 %v3738_v26, 16 }
  0xa1   : > { %1132 = vrot.lane.b32.xlu0 %v1035_v18, %s3633_s14 }
  0xa2   : > { %v773_v60 = vrot.slane %v7132_v19, 2 }
  0xa3   : > { %v594_v23 = vpop.permute.xlu0 %593 }
  0xa4   : > { %921 = vrot.lane.b32.xlu2 %v890_v6, %s3629_s10  ;;  %v1225_v18 = vsel %vm7079_vm6, %v3773_v54, %v594_v23  ;;  %v7055_v6 = vrot.slane %v4183_v31, 1  ;;  %v7056_v54 = vrot.slane %v4211_v29, 1 }
  0xa6   : > { %855 = vrot.lane.b32.xlu1 %v800_v51, %s3630_s11  ;;  %v660_v16 = vpop.permute.xlu2 %659  ;;  %v1174_v51 = vsel %vm623_vm1, %v7055_v6, %v7056_v54 }
  0xa7   : > { %v4241_v33 = vsel %vm7078_vm5, %v1225_v18, %v660_v16  ;;  %v1067_v16 = vsel %vm458_vm0, %v1062_v8, %v4243_v45  ;;  %v7133_v18 = vshll.u32 %v3738_v26, 16  ;;  %v7061_v8 = vrot.slane %v3856_v14, 2 }
  0xa8   : > { %v606_v23 = vpop.permute.xlu1 %605 }
  0xa9   : > { %745 = vrot.lane.b32.xlu0 %v714_v22, %s3631_s12  ;;  %v774_v25 = vrot.slane %v7133_v18, 3  ;;  %v1231_v22 = vsel %vm7079_vm6, %v3738_v26, %v4073_v34  ;;  %v7063_v34 = vrot.slane %v3738_v26, 2 }
  0xab   : > { %v4253_v46 = vpop.permute.xlu0 %603  ;;  %v4270_v3 = vor.u32 %v774_v25, %v773_v60  ;;  %v1237_v25 = vsel %vm7079_vm6, %v3856_v14, %v606_v23  ;;  %v7074_v23 = vrot.slane %v3738_v26, 3 }
  0xac   : > { %1205 = vrot.lane.b32.xlu2 %v1174_v51, %s3632_s13 }
  0xad   : > { %v776_v19 = vsel %vm761_vm2, %v4082_v15, %v4270_v3  ;;  %v7136_v15 = vrot.slane %v3757_v40, 2 }
  0xae   : > { %1140 = vrot.lane.b32.xlu1 %v1067_v16, %s3633_s14  ;;  %v666_v6 = vpop.permute.xlu2 %665 }
  0xaf   : > { %v4267_v54 = vsel %vm7078_vm5, %v1231_v22, %v666_v6  ;;  %v7135_v6 = vrot.slane %v3803_v12, 2  ;;  %v702_v60 = vsel %vm695_vm4, %v7136_v15, %v7063_v34  ;;  %v3417_v15 = vld [vmem:[%s7007_s1 + $0x30] sm:$0x30] }
  0xb0   : > { %7134 = vst [vmem:[#allocation10_spill] sm:$0xff] %v4267_v54  ;;  %v612_v51 = vpop.permute.xlu1 %611 }
  0xb1   : > { %973 = vrot.lane.b32.xlu0 %v4183_v31, %s3634_s15  ;;  %v708_v16 = vsel %vm695_vm4, %v7135_v6, %v7061_v8  ;;  %v7137_v31 = vshrl.u32 %v3856_v14, 16  ;;  %v786_v6 = vrot.slane %v7138_v63, 3  ;;  %v7140_v63 = vrot.slane %v3803_v12, 3 }
  0xb3   : > { %v4278_v18 = vpop.permute.xlu0 %609  ;;  %v785_v41 = vrot.slane %v7137_v31, 2 }
  0xb4   : > { %843 = vrot.lane.b32.xlu2 %v776_v19, %s3630_s11 }
  0xb6   : > { %739 = vrot.lane.b32.xlu1 %v708_v16, %s3631_s12  ;;  %v672_v22 = vpop.permute.xlu2 %671  ;;  %v883_v16 = vrot.slane %v3856_v14, 3 }
  0xb7   : > { %v4299_v19 = vsel %vm7078_vm5, %v1237_v25, %v672_v22  ;;  %v3392_v25 = vor.u32 %v3417_v15, %v3391_v59  ;;  %v4315_v22 = vor.u32 %v786_v6, %v785_v41  ;;  %v3416_v59 = vld [vmem:[%s7007_s1 + $0x28] sm:$0xff]  ;;  %v1012_v41 = vshrl.u32 %v4127_v2, 16 }
  0xb8   : > { %7139 = vst [vmem:[#allocation11_spill] sm:$0xff] %v4299_v19  ;;  %v618_v8 = vpop.permute.xlu1 %617  ;;  %v884_v31 = vsel %vm871_vm3, %v7140_v63, %v883_v16  ;;  %v7141_v19 = vrot.slane %v3757_v40, 3 }
  0xb9   : > { %733 = vrot.lane.b32.xlu0 %v702_v60, %s3631_s12  ;;  %v4326_v60 = vpack.c.b16 %v3779_v58, %v3731_v21  ;;  %v1579_v54 = vsel %vm695_vm4, %v3392_v25, 0  ;;  %v788_v21 = vsel %vm761_vm2, %v4120_v38, %v4315_v22  ;;  %v1014_v63 = vor.u32 %v1012_v41, %v4143_v17 }
  0xba   : > { %v878_v7 = vsel %vm871_vm3, %v7141_v19, %v7074_v23  ;;  %1582 = vmatpush.bf16.msra.mxu0 %v1579_v54  ;;  %3513 = vmatpush.bf16.msra.mxu1 %v1579_v54  ;;  %v1243_v19 = vsel %vm7079_vm6, %v3907_v56, %v612_v51  ;;  %v4354_v38 = vpack.c.b16 %v3817_v37, %v3815_v36  ;;  %v3414_v51 = vld [vmem:[%s7007_s1 + $0x18] sm:$0xff]  ;;  %v1036_v41 = vshrl.u32 %v4151_v20, 16 }
  0xbb   : > { %v4317_v34 = vpop.permute.xlu0 %615  ;;  %v1016_v6 = vshll.u32 %v4326_v60, 16  ;;  %3514 = vmatpush.bf16.msra.mxu2 %v1579_v54  ;;  %3515 = vmatpush.bf16.msra.mxu3 %v1579_v54  ;;  %v3415_v54 = vld [vmem:[%s7007_s1 + $0x20] sm:$0xff]  ;;  %v1249_v36 = vsel %vm7079_vm6, %v3953_v50, %v618_v8  ;;  %v1229_v8 = vsel %vm7079_vm6, %v3757_v40, %v4202_v39  ;;  %v3413_v40 = vld [vmem:[%s7007_s1 + $0x10] sm:$0xff]  ;;  %v1227_v39 = vsel %vm7079_vm6, %v3749_v32, %v4161_v55 }
  0xbc   : > { %915 = vrot.lane.b32.xlu2 %v884_v31, %s3629_s10 }
  0xbd   : > { %v4345_v31 = vrot.slane %v1016_v6, 1 }
  0xbe   : > { %909 = vrot.lane.b32.xlu1 %v878_v7, %s3629_s10  ;;  %v678_v58 = vpop.permute.xlu2 %677  ;;  %1583 = vmatpush.bf16.msra.mxu0 %v3416_v59 }
  0xbf   : > { %v4342_v15 = vsel %vm7078_vm5, %v1243_v19, %v678_v58  ;;  %v1019_v7 = vsel %vm458_vm0, %v1014_v63, %v4345_v31  ;;  %3516 = vmatpush.bf16.msra.mxu1 %v3416_v59  ;;  %3517 = vmatpush.bf16.msra.mxu2 %v3416_v59  ;;  %v7069_v19 = vrot.slane %v4326_v60, 1 }
  0xc0   : > { %v4347_v25 = vpop.permute.xlu1 %657  ;;  %3518 = vmatpush.bf16.msra.mxu3 %v3416_v59  ;;  %v1040_v59 = vshll.u32 %v4354_v38, 16 }
  0xc1   : > { %849 = vrot.lane.b32.xlu0 %v788_v21, %s3630_s11  ;;  %v7070_v21 = vrot.slane %v4354_v38, 1 }
  0xc2   : > { %1584 = vmatpush.bf16.msra.mxu0 %v3415_v54 }
  0xc3   : > { %v4359_v17 = vpop.permute.xlu0 %621  ;;  %3519 = vmatpush.bf16.msra.mxu1 %v3415_v54  ;;  %3520 = vmatpush.bf16.msra.mxu2 %v3415_v54 }
  0xc4   : > { %1128 = vrot.lane.b32.xlu2 %v1019_v7, %s3633_s14  ;;  %3521 = vmatpush.bf16.msra.mxu3 %v3415_v54  ;;  %v7142_v7 = vrot.slane %v4151_v20, 1  ;;  %v1038_v54 = vor.u32 %v1036_v41, %v4175_v4  ;;  %v7144_v41 = vshrl.u32 %v3875_v48, 16 }
  0xc6   : > { %967 = vrot.lane.b32.xlu1 %v4151_v20, %s3634_s15  ;;  %v684_v37 = vpop.permute.xlu2 %683  ;;  %1585 = vmatpush.bf16.msra.mxu0 %v3414_v51  ;;  %v7143_v20 = vrot.slane %v4127_v2, 1 }
  0xc7   : > { %v4372_v6 = vsel %vm7078_vm5, %v1249_v36, %v684_v37  ;;  %v1168_v36 = vsel %vm623_vm1, %v7142_v7, %v7070_v21  ;;  %3522 = vmatpush.bf16.msra.mxu1 %v3414_v51  ;;  %v4390_v37 = vrot.slane %v1040_v59, 1  ;;  %3523 = vmatpush.bf16.msra.mxu2 %v3414_v51  ;;  %v801_v59 = vrot.slane %v7144_v41, 2 }
  0xc8   : > { %v664_v58 = vpop.permute.xlu1 %663  ;;  %3524 = vmatpush.bf16.msra.mxu3 %v3414_v51  ;;  %v7145_v51 = vshll.u32 %v3875_v48, 16  ;;  %v7068_v41 = vrot.slane %v3875_v48, 2 }
  0xc9   : > { %961 = vrot.lane.b32.xlu0 %v4127_v2, %s3634_s15  ;;  %v4382_v63 = vsel %vm7078_vm5, %v1229_v8, %v664_v58  ;;  %v1162_v58 = vsel %vm623_vm1, %v7143_v20, %v7069_v19  ;;  %v1043_v32 = vsel %vm458_vm0, %v1038_v54, %v4390_v37  ;;  %v3412_v2 = vld [vmem:[%s7007_s1 + $0x8] sm:$0xff] }
  0xca   : > { %1586 = vmatpush.bf16.msra.mxu0 %v3413_v40  ;;  %v802_v7 = vrot.slane %v7145_v51, 3 }
  0xcb   : > { %v662_v8 = vpop.permute.xlu0 %661  ;;  %3525 = vmatpush.bf16.msra.mxu1 %v3413_v40  ;;  %3526 = vmatpush.bf16.msra.mxu2 %v3413_v40 }
  0xcc   : > { %v4404_v4 = vsel %vm7078_vm5, %v1227_v39, %v662_v8  ;;  %1199 = vrot.lane.b32.xlu2 %v1168_v36, %s3632_s13  ;;  %v7066_v36 = vrot.slane %v3953_v50, 2  ;;  %v7067_v39 = vrot.slane %v3927_v5, 2  ;;  %3527 = vmatpush.bf16.msra.mxu3 %v3413_v40  ;;  %v1235_v8 = vsel %vm7079_vm6, %v3803_v12, %v4253_v46  ;;  %v3411_v12 = vld [vmem:[%s7007_s1] sm:$0xff] }
  0xcd   : > { %v4424_v20 = vor.u32 %v802_v7, %v801_v59  ;;  %v1233_v46 = vsel %vm7079_vm6, %v3744_v30, %v4099_v62  ;;  %v7147_v7 = vshrl.u32 %v3953_v50, 16 }
  0xce   : > { %1193 = vrot.lane.b32.xlu1 %v1162_v58, %s3632_s13  ;;  %v4412_v55 = vpop.permute.xlu2 %905  ;;  %1587 = vmatpush.bf16.msra.mxu0 %v3412_v2 }
  0xcf   : > { %3528 = vmatpush.bf16.msra.mxu1 %v3412_v2  ;;  %v804_v40 = vsel %vm761_vm2, %v4207_v43, %v4424_v20  ;;  %3529 = vmatpush.bf16.msra.mxu2 %v3412_v2  ;;  %v7146_v43 = vrot.slane %v3907_v56, 2 }
  0xd0   : > { %v670_v54 = vpop.permute.xlu1 %669  ;;  %3530 = vmatpush.bf16.msra.mxu3 %v3412_v2  ;;  %v7148_v2 = vshll.u32 %v3953_v50, 16 }
  0xd1   : > { %1134 = vrot.lane.b32.xlu0 %v1043_v32, %s3633_s14  ;;  %v4428_v58 = vsel %vm7078_vm5, %v1235_v8, %v670_v54  ;;  %v722_v32 = vsel %vm695_vm4, %v7066_v36, %v7067_v39  ;;  %v716_v62 = vsel %vm695_vm4, %v7146_v43, %v7068_v41  ;;  %v809_v8 = vrot.slane %v7147_v7, 2 }
  0xd2   : > { %1588 = vmatpush.bf16.msra.mxu0 %v3411_v12  ;;  %v810_v54 = vrot.slane %v7148_v2, 3  ;;  %v7072_v43 = vrot.slane %v3875_v48, 3  ;;  %v7071_v41 = vrot.slane %v3953_v50, 3  ;;  %v1241_v7 = vsel %vm7079_vm6, %v3837_v49, %v4278_v18 }
  0xd3   : > { %v668_v59 = vpop.permute.xlu0 %667  ;;  %3531 = vmatpush.bf16.msra.mxu1 %v3411_v12  ;;  %3532 = vmatpush.bf16.msra.mxu2 %v3411_v12  ;;  %v1239_v18 = vsel %vm7079_vm6, %v3830_v44, %v4140_v42 }
  0xd4   : > { %v4446_v51 = vsel %vm7078_vm5, %v1233_v46, %v668_v59  ;;  %857 = vrot.lane.b32.xlu2 %v804_v40, %s3630_s11  ;;  %v7149_v46 = vshrl.u32 %v3927_v5, 16  ;;  %v7150_v40 = vshll.u32 %v3927_v5, 16  ;;  %3533 = vmatpush.bf16.msra.mxu3 %v3411_v12  ;;  %v4480_v19 = vor.u32 %v810_v54, %v809_v8 }
  0xd5   : > { %v4508_v54 = vpack.c.b16 %v3921_v13, %v3916_v61  ;;  %v4526_v13 = vpack.c.b16 %v3966_v35, %v3923_v1 }
  0xd6   : > { %753 = vrot.lane.b32.xlu1 %v722_v32, %s3631_s12  ;;  %v813_v59 = vrot.slane %v7149_v46, 2  ;;  %v814_v36 = vrot.slane %v7150_v40, 3  ;;  %v4463_v39 = vpop.permute.xlu2 %1189  ;;  %v7073_v32 = vrot.slane %v3927_v5, 3 }
  0xd7   : > { %v1092_v1 = vshrl.u32 %v4508_v54, 16 }
  0xd8   : > { %v676_v2 = vpop.permute.xlu1 %675  ;;  %v898_v40 = vsel %vm871_vm3, %v7071_v41, %v7073_v32  ;;  %v4482_v21 = vor.u32 %v814_v36, %v813_v59  ;;  %v1068_v36 = vshrl.u32 %v4211_v29, 16 }
  0xd9   : > { %747 = vrot.lane.b32.xlu0 %v716_v62, %s3631_s12  ;;  %v4473_v46 = vsel %vm7078_vm5, %v1241_v7, %v676_v2  ;;  %v7151_v62 = vrot.slane %v3907_v56, 3  ;;  %v4494_v2 = vpack.c.b16 %v3939_v11, %v3867_v28 }
  0xda   : > { %v816_v56 = vsel %vm761_vm2, %v4480_v19, %v4482_v21  ;;  %v1070_v11 = vor.u32 %v1068_v36, %v4243_v45  ;;  %v1088_v45 = vshll.u32 %v4508_v54, 16 }
  0xdb   : > { %v674_v12 = vpop.permute.xlu0 %673  ;;  %v892_v7 = vsel %vm871_vm3, %v7151_v62, %v7072_v43  ;;  %v1072_v42 = vshll.u32 %v4494_v2, 16  ;;  %v1245_v62 = vsel %vm7079_vm6, %v3875_v48, %v4159_v27  ;;  %v7076_v27 = vrot.slane %v4508_v54, 1 }
  0xdc   : > { %v4497_v8 = vsel %vm7078_vm5, %v1239_v18, %v674_v12  ;;  %929 = vrot.lane.b32.xlu2 %v898_v40, %s3629_s10  ;;  %v1247_v40 = vsel %vm7079_vm6, %v3880_v52, %v4317_v34  ;;  %v4538_v36 = vrot.slane %v1088_v45, 1  ;;  %v7152_v43 = vrot.slane %v4211_v29, 1 }
  0xdd   : > { %v4513_v59 = vrot.slane %v1072_v42, 1  ;;  %v1096_v42 = vshll.u32 %v4526_v13, 16 }
  0xde   : > { %923 = vrot.lane.b32.xlu1 %v892_v7, %s3629_s10  ;;  %v4510_v28 = vpop.permute.xlu2 %841  ;;  %v1094_v45 = vor.u32 %v1092_v1, %v4538_v36 }
  0xdf   : > { %v1075_v61 = vsel %vm458_vm0, %v1070_v11, %v4513_v59  ;;  %v1175_v11 = vrot.slane %v4494_v2, 1 }
  0xe0   : > { %v682_v18 = vpop.permute.xlu1 %681 }
  0xe1   : > { %863 = vrot.lane.b32.xlu0 %v816_v56, %s3630_s11  ;;  %v4520_v12 = vsel %vm7078_vm5, %v1247_v40, %v682_v18  ;;  %v1181_v40 = vrot.slane %v4526_v13, 1  ;;  %v1176_v32 = vsel %vm623_vm1, %v7152_v43, %v1175_v11 }
  0xe3   : > { %v680_v34 = vpop.permute.xlu0 %679 }
  0xe4   : > { %v4533_v7 = vsel %vm7078_vm5, %v1245_v62, %v680_v34  ;;  %1142 = vrot.lane.b32.xlu2 %v1075_v61, %s3633_s14  ;;  %v1182_v61 = vsel %vm623_vm1, %v7076_v27, %v1181_v40  ;;  %v4555_v62 = vrot.slane %v1096_v42, 1  ;;  %v1223_v34 = vsel %vm7079_vm6, %v3771_v53, %v4185_v10 }
  0xe5   : > { %v1256_v23 = vsel %vm7078_vm5, %v1223_v34, %v4347_v25  ;;  %v709_v42 = vrot.slane %v3830_v44, 2 }
  0xe6   : > { %981 = vrot.lane.b32.xlu1 %v4508_v54, %s3634_s15  ;;  %v4542_v56 = vpop.permute.xlu2 %913  ;;  %v1099_v53 = vsel %vm458_vm0, %v1094_v45, %v4555_v62 }
  0xe8   : > { %v840_v18 = vpop.permute.xlu1 %839 }
  0xe9   : > { %975 = vrot.lane.b32.xlu0 %v4211_v29, %s3634_s15 }
  0xeb   : > { %v730_v41 = vpop.permute.xlu0 %729 }
  0xec   : > { %1213 = vrot.lane.b32.xlu2 %v1182_v61, %s3632_s13  ;;  %v1289_v1 = vsel %vm1287_vm7, %v1256_v23, %v730_v41  ;;  %v780_v23 = vsel %vm761_vm2, %v4270_v3, %v4118_v9  ;;  %v7154_v3 = vrot.slane %v3744_v30, 2 }
  0xed   : > { %v1322_v29 = vsel %vm1320_vm8, %v1289_v1, %v840_v18  ;;  %v7156_v1 = vshrl.u32 %v3830_v44, 16 }
  0xee   : > { %1207 = vrot.lane.b32.xlu1 %v1176_v32, %s3632_s13  ;;  %v4572_v10 = vpop.permute.xlu2 %1126  ;;  %v1355_v25 = vsel %vm1353_vm9, %v1322_v29, %v4412_v55  ;;  %v7153_v32 = vrot.slane %v3856_v14, 2  ;;  %v7155_v55 = vrot.slane %v3738_v26, 2  ;;  %v7157_v29 = vshll.u32 %v3830_v44, 16 }
  0xf0   : > { %v1125_v43 = vpop.permute.xlu1 %1124  ;;  %v710_v18 = vsel %vm695_vm4, %v7153_v32, %v709_v42  ;;  %v704_v34 = vsel %vm695_vm4, %v7155_v55, %v7154_v3  ;;  %v1020_v3 = vshrl.u32 %v4326_v60, 16 }
  0xf1   : > { %1148 = vrot.lane.b32.xlu0 %v1099_v53, %s3633_s14  ;;  %v789_v53 = vrot.slane %v7156_v1, 2 }
  0xf2   : > { %v1022_v55 = vor.u32 %v1020_v3, %v4345_v31 }
  0xf3   : > { %v958_v41 = vpop.permute.xlu0 %957 }
  0xf4   : > { %v1388_v61 = vsel %vm7087_vm10, %v1355_v25, %v958_v41  ;;  %845 = vrot.lane.b32.xlu2 %v780_v23, %s3630_s11  ;;  %v790_v25 = vrot.slane %v7157_v29, 3 }
  0xf5   : > { %v1421_v45 = vsel %vm7086_vm11, %v1388_v61, %v1125_v43  ;;  %v885_v43 = vrot.slane %v3830_v44, 3  ;;  %v7158_v61 = vrot.slane %v3744_v30, 3  ;;  %v4631_v30 = vpack.c.b16 %v3882_v57, %v3823_v47 }
  0xf6   : > { %v1454_v9 = vsel %vm7085_vm12, %v1421_v45, %v4463_v39  ;;  %741 = vrot.lane.b32.xlu1 %v710_v18, %s3631_s12  ;;  %v1198_v23 = vpop.permute.xlu2 %1197  ;;  %v4610_v32 = vor.u32 %v790_v25, %v789_v53  ;;  %v7159_v45 = vrot.slane %v3738_v26, 3  ;;  %v1027_v26 = vsel %vm458_vm0, %v1022_v55, %v4154_v24 }
  0xf7   : > { %3393 = vmatmul.msk.bf16.vlgmr.msra.gmra.mxu0 %vm7082_vm13, %v1454_v9  ;;  %v886_v41 = vsel %vm871_vm3, %v883_v16, %v885_v43  ;;  %v1048_v31 = vshll.u32 %v4631_v30, 16  ;;  %v1169_v29 = vrot.slane %v4631_v30, 1  ;;  %v7160_v47 = vrot.slane %v4354_v38, 1 }
  0xf8   : > { %v738_v39 = vpop.permute.xlu1 %737  ;;  %v880_v9 = vsel %vm871_vm3, %v7159_v45, %v7158_v61  ;;  %v792_v14 = vsel %vm761_vm2, %v4315_v22, %v4610_v32  ;;  %v1044_v22 = vshrl.u32 %v4354_v38, 16 }
  0xf9   : > { %735 = vrot.lane.b32.xlu0 %v704_v34, %s3631_s12  ;;  %v1170_v57 = vsel %vm623_vm1, %v7160_v47, %v1169_v29  ;;  %v4651_v61 = vrot.slane %v1048_v31, 1 }
  0xfb   : > { %v732_v18 = vpop.permute.xlu0 %731 }
  0xfc   : > { %917 = vrot.lane.b32.xlu2 %v886_v41, %s3629_s10  ;;  %v1291_v24 = vsel %vm1287_vm7, %v4241_v33, %v732_v18  ;;  %v1046_v41 = vor.u32 %v1044_v22, %v4390_v37  ;;  %v7161_v33 = vrot.slane %v4132_v0, 1  ;;  %v7162_v18 = vrot.slane %v4326_v60, 1 }
  0xfd   : > { %v1324_v45 = vsel %vm1320_vm8, %v1291_v24, %v4510_v28  ;;  %v7163_v37 = vshrl.u32 %v3880_v52, 16  ;;  %v7165_v28 = vld [vmem:[#allocation10_spill] sm:$0xff]  ;;  %v7166_v24 = vld [vmem:[#allocation3_spill] sm:$0xff] }
  0xfe   : > { %911 = vrot.lane.b32.xlu1 %v880_v9, %s3629_s10  ;;  %v4623_v16 = vpop.permute.xlu2 %921  ;;  %v1164_v3 = vsel %vm623_vm1, %v7162_v18, %v7161_v33  ;;  %v1297_v31 = vsel %vm1287_vm7, %v7165_v28, %v738_v39  ;;  %v1051_v0 = vsel %vm458_vm0, %v1046_v41, %v4651_v61  ;;  %v723_v47 = vrot.slane %v7166_v24, 2 }
  0xff   : > { %v805_v55 = vrot.slane %v7163_v37, 2  ;;  %v7169_v37 = vshrl.u32 %v7166_v24, 16 }
 0x100   : > { %v908_v34 = vpop.permute.xlu1 %907 }
 0x101   : > { %851 = vrot.lane.b32.xlu0 %v792_v14, %s3630_s11  ;;  %v1357_v14 = vsel %vm1353_vm9, %v1324_v45, %v908_v34 }
 0x103   : > { %v848_v1 = vpop.permute.xlu0 %847 }
 0x104   : > { %1130 = vrot.lane.b32.xlu2 %v1027_v26, %s3633_s14  ;;  %v7164_v26 = vshll.u32 %v3880_v52, 16  ;;  %v1330_v34 = vsel %vm1320_vm8, %v1297_v31, %v848_v1  ;;  %v717_v1 = vrot.slane %v3880_v52, 2  ;;  %v332_v31 = vld [vmem:[%s3712_s7 + $0x108] sm:$0xff] }
 0x105   : > { %v1363_v33 = vsel %vm1353_vm9, %v1330_v34, %v4542_v56  ;;  %v899_v34 = vrot.slane %v7166_v24, 3 }
 0x106   : > { %969 = vrot.lane.b32.xlu1 %v4354_v38, %s3634_s15  ;;  %v4638_v53 = vpop.permute.xlu2 %1205  ;;  %v806_v22 = vrot.slane %v7164_v26, 3  ;;  %v7170_v26 = vshll.u32 %v7166_v24, 16 }
 0x108   : > { %v966_v25 = vpop.permute.xlu1 %965 }
 0x109   : > { %963 = vrot.lane.b32.xlu0 %v4326_v60, %s3634_s15 }
 0x10b   : > { %v960_v9 = vpop.permute.xlu0 %959 }
 0x10c   : > { %1201 = vrot.lane.b32.xlu2 %v1170_v57, %s3632_s13  ;;  %v1390_v38 = vsel %vm7087_vm10, %v1357_v14, %v960_v9  ;;  %v4676_v57 = vor.u32 %v806_v22, %v805_v55  ;;  %v817_v55 = vrot.slane %v7169_v37, 2  ;;  %v818_v22 = vrot.slane %v7170_v26, 3 }
 0x10d   : > { %v1423_v45 = vsel %vm7086_vm11, %v1390_v38, %v4572_v10  ;;  %v1396_v10 = vsel %vm7087_vm10, %v1363_v33, %v966_v25  ;;  %v7168_v25 = vrot.slane %v3875_v48, 2  ;;  %v370_v33 = vpack.c.bf16 %v332_v31, %v332_v31 }
 0x10e   : > { %1195 = vrot.lane.b32.xlu1 %v1164_v3, %s3632_s13  ;;  %v4672_v60 = vpop.permute.xlu2 %843  ;;  %v808_v41 = vsel %vm761_vm2, %v4424_v20, %v4676_v57  ;;  %v7167_v3 = vrot.slane %v3927_v5, 2  ;;  %v1076_v37 = vshrl.u32 %v4494_v2, 16 }
 0x10f   : > { %v718_v38 = vsel %vm695_vm4, %v7168_v25, %v717_v1  ;;  %v691_v26 = vunpack.c.l.b16 %v370_v33 }
 0x110   : > { %v1192_v9 = vpop.permute.xlu1 %1191  ;;  %v724_v14 = vsel %vm695_vm4, %v7167_v3, %v723_v47  ;;  %v7172_v3 = vrot.slane %v3875_v48, 3 }
 0x111   : > { %1136 = vrot.lane.b32.xlu0 %v1051_v0, %s3633_s14  ;;  %v1456_v39 = vsel %vm7085_vm12, %v1423_v45, %v1192_v9  ;;  %v333_v0 = vld [vmem:[%s3712_s7 + $0x110] sm:$0xff]  ;;  %v7171_v9 = vrot.slane %v3927_v5, 3 }
 0x112   : > { %3394 = vmatmul.msk.bf16.gmra.mxu0 %vm7082_vm13, %v1456_v39 }
 0x113   : > { %v1133_v18 = vpop.permute.xlu0 %1132  ;;  %v900_v39 = vsel %vm871_vm3, %v7171_v9, %v899_v34 }
 0x114   : > { %v1429_v20 = vsel %vm7086_vm11, %v1396_v10, %v1133_v18  ;;  %859 = vrot.lane.b32.xlu2 %v808_v41, %s3630_s11  ;;  %v4721_v41 = vor.u32 %v818_v22, %v817_v55  ;;  %v371_v10 = vpack.c.bf16 %v333_v0, %v333_v0  ;;  %v1078_v0 = vor.u32 %v1076_v37, %v4513_v59 }
 0x115   : > { %v1462_v56 = vsel %vm7085_vm12, %v1429_v20, %v1198_v23  ;;  %v893_v23 = vrot.slane %v3880_v52, 3  ;;  %v7173_v20 = vld [vmem:[#allocation4_spill] sm:$0xff] }
 0x116   : > { %3397 = vmatmul.msk.bf16.vlgmr.msra.gmra.mxu1 %vm7082_vm13, %v1462_v56  ;;  %755 = vrot.lane.b32.xlu1 %v724_v14, %s3631_s12  ;;  %v4709_v28 = vpop.permute.xlu2 %915  ;;  %v7174_v56 = vld [vmem:[#allocation2_spill] sm:$0xff]  ;;  %v820_v48 = vsel %vm761_vm2, %v4482_v21, %v4721_v41  ;;  %v4741_v22 = vunpack.c.l.b16 %v371_v10 }
 0x117   : > { %v894_v14 = vsel %vm871_vm3, %v7172_v3, %v893_v23  ;;  %v4730_v25 = vpack.c.b16 %v7174_v56, %v7173_v20 }
 0x118   : > { %v856_v45 = vpop.permute.xlu1 %855  ;;  %v4753_v3 = vpack.c.b16 %v4741_v22, %v691_v26 }
 0x119   : > { %749 = vrot.lane.b32.xlu0 %v718_v38, %s3631_s12  ;;  %v1080_v55 = vshll.u32 %v4730_v25, 16 }
 0x11a   : > { %v1104_v20 = vshll.u32 %v4753_v3, 16  ;;  %v1108_v52 = vshrl.u32 %v4753_v3, 16 }
 0x11b   : > { %v746_v18 = vpop.permute.xlu0 %745  ;;  %v4746_v9 = vrot.slane %v1080_v55, 1 }
 0x11c   : > { %931 = vrot.lane.b32.xlu2 %v900_v39, %s3629_s10  ;;  %v1305_v38 = vsel %vm1287_vm7, %v4497_v8, %v746_v18 }
 0x11d   : > { %v1338_v8 = vsel %vm1320_vm8, %v1305_v38, %v856_v45  ;;  %v1083_v18 = vsel %vm458_vm0, %v1078_v0, %v4746_v9  ;;  %v7077_v38 = vrot.slane %v4753_v3, 1 }
 0x11e   : > { %925 = vrot.lane.b32.xlu1 %v894_v14, %s3629_s10  ;;  %v4743_v31 = vpop.permute.xlu2 %1128  ;;  %v1371_v21 = vsel %vm1353_vm9, %v1338_v8, %v4623_v16  ;;  %v1100_v14 = vshrl.u32 %v4526_v13, 16  ;;  %v7075_v16 = vrot.slane %v4730_v25, 1 }
 0x120   : > { %v1141_v39 = vpop.permute.xlu1 %1140  ;;  %v1102_v55 = vor.u32 %v1100_v14, %v4555_v62  ;;  %v1178_v8 = vsel %vm623_vm1, %v1175_v11, %v7075_v16  ;;  %v1052_v11 = vshrl.u32 %v4631_v30, 16 }
 0x121   : > { %865 = vrot.lane.b32.xlu0 %v820_v48, %s3630_s11  ;;  %v4779_v48 = vrot.slane %v1104_v20, 1 }
 0x123   : > { %v974_v33 = vpop.permute.xlu0 %973 }
 0x124   : > { %v1404_v10 = vsel %vm7087_vm10, %v1371_v21, %v974_v33  ;;  %1144 = vrot.lane.b32.xlu2 %v1083_v18, %s3633_s14  ;;  %v7175_v18 = vrot.slane %v3837_v49, 3 }
 0x125   : > { %v1437_v59 = vsel %vm7086_vm11, %v1404_v10, %v1141_v39  ;;  %v1734_v39 = vlaneseq  ;;  %v7176_v10 = vld [vmem:[#allocation8_spill] sm:$0xff] }
 0x126   : > { %v1470_v45 = vsel %vm7085_vm12, %v1437_v59, %v4638_v53  ;;  %983 = vrot.lane.b32.xlu1 %v4526_v13, %s3634_s15  ;;  %v4766_v56 = vpop.permute.xlu2 %1199  ;;  %v1184_v53 = vsel %vm623_vm1, %v1181_v40, %v7077_v38  ;;  %v1107_v13 = vsel %vm458_vm0, %v1102_v55, %v4779_v48  ;;  %v796_v59 = vsel %vm761_vm2, %v4610_v32, %v7176_v10 }
 0x127   : > { %3401 = vmatmul.msk.bf16.vlgmr.msra.gmra.mxu2 %vm7082_vm13, %v1470_v45  ;;  %v4799_v21 = vshrl.u32 %v1734_v39, 7  ;;  %v4806_v45 = vstv %s3364_s27  ;;  %v4821_v32 = vpack.c.b16 %v691_v26, %v3966_v35  ;;  %v7178_v35 = vld [vmem:[#allocation6_spill] sm:$0xff]  ;;  %v7180_v39 = vld [vmem:[#allocation9_spill] sm:$0xff]  ;;  %v7181_v10 = vrot.slane %v3953_v50, 2  ;;  %s3359_s27 = sshll.u32 %s3609_s21, 5  ;;  %s7427_s21 = smov (!%p290_p7, %s3609_s21), 1 }
 0x128   : > { %v740_v37 = vpop.permute.xlu1 %739  ;;  %p5117_p6 = scmp.lt.s32.totalorder %s3359_s27, 63  ;;  %s293_s18 = sadd.s32 %s3362_s17, %s7427_s21 }
 0x129   : > { %977 = vrot.lane.b32.xlu0 %v4494_v2, %s3634_s15  ;;  %v888_v2 = vsel %vm871_vm3, %v885_v43, %v7175_v18  ;;  %v4811_v14 = vadd.s32 %v4806_v45, %v4799_v21  ;;  %v7177_v43 = vrot.slane %v3837_v49, 2  ;;  %v1736_v18 = vadd.s32 8, %v4799_v21  ;;  %s3363_s19 = sshll.u32 %s293_s18, 1 }
 0x12a   : > { %s7425_s27 = smov (!%p5117_p6, %s3359_s27), 63 }
 0x12b   : > { %v734_v0 = vpop.permute.xlu0 %733  ;;  %v712_v20 = vsel %vm695_vm4, %v709_v42, %v7177_v43  ;;  %vm1800_vm14 = vcmp.lt.s32.totalorder %v4811_v14, 0  ;;  %v7179_v42 = vrot.slane %v7178_v35, 1  ;;  %v653_v35 = vrot.slane %v7166_v24, 1 }
 0x12c   : > { %1215 = vrot.lane.b32.xlu2 %v1184_v53, %s3632_s13  ;;  %v1054_v53 = vor.u32 %v1052_v11, %v4651_v61 }
 0x12d   : > { %v1172_v61 = vsel %vm623_vm1, %v1169_v29, %v7179_v42  ;;  %v720_v29 = vsel %vm695_vm4, %v717_v1, %v7181_v10  ;;  %v335_v42 = vld [vmem:[%s3712_s7 + $0x120] sm:$0xff] }
 0x12e   : > { %1209 = vrot.lane.b32.xlu1 %v1178_v8, %s3632_s13  ;;  %v4790_v40 = vpop.permute.xlu2 %857  ;;  %v1801_v8 = vsub.s32 0, %v4811_v14 }
 0x130   : > { %v910_v62 = vpop.permute.xlu1 %909  ;;  %v4832_v44 = vsel %vm1800_vm14, %v1801_v8, %v4811_v14 }
 0x131   : > { %1150 = vrot.lane.b32.xlu0 %v1107_v13, %s3633_s14  ;;  %v1293_v13 = vsel %vm1287_vm7, %v4404_v4, %v734_v0  ;;  %v1803_v26 = vand.u32 65535, %v4832_v44  ;;  %v1059_v4 = vsel %vm458_vm0, %v1054_v53, %v7180_v39  ;;  %v822_v0 = vshrl.u32 %v4821_v32, 16 }
 0x132   : > { %v1804_v43 = vshrl.u32 %v4832_v44, 16  ;;  %v1299_v53 = vsel %vm1287_vm7, %v4446_v51, %v740_v37 }
 0x133   : > { %v850_v33 = vpop.permute.xlu0 %849  ;;  %v1806_v39 = vmul.u32 52429, %v1803_v26  ;;  %v824_v27 = vrot.slane %v822_v0, 2 }
 0x134   : > { %919 = vrot.lane.b32.xlu2 %v888_v2, %s3629_s10  ;;  %v1326_v2 = vsel %vm1320_vm8, %v1293_v13, %v4672_v60  ;;  %v825_v60 = vshll.u32 %v4821_v32, 16  ;;  %v1808_v1 = vmul.u32 52429, %v1804_v43  ;;  %v1332_v16 = vsel %vm1320_vm8, %v1299_v53, %v850_v33 }
 0x135   : > { %v1359_v8 = vsel %vm1353_vm9, %v1326_v2, %v910_v62  ;;  %v4867_v62 = vadd.s32 %v4806_v45, %v1736_v18  ;;  %v725_v2 = vrot.slane %v4821_v32, 2  ;;  %v7091_v18 = vmov 0  }
 0x136   : > { %853 = vrot.lane.b32.xlu1 %v796_v59, %s3630_s11  ;;  %v4823_v55 = vpop.permute.xlu2 %929  ;;  %v334_v59 = vld [vmem:[%s3712_s7 + $0x118] sm:$0xff]  ;;  %v1812_v38 = vshll.u32 %v1808_v1, 16 }
 0x137   : > { %v372_v37 = vpack.c.bf16 %v334_v59, %v334_v59  ;;  %v726_v0 = vsel %vm695_vm4, %v723_v47, %v725_v2  ;;  %vm1829_vm5 = vcmp.lt.s32.totalorder %v4867_v62, 0 }
 0x138   : > { %v968_v49 = vpop.permute.xlu1 %967 }
 0x139   : > { %743 = vrot.lane.b32.xlu0 %v712_v20, %s3631_s12  ;;  %v1807_v20 = vmul.u32 52428, %v1803_v26 }
 0x13b   : > { %v962_v11 = vpop.permute.xlu0 %961  ;;  %v1810_v10 = vshll.u32 %v1807_v20, 16 }
 0x13c   : > { %1203 = vrot.lane.b32.xlu2 %v1172_v61, %s3632_s13  ;;  %v1392_v13 = vsel %vm7087_vm10, %v1359_v8, %v962_v11  ;;  %v1809_v61 = vmul.u32 52428, %v1804_v43  ;;  %v373_v8 = vpack.c.bf16 %v335_v42, %v335_v42  ;;  %v827_v42 = vrot.slane %v825_v60, 3 }
 0x13d   : > { %vm1814_vm15 = vc.u32 %v1806_v39, %v1810_v10  ;;  %v1425_v26 = vsel %vm7086_vm11, %v1392_v13, %v4743_v31  ;;  %v1816_v33 = vadd.s32 %v1810_v10, %v1806_v39  ;;  %v1365_v31 = vsel %vm1353_vm9, %v1332_v16, %v4709_v28 }
 0x13e   : > { %1138 = vrot.lane.b32.xlu1 %v1059_v4, %s3633_s14  ;;  %v4864_v51 = vpop.permute.xlu2 %1142  ;;  %v1815_v59 = vsel %vm1814_vm15, 1, %v7091_v18  ;;  %v1398_v53 = vsel %vm7087_vm10, %v1365_v31, %v968_v49  ;;  %v1811_v39 = vshrl.u32 %v1807_v20, 16  ;;  %v7182_v60 = vrot.slane %v3927_v5, 1 }
 0x13f   : > { %v1817_v43 = vadd.s32 %v1815_v59, %v1809_v61  ;;  %vm1818_vm6 = vc.u32 %v1816_v33, %v1812_v38  ;;  %v940_v38 = vunpack.c.l.b16 %v373_v8  ;;  %v1813_v33 = vshrl.u32 %v1808_v1, 16 }
 0x140   : > { %v1194_v11 = vpop.permute.xlu1 %1193  ;;  %v1819_v47 = vsel %vm1818_vm6, 1, %v7091_v18 }
 0x141   : > { %971 = vrot.lane.b32.xlu0 %v4631_v30, %s3634_s15  ;;  %v1458_v4 = vsel %vm7085_vm12, %v1425_v26, %v1194_v11  ;;  %v1830_v30 = vsub.s32 0, %v4867_v62  ;;  %v939_v26 = vunpack.c.l.b16 %v372_v37  ;;  %v1821_v11 = vadd.s32 %v1819_v47, %v1817_v43 }
 0x142   : > { %3395 = vmatmul.msk.bf16.gmra.mxu0 %vm7082_vm13, %v1458_v4  ;;  %v654_v37 = vsel %vm623_vm1, %v7182_v60, %v653_v35 }
 0x143   : > { %v1135_v13 = vpop.permute.xlu0 %1134  ;;  %v4893_v28 = vsel %vm1829_vm5, %v1830_v30, %v4867_v62  ;;  %v1822_v4 = vadd.s32 %v1821_v11, %v1811_v39  ;;  %v4911_v43 = vpack.c.b16 %v940_v38, %v939_v26 }
 0x144   : > { %v1431_v10 = vsel %vm7086_vm11, %v1398_v53, %v1135_v13  ;;  %757 = vrot.lane.b32.xlu2 %v726_v0, %s3631_s12  ;;  %v1832_v49 = vand.u32 65535, %v4893_v28  ;;  %v1833_v20 = vshrl.u32 %v4893_v28, 16 }
 0x145   : > { %v1464_v16 = vsel %vm7085_vm12, %v1431_v10, %v4766_v56  ;;  %v4908_v56 = vor.u32 %v827_v42, %v824_v27  ;;  %v1823_v1 = vadd.s32 %v1822_v4, %v1813_v33  ;;  %v812_v10 = vsel %vm761_vm2, %v4676_v57, %v4480_v19 }
 0x146   : > { %3398 = vmatmul.msk.bf16.gmra.mxu1 %vm7082_vm13, %v1464_v16  ;;  %751 = vrot.lane.b32.xlu1 %v720_v29, %s3631_s12  ;;  %v4906_v61 = vpop.permute.xlu2 %1213  ;;  %v1835_v8 = vmul.u32 52429, %v1832_v49  ;;  %v1836_v0 = vmul.u32 52428, %v1832_v49  ;;  %v1837_v59 = vmul.u32 52429, %v1833_v20  ;;  %v7183_v29 = vrot.slane %v3953_v50, 3 }
 0x147   : > { %v1838_v39 = vmul.u32 52428, %v1833_v20  ;;  %v829_v42 = vsel %vm761_vm2, %v4721_v41, %v4908_v56  ;;  %v4927_v50 = vpack.c.b16 %v4741_v22, %v4741_v22  ;;  %v1084_v41 = vshrl.u32 %v4730_v25, 16 }
 0x148   : > { %v754_v31 = vpop.permute.xlu1 %753  ;;  %v896_v30 = vsel %vm871_vm3, %v893_v23, %v7183_v29  ;;  %v1839_v53 = vshll.u32 %v1836_v0, 16  ;;  %v1841_v13 = vshll.u32 %v1837_v59, 16  ;;  %v1112_v23 = vshll.u32 %v4911_v43, 16 }
 0x149   : > { %685 = vrot.lane.b32.xlu0 %v654_v37, %s3628_s9  ;;  %v1824_v11 = vshrl.u32 %v1823_v1, 4  ;;  %v1840_v16 = vshrl.u32 %v1836_v0, 16  ;;  %v831_v22 = vshrl.u32 %v4927_v50, 16  ;;  %v834_v20 = vshll.u32 %v4927_v50, 16  ;;  %v7184_v1 = vld [vmem:[#allocation5_spill] sm:$0xff] }
 0x14a   : > { %vm1843_vm6 = vc.u32 %v1835_v8, %v1839_v53  ;;  %v1845_v47 = vadd.s32 %v1839_v53, %v1835_v8  ;;  %v901_v37 = vrot.slane %v4821_v32, 3  ;;  %v1110_v33 = vor.u32 %v1108_v52, %v4779_v48 }
 0x14b   : > { %v748_v27 = vpop.permute.xlu0 %747  ;;  %v1844_v26 = vsel %vm1843_vm6, 1, %v7091_v18  ;;  %v1842_v4 = vshrl.u32 %v1837_v59, 16  ;;  %v1737_v8 = vadd.s32 16, %v4799_v21  ;;  %v4943_v0 = vrot.slane %v1112_v23, 1  ;;  %v336_v23 = vld [vmem:[%s3712_s7 + $0x128] sm:$0x3] }
 0x14c   : > { %927 = vrot.lane.b32.xlu2 %v896_v30, %s3629_s10  ;;  %vm1847_vm15 = vc.u32 %v1845_v47, %v1841_v13  ;;  %v1846_v19 = vadd.s32 %v1844_v26, %v1838_v39  ;;  %v1086_v29 = vor.u32 %v1084_v41, %v4746_v9  ;;  %v1825_v30 = vmul.u32 20, %v1824_v11 }
 0x14d   : > { %v1848_v57 = vsel %vm1847_vm15, 1, %v7091_v18  ;;  %v655_v39 = vrot.slane %v7184_v1, 1  ;;  %v4949_v47 = vadd.s32 %v4806_v45, %v1737_v8  ;;  %v1743_v48 = vadd.s32 64, %v4799_v21 }
 0x14e   : > { %867 = vrot.lane.b32.xlu1 %v829_v42, %s3630_s11  ;;  %v4935_v49 = vpop.permute.xlu2 %845  ;;  %v1850_v60 = vadd.s32 %v1848_v57, %v1846_v19  ;;  %v1185_v42 = vrot.slane %v4911_v43, 1  ;;  %v833_v59 = vrot.slane %v831_v22, 2  ;;  %v1307_v9 = vsel %vm1287_vm7, %v4473_v46, %v748_v27 }
 0x14f   : > { %v902_v52 = vsel %vm871_vm3, %v899_v34, %v901_v37  ;;  %v1115_v41 = vsel %vm458_vm0, %v1110_v33, %v4943_v0  ;;  %v1091_v11 = vsel %vm458_vm0, %v1086_v29, %v4538_v36  ;;  %vm1858_vm6 = vcmp.lt.s32.totalorder %v4949_v47, 0 }
 0x150   : > { %v924_v38 = vpop.permute.xlu1 %923  ;;  %v1851_v53 = vadd.s32 %v1850_v60, %v1840_v16  ;;  %v1826_v16 = vsub.s32 %v4832_v44, %v1825_v30  ;;  %v4971_v46 = vsel %vm623_vm1, %v653_v35, %v655_v39  ;;  %v7185_v34 = vrot.slane %v4753_v3, 1 }
 0x151   : > { %861 = vrot.lane.b32.xlu0 %v812_v10, %s3630_s11  ;;  %v836_v10 = vrot.slane %v834_v20, 3  ;;  %v1859_v19 = vsub.s32 0, %v4949_v47  ;;  %v4982_v36 = vadd.s32 %v4806_v45, %v1743_v48  ;;  %v1313_v44 = vsel %vm1287_vm7, %v4520_v12, %v754_v31 }
 0x152   : > { %v1852_v26 = vadd.s32 %v1851_v53, %v1842_v4  ;;  %v4978_v27 = vsel %vm623_vm1, %v7185_v34, %v1185_v42  ;;  %v1340_v57 = vsel %vm1320_vm8, %v1307_v9, %v4790_v40  ;;  %v374_v20 = vpack.c.bf16 %v336_v23, %v336_v23 }
 0x153   : > { %v864_v13 = vpop.permute.xlu0 %863  ;;  %v837_v22 = vor.u32 %v836_v10, %v833_v59  ;;  %v7186_v60 = vrot.slane %v4508_v54, 1  ;;  %v7187_v33 = vrot.slane %v4730_v25, 1  ;;  %v4998_v12 = vsel %vm1858_vm6, %v1859_v19, %v4949_v47 }
 0x154   : > { %985 = vrot.lane.b32.xlu2 %v4753_v3, %s3634_s15  ;;  %v903_v3 = vrot.slane %v4927_v50, 3  ;;  %v1853_v8 = vshrl.u32 %v1852_v26, 4  ;;  %v1373_v40 = vsel %vm1353_vm9, %v1340_v57, %v924_v38  ;;  %v1827_v29 = vsub.s32 0, %v1826_v16 }
 0x155   : > { %v1180_v4 = vsel %vm623_vm1, %v7187_v33, %v7186_v60  ;;  %v1861_v30 = vand.u32 65535, %v4998_v12  ;;  %v1862_v53 = vshrl.u32 %v4998_v12, 16  ;;  %v1346_v54 = vsel %vm1320_vm8, %v1313_v44, %v864_v13 }
 0x156   : > { %979 = vrot.lane.b32.xlu1 %v4730_v25, %s3634_s15  ;;  %v5001_v31 = vpop.permute.xlu2 %917  ;;  %vm7080_vm15 = vcmp.lt.s32.totalorder %v4982_v36, 0  ;;  %v2033_v1 = vsub.s32 0, %v4982_v36  ;;  %v1738_v39 = vadd.s32 24, %v4799_v21  ;;  %v5012_v38 = vsel %vm761_vm2, %v4908_v56, %v837_v22 }
 0x157   : > { %v1864_v59 = vmul.u32 52429, %v1861_v30  ;;  %v1865_v10 = vmul.u32 52428, %v1861_v30  ;;  %v5016_v9 = vsel %vm871_vm3, %v901_v37, %v903_v3  ;;  %v990_v13 = vunpack.c.l.b16 %v374_v20 }
 0x158   : > { %v982_v35 = vpop.permute.xlu1 %981  ;;  %v1866_v23 = vmul.u32 52429, %v1862_v53  ;;  %v1379_v26 = vsel %vm1353_vm9, %v1346_v54, %v4823_v55  ;;  %v5023_v34 = vsel %vm1800_vm14, %v1827_v29, %v1826_v16  ;;  %v5028_v19 = vsel %vm7080_vm15, %v2033_v1, %v4982_v36 }
 0x159   : > { %933 = vrot.lane.b32.xlu0 %v902_v52, %s3629_s10  ;;  %v1854_v52 = vmul.u32 20, %v1853_v8  ;;  %v1868_v56 = vshll.u32 %v1865_v10, 16  ;;  %v727_v44 = vrot.slane %v4927_v50, 2  ;;  %v1867_v57 = vmul.u32 52428, %v1862_v53 }
 0x15a   : > { %v5034_v55 = vadd.s32 %v4806_v45, %v1738_v39  ;;  %v1870_v22 = vshll.u32 %v1866_v23, 16  ;;  %v2035_v20 = vand.u32 65535, %v5028_v19  ;;  %v1412_v3 = vsel %vm7087_vm10, %v1379_v26, %v982_v35 }
 0x15b   : > { %v976_v25 = vpop.permute.xlu0 %975  ;;  %vm1872_vm2 = vc.u32 %v1864_v59, %v1868_v56  ;;  %v1874_v16 = vadd.s32 %v1868_v56, %v1864_v59  ;;  %v728_v50 = vsel %vm695_vm4, %v725_v2, %v727_v44  ;;  %v1744_v8 = vadd.s32 72, %v4799_v21 }
 0x15c   : > { %v1406_v48 = vsel %vm7087_vm10, %v1373_v40, %v976_v25  ;;  %1211 = vrot.lane.b32.xlu2 %v1180_v4, %s3632_s13  ;;  %v1873_v33 = vsel %vm1872_vm2, 1, %v7091_v18  ;;  %v2036_v4 = vshrl.u32 %v5028_v19, 16  ;;  %v1869_v40 = vshrl.u32 %v1865_v10, 16 }
 0x15d   : > { %v1439_v37 = vsel %vm7086_vm11, %v1406_v48, %v4864_v51  ;;  %v1855_v51 = vsub.s32 %v4893_v28, %v1854_v52  ;;  %vm1876_vm3 = vc.u32 %v1874_v16, %v1870_v22  ;;  %vm7081_vm14 = vcmp.lt.s32.totalorder %v5034_v55, 0 }
 0x15e   : > { %1152 = vrot.lane.b32.xlu1 %v1115_v41, %s3633_s14  ;;  %v1877_v29 = vsel %vm1876_vm3, 1, %v7091_v18  ;;  %v5051_v28 = vpop.permute.xlu2 %1130  ;;  %v2038_v2 = vmul.u32 52429, %v2035_v20  ;;  %v5054_v30 = vmul.u32 52428, %v2035_v20  ;;  %v5056_v53 = vmul.u32 52429, %v2036_v4 }
 0x15f   : > { %v1871_v25 = vshrl.u32 %v1866_v23, 16  ;;  %v1888_v39 = vsub.s32 0, %v5034_v55  ;;  %v5064_v48 = vpack.c.b16 %v990_v13, %v990_v13  ;;  %v1856_v59 = vsub.s32 0, %v1855_v51 }
 0x160   : > { %v1208_v41 = vpop.permute.xlu1 %1207  ;;  %v2042_v10 = vshll.u32 %v5054_v30, 16  ;;  %v2044_v52 = vshll.u32 %v5056_v53, 16  ;;  %v2041_v56 = vmul.u32 52428, %v2036_v4  ;;  %v5074_v23 = vadd.s32 %v4806_v45, %v1744_v8 }
 0x161   : > { %1146 = vrot.lane.b32.xlu0 %v1091_v11, %s3633_s14  ;;  %v1472_v60 = vsel %vm7085_vm12, %v1439_v37, %v1208_v41  ;;  %v1875_v11 = vadd.s32 %v1873_v33, %v1867_v57  ;;  %vm2728_vm2 = vcmp.ne.s32.totalorder %v5023_v34, 0  ;;  %vm2760_vm3 = vcmp.lt.s32.totalorder %v5023_v34, 0 }
 0x162   : > { %3402 = vmatmul.msk.bf16.gmra.mxu2 %vm7082_vm13, %v1472_v60  ;;  %vm2046_vm4 = vc.u32 %v2038_v2, %v2042_v10  ;;  %v5087_v22 = vsel %vm1829_vm5, %v1856_v59, %v1855_v51 }
 0x163   : > { %v1149_v35 = vpop.permute.xlu0 %1148  ;;  %v1879_v1 = vadd.s32 %v1877_v29, %v1875_v11  ;;  %v2047_v41 = vsel %vm2046_vm4, 1, %v7091_v18  ;;  %v1187_v11 = vrot.slane %v5064_v48, 1  ;;  %vm2729_vm5 = vcmp.ne.s32.totalorder %v5087_v22, 0 }
 0x164   : > { %v1445_v32 = vsel %vm7086_vm11, %v1412_v3, %v1149_v35  ;;  %759 = vrot.lane.b32.xlu2 %v728_v50, %s3631_s12  ;;  %v2049_v60 = vadd.s32 %v2047_v41, %v2041_v56  ;;  %v1116_v35 = vshrl.u32 %v4911_v43, 16  ;;  %vm2761_vm4 = vcmp.lt.s32.totalorder %v5087_v22, 0 }
 0x165   : > { %v1478_v54 = vsel %vm7085_vm12, %v1445_v32, %v4906_v61  ;;  %v1880_v26 = vadd.s32 %v1879_v1, %v1869_v40  ;;  %v5071_v61 = vsel %vm7081_vm14, %v1888_v39, %v5034_v55  ;;  %vm7083_vm14 = vcmp.lt.s32.totalorder %v5074_v23, 0 }
 0x166   : > { %3405 = vmatmul.msk.bf16.vlgmr.msra.gmra.mxu3 %vm7082_vm13, %v1478_v54  ;;  %687 = vrot.lane.b32.xlu1 %v4971_v46, %s3628_s9  ;;  %v2048_v46 = vadd.s32 %v2042_v10, %v2038_v2  ;;  %v1890_v13 = vand.u32 65535, %v5071_v61  ;;  %v1891_v44 = vshrl.u32 %v5071_v61, 16  ;;  %v1120_v40 = vshll.u32 %v5064_v48, 16  ;;  %v5105_v32 = vpop.permute.xlu2 %1201 }
 0x167   : > { %v1881_v57 = vadd.s32 %v1880_v26, %v1871_v25  ;;  %v2043_v54 = vshrl.u32 %v5054_v30, 16  ;;  %v2825_v56 = vadd.s32 20, %v5087_v22 }
 0x168   : > { %v5076_v37 = vpop.permute.xlu1 %741  ;;  %vm2050_vm15 = vc.u32 %v2048_v46, %v2044_v52  ;;  %v1893_v16 = vmul.u32 52429, %v1890_v13  ;;  %v1894_v20 = vmul.u32 52428, %v1890_v13  ;;  %v5089_v50 = vmul.u32 52429, %v1891_v44 }
 0x169   : > { %1217 = vrot.lane.b32.xlu0 %v4978_v27, %s3632_s13  ;;  %v2062_v27 = vsub.s32 0, %v5074_v23  ;;  %v1882_v33 = vshrl.u32 %v1881_v57, 4  ;;  %v2051_v4 = vsel %vm2050_vm15, 1, %v7091_v18  ;;  %v1896_v51 = vmul.u32 52428, %v1891_v44 }
 0x16a   : > { %v1897_v8 = vshll.u32 %v1894_v20, 16  ;;  %v1899_v29 = vshll.u32 %v5089_v50, 16  ;;  %v2053_v25 = vadd.s32 %v2051_v4, %v2049_v60  ;;  %v1118_v52 = vor.u32 %v1116_v35, %v4943_v0 }
 0x16b   : > { %v736_v3 = vpop.permute.xlu0 %735  ;;  %v5112_v39 = vsel %vm7083_vm14, %v2062_v27, %v5074_v23  ;;  %v1883_v59 = vmul.u32 20, %v1882_v33  ;;  %v1122_v26 = vrot.slane %v1120_v40, 1  ;;  %vm5138_vm14 = vmand %vm2761_vm4, %vm2729_vm5  ;;  %v1898_v13 = vshrl.u32 %v1894_v20, 16  ;;  %v5156_v20 = vld [vmem:[%s7008_s2] ss:$0 sm:$0xff] }
 0x16c   : > { %987 = vrot.lane.b32.xlu2 %v4911_v43, %s3634_s15  ;;  %vm1901_vm15 = vc.u32 %v1893_v16, %v1897_v8  ;;  %v1903_v2 = vadd.s32 %v1897_v8, %v1893_v16  ;;  %v2064_v57 = vand.u32 65535, %v5112_v39  ;;  %v1188_v0 = vsel %vm623_vm1, %v1185_v42, %v1187_v11 }
 0x16d   : > { %v1902_v1 = vsel %vm1901_vm15, 1, %v7091_v18  ;;  %vm5127_vm15 = vmand %vm2760_vm3, %vm2728_vm2  ;;  %v2045_v16 = vshrl.u32 %v5056_v53, 16  ;;  %v2054_v60 = vadd.s32 %v2053_v25, %v2043_v54  ;;  %v1884_v33 = vsub.s32 %v4998_v12, %v1883_v59 }
 0x16e   : > { %935 = vrot.lane.b32.xlu1 %v5016_v9, %s3629_s10  ;;  %v2824_v9 = vadd.s32 20, %v5023_v34  ;;  %v1904_v10 = vadd.s32 %v1902_v1, %v1896_v51  ;;  %vm1905_vm13 = vc.u32 %v1903_v2, %v1899_v29  ;;  %v1900_v4 = vshrl.u32 %v5089_v50, 16 }
 0x16f   : > { %v1906_v46 = vsel %vm1905_vm13, 1, %v7091_v18  ;;  %v1123_v42 = vsel %vm458_vm0, %v1118_v52, %v1122_v26  ;;  %v2857_v53 = vsel %vm5138_vm14, %v2825_v56, %v5087_v22  ;;  %v1295_v12 = vsel %vm1287_vm7, %v4382_v63, %v736_v3  ;;  %v5181_v22 = vpop.permute.xlu2 %859 }
 0x170   : > { %v912_v48 = vpop.permute.xlu1 %911  ;;  %v1908_v44 = vadd.s32 %v1906_v46, %v1904_v10  ;;  %v2856_v43 = vsel %vm5127_vm15, %v2824_v9, %v5023_v34  ;;  %v2065_v51 = vshrl.u32 %v5112_v39, 16  ;;  %v5170_v8 = vmul.u32 52428, %v2064_v57 }
 0x171   : > { %869 = vrot.lane.b32.xlu0 %v5012_v38, %s3630_s11  ;;  %s3360_s11 = sshll.u32 %s7423_s22, 6  ;;  %vm2920_vm1 = vcmp.lt.s32.totalorder %v4811_v14, 260  ;;  %v5173_v34 = vadd.s32 %v2054_v60, %v2045_v16  ;;  %vm5175_vm0 = vcmp.lt.s32.totalorder %v2856_v43, 18  ;;  %v1885_v63 = vsub.s32 0, %v1884_v33 }
 0x172   : > { %v1909_v50 = vadd.s32 %v1908_v44, %v1898_v13  ;;  %s5179_s12 = sadd.s32 %s3360_s11, %s7425_s27  ;;  %v1751_v11 = vadd.s32 128, %v4799_v21  ;;  %v1328_v29 = vsel %vm1320_vm8, %v1295_v12, %v4935_v49  ;;  %vm5188_vm13 = vcmp.lt.s32.totalorder %v2857_v53, 18  ;;  %vm5204_vm2 = vmand %vm5175_vm0, %vm2920_vm1  ;;  %s295_s27 = scalar_lea.vmem %s7012_s6, %s3363_s19 }
 0x173   : > { %v852_v41 = vpop.permute.xlu0 %851  ;;  %vm2921_vm14 = vcmp.lt.s32.totalorder %v4867_v62, 260  ;;  %v2067_v1 = vmul.u32 52429, %v2064_v57  ;;  %v5193_v9 = vmul.u32 52429, %v2065_v51  ;;  %v2071_v59 = vshll.u32 %v5170_v8, 16 }
 0x174   : > { %v1590_v27 = vpop.f32.mrf.mxu0  ;;  %v1910_v3 = vadd.s32 %v1909_v50, %v1900_v4  ;;  %v1301_v49 = vsel %vm1287_vm7, %v4428_v58, %v5076_v37  ;;  %v1361_v10 = vsel %vm1353_vm9, %v1328_v29, %v912_v48  ;;  %v2056_v52 = vshrl.u32 %v5173_v34, 4  ;;  %vm5214_vm3 = vmand %vm5188_vm13, %vm2921_vm14 }
 0x175   : > { %v1591_v2 = vadd.f32 %v5156_v20, %v1590_v27  ;;  %v1752_v26 = vadd.s32 136, %v4799_v21  ;;  %v1334_v56 = vsel %vm1320_vm8, %v1301_v49, %v852_v41  ;;  %v1886_v14 = vsel %vm1858_vm6, %v1885_v63, %v1884_v33 }
 0x176   : > { %1219 = vrot.lane.b32.xlu1 %v1188_v0, %s3632_s13  ;;  %v1911_v25 = vshrl.u32 %v1910_v3, 4  ;;  %s3361_s13 = sshll.u32 %s5179_s12, 2  ;;  %v2070_v37 = vmul.u32 52428, %v2065_v51  ;;  %v5221_v48 = vadd.s32 %v4806_v45, %v1751_v11  ;;  %v2073_v0 = vshll.u32 %v5193_v9, 16 }
 0x177   : > { %v3118_v38 = vmul.f32 %v1591_v2, %v1591_v2  ;;  %v3048_v41 = vsel %vm5204_vm2, %v1591_v2, 0.0  ;;  %s5230_s28 = scalar_lea.vmem %s7011_s5, %s3361_s13  ;;  %vm5233_vm6 = vc.u32 %v2067_v1, %v2071_v59  ;;  %v2077_v60 = vadd.s32 %v2071_v59, %v2067_v1  ;;  %v5259_v11 = vpop.permute.xlu2 %931 }
 0x178   : > { %v970_v40 = vpop.permute.xlu1 %969  ;;  %v1912_v57 = vmul.u32 20, %v1911_v25  ;;  %v5240_v43 = vadd.s32 %v4806_v45, %v1752_v26  ;;  %vm2730_vm5 = vcmp.ne.s32.totalorder %v1886_v14, 0  ;;  %v2265_v63 = vsub.s32 0, %v5221_v48 }
 0x179   : > { %1154 = vrot.lane.b32.xlu0 %v1123_v42, %s3633_s14  ;;  %v3150_v51 = vsel %vm5204_vm2, %v3118_v38, 0.0  ;;  %vm7203_vm4 = vcmask 883712   ;;  %vm2264_vm15 = vcmp.lt.s32.totalorder %v5221_v48, 0  ;;  %vm2762_vm1 = vcmp.lt.s32.totalorder %v1886_v14, 0 }
 0x17a   : > { %v1913_v50 = vsub.s32 %v5071_v61, %v1912_v57  ;;  %v2076_v61 = vsel %vm5233_vm6, 1, %v7091_v18  ;;  %vm2079_vm0 = vc.u32 %v2077_v60, %v2073_v0  ;;  %v2294_v54 = vsub.s32 0, %v5240_v43  ;;  %vm7204_vm14 = vmmov %vm7203_vm4 }
 0x17b   : > { %v964_v62 = vpop.permute.xlu0 %963  ;;  %vm2293_vm13 = vcmp.lt.s32.totalorder %v5240_v43, 0  ;;  %v2826_v59 = vadd.s32 20, %v1886_v14  ;;  %v2078_v49 = vadd.s32 %v2076_v61, %v2070_v37  ;;  %vm5278_vm2 = vmand %vm2762_vm1, %vm2730_vm5  ;;  %v2080_v30 = vsel %vm2079_vm0, 1, %v7091_v18 }
 0x17c   : > { %v1592_v46 = vpop.f32.mrf.mxu0  ;;  %v1394_v13 = vsel %vm7087_vm10, %v1361_v10, %v964_v62  ;;  %v1914_v25 = vsub.s32 0, %v1913_v50  ;;  %v5274_v10 = vsel %vm2264_vm15, %v2265_v63, %v5221_v48  ;;  %v2057_v62 = vmul.u32 20, %v2056_v52 }
 0x17d   : > { %v1593_v44 = vadd.f32 %v5156_v20, %v1592_v46  ;;  %v1427_v42 = vsel %vm7086_vm11, %v1394_v13, %v5051_v28  ;;  %v1367_v28 = vsel %vm1353_vm9, %v1334_v56, %v5001_v31  ;;  %v2267_v46 = vand.u32 65535, %v5274_v10 }
 0x17e   : > { %v1400_v29 = vsel %vm7087_vm10, %v1367_v28, %v970_v40  ;;  %v1739_v58 = vadd.s32 32, %v4799_v21  ;;  %v2858_v37 = vsel %vm5278_vm2, %v2826_v59, %v1886_v14  ;;  %v2072_v38 = vshrl.u32 %v5170_v8, 16 }
 0x17f   : > { %v3421_v27 = vpack.c.bf16 %v1593_v44, %v1591_v2  ;;  %v3049_v33 = vsel %vm5214_vm3, %v1593_v44, 0.0  ;;  %v3119_v4 = vmul.f32 %v1593_v44, %v1593_v44  ;;  %v2082_v13 = vadd.s32 %v2080_v30, %v2078_v49  ;;  %v5299_v0 = vpop.permute.xlu2 %1144 }
 0x180   : > { %v5244_v53 = vadd.f32 %v3049_v33, %v3048_v41  ;;  %v1196_v12 = vpop.permute.xlu1 %1195  ;;  %v2058_v57 = vsub.s32 %v5028_v19, %v2057_v62  ;;  %v2268_v41 = vshrl.u32 %v5274_v10, 16  ;;  %vm2922_vm1 = vcmp.lt.s32.totalorder %v4949_v47, 260 }
 0x181   : > { %3422 = vst [vmem:[%s5230_s28] sm:$0xff] %v3421_v27   ;;  %v3151_v34 = vsel %vm5214_vm3, %v3119_v4, 0.0  ;;  %v1460_v35 = vsel %vm7085_vm12, %v1427_v42, %v1196_v12  ;;  %vm7207_vm3 = vcmp.lt.s32.totalorder %v5034_v55, 0  ;;  %v5301_v16 = vmul.u32 52428, %v2267_v46 }
 0x182   : > { %v5256_v3 = vadd.f32 %v3151_v34, %v3150_v51  ;;  %3396 = vmatmul.msk.bf16.gmra.mxu0 %vm7203_vm4, %v1460_v35  ;;  %v1915_v56 = vsel %vm7207_vm3, %v1914_v25, %v1913_v50  ;;  %vm2890_vm4 = vcmp.lt.s32.totalorder %v2858_v37, 18  ;;  %v5304_v14 = vadd.s32 %v4806_v45, %v1739_v58 }
 0x183   : > { %v1137_v2 = vpop.permute.xlu0 %1136  ;;  %vm2731_vm6 = vcmp.ne.s32.totalorder %v1915_v56, 0  ;;  %vm2763_vm5 = vcmp.lt.s32.totalorder %v1915_v56, 0  ;;  %v2827_v8 = vadd.s32 20, %v1915_v56  ;;  %v2074_v60 = vshrl.u32 %v5193_v9, 16 }
 0x184   : > { %v1433_v31 = vsel %vm7086_vm11, %v1400_v29, %v1137_v2  ;;  %v2083_v27 = vadd.s32 %v2082_v13, %v2072_v38  ;;  %vm5307_vm0 = vmand %vm2763_vm5, %vm2731_vm6  ;;  %v2059_v42 = vsub.s32 0, %v2058_v57  ;;  %v5317_v12 = vmul.u32 52429, %v2268_v41 }
 0x185   : > { %v1466_v1 = vsel %vm7085_vm12, %v1433_v31, %v5105_v32  ;;  %v5286_v32 = vsel %vm2293_vm13, %v2294_v54, %v5240_v43  ;;  %v2270_v34 = vmul.u32 52429, %v2267_v46  ;;  %v2274_v9 = vshll.u32 %v5301_v16, 16 }
 0x186   : > { %3399 = vmatmul.msk.bf16.gmra.mxu1 %vm7204_vm14, %v1466_v1  ;;  %v2296_v52 = vand.u32 65535, %v5286_v32  ;;  %vm5313_vm14 = vmand %vm2890_vm4, %vm2922_vm1  ;;  %vm1916_vm2 = vcmp.lt.s32.totalorder %v5304_v14, 0  ;;  %v2859_v35 = vsel %vm5307_vm0, %v2827_v8, %v1915_v56  ;;  %v2084_v63 = vadd.s32 %v2083_v27, %v2074_v60 }
 0x187   : > { %v2297_v28 = vshrl.u32 %v5286_v32, 16  ;;  %v1917_v61 = vsub.s32 0, %v5304_v14  ;;  %vm2923_vm3 = vcmp.lt.s32.totalorder %v5034_v55, 260  ;;  %v2276_v49 = vshll.u32 %v5317_v12, 16 }
 0x188   : > { %v756_v26 = vpop.permute.xlu1 %755  ;;  %v5311_v33 = vmul.u32 52428, %v2296_v52  ;;  %v2299_v54 = vmul.u32 52429, %v2296_v52  ;;  %vm2891_vm6 = vcmp.lt.s32.totalorder %v2859_v35, 18  ;;  %vm5339_vm5 = vc.u32 %v2270_v34, %v2274_v9  ;;  %v5353_v52 = vpop.permute.xlu2 %1215 }
 0x189   : > { %v5335_v40 = vsel %vm1916_vm2, %v1917_v61, %v5304_v14  ;;  %v5346_v58 = vmul.u32 52429, %v2297_v28  ;;  %vm7214_vm4 = vcmp.lt.s32.totalorder %v4982_v36, 0  ;;  %v2085_v13 = vshrl.u32 %v2084_v63, 4  ;;  %vm5359_vm0 = vmand %vm2891_vm6, %vm2923_vm3 }
 0x18a   : > { %v2303_v31 = vshll.u32 %v5311_v33, 16  ;;  %v1919_v37 = vand.u32 65535, %v5335_v40  ;;  %v5351_v38 = vsel %vm7214_vm4, %v2059_v42, %v2058_v57  ;;  %v2273_v8 = vmul.u32 52428, %v2268_v41 }
 0x18b   : > { %v750_v44 = vpop.permute.xlu0 %749  ;;  %v1315_v60 = vsel %vm1287_vm7, %v4372_v6, %v756_v26  ;;  %v2279_v6 = vsel %vm5339_vm5, 1, %v7091_v18  ;;  %v2302_v26 = vmul.u32 52428, %v2297_v28  ;;  %v2305_v47 = vshll.u32 %v5346_v58, 16 }
 0x18c   : > { %v1309_v56 = vsel %vm1287_vm7, %v4342_v15, %v750_v44  ;;  %vm2307_vm1 = vc.u32 %v2299_v54, %v2303_v31  ;;  %v1920_v44 = vshrl.u32 %v5335_v40, 16  ;;  %v5365_v57 = vmul.u32 52428, %v1919_v37 }
 0x18d   : > { %v1342_v41 = vsel %vm1320_vm8, %v1309_v56, %v5181_v22  ;;  %v2308_v42 = vsel %vm2307_vm1, 1, %v7091_v18  ;;  %v1745_v56 = vadd.s32 80, %v4799_v21  ;;  %vm7219_vm5 = vcmask 883712  }
 0x18e   : > { %v1926_v28 = vshll.u32 %v5365_v57, 16 }
 0x18f   : > { %v1595_v4 = vpop.f32.mrf.mxu0 }
 0x190   : > { %v1596_v50 = vadd.f32 %v5156_v20, %v1595_v4  ;;  %v926_v51 = vpop.permute.xlu1 %925 }
 0x191   : > { %v1375_v22 = vsel %vm1353_vm9, %v1342_v41, %v926_v51 }
 0x192   : > { %v3050_v29 = vsel %vm5313_vm14, %v1596_v50, 0.0  ;;  %v3120_v2 = vmul.f32 %v1596_v50, %v1596_v50 }
 0x193   : > { %v3081_v25 = vadd.f32 %v5244_v53, %v3050_v29  ;;  %v1610_v1 = vpop.f32.mrf.mxu1  ;;  %v866_v59 = vpop.permute.xlu0 %865  ;;  %v2280_v53 = vadd.s32 %v2274_v9, %v2270_v34  ;;  %v2309_v34 = vadd.s32 %v2303_v31, %v2299_v54 }
 0x194   : > { %v3152_v30 = vsel %vm5313_vm14, %v3120_v2, 0.0  ;;  %v5386_v62 = vadd.f32 %v5156_v20, %v1610_v1  ;;  %v1348_v54 = vsel %vm1320_vm8, %v1315_v60, %v866_v59  ;;  %v2281_v59 = vadd.s32 %v2279_v6, %v2273_v8 }
 0x195   : > { %v3183_v46 = vadd.f32 %v5256_v3, %v3152_v30  ;;  %v2275_v3 = vshrl.u32 %v5301_v16, 16  ;;  %vm5373_vm14 = vc.u32 %v2280_v53, %v2276_v49  ;;  %v1922_v49 = vmul.u32 52429, %v1919_v37 }
 0x196   : > { %v1924_v30 = vmul.u32 52429, %v1920_v44  ;;  %v1925_v53 = vmul.u32 52428, %v1920_v44  ;;  %v2086_v37 = vmul.u32 20, %v2085_v13  ;;  %vm2311_vm3 = vc.u32 %v2309_v34, %v2305_v47 }
 0x197   : > { %v1597_v27 = vpop.f32.mrf.mxu0  ;;  %v2283_v60 = vsel %vm5373_vm14, 1, %v7091_v18  ;;  %vm1930_vm6 = vc.u32 %v1922_v49, %v1926_v28  ;;  %v1932_v8 = vadd.s32 %v1926_v28, %v1922_v49  ;;  %v2312_v55 = vsel %vm2311_vm3, 1, %v7091_v18 }
 0x198   : > { %v1598_v19 = vadd.f32 %v5156_v20, %v1597_v27  ;;  %v984_v4 = vpop.permute.xlu1 %983  ;;  %v2310_v27 = vadd.s32 %v2308_v42, %v2302_v26  ;;  %v1928_v15 = vshll.u32 %v1924_v30, 16  ;;  %v1931_v13 = vsel %vm1930_vm6, 1, %v7091_v18 }
 0x199   : > { %v1933_v26 = vadd.s32 %v1931_v13, %v1925_v53  ;;  %v5415_v47 = vadd.s32 %v4806_v45, %v1745_v56  ;;  %v1740_v42 = vadd.s32 40, %v4799_v21  ;;  %v2285_v49 = vadd.s32 %v2283_v60, %v2281_v59 }
 0x19a   : > { %v3426_v9 = vpack.c.bf16 %v1598_v19, %v1596_v50  ;;  %v3051_v35 = vsel %vm5359_vm0, %v1598_v19, 0.0  ;;  %v3121_v63 = vmul.f32 %v1598_v19, %v1598_v19  ;;  %v5409_v19 = vpop.permute.xlu2 %919  ;;  %vm1934_vm4 = vc.u32 %v1932_v8, %v1928_v15 }
 0x19b   : > { %v5382_v61 = vadd.f32 %v3081_v25, %v3051_v35  ;;  %v1612_v29 = vpop.f32.mrf.mxu1  ;;  %v978_v2 = vpop.permute.xlu0 %977  ;;  %vm2090_vm1 = vcmp.lt.s32.totalorder %v5415_v47, 0  ;;  %v1746_v35 = vadd.s32 88, %v4799_v21  ;;  %v2304_v28 = vshrl.u32 %v5311_v33, 16 }
 0x19c   : > { %3498 = vst [vmem:[%s5230_s28 + $0x8] sm:$0xff] %v3426_v9   ;;  %v3153_v50 = vsel %vm5359_vm0, %v3121_v63, 0.0  ;;  %v5393_v51 = vadd.f32 %v5156_v20, %v1612_v29  ;;  %v1408_v25 = vsel %vm7087_vm10, %v1375_v22, %v978_v2  ;;  %v1935_v22 = vsel %vm1934_vm4, 1, %v7091_v18  ;;  %vm7220_vm0 = vmmov %vm7219_vm5 }
 0x19d   : > { %v5395_v31 = vadd.f32 %v3183_v46, %v3153_v50  ;;  %v1381_v46 = vsel %vm1353_vm9, %v1348_v54, %v5259_v11  ;;  %v1441_v44 = vsel %vm7086_vm11, %v1408_v25, %v5299_v0  ;;  %v1927_v0 = vshrl.u32 %v5365_v57, 16 }
 0x19e   : > { %v3441_v1 = vpack.c.bf16 %v5393_v51, %v5386_v62  ;;  %v1414_v11 = vsel %vm7087_vm10, %v1381_v46, %v984_v4  ;;  %v2091_v9 = vsub.s32 0, %v5415_v47  ;;  %v1929_v29 = vshrl.u32 %v1924_v30, 16 }
 0x19f   : > { %v1937_v4 = vadd.s32 %v1935_v22, %v1933_v26  ;;  %v5427_v2 = vadd.s32 %v4806_v45, %v1740_v42  ;;  %v2314_v50 = vadd.s32 %v2312_v55, %v2310_v27  ;;  %v5441_v56 = vadd.s32 %v4806_v45, %v1746_v35 }
 0x1a0   : > { %3501 = vst [vmem:[%s5230_s28 + $0x20] sm:$0xff] %v3441_v1   ;;  %v1210_v41 = vpop.permute.xlu1 %1209  ;;  %v5435_v54 = vsel %vm2090_vm1, %v2091_v9, %v5415_v47  ;;  %vm2736_vm14 = vcmp.ne.s32.totalorder %v5351_v38, 0  ;;  %v5445_v33 = vsub.s32 %v5112_v39, %v2086_v37  ;;  %v2306_v39 = vshrl.u32 %v5346_v58, 16 }
 0x1a1   : > { %v1474_v6 = vsel %vm7085_vm12, %v1441_v44, %v1210_v41  ;;  %v1938_v25 = vadd.s32 %v1937_v4, %v1927_v0  ;;  %v2093_v30 = vand.u32 65535, %v5435_v54  ;;  %v2094_v53 = vshrl.u32 %v5435_v54, 16 }
 0x1a2   : > { %3403 = vmatmul.msk.bf16.gmra.mxu2 %vm7219_vm5, %v1474_v6  ;;  %v1946_v60 = vsub.s32 0, %v5427_v2  ;;  %vm1945_vm3 = vcmp.lt.s32.totalorder %v5427_v2, 0  ;;  %v2286_v41 = vadd.s32 %v2285_v49, %v2275_v3  ;;  %v2315_v37 = vadd.s32 %v2314_v50, %v2304_v28  ;;  %v1204_v13 = vpop.permute.xlu2 %1203 }
 0x1a3   : > { %v1151_v34 = vpop.permute.xlu0 %1150  ;;  %v1939_v59 = vadd.s32 %v1938_v25, %v1929_v29  ;;  %v2096_v27 = vmul.u32 52429, %v2093_v30  ;;  %v5449_v15 = vmul.u32 52428, %v2093_v30  ;;  %v5451_v46 = vmul.u32 52429, %v2094_v53 }
 0x1a4   : > { %v1447_v63 = vsel %vm7086_vm11, %v1414_v11, %v1151_v34  ;;  %v2099_v6 = vmul.u32 52428, %v2094_v53  ;;  %vm7084_vm6 = vcmp.lt.s32.totalorder %v5441_v56, 0  ;;  %v2120_v26 = vsub.s32 0, %v5441_v56  ;;  %v7221_v11 = vld [vmem:[#allocation11_spill] sm:$0xff] }
 0x1a5   : > { %v1480_v57 = vsel %vm7085_vm12, %v1447_v63, %v5353_v52  ;;  %v2277_v52 = vshrl.u32 %v5317_v12, 16  ;;  %v1940_v12 = vshrl.u32 %v1939_v59, 4  ;;  %v2100_v55 = vshll.u32 %v5449_v15, 16 }
 0x1a6   : > { %3406 = vmatmul.msk.bf16.gmra.mxu3 %vm7220_vm0, %v1480_v57  ;;  %v2102_v16 = vshll.u32 %v5451_v46, 16  ;;  %v5466_v58 = vsel %vm1945_vm3, %v1946_v60, %v5427_v2  ;;  %vm2768_vm5 = vcmp.lt.s32.totalorder %v5351_v38, 0  ;;  %v5470_v3 = vadd.s32 20, %v5351_v38 }
 0x1a7   : > { %v1941_v42 = vmul.u32 20, %v1940_v12  ;;  %v2088_v34 = vsub.s32 0, %v5445_v33  ;;  %vm2104_vm4 = vc.u32 %v2096_v27, %v2100_v55  ;;  %v2287_v22 = vadd.s32 %v2286_v41, %v2277_v52 }
 0x1a8   : > { %v854_v1 = vpop.permute.xlu1 %853  ;;  %v2105_v35 = vsel %vm2104_vm4, 1, %v7091_v18  ;;  %v2106_v63 = vadd.s32 %v2100_v55, %v2096_v27  ;;  %v1948_v4 = vand.u32 65535, %v5466_v58  ;;  %v1949_v57 = vshrl.u32 %v5466_v58, 16  ;;  %vm5501_vm4 = vmand %vm2768_vm5, %vm2736_vm14 }
 0x1a9   : > { %v1942_v9 = vsub.s32 %v5335_v40, %v1941_v42  ;;  %v5481_v49 = vsel %vm7084_vm6, %v2120_v26, %v5441_v56  ;;  %v2316_v28 = vadd.s32 %v2315_v37, %v2306_v39  ;;  %v2107_v30 = vadd.s32 %v2105_v35, %v2099_v6 }
 0x1aa   : > { %v1630_v44 = vpop.f32.mrf.mxu2  ;;  %vm2108_vm0 = vc.u32 %v2106_v63, %v2102_v16  ;;  %v2101_v53 = vshrl.u32 %v5449_v15, 16  ;;  %v5494_v41 = vmul.u32 52429, %v1949_v57  ;;  %v2122_v39 = vand.u32 65535, %v5481_v49 }
 0x1ab   : > { %v744_v8 = vpop.permute.xlu0 %743  ;;  %v1943_v25 = vsub.s32 0, %v1942_v9  ;;  %v5484_v40 = vadd.f32 %v5156_v20, %v1630_v44  ;;  %v2109_v52 = vsel %vm2108_vm0, 1, %v7091_v18  ;;  %v1951_v37 = vmul.u32 52429, %v1948_v4 }
 0x1ac   : > { %v1303_v0 = vsel %vm1287_vm7, %v7221_v11, %v744_v8  ;;  %v5509_v8 = vpop.permute.xlu2 %757  ;;  %v2111_v55 = vadd.s32 %v2109_v52, %v2107_v30  ;;  %v1954_v16 = vmul.u32 52428, %v1949_v57  ;;  %v2864_v35 = vsel %vm5501_vm4, %v5470_v3, %v5351_v38 }
 0x1ad   : > { %v1336_v29 = vsel %vm1320_vm8, %v1303_v0, %v854_v1  ;;  %7222 = vst [vmem:[#allocation10_spill] sm:$0xff] %v5484_v40  ;;  %v5488_v1 = vmul.u32 52428, %v1948_v4  ;;  %v1944_v27 = vsel %vm1916_vm2, %v1943_v25, %v1942_v9  ;;  %v2123_v9 = vshrl.u32 %v5481_v49, 16 }
 0x1ae   : > { %v1369_v59 = vsel %vm1353_vm9, %v1336_v29, %v5409_v19  ;;  %vm2732_vm0 = vcmp.ne.s32.totalorder %v1944_v27, 0  ;;  %vm2764_vm6 = vcmp.lt.s32.totalorder %v1944_v27, 0  ;;  %v2828_v6 = vadd.s32 20, %v1944_v27 }
 0x1af   : > { %v1955_v26 = vshll.u32 %v5488_v1, 16  ;;  %vm5515_vm2 = vmand %vm2764_vm6, %vm2732_vm0  ;;  %v2288_v63 = vshrl.u32 %v2287_v22, 4  ;;  %v1957_v4 = vshll.u32 %v5494_v41, 16  ;;  %vm7228_vm14 = vcmp.lt.s32.totalorder %v5074_v23, 0 }
 0x1b0   : > { %v1139_v50 = vpop.permute.xlu1 %1138  ;;  %v2317_v25 = vshrl.u32 %v2316_v28, 4  ;;  %vm7229_vm6 = vcmask 883712   ;;  %v2103_v57 = vshrl.u32 %v5451_v46, 16  ;;  %vm2928_vm0 = vcmp.lt.s32.totalorder %v4982_v36, 260 }
 0x1b1   : > { %vm1959_vm5 = vc.u32 %v1951_v37, %v1955_v26  ;;  %v2112_v3 = vadd.s32 %v2111_v55, %v2101_v53  ;;  %v1961_v30 = vadd.s32 %v1955_v26, %v1951_v37  ;;  %v5540_v52 = vmul.u32 52428, %v2122_v39 }
 0x1b2   : > { %v1632_v60 = vpop.f32.mrf.mxu2  ;;  %v1960_v22 = vsel %vm1959_vm5, 1, %v7091_v18  ;;  %v5542_v28 = vmul.u32 52429, %v2123_v9  ;;  %vm2924_vm4 = vcmp.lt.s32.totalorder %v5304_v14, 260  ;;  %v1956_v46 = vshrl.u32 %v5488_v1, 16  ;;  %v7236_v14 = vld [vmem:[#allocation7_spill] sm:$0xff] }
 0x1b3   : > { %v5506_v44 = vadd.f32 %v5156_v20, %v1632_v60  ;;  %v972_v19 = vpop.permute.xlu0 %971  ;;  %v2318_v60 = vmul.u32 20, %v2317_v25  ;;  %v2113_v37 = vadd.s32 %v2112_v3, %v2103_v57  ;;  %v2128_v55 = vmul.u32 52428, %v2123_v9 }
 0x1b4   : > { %v1402_v12 = vsel %vm7087_vm10, %v1369_v59, %v972_v19  ;;  %v2289_v59 = vmul.u32 20, %v2288_v63  ;;  %v2131_v19 = vshll.u32 %v5542_v28, 16  ;;  %v1753_v26 = vadd.s32 144, %v4799_v21 }
 0x1b5   : > { %7225 = vst [vmem:[#allocation3_spill] sm:$0xff] %v5506_v44  ;;  %v3461_v11 = vpack.c.bf16 %v5506_v44, %v5484_v40  ;;  %v1435_v0 = vsel %vm7086_vm11, %v1402_v12, %v1139_v50  ;;  %v5529_v50 = vsel %vm7228_vm14, %v2088_v34, %v5445_v33  ;;  %v1962_v33 = vadd.s32 %v1960_v22, %v1954_v16 }
 0x1b6   : > { %v1468_v29 = vsel %vm7085_vm12, %v1435_v0, %v1204_v13  ;;  %v2860_v13 = vsel %vm5515_vm2, %v2828_v6, %v1944_v27  ;;  %v2125_v34 = vmul.u32 52429, %v2122_v39  ;;  %vm1963_vm14 = vc.u32 %v1961_v30, %v1957_v4 }
 0x1b7   : > { %3505 = vst [vmem:[%s5230_s28 + $0x40] sm:$0xff] %v3461_v11   ;;  %3400 = vmatmul.msk.bf16.gmra.mxu1 %vm7229_vm6, %v1468_v29  ;;  %v1964_v53 = vsel %vm1963_vm14, 1, %v7091_v18  ;;  %v2129_v27 = vshll.u32 %v5540_v52, 16  ;;  %vm5551_vm2 = vcmp.lt.s32.totalorder %v2860_v13, 18  ;;  %v1958_v12 = vshrl.u32 %v5494_v41, 16  ;;  %v5559_v11 = vpop.permute.xlu2 %927 }
 0x1b8   : > { %v5535_v38 = vpop.permute.xlu1 %751  ;;  %v1966_v6 = vadd.s32 %v1964_v53, %v1962_v33  ;;  %vm2737_vm5 = vcmp.ne.s32.totalorder %v5529_v50, 0  ;;  %vm2769_vm14 = vcmp.lt.s32.totalorder %v5529_v50, 0  ;;  %vm5562_vm12 = vcmp.lt.s32.totalorder %v2864_v35, 18  ;;  %vm5573_vm11 = vmand %vm5551_vm2, %vm2924_vm4 }
 0x1b9   : > { %vm2133_vm6 = vc.u32 %v2125_v34, %v2129_v27  ;;  %v2135_v1 = vadd.s32 %v2129_v27, %v2125_v34  ;;  %v5567_v41 = vadd.s32 20, %v5529_v50  ;;  %v5578_v29 = vadd.s32 %v4806_v45, %v1753_v26  ;;  %vm5597_vm2 = vmand %vm2769_vm14, %vm2737_vm5 }
 0x1ba   : > { %v1967_v0 = vadd.s32 %v1966_v6, %v1956_v46  ;;  %v2134_v42 = vsel %vm2133_vm6, 1, %v7091_v18  ;;  %v2290_v35 = vsub.s32 %v5274_v10, %v2289_v59  ;;  %v2319_v4 = vsub.s32 %v5286_v32, %v2318_v60 }
 0x1bb   : > { %v5546_v15 = vpop.permute.xlu0 %685  ;;  %vm2137_vm10 = vc.u32 %v2135_v1, %v2131_v19  ;;  %vm7237_vm6 = vcmask 97280   ;;  %v2114_v32 = vshrl.u32 %v2113_v37, 4  ;;  %v2136_v30 = vadd.s32 %v2134_v42, %v2128_v55 }
 0x1bc   : > { %v1968_v13 = vadd.s32 %v1967_v0, %v1958_v12  ;;  %v1251_v3 = vsel %vm7237_vm6, %v3927_v5, %v7236_v14  ;;  %vm7238_vm4 = vmmov %vm7237_vm6  ;;  %v2138_v59 = vsel %vm2137_vm10, 1, %v7091_v18  ;;  %vm7088_vm5 = vcmp.lt.s32.totalorder %v5578_v29, 0 }
 0x1bd   : > { %v5591_v22 = vsel %vm7238_vm4, %v7166_v24, %v4359_v17  ;;  %vm5608_vm6 = vmand %vm5562_vm12, %vm2928_vm0  ;;  %v2323_v53 = vsub.s32 0, %v5578_v29  ;;  %v1759_v27 = vadd.s32 192, %v4799_v21  ;;  %v2865_v36 = vsel %vm5597_vm2, %v5567_v41, %v5529_v50 }
 0x1be   : > { %v1969_v5 = vshrl.u32 %v1968_v13, 4  ;;  %v2291_v19 = vsub.s32 0, %v2290_v35  ;;  %v2320_v39 = vsub.s32 0, %v2319_v4  ;;  %v2130_v6 = vshrl.u32 %v5540_v52, 16 }
 0x1bf   : > { %v1600_v9 = vpop.f32.mrf.mxu0  ;;  %v2140_v55 = vadd.s32 %v2138_v59, %v2136_v30  ;;  %v5633_v26 = vmul.f32 %v5386_v62, %v5386_v62  ;;  %v2115_v50 = vmul.u32 20, %v2114_v32  ;;  %v5638_v0 = vsel %vm7088_vm5, %v2323_v53, %v5578_v29  ;;  %v5656_v14 = vpop.permute.xlu2 %985 }
 0x1c0   : > { %v1601_v25 = vadd.f32 %v5156_v20, %v1600_v9  ;;  %v5583_v57 = vpop.permute.xlu1 %867  ;;  %v1970_v12 = vmul.u32 20, %v1969_v5  ;;  %v2325_v52 = vand.u32 65535, %v5638_v0  ;;  %v2326_v16 = vshrl.u32 %v5638_v0, 16 }
 0x1c1   : > { %v5644_v41 = vadd.s32 %v4806_v45, %v1759_v27  ;;  %v5648_v9 = vsel %vm2264_vm15, %v2291_v19, %v2290_v35  ;;  %v5652_v63 = vsel %vm2293_vm13, %v2320_v39, %v2319_v4  ;;  %vm2925_vm10 = vcmp.lt.s32.totalorder %v5427_v2, 260 }
 0x1c2   : > { %v3052_v33 = vsel %vm5573_vm11, %v1601_v25, 0.0  ;;  %v3122_v34 = vmul.f32 %v1601_v25, %v1601_v25  ;;  %v1971_v42 = vsub.s32 %v5466_v58, %v1970_v12  ;;  %v2132_v30 = vshrl.u32 %v5542_v28, 16 }
 0x1c3   : > { %v5613_v24 = vadd.f32 %v5382_v61, %v3052_v33  ;;  %v1615_v46 = vpop.f32.mrf.mxu1  ;;  %v862_v60 = vpop.permute.xlu0 %861  ;;  %v2141_v35 = vadd.s32 %v2140_v55, %v2130_v6  ;;  %v2116_v4 = vsub.s32 %v5435_v54, %v2115_v50  ;;  %v5665_v5 = vmul.u32 52428, %v2325_v52 }
 0x1c4   : > { %v3154_v37 = vsel %vm5573_vm11, %v3122_v34, 0.0  ;;  %vm7243_vm11 = vcmask 195584   ;;  %v1972_v32 = vsub.s32 0, %v1971_v42  ;;  %v5662_v33 = vadd.f32 %v5156_v20, %v1615_v46 }
 0x1c5   : > { %v5625_v61 = vadd.f32 %v5395_v31, %v3154_v37  ;;  %v1284_v10 = vsel %vm7243_vm11, %v1251_v3, %v5546_v15  ;;  %v2328_v15 = vmul.u32 52429, %v2325_v52  ;;  %v5671_v3 = vmul.u32 52429, %v2326_v16 }
 0x1c6   : > { %v1973_v59 = vsel %vm1945_vm3, %v1972_v32, %v1971_v42  ;;  %v2497_v28 = vsub.s32 0, %v5644_v41  ;;  %vm5674_vm12 = vcmp.lt.s32.totalorder %v2865_v36, 18  ;;  %vm2929_vm15 = vcmp.lt.s32.totalorder %v5074_v23, 260 }
 0x1c7   : > { %v1602_v31 = vpop.f32.mrf.mxu0  ;;  %vm2733_vm13 = vcmp.ne.s32.totalorder %v1973_v59, 0  ;;  %vm2765_vm0 = vcmp.lt.s32.totalorder %v1973_v59, 0  ;;  %v2829_v54 = vadd.s32 20, %v1973_v59  ;;  %vm2744_vm3 = vcmp.ne.s32.totalorder %v5648_v9, 0 }
 0x1c8   : > { %v1603_v13 = vadd.f32 %v5156_v20, %v1602_v31  ;;  %v980_v58 = vpop.permute.xlu1 %979  ;;  %vm2776_vm14 = vcmp.lt.s32.totalorder %v5648_v9, 0  ;;  %vm2797_vm4 = vmand %vm2765_vm0, %vm2733_vm13  ;;  %v2142_v36 = vadd.s32 %v2141_v35, %v2132_v30  ;;  %v2332_v39 = vshll.u32 %v5665_v5, 16 }
 0x1c9   : > { %vm7090_vm2 = vcmp.lt.s32.totalorder %v5644_v41, 0  ;;  %vm2745_vm11 = vcmp.ne.s32.totalorder %v5652_v63, 0  ;;  %v1311_v37 = vsel %vm1287_vm7, %v4533_v7, %v5535_v38  ;;  %v2861_v12 = vsel %vm2797_vm4, %v2829_v54, %v1973_v59 }
 0x1ca   : > { %v3431_v34 = vpack.c.bf16 %v1603_v13, %v1601_v25  ;;  %v3123_v46 = vmul.f32 %v1603_v13, %v1603_v13  ;;  %v1317_v55 = vsel %vm1287_vm7, %v1284_v10, %v5509_v8  ;;  %v1344_v50 = vsel %vm1320_vm8, %v1311_v37, %v862_v60 }
 0x1cb   : > { %v1617_v53 = vpop.f32.mrf.mxu1  ;;  %v5669_v27 = vpop.permute.xlu0 %933  ;;  %vm2893_vm13 = vcmp.lt.s32.totalorder %v2861_v12, 18  ;;  %v2334_v31 = vshll.u32 %v5671_v3, 16  ;;  %v2331_v52 = vmul.u32 52428, %v2326_v16  ;;  %vm2336_vm5 = vc.u32 %v2328_v15, %v2332_v39 }
 0x1cc   : > { %3499 = vst [vmem:[%s5230_s28 + $0x10] sm:$0xff] %v3431_v34   ;;  %v5681_v25 = vadd.f32 %v5156_v20, %v1617_v53  ;;  %v2117_v20 = vsub.s32 0, %v2116_v4  ;;  %vm2957_vm0 = vmand %vm2893_vm13, %vm2925_vm10  ;;  %v2338_v7 = vadd.s32 %v2332_v39, %v2328_v15  ;;  %v5703_v38 = vsel %vm7090_vm2, %v2497_v28, %v5644_v41  ;;  %v1212_v34 = vpop.permute.xlu2 %1211 }
 0x1cd   : > { %v3053_v32 = vsel %vm2957_vm0, %v1603_v13, 0.0  ;;  %v3155_v8 = vsel %vm2957_vm0, %v3123_v46, 0.0  ;;  %v2143_v10 = vshrl.u32 %v2142_v36, 4  ;;  %v1754_v60 = vadd.s32 152, %v4799_v21 }
 0x1ce   : > { %v3446_v6 = vpack.c.bf16 %v5681_v25, %v5662_v33  ;;  %v5708_v30 = vsel %vm2090_vm1, %v2117_v20, %v2116_v4  ;;  %v1377_v2 = vsel %vm1353_vm9, %v1344_v50, %v5559_v11  ;;  %v5713_v16 = vadd.f32 %v5613_v24, %v3053_v32 }
 0x1cf   : > { %v5716_v35 = vadd.f32 %v5625_v61, %v3155_v8  ;;  %vm7246_vm10 = vcmask 588800   ;;  %v2337_v53 = vsel %vm2336_vm5, 1, %v7091_v18  ;;  %vm2340_vm4 = vc.u32 %v2338_v7, %v2334_v31 }
 0x1d0   : > { %3502 = vst [vmem:[%s5230_s28 + $0x28] sm:$0xff] %v3446_v6   ;;  %v1153_v42 = vpop.permute.xlu1 %1152  ;;  %v1410_v13 = vsel %vm7246_vm10, %v1377_v2, %v980_v58  ;;  %v2499_v15 = vand.u32 65535, %v5703_v38  ;;  %vm7247_vm1 = vcmask 687104   ;;  %v2333_v28 = vshrl.u32 %v5665_v5, 16  ;;  %vm5740_vm10 = vmand %vm5674_vm12, %vm2929_vm15 }
 0x1d1   : > { %v2339_v11 = vadd.s32 %v2337_v53, %v2331_v52  ;;  %v2341_v24 = vsel %vm2340_vm4, 1, %v7091_v18  ;;  %v2144_v54 = vmul.u32 20, %v2143_v10  ;;  %vm7248_vm13 = vcmask 785408   ;;  %vm5754_vm4 = vmand %vm2776_vm14, %vm2744_vm3 }
 0x1d2   : > { %v2500_v46 = vshrl.u32 %v5703_v38, 16  ;;  %v5726_v36 = vmul.u32 52428, %v2499_v15  ;;  %vm2777_vm0 = vcmp.lt.s32.totalorder %v5652_v63, 0  ;;  %v1350_v58 = vsel %vm1320_vm8, %v1317_v55, %v5583_v57 }
 0x1d3   : > { %v1147_v59 = vpop.permute.xlu0 %1146  ;;  %vm7249_vm5 = vcmask 883712   ;;  %v2335_v39 = vshrl.u32 %v5671_v3, 16  ;;  %v2343_v5 = vadd.s32 %v2341_v24, %v2339_v11  ;;  %v2840_v12 = vadd.s32 20, %v5648_v9 }
 0x1d4   : > { %v1443_v4 = vsel %vm7247_vm1, %v1410_v13, %v1147_v59  ;;  %v1383_v57 = vsel %vm1353_vm9, %v1350_v58, %v5669_v27  ;;  %v5748_v3 = vadd.s32 %v4806_v45, %v1754_v60  ;;  %vm2936_vm12 = vcmp.lt.s32.totalorder %v5221_v48, 260  ;;  %v760_v11 = vpop.permute.xlu2 %759 }
 0x1d5   : > { %v1476_v61 = vsel %vm7248_vm13, %v1443_v4, %v1212_v34  ;;  %v2841_v19 = vadd.s32 20, %v5652_v63  ;;  %vm2738_vm15 = vcmp.ne.s32.totalorder %v5708_v30, 0  ;;  %vm2770_vm1 = vcmp.lt.s32.totalorder %v5708_v30, 0  ;;  %vm5766_vm13 = vmand %vm2777_vm0, %vm2745_vm11 }
 0x1d6   : > { %3404 = vmatmul.msk.bf16.gmra.mxu2 %vm7249_vm5, %v1476_v61  ;;  %v2344_v6 = vadd.s32 %v2343_v5, %v2333_v28  ;;  %v2145_v50 = vsub.s32 %v5481_v49, %v2144_v54  ;;  %v2502_v31 = vmul.u32 52429, %v2499_v15  ;;  %v5771_v52 = vmul.u32 52429, %v2500_v46  ;;  %vm5795_vm0 = vmand %vm2770_vm1, %vm2738_vm15 }
 0x1d7   : > { %v2506_v7 = vshll.u32 %v5726_v36, 16  ;;  %vm2937_vm3 = vcmp.lt.s32.totalorder %v5240_v43, 260  ;;  %vm7256_vm14 = vcmask 588800   ;;  %vm7089_vm5 = vcmp.lt.s32.totalorder %v5748_v3, 0 }
 0x1d8   : > { %v688_v27 = vpop.permute.xlu1 %687  ;;  %v1416_v32 = vsel %vm7256_vm14, %v1383_v57, %v5656_v14  ;;  %v2345_v8 = vadd.s32 %v2344_v6, %v2335_v39  ;;  %v1760_v10 = vadd.s32 200, %v4799_v21  ;;  %v2872_v60 = vsel %vm5754_vm4, %v2840_v12, %v5648_v9 }
 0x1d9   : > { %v2834_v49 = vadd.s32 20, %v5708_v30  ;;  %vm7257_vm11 = vcmask 687104   ;;  %v2352_v13 = vsub.s32 0, %v5748_v3  ;;  %v2873_v59 = vsel %vm5766_vm13, %v2841_v19, %v5652_v63 }
 0x1da   : > { %v1449_v2 = vsel %vm7257_vm11, %v1416_v32, %v1153_v42  ;;  %vm7260_vm4 = vcmask 785408   ;;  %v2346_v53 = vshrl.u32 %v2345_v8, 4  ;;  %v2146_v15 = vsub.s32 0, %v2145_v50 }
 0x1db   : > { %v1218_v34 = vpop.permute.xlu0 %1217  ;;  %vm7261_vm14 = vcmask 883712   ;;  %v2508_v4 = vshll.u32 %v5771_v52, 16  ;;  %vm5802_vm11 = vc.u32 %v2502_v31, %v2506_v7  ;;  %v5809_v63 = vsel %vm7089_vm5, %v2352_v13, %v5748_v3 }
 0x1dc   : > { %v1482_v42 = vsel %vm7260_vm4, %v1449_v2, %v1218_v34  ;;  %v2347_v24 = vmul.u32 20, %v2346_v53  ;;  %v2512_v54 = vadd.s32 %v2506_v7, %v2502_v31  ;;  %v2354_v61 = vand.u32 65535, %v5809_v63 }
 0x1dd   : > { %3407 = vmatmul.msk.bf16.gmra.mxu3 %vm7261_vm14, %v1482_v42  ;;  %v5813_v58 = vadd.s32 %v4806_v45, %v1760_v10  ;;  %v5817_v39 = vmul.f32 %v5393_v51, %v5393_v51  ;;  %vm5819_vm15 = vcmp.lt.s32.totalorder %v2872_v60, 18  ;;  %v2866_v12 = vsel %vm5795_vm0, %v2834_v49, %v5708_v30 }
 0x1de   : > { %v2355_v57 = vshrl.u32 %v5809_v63, 16  ;;  %vm5827_vm1 = vcmp.lt.s32.totalorder %v2873_v59, 18  ;;  %vm2930_vm13 = vcmp.lt.s32.totalorder %v5415_v47, 260  ;;  %v2505_v6 = vmul.u32 52428, %v2500_v46 }
 0x1df   : > { %v5832_v55 = vmul.u32 52428, %v2354_v61  ;;  %v5836_v31 = vmul.f32 %v5484_v40, %v5484_v40  ;;  %vm7269_vm4 = vcmp.lt.s32.totalorder %v5441_v56, 0  ;;  %vm7270_vm0 = vcmask 195584  }
 0x1e0   : > { %v936_v19 = vpop.permute.xlu1 %935  ;;  %v5840_v7 = vsel %vm7269_vm4, %v2146_v15, %v2145_v50  ;;  %v1286_v30 = vsel %vm7270_vm0, %v5591_v22, %v688_v27  ;;  %v2511_v32 = vsel %vm5802_vm11, 1, %v7091_v18  ;;  %vm5847_vm14 = vcmp.lt.s32.totalorder %v2866_v12, 18  ;;  %vm5861_vm4 = vmand %vm5819_vm15, %vm2936_vm12 }
 0x1e1   : > { %7268 = vst [vmem:[#allocation4_spill] sm:$0xff] %v5836_v31  ;;  %v2348_v46 = vsub.s32 %v5638_v0, %v2347_v24  ;;  %vm5852_vm5 = vc.u32 %v2512_v54, %v2508_v4  ;;  %v2526_v50 = vsub.s32 0, %v5813_v58  ;;  %v7275_v22 = vmov 0  ;;  %vm5879_vm12 = vmand %vm5827_vm1, %vm2937_vm3 }
 0x1e2   : > { %v7276_v22 = vsel %vm5861_vm4, 4294967295, %v7275_v22  ;;  %v2357_v60 = vmul.u32 52429, %v2354_v61  ;;  %v5865_v49 = vmul.u32 52429, %v2355_v57  ;;  %v2361_v0 = vshll.u32 %v5832_v55, 16 }
 0x1e3   : > { %7277 = vst [vmem:[#allocation2_spill] sm:$0xff] %v7276_v22  ;;  %v870_v27 = vpop.permute.xlu0 %869  ;;  %vm7103_vm11 = vcmp.lt.s32.totalorder %v5813_v58, 0  ;;  %vm2739_vm0 = vcmp.ne.s32.totalorder %v5840_v7, 0  ;;  %vm2771_vm2 = vcmp.lt.s32.totalorder %v5840_v7, 0  ;;  %v1319_v48 = vsel %vm1287_vm7, %v1286_v30, %v760_v11  ;;  %vm5898_vm7 = vmand %vm5847_vm14, %vm2930_vm13 }
 0x1e4   : > { %v2513_v2 = vadd.s32 %v2511_v32, %v2505_v6  ;;  %v7278_v13 = vmov 0  ;;  %v5885_v59 = vmul.f32 %v5506_v44, %v5506_v44  ;;  %v1352_v9 = vsel %vm1320_vm8, %v1319_v48, %v870_v27  ;;  %vm5915_vm8 = vmand %vm2771_vm2, %vm2739_vm0  ;;  %v988_v6 = vpop.permute.xlu2 %987 }
 0x1e5   : > { %v7279_v13 = vsel %vm5879_vm12, 4294967295, %v7278_v13  ;;  %v1635_v42 = vpop.f32.mrf.mxu2  ;;  %v2515_v53 = vsel %vm5852_vm5, 1, %v7091_v18  ;;  %v2835_v4 = vadd.s32 20, %v5840_v7  ;;  %v2349_v28 = vsub.s32 0, %v2348_v46 }
 0x1e6   : > { %7280 = vst [vmem:[#allocation8_spill] sm:$0xff] %v7279_v13  ;;  %v5906_v11 = vsel %vm7103_vm11, %v2526_v50, %v5813_v58  ;;  %v2363_v54 = vshll.u32 %v5865_v49, 16  ;;  %vm5920_vm3 = vc.u32 %v2357_v60, %v2361_v0  ;;  %v2367_v5 = vadd.s32 %v2361_v0, %v2357_v60 }
 0x1e7   : > { %7281 = vst [vmem:[#allocation6_spill] sm:$0xff] %v5885_v59  ;;  %v1385_v23 = vsel %vm1353_vm9, %v1352_v9, %v936_v19  ;;  %v2507_v30 = vshrl.u32 %v5726_v36, 16  ;;  %v2517_v32 = vadd.s32 %v2515_v53, %v2513_v2  ;;  %v2360_v27 = vmul.u32 52428, %v2355_v57 }
 0x1e8   : > { %v2528_v60 = vand.u32 65535, %v5906_v11  ;;  %v5938_v0 = vmul.f32 %v5662_v33, %v5662_v33  ;;  %v2867_v36 = vsel %vm5915_vm8, %v2835_v4, %v5840_v7  ;;  %vm2931_vm9 = vcmp.lt.s32.totalorder %v5441_v56, 260  ;;  %v1220_v48 = vpop.permute.xlu1 %1219 }
 0x1e9   : > { %v1650_v50 = vpop.f32.mrf.mxu3  ;;  %vm7288_vm2 = vcmp.lt.s32.totalorder %v5578_v29, 0  ;;  %v2366_v57 = vsel %vm5920_vm3, 1, %v7091_v18  ;;  %vm7289_vm5 = vcmask 588800   ;;  %vm5952_vm15 = vc.u32 %v2367_v5, %v2363_v54 }
 0x1ea   : > { %v5946_v19 = vsel %vm7288_vm2, %v2349_v28, %v2348_v46  ;;  %v1418_v2 = vsel %vm7289_vm5, %v1385_v23, %v988_v6  ;;  %v1741_v7 = vadd.s32 48, %v4799_v21  ;;  %v1747_v4 = vadd.s32 96, %v4799_v21  ;;  %v5968_v6 = vld [vmem:[%s7008_s2] ss:$0 sm:$0xff] }
 0x1eb   : > { %v1155_v9 = vpop.permute.xlu0 %1154  ;;  %v2509_v47 = vshrl.u32 %v5771_v52, 16  ;;  %v2518_v46 = vadd.s32 %v2517_v32, %v2507_v30  ;;  %vm7292_vm1 = vcmask 687104   ;;  %v2529_v8 = vshrl.u32 %v5906_v11, 16 }
 0x1ec   : > { %v1451_v28 = vsel %vm7292_vm1, %v1418_v2, %v1155_v9  ;;  %vm2746_vm13 = vcmp.ne.s32.totalorder %v5946_v19, 0  ;;  %vm7293_vm14 = vcmask 785408   ;;  %v2368_v54 = vadd.s32 %v2366_v57, %v2360_v27 }
 0x1ed   : > { %v1484_v61 = vsel %vm7293_vm14, %v1451_v28, %v1220_v48  ;;  %v1637_v23 = vpop.f32.mrf.mxu2  ;;  %v5963_v5 = vmul.u32 52428, %v2528_v60  ;;  %v5971_v52 = vadd.f32 %v5968_v6, %v1635_v42  ;;  %vm2778_vm0 = vcmp.lt.s32.totalorder %v5946_v19, 0 }
 0x1ee   : > { %vm7294_vm8 = vcmask 883712   ;;  %v5976_v30 = vadd.f32 %v5968_v6, %v1637_v23  ;;  %v2370_v32 = vsel %vm5952_vm15, 1, %v7091_v18  ;;  %vm5984_vm3 = vcmp.lt.s32.totalorder %v2867_v36, 18  ;;  %vm6000_vm2 = vmand %vm2778_vm0, %vm2746_vm13 }
 0x1ef   : > { %3408 = vmatmul.msk.bf16.gmra.mxu3 %vm7294_vm8, %v1484_v61  ;;  %v5989_v42 = vadd.s32 %v4806_v45, %v1741_v7  ;;  %v5992_v57 = vadd.s32 %v4806_v45, %v1747_v4  ;;  %v2842_v2 = vadd.s32 20, %v5946_v19  ;;  %v2519_v9 = vadd.s32 %v2518_v46, %v2509_v47  ;;  %vm6037_vm1 = vmand %vm5984_vm3, %vm2931_vm9 }
 0x1f0   : > { %v3466_v53 = vpack.c.bf16 %v5976_v30, %v5971_v52  ;;  %v2362_v28 = vshrl.u32 %v5832_v55, 16  ;;  %v2372_v61 = vadd.s32 %v2370_v32, %v2368_v54  ;;  %v2531_v23 = vmul.u32 52429, %v2528_v60 }
 0x1f1   : > { %v1652_v7 = vpop.f32.mrf.mxu3  ;;  %vm1974_vm5 = vcmp.lt.s32.totalorder %v5989_v42, 0  ;;  %v1975_v4 = vsub.s32 0, %v5989_v42  ;;  %v6007_v47 = vadd.f32 %v5968_v6, %v1650_v50  ;;  %v6013_v55 = vmul.u32 52429, %v2529_v8 }
 0x1f2   : > { %3506 = vst [vmem:[%s5230_s28 + $0x48] sm:$0xff] %v3466_v53   ;;  %v6011_v46 = vadd.f32 %v5968_v6, %v1652_v7  ;;  %v2535_v12 = vshll.u32 %v5963_v5, 16  ;;  %v6018_v54 = vmul.f32 %v5681_v25, %v5681_v25  ;;  %vm2148_vm15 = vcmp.lt.s32.totalorder %v5992_v57, 0 }
 0x1f3   : > { %v6023_v60 = vsel %vm1974_vm5, %v1975_v4, %v5989_v42  ;;  %v2149_v50 = vsub.s32 0, %v5992_v57  ;;  %v2874_v32 = vsel %vm6000_vm2, %v2842_v2, %v5946_v19  ;;  %v2520_v53 = vshrl.u32 %v2519_v9, 4 }
 0x1f4   : > { %7299 = vst [vmem:[#allocation9_spill] sm:$0xff] %v6011_v46  ;;  %v2364_v7 = vshrl.u32 %v5865_v49, 16  ;;  %v3481_v24 = vpack.c.bf16 %v6011_v46, %v6007_v47  ;;  %vm2938_vm13 = vcmp.lt.s32.totalorder %v5578_v29, 260  ;;  %v2373_v43 = vadd.s32 %v2372_v61, %v2362_v28 }
 0x1f5   : > { %v1977_v36 = vand.u32 65535, %v6023_v60  ;;  %v1978_v19 = vshrl.u32 %v6023_v60, 16  ;;  %v6047_v49 = vsel %vm2148_vm15, %v2149_v50, %v5992_v57  ;;  %v2537_v56 = vshll.u32 %v6013_v55, 16 }
 0x1f6   : > { %3509 = vst [vmem:[%s5230_s28 + $0x60] sm:$0xff] %v3481_v24   ;;  %vm6051_vm14 = vc.u32 %v2531_v23, %v2535_v12  ;;  %v2541_v2 = vadd.s32 %v2535_v12, %v2531_v23  ;;  %v2151_v9 = vand.u32 65535, %v6047_v49  ;;  %v2152_v10 = vshrl.u32 %v6047_v49, 16 }
 0x1f7   : > { %v1980_v28 = vmul.u32 52429, %v1977_v36  ;;  %v1981_v61 = vmul.u32 52428, %v1977_v36  ;;  %v1982_v27 = vmul.u32 52429, %v1978_v19  ;;  %vm6060_vm9 = vcmp.lt.s32.totalorder %v2874_v32, 18 }
 0x1f8   : > { %v2521_v34 = vmul.u32 20, %v2520_v53  ;;  %v1742_v14 = vadd.s32 56, %v4799_v21  ;;  %v2534_v37 = vmul.u32 52428, %v2529_v8  ;;  %v1983_v12 = vmul.u32 52428, %v1978_v19 }
 0x1f9   : > { %v1984_v23 = vshll.u32 %v1981_v61, 16  ;;  %v2155_v1 = vmul.u32 52428, %v2151_v9  ;;  %v2374_v18 = vadd.s32 %v2373_v43, %v2364_v7  ;;  %v7306_v36 = vmov 0  }
 0x1fa   : > { %v2540_v46 = vsel %vm6051_vm14, 1, %v7306_v36  ;;  %vm6068_vm0 = vc.u32 %v2541_v2, %v2537_v56  ;;  %v1986_v32 = vshll.u32 %v1982_v27, 16  ;;  %v2154_v44 = vmul.u32 52429, %v2151_v9  ;;  %vm6091_vm14 = vmand %vm6060_vm9, %vm2938_vm13 }
 0x1fb   : > { %vm1988_vm8 = vc.u32 %v1980_v28, %v1984_v23  ;;  %v1990_v50 = vadd.s32 %v1984_v23, %v1980_v28  ;;  %v2156_v53 = vmul.u32 52429, %v2152_v10  ;;  %v6074_v8 = vmul.f32 %v5971_v52, %v5971_v52 }
 0x1fc   : > { %v1985_v19 = vshrl.u32 %v1981_v61, 16  ;;  %v1989_v43 = vsel %vm1988_vm8, 1, %v7306_v36  ;;  %v6078_v7 = vadd.s32 %v4806_v45, %v1742_v14  ;;  %v2157_v56 = vmul.u32 52428, %v2152_v10 }
 0x1fd   : > { %7309 = vst [vmem:[#allocation5_spill] sm:$0xff] %v6074_v8  ;;  %v1991_v48 = vadd.s32 %v1989_v43, %v1983_v12  ;;  %vm1992_vm3 = vc.u32 %v1990_v50, %v1986_v32  ;;  %v2158_v2 = vshll.u32 %v2155_v1, 16  ;;  %v2375_v13 = vshrl.u32 %v2374_v18, 4 }
 0x1fe   : > { %v2542_v31 = vadd.s32 %v2540_v46, %v2534_v37  ;;  %v2544_v9 = vsel %vm6068_vm0, 1, %v7306_v36  ;;  %v1993_v28 = vsel %vm1992_vm3, 1, %v7306_v36  ;;  %v1987_v40 = vshrl.u32 %v1982_v27, 16 }
 0x1ff   : > { %v1605_v23 = vpop.f32.mrf.mxu0  ;;  %v1995_v61 = vadd.s32 %v1993_v28, %v1991_v48  ;;  %v2160_v22 = vshll.u32 %v2156_v53, 16  ;;  %vm2162_vm2 = vc.u32 %v2154_v44, %v2158_v2  ;;  %v6096_v37 = vsub.s32 %v5703_v38, %v2521_v34 }
 0x200   : > { %v2163_v59 = vsel %vm2162_vm2, 1, %v7306_v36  ;;  %v2164_v10 = vadd.s32 %v2158_v2, %v2154_v44  ;;  %v2536_v27 = vshrl.u32 %v5963_v5, 16  ;;  %vm2003_vm0 = vcmp.lt.s32.totalorder %v6078_v7, 0 }
 0x201   : > { %v1996_v46 = vadd.s32 %v1995_v61, %v1985_v19  ;;  %v2165_v50 = vadd.s32 %v2163_v59, %v2157_v56  ;;  %v2376_v12 = vmul.u32 20, %v2375_v13  ;;  %v2546_v29 = vadd.s32 %v2544_v9, %v2542_v31 }
 0x202   : > { %vm2166_vm8 = vc.u32 %v2164_v10, %v2160_v22  ;;  %v2004_v24 = vsub.s32 0, %v6078_v7  ;;  %v2159_v5 = vshrl.u32 %v2155_v1, 16  ;;  %v2523_v19 = vsub.s32 0, %v6096_v37 }
 0x203   : > { %v1997_v44 = vadd.s32 %v1996_v46, %v1987_v40  ;;  %v1620_v34 = vpop.f32.mrf.mxu1  ;;  %v6110_v43 = vadd.f32 %v5968_v6, %v1605_v23  ;;  %v2167_v31 = vsel %vm2166_vm8, 1, %v7306_v36  ;;  %v2161_v48 = vshrl.u32 %v2156_v53, 16 }
 0x204   : > { %v6116_v22 = vsel %vm2003_vm0, %v2004_v24, %v6078_v7  ;;  %v2169_v56 = vadd.s32 %v2167_v31, %v2165_v50  ;;  %v6120_v40 = vsub.s32 %v5809_v63, %v2376_v12  ;;  %v2538_v1 = vshrl.u32 %v6013_v55, 16 }
 0x205   : > { %v1998_v13 = vshrl.u32 %v1997_v44, 4  ;;  %v2006_v2 = vand.u32 65535, %v6116_v22  ;;  %v2547_v9 = vadd.s32 %v2546_v29, %v2536_v27  ;;  %v2007_v28 = vshrl.u32 %v6116_v22, 16 }
 0x206   : > { %vm2926_vm13 = vcmp.lt.s32.totalorder %v5989_v42, 260  ;;  %v2170_v61 = vadd.s32 %v2169_v56, %v2159_v5  ;;  %v3124_v53 = vmul.f32 %v6110_v43, %v6110_v43  ;;  %v1748_v55 = vadd.s32 104, %v4799_v21 }
 0x207   : > { %v1999_v23 = vmul.u32 20, %v1998_v13  ;;  %v1607_v59 = vpop.f32.mrf.mxu0  ;;  %v2009_v10 = vmul.u32 52429, %v2006_v2  ;;  %v2010_v46 = vmul.u32 52428, %v2006_v2  ;;  %v2011_v63 = vmul.u32 52429, %v2007_v28 }
 0x208   : > { %v6128_v50 = vadd.f32 %v5968_v6, %v1607_v59  ;;  %v2171_v12 = vadd.s32 %v2170_v61, %v2161_v48  ;;  %v2012_v29 = vmul.u32 52428, %v2007_v28  ;;  %v6133_v44 = vadd.f32 %v5968_v6, %v1620_v34 }
 0x209   : > { %v2000_v27 = vsub.s32 %v6023_v60, %v1999_v23  ;;  %v2013_v24 = vshll.u32 %v2010_v46, 16  ;;  %v2014_v31 = vshrl.u32 %v2010_v46, 16  ;;  %v2015_v13 = vshll.u32 %v2011_v63, 16 }
 0x20a   : > { %v3436_v5 = vpack.c.bf16 %v6128_v50, %v6110_v43  ;;  %v2172_v2 = vshrl.u32 %v2171_v12, 4  ;;  %v2016_v32 = vshrl.u32 %v2011_v63, 16  ;;  %v6143_v34 = vadd.s32 %v4806_v45, %v1748_v55 }
 0x20b   : > { %v2001_v56 = vsub.s32 0, %v2000_v27  ;;  %vm2017_vm9 = vc.u32 %v2009_v10, %v2013_v24  ;;  %v2019_v59 = vadd.s32 %v2013_v24, %v2009_v10  ;;  %v1622_v38 = vpop.f32.mrf.mxu1  ;;  %v1755_v24 = vadd.s32 160, %v4799_v21 }
 0x20c   : > { %3500 = vst [vmem:[%s5230_s28 + $0x18] sm:$0xff] %v3436_v5   ;;  %v2018_v60 = vsel %vm2017_vm9, 1, %v7306_v36  ;;  %v6140_v48 = vadd.f32 %v5968_v6, %v1622_v38  ;;  %v2173_v23 = vmul.u32 20, %v2172_v2  ;;  %vm7107_vm9 = vcmp.lt.s32.totalorder %v6143_v34, 0 }
 0x20d   : > { %v2002_v28 = vsel %vm1974_vm5, %v2001_v56, %v2000_v27  ;;  %v2020_v61 = vadd.s32 %v2018_v60, %v2012_v29  ;;  %vm2021_vm3 = vc.u32 %v2019_v59, %v2015_v13  ;;  %vm7312_vm5 = vcmp.lt.s32.totalorder %v5644_v41, 0 }
 0x20e   : > { %vm2734_vm2 = vcmp.ne.s32.totalorder %v2002_v28, 0  ;;  %vm2766_vm8 = vcmp.lt.s32.totalorder %v2002_v28, 0  ;;  %v2830_v10 = vadd.s32 20, %v2002_v28  ;;  %v2022_v46 = vsel %vm2021_vm3, 1, %v7306_v36 }
 0x20f   : > { %vm2798_vm11 = vmand %vm2766_vm8, %vm2734_vm2  ;;  %v2174_v63 = vsub.s32 %v6047_v49, %v2173_v23  ;;  %v2024_v38 = vadd.s32 %v2022_v46, %v2020_v61  ;;  %v3451_v55 = vpack.c.bf16 %v6140_v48, %v6133_v44  ;;  %v6155_v27 = vsel %vm7312_vm5, %v2523_v19, %v6096_v37 }
 0x210   : > { %v2862_v12 = vsel %vm2798_vm11, %v2830_v10, %v2002_v28  ;;  %v2178_v29 = vsub.s32 0, %v6143_v34  ;;  %v2378_v5 = vsub.s32 0, %v6120_v40  ;;  %v6161_v56 = vadd.s32 %v2547_v9, %v2538_v1 }
 0x211   : > { %vm2894_vm3 = vcmp.lt.s32.totalorder %v2862_v12, 18  ;;  %v2175_v49 = vsub.s32 0, %v2174_v63  ;;  %v2025_v13 = vadd.s32 %v2024_v38, %v2014_v31  ;;  %3503 = vst [vmem:[%s5230_s28 + $0x30] sm:$0xff] %v3451_v55   ;;  %v6171_v19 = vadd.s32 %v4806_v45, %v1755_v24 }
 0x212   : > { %vm2958_vm2 = vmand %vm2894_vm3, %vm2926_vm13  ;;  %v6168_v37 = vsel %vm7107_vm9, %v2178_v29, %v6143_v34  ;;  %v1761_v2 = vadd.s32 208, %v4799_v21  ;;  %v6185_v28 = vmul.f32 %v6007_v47, %v6007_v47  ;;  %vm7314_vm8 = vcmp.lt.s32.totalorder %v5748_v3, 0 }
 0x213   : > { %v3054_v59 = vsel %vm2958_vm2, %v6110_v43, 0.0  ;;  %v3156_v60 = vsel %vm2958_vm2, %v3124_v53, 0.0  ;;  %v2176_v1 = vsel %vm2148_vm15, %v2175_v49, %v2174_v63  ;;  %v2026_v9 = vadd.s32 %v2025_v13, %v2016_v32 }
 0x214   : > { %v6178_v42 = vadd.f32 %v5713_v16, %v3054_v59  ;;  %v6181_v31 = vadd.f32 %v5716_v35, %v3156_v60  ;;  %vm2740_vm11 = vcmp.ne.s32.totalorder %v2176_v1, 0  ;;  %vm2772_vm13 = vcmp.lt.s32.totalorder %v2176_v1, 0  ;;  %7313 = vst [vmem:[#allocation11_spill] sm:$0xff] %v6185_v28 }
 0x215   : > { %v2027_v23 = vshrl.u32 %v2026_v9, 4  ;;  %v2180_v43 = vand.u32 65535, %v6168_v37  ;;  %v2181_v53 = vshrl.u32 %v6168_v37, 16  ;;  %v2836_v61 = vadd.s32 20, %v2176_v1  ;;  %vm6199_vm5 = vmand %vm2772_vm13, %vm2740_vm11 }
 0x216   : > { %vm7104_vm15 = vcmp.lt.s32.totalorder %v6171_v19, 0  ;;  %v2381_v16 = vsub.s32 0, %v6171_v19  ;;  %v6192_v32 = vadd.s32 %v4806_v45, %v1761_v2  ;;  %v6197_v35 = vsel %vm7314_vm8, %v2378_v5, %v6120_v40 }
 0x217   : > { %v2028_v46 = vmul.u32 20, %v2027_v23  ;;  %v2183_v63 = vmul.u32 52429, %v2180_v43  ;;  %v2184_v38 = vmul.u32 52428, %v2180_v43  ;;  %v2185_v12 = vmul.u32 52429, %v2181_v53 }
 0x218   : > { %v6208_v29 = vsel %vm7104_vm15, %v2381_v16, %v6171_v19  ;;  %v2186_v24 = vmul.u32 52428, %v2181_v53  ;;  %v2868_v13 = vsel %vm6199_vm5, %v2836_v61, %v2176_v1  ;;  %v3125_v2 = vmul.f32 %v6128_v50, %v6128_v50 }
 0x219   : > { %v2029_v40 = vsub.s32 %v6116_v22, %v2028_v46  ;;  %v2187_v5 = vshll.u32 %v2184_v38, 16  ;;  %v2383_v49 = vand.u32 65535, %v6208_v29  ;;  %v2189_v59 = vshll.u32 %v2185_v12, 16 }
 0x21a   : > { %v2384_v23 = vshrl.u32 %v6208_v29, 16  ;;  %v2188_v43 = vshrl.u32 %v2184_v38, 16  ;;  %v2555_v8 = vsub.s32 0, %v6192_v32  ;;  %vm2752_vm2 = vcmp.ne.s32.totalorder %v6155_v27, 0 }
 0x21b   : > { %v2030_v60 = vsub.s32 0, %v2029_v40  ;;  %vm2191_vm11 = vc.u32 %v2183_v63, %v2187_v5  ;;  %v2193_v9 = vadd.s32 %v2187_v5, %v2183_v63  ;;  %v2386_v53 = vmul.u32 52429, %v2383_v49 }
 0x21c   : > { %v2192_v22 = vsel %vm2191_vm11, 1, %v7306_v36  ;;  %v2387_v16 = vmul.u32 52428, %v2383_v49  ;;  %v2388_v61 = vmul.u32 52429, %v2384_v23  ;;  %v2190_v63 = vshrl.u32 %v2185_v12, 16 }
 0x21d   : > { %v2031_v10 = vsel %vm2003_vm0, %v2030_v60, %v2029_v40  ;;  %v2194_v1 = vadd.s32 %v2192_v22, %v2186_v24  ;;  %vm2195_vm13 = vc.u32 %v2193_v9, %v2189_v59  ;;  %v2389_v55 = vmul.u32 52428, %v2384_v23 }
 0x21e   : > { %vm2735_vm8 = vcmp.ne.s32.totalorder %v2031_v10, 0  ;;  %vm2767_vm5 = vcmp.lt.s32.totalorder %v2031_v10, 0  ;;  %v2831_v46 = vadd.s32 20, %v2031_v10  ;;  %v2196_v14 = vsel %vm2195_vm13, 1, %v7306_v36 }
 0x21f   : > { %vm2799_vm15 = vmand %vm2767_vm5, %vm2735_vm8  ;;  %v2198_v5 = vadd.s32 %v2196_v14, %v2194_v1  ;;  %v2390_v38 = vshll.u32 %v2387_v16, 16  ;;  %vm2932_vm11 = vcmp.lt.s32.totalorder %v5992_v57, 260  ;;  %v2392_v49 = vshll.u32 %v2388_v61, 16 }
 0x220   : > { %v2863_v28 = vsel %vm2799_vm15, %v2831_v46, %v2031_v10  ;;  %vm6226_vm13 = vcmp.lt.s32.totalorder %v2868_v13, 18  ;;  %vm7319_vm8 = vcmp.lt.s32.totalorder %v6078_v7, 260  ;;  %v2391_v14 = vshrl.u32 %v2387_v16, 16 }
 0x221   : > { %vm2895_vm0 = vcmp.lt.s32.totalorder %v2863_v28, 18  ;;  %v2199_v40 = vadd.s32 %v2198_v5, %v2188_v43  ;;  %vm2394_vm9 = vc.u32 %v2386_v53, %v2390_v38  ;;  %v2396_v24 = vadd.s32 %v2390_v38, %v2386_v53 }
 0x222   : > { %vm2959_vm5 = vmand %vm2895_vm0, %vm7319_vm8  ;;  %v2395_v12 = vsel %vm2394_vm9, 1, %v7306_v36  ;;  %vm7320_vm15 = vcmp.lt.s32.totalorder %v6192_v32, 0  ;;  %v6243_v53 = vadd.s32 20, %v6155_v27  ;;  %vm2747_vm9 = vcmp.ne.s32.totalorder %v6197_v35, 0 }
 0x223   : > { %v6236_v28 = vsel %vm7320_vm15, %v2555_v8, %v6192_v32  ;;  %v3055_v60 = vsel %vm2959_vm5, %v6128_v50, 0.0  ;;  %v3157_v9 = vsel %vm2959_vm5, %v3125_v2, 0.0  ;;  %v2200_v23 = vadd.s32 %v2199_v40, %v2190_v63 }
 0x224   : > { %v2397_v43 = vadd.s32 %v2395_v12, %v2389_v55  ;;  %v3086_v13 = vadd.f32 %v6178_v42, %v3055_v60  ;;  %v3188_v22 = vadd.f32 %v6181_v31, %v3157_v9  ;;  %vm2398_vm3 = vc.u32 %v2396_v24, %v2392_v49 }
 0x225   : > { %v2557_v7 = vand.u32 65535, %v6236_v28  ;;  %v2201_v16 = vshrl.u32 %v2200_v23, 4  ;;  %v1640_v10 = vpop.f32.mrf.mxu2  ;;  %v2399_v8 = vsel %vm2398_vm3, 1, %v7306_v36  ;;  %v2558_v1 = vshrl.u32 %v6236_v28, 16  ;;  %vm6261_vm3 = vmand %vm6226_vm13, %vm2932_vm11 }
 0x226   : > { %v7321_v50 = vsel %vm5608_vm6, %v5386_v62, 0.0  ;;  %v7322_v31 = vsel %vm5608_vm6, %v5633_v26, 0.0  ;;  %v2393_v2 = vshrl.u32 %v2388_v61, 16  ;;  %v2401_v46 = vadd.s32 %v2399_v8, %v2397_v43 }
 0x227   : > { %v3087_v42 = vadd.f32 %v3086_v13, %v7321_v50  ;;  %v3189_v55 = vadd.f32 %v3188_v22, %v7322_v31  ;;  %vm2779_vm0 = vcmp.lt.s32.totalorder %v6197_v35, 0  ;;  %v3130_v62 = vmul.f32 %v6133_v44, %v6133_v44 }
 0x228   : > { %v2202_v5 = vmul.u32 20, %v2201_v16  ;;  %v6267_v17 = vmul.u32 52428, %v2557_v7  ;;  %v7325_v26 = vshrl.u32 %v6161_v56, 4  ;;  %v7326_v38 = vsel %vm5740_vm10, %v5393_v51, 0.0  ;;  %vm6343_vm15 = vmand %vm2779_vm0, %vm2747_vm9 }
 0x229   : > { %v3088_v57 = vadd.f32 %v3087_v42, %v7326_v38  ;;  %v7327_v49 = vsel %vm5740_vm10, %v5817_v39, 0.0  ;;  %v2402_v24 = vadd.s32 %v2401_v46, %v2391_v14  ;;  %vm2933_vm6 = vcmp.lt.s32.totalorder %v6143_v34, 260  ;;  %v1655_v9 = vpop.f32.mrf.mxu3 }
 0x22a   : > { %v2550_v61 = vmul.u32 20, %v7325_v26  ;;  %v3190_v40 = vadd.f32 %v3189_v55, %v7327_v49  ;;  %v2203_v59 = vsub.s32 %v6168_v37, %v2202_v5  ;;  %v3131_v12 = vmul.f32 %v6140_v48, %v6140_v48 }
 0x22b   : > { %v6283_v56 = vmul.u32 52429, %v2558_v1  ;;  %v3060_v51 = vsel %vm6261_vm3, %v6133_v44, 0.0  ;;  %v7328_v20 = vsel %vm5898_vm7, %v5662_v33, 0.0  ;;  %v7329_v37 = vsel %vm5898_vm7, %v5938_v0, 0.0 }
 0x22c   : > { %v3089_v39 = vadd.f32 %v3088_v57, %v7328_v20  ;;  %v3191_v14 = vadd.f32 %v3190_v40, %v7329_v37  ;;  %v2403_v60 = vadd.s32 %v2402_v24, %v2393_v2  ;;  %v3162_v23 = vsel %vm6261_vm3, %v3130_v62, 0.0 }
 0x22d   : > { %v2204_v43 = vsub.s32 0, %v2203_v59  ;;  %v2560_v13 = vmul.u32 52429, %v2557_v7  ;;  %v2564_v22 = vshll.u32 %v6267_v17, 16  ;;  %v7330_v44 = vsel %vm6037_vm1, %v5681_v25, 0.0  ;;  %v1642_v42 = vpop.f32.mrf.mxu2 }
 0x22e   : > { %v3090_v33 = vadd.f32 %v3089_v39, %v7330_v44  ;;  %v7331_v15 = vsel %vm6037_vm1, %v6018_v54, 0.0  ;;  %v1756_v16 = vadd.s32 168, %v4799_v21  ;;  %v1762_v8 = vadd.s32 216, %v4799_v21 }
 0x22f   : > { %v3192_v0 = vadd.f32 %v3191_v14, %v7331_v15  ;;  %vm7332_vm10 = vcmp.lt.s32.totalorder %v6155_v27, 0  ;;  %vm7335_vm11 = vcmp.lt.s32.totalorder %v6143_v34, 0  ;;  %v6320_v4 = vadd.f32 %v5968_v6, %v1640_v10 }
 0x230   : > { %vm6313_vm7 = vmand %vm7332_vm10, %vm2752_vm2  ;;  %v2205_v25 = vsel %vm7335_vm11, %v2204_v43, %v2203_v59  ;;  %v2404_v54 = vshrl.u32 %v2403_v60, 4  ;;  %v2566_v50 = vshll.u32 %v6283_v56, 16  ;;  %v3091_v55 = vadd.f32 %v3090_v33, %v3060_v51 }
 0x231   : > { %vm2741_vm1 = vcmp.ne.s32.totalorder %v2205_v25, 0  ;;  %vm2773_vm13 = vcmp.lt.s32.totalorder %v2205_v25, 0  ;;  %v2837_v31 = vadd.s32 20, %v2205_v25  ;;  %v3193_v2 = vadd.f32 %v3192_v0, %v3162_v23  ;;  %v1657_v37 = vpop.f32.mrf.mxu3 }
 0x232   : > { %vm2805_vm8 = vmand %vm2773_vm13, %vm2741_vm1  ;;  %vm6323_vm2 = vc.u32 %v2560_v13, %v2564_v22  ;;  %v2570_v63 = vadd.s32 %v2564_v22, %v2560_v13  ;;  %v6328_v62 = vadd.f32 %v5968_v6, %v1642_v42  ;;  %v2880_v10 = vsel %vm6313_vm7, %v6243_v53, %v6155_v27 }
 0x233   : > { %v2551_v5 = vsub.s32 %v5906_v11, %v2550_v61  ;;  %v2869_v26 = vsel %vm2805_vm8, %v2837_v31, %v2205_v25  ;;  %v6336_v38 = vadd.s32 %v4806_v45, %v1756_v16  ;;  %vm2944_vm5 = vcmp.lt.s32.totalorder %v5644_v41, 260 }
 0x234   : > { %v2843_v49 = vadd.s32 20, %v6197_v35  ;;  %vm2901_vm3 = vcmp.lt.s32.totalorder %v2869_v26, 18  ;;  %v2563_v27 = vmul.u32 52428, %v2558_v1  ;;  %v3471_v11 = vpack.c.bf16 %v6328_v62, %v6320_v4 }
 0x235   : > { %vm2939_vm10 = vcmp.lt.s32.totalorder %v5748_v3, 260  ;;  %vm2965_vm7 = vmand %vm2901_vm3, %vm2933_vm6  ;;  %v2405_v53 = vmul.u32 20, %v2404_v54  ;;  %v2569_v61 = vsel %vm6323_vm2, 1, %v7306_v36  ;;  %vm2409_vm9 = vcmp.lt.s32.totalorder %v6336_v38, 0 }
 0x236   : > { %v2410_v40 = vsub.s32 0, %v6336_v38  ;;  %v3061_v24 = vsel %vm2965_vm7, %v6140_v48, 0.0  ;;  %v3163_v1 = vsel %vm2965_vm7, %v3131_v12, 0.0  ;;  %vm2572_vm0 = vc.u32 %v2570_v63, %v2566_v50  ;;  %3507 = vst [vmem:[%s5230_s28 + $0x50] sm:$0xff] %v3471_v11  }
 0x237   : > { %v6361_v59 = vadd.s32 %v4806_v45, %v1762_v8  ;;  %v2552_v51 = vsub.s32 0, %v2551_v5  ;;  %v6363_v34 = vadd.f32 %v3091_v55, %v3061_v24  ;;  %v6365_v20 = vadd.f32 %v3193_v2, %v3163_v1 }
 0x238   : > { %v6370_v39 = vsel %vm2409_vm9, %v2410_v40, %v6336_v38  ;;  %v2875_v48 = vsel %vm6343_vm15, %v2843_v49, %v6197_v35  ;;  %v2571_v12 = vadd.s32 %v2569_v61, %v2563_v27  ;;  %v2406_v23 = vsub.s32 %v6208_v29, %v2405_v53  ;;  %v1625_v49 = vpop.f32.mrf.mxu1 }
 0x239   : > { %v2412_v14 = vand.u32 65535, %v6370_v39  ;;  %v2413_v60 = vshrl.u32 %v6370_v39, 16  ;;  %v6379_v43 = vadd.f32 %v5968_v6, %v1655_v9  ;;  %v2573_v13 = vsel %vm2572_vm0, 1, %v7306_v36 }
 0x23a   : > { %v6383_v22 = vadd.f32 %v5968_v6, %v1657_v37  ;;  %vm7108_vm6 = vcmp.lt.s32.totalorder %v6361_v59, 0  ;;  %vm6386_vm11 = vcmp.lt.s32.totalorder %v2880_v10, 18  ;;  %vm7342_vm1 = vcmp.lt.s32.totalorder %v5813_v58, 0 }
 0x23b   : > { %v2415_v44 = vmul.u32 52429, %v2412_v14  ;;  %v2416_v33 = vmul.u32 52428, %v2412_v14  ;;  %v2417_v15 = vmul.u32 52429, %v2413_v60  ;;  %v6392_v29 = vsel %vm7342_vm1, %v2552_v51, %v2551_v5  ;;  %vm6414_vm3 = vmand %vm6386_vm11, %vm2944_vm5 }
 0x23c   : > { %v3486_v9 = vpack.c.bf16 %v6383_v22, %v6379_v43  ;;  %v2584_v0 = vsub.s32 0, %v6361_v59  ;;  %v2565_v16 = vshrl.u32 %v6267_v17, 16  ;;  %v2575_v8 = vadd.s32 %v2573_v13, %v2571_v12 }
 0x23d   : > { %v2418_v7 = vmul.u32 52428, %v2413_v60  ;;  %v2419_v25 = vshll.u32 %v2416_v33, 16  ;;  %vm2907_vm13 = vcmp.lt.s32.totalorder %v2875_v48, 18  ;;  %v6400_v54 = vmul.f32 %v5976_v30, %v5976_v30 }
 0x23e   : > { %v2421_v50 = vshll.u32 %v2417_v15, 16  ;;  %3510 = vst [vmem:[%s5230_s28 + $0x68] sm:$0xff] %v3486_v9   ;;  %v6406_v42 = vsel %vm7108_vm6, %v2584_v0, %v6361_v59  ;;  %vm2753_vm8 = vcmp.ne.s32.totalorder %v6392_v29, 0  ;;  %vm2785_vm2 = vcmp.lt.s32.totalorder %v6392_v29, 0  ;;  %vm6423_vm7 = vmand %vm2907_vm13, %vm2939_vm10 }
 0x23f   : > { %v2407_v17 = vsub.s32 0, %v2406_v23  ;;  %vm2423_vm15 = vc.u32 %v2415_v44, %v2419_v25  ;;  %v2425_v2 = vadd.s32 %v2419_v25, %v2415_v44  ;;  %v2586_v46 = vand.u32 65535, %v6406_v42  ;;  %vm6440_vm10 = vmand %vm2785_vm2, %vm2753_vm8 }
 0x240   : > { %v2424_v55 = vsel %vm2423_vm15, 1, %v7306_v36  ;;  %v2587_v63 = vshrl.u32 %v6406_v42, 16  ;;  %v6428_v41 = vadd.s32 20, %v6392_v29  ;;  %v2567_v5 = vshrl.u32 %v6283_v56, 16 }
 0x241   : > { %v2576_v26 = vadd.s32 %v2575_v8, %v2565_v16  ;;  %v2426_v57 = vadd.s32 %v2424_v55, %v2418_v7  ;;  %v2420_v27 = vshrl.u32 %v2416_v33, 16  ;;  %vm2427_vm5 = vc.u32 %v2425_v2, %v2421_v50 }
 0x242   : > { %v2590_v11 = vmul.u32 52428, %v2586_v46  ;;  %v6431_v53 = vmul.u32 52429, %v2587_v63  ;;  %v2428_v56 = vsel %vm2427_vm5, 1, %v7306_v36  ;;  %v2589_v40 = vmul.u32 52429, %v2586_v46 }
 0x243   : > { %v1749_v24 = vadd.s32 112, %v4799_v21  ;;  %v3067_v1 = vsel %vm6423_vm7, %v5976_v30, 0.0  ;;  %vm7349_vm0 = vcmp.lt.s32.totalorder %v6171_v19, 0  ;;  %v2422_v37 = vshrl.u32 %v2417_v15, 16 }
 0x244   : > { %v6451_v51 = vsel %vm7349_vm0, %v2407_v17, %v2406_v23  ;;  %v2430_v48 = vadd.s32 %v2428_v56, %v2426_v57  ;;  %v2577_v12 = vadd.s32 %v2576_v26, %v2567_v5  ;;  %v2592_v14 = vmul.u32 52428, %v2587_v63  ;;  %v1627_v57 = vpop.f32.mrf.mxu1 }
 0x245   : > { %v2593_v60 = vshll.u32 %v2590_v11, 16  ;;  %v2595_v13 = vshll.u32 %v6431_v53, 16  ;;  %v3169_v44 = vsel %vm6423_vm7, %v6400_v54, 0.0  ;;  %v2881_v33 = vsel %vm6440_vm10, %v6428_v41, %v6392_v29 }
 0x246   : > { %v2431_v35 = vadd.s32 %v2430_v48, %v2420_v27  ;;  %v6462_v23 = vadd.s32 %v4806_v45, %v1749_v24  ;;  %vm2748_vm11 = vcmp.ne.s32.totalorder %v6451_v51, 0  ;;  %v1750_v9 = vadd.s32 120, %v4799_v21 }
 0x247   : > { %vm2597_vm1 = vc.u32 %v2589_v40, %v2593_v60  ;;  %v2599_v15 = vadd.s32 %v2593_v60, %v2589_v40  ;;  %vm2780_vm8 = vcmp.lt.s32.totalorder %v6451_v51, 0  ;;  %v2578_v7 = vshrl.u32 %v2577_v12, 4 }
 0x248   : > { %v2432_v0 = vadd.s32 %v2431_v35, %v2422_v37  ;;  %v2598_v16 = vsel %vm2597_vm1, 1, %v7306_v36  ;;  %vm2206_vm13 = vcmp.lt.s32.totalorder %v6462_v23, 0  ;;  %v2207_v8 = vsub.s32 0, %v6462_v23  ;;  %vm6481_vm15 = vmand %vm2780_vm8, %vm2748_vm11 }
 0x249   : > { %v2600_v25 = vadd.s32 %v2598_v16, %v2592_v14  ;;  %vm2601_vm2 = vc.u32 %v2599_v15, %v2595_v13  ;;  %v2594_v17 = vshrl.u32 %v2590_v11, 16  ;;  %v2844_v46 = vadd.s32 20, %v6451_v51 }
 0x24a   : > { %v2433_v50 = vshrl.u32 %v2432_v0, 4  ;;  %v2602_v55 = vsel %vm2601_vm2, 1, %v7306_v36  ;;  %v6474_v2 = vsel %vm2206_vm13, %v2207_v8, %v6462_v23  ;;  %v6486_v56 = vadd.f32 %v5968_v6, %v1625_v49 }
 0x24b   : > { %v2604_v63 = vadd.s32 %v2602_v55, %v2600_v25  ;;  %v2209_v5 = vand.u32 65535, %v6474_v2  ;;  %v2210_v26 = vshrl.u32 %v6474_v2, 16  ;;  %v6489_v40 = vadd.f32 %v5968_v6, %v1627_v57 }
 0x24c   : > { %v2434_v11 = vmul.u32 20, %v2433_v50  ;;  %v6492_v24 = vadd.s32 %v4806_v45, %v1750_v9  ;;  %v2579_v37 = vmul.u32 20, %v2578_v7  ;;  %v2596_v13 = vshrl.u32 %v6431_v53, 16 }
 0x24d   : > { %v2212_v48 = vmul.u32 52429, %v2209_v5  ;;  %v2213_v12 = vmul.u32 52428, %v2209_v5  ;;  %v2214_v14 = vmul.u32 52429, %v2210_v26  ;;  %v2605_v35 = vadd.s32 %v2604_v63, %v2594_v17 }
 0x24e   : > { %v2435_v60 = vsub.s32 %v6370_v39, %v2434_v11  ;;  %v3456_v49 = vpack.c.bf16 %v6489_v40, %v6486_v56  ;;  %v2876_v6 = vsel %vm6481_vm15, %v2844_v46, %v6451_v51  ;;  %vm7110_vm5 = vcmp.lt.s32.totalorder %v6492_v24, 0 }
 0x24f   : > { %v2216_v15 = vshll.u32 %v2213_v12, 16  ;;  %v1757_v9 = vadd.s32 176, %v4799_v21  ;;  %v2215_v16 = vmul.u32 52428, %v2210_v26  ;;  %v2218_v8 = vshll.u32 %v2214_v14, 16 }
 0x250   : > { %v2436_v0 = vsub.s32 0, %v2435_v60  ;;  %3504 = vst [vmem:[%s5230_s28 + $0x38] sm:$0xff] %v3456_v49   ;;  %v2236_v39 = vsub.s32 0, %v6492_v24  ;;  %vm2940_vm0 = vcmp.lt.s32.totalorder %v6171_v19, 260  ;;  %v2580_v53 = vsub.s32 %v6236_v28, %v2579_v37 }
 0x251   : > { %vm2220_vm11 = vc.u32 %v2212_v48, %v2216_v15  ;;  %v2222_v7 = vadd.s32 %v2216_v15, %v2212_v48  ;;  %v2606_v25 = vadd.s32 %v2605_v35, %v2596_v13  ;;  %vm6515_vm1 = vcmp.lt.s32.totalorder %v2876_v6, 18 }
 0x252   : > { %v2437_v51 = vsel %vm2409_vm9, %v2436_v0, %v2435_v60  ;;  %v2221_v50 = vsel %vm2220_vm11, 1, %v7306_v36  ;;  %v6513_v17 = vsel %vm7110_vm5, %v2236_v39, %v6492_v24  ;;  %v6521_v28 = vmul.f32 %v6320_v4, %v6320_v4  ;;  %vm6533_vm15 = vmand %vm6515_vm1, %vm2940_vm0 }
 0x253   : > { %v2217_v46 = vshrl.u32 %v2213_v12, 16  ;;  %v6524_v63 = vadd.s32 %v4806_v45, %v1757_v9  ;;  %v2223_v5 = vadd.s32 %v2221_v50, %v2215_v16  ;;  %vm2224_vm9 = vc.u32 %v2222_v7, %v2218_v8 }
 0x254   : > { %v2238_v26 = vand.u32 65535, %v6513_v17  ;;  %v2239_v57 = vshrl.u32 %v6513_v17, 16  ;;  %v2581_v27 = vsub.s32 0, %v2580_v53  ;;  %vm2749_vm8 = vcmp.ne.s32.totalorder %v2437_v51, 0 }
 0x255   : > { %vm2781_vm2 = vcmp.lt.s32.totalorder %v2437_v51, 0  ;;  %v2225_v11 = vsel %vm2224_vm9, 1, %v7306_v36  ;;  %v2607_v37 = vshrl.u32 %v2606_v25, 4  ;;  %v2219_v48 = vshrl.u32 %v2214_v14, 16 }
 0x256   : > { %v2227_v60 = vadd.s32 %v2225_v11, %v2223_v5  ;;  %v2242_v13 = vmul.u32 52428, %v2238_v26  ;;  %v2845_v35 = vadd.s32 20, %v2437_v51  ;;  %v2241_v49 = vmul.u32 52429, %v2238_v26  ;;  %vm6538_vm11 = vmand %vm2781_vm2, %vm2749_vm8 }
 0x257   : > { %v2243_v6 = vmul.u32 52429, %v2239_v57  ;;  %v2439_v15 = vsub.s32 0, %v6524_v63  ;;  %vm2941_vm9 = vcmp.lt.s32.totalorder %v6336_v38, 260  ;;  %vm7109_vm6 = vcmp.lt.s32.totalorder %v6524_v63, 0 }
 0x258   : > { %v2228_v14 = vadd.s32 %v2227_v60, %v2217_v46  ;;  %v2245_v0 = vshll.u32 %v2242_v13, 16  ;;  %vm7358_vm0 = vcmp.lt.s32.totalorder %v6192_v32, 0  ;;  %v6550_v16 = vmul.f32 %v6328_v62, %v6328_v62 }
 0x259   : > { %v6546_v19 = vsel %vm7358_vm0, %v2581_v27, %v2580_v53  ;;  %v2244_v8 = vmul.u32 52428, %v2239_v57  ;;  %v2247_v39 = vshll.u32 %v2243_v6, 16  ;;  %v3068_v7 = vsel %vm6533_vm15, %v6320_v4, 0.0 }
 0x25a   : > { %v2608_v50 = vmul.u32 20, %v2607_v37  ;;  %v2229_v55 = vadd.s32 %v2228_v14, %v2219_v48  ;;  %v2877_v53 = vsel %vm6538_vm11, %v2845_v35, %v2437_v51  ;;  %vm2249_vm1 = vc.u32 %v2241_v49, %v2245_v0  ;;  %v1645_v14 = vpop.f32.mrf.mxu2 }
 0x25b   : > { %v2251_v46 = vadd.s32 %v2245_v0, %v2241_v49  ;;  %v6563_v5 = vsel %vm7109_vm6, %v2439_v15, %v6524_v63  ;;  %v6566_v26 = vadd.s32 20, %v6546_v19  ;;  %v2250_v27 = vsel %vm2249_vm1, 1, %v7306_v36 }
 0x25c   : > { %v2230_v57 = vshrl.u32 %v2229_v55, 4  ;;  %v2441_v11 = vand.u32 65535, %v6563_v5  ;;  %v2246_v37 = vshrl.u32 %v2242_v13, 16  ;;  %v2252_v48 = vadd.s32 %v2250_v27, %v2244_v8 }
 0x25d   : > { %vm2253_vm8 = vc.u32 %v2251_v46, %v2247_v39  ;;  %v2442_v51 = vshrl.u32 %v6563_v5, 16  ;;  %vm2909_vm2 = vcmp.lt.s32.totalorder %v2877_v53, 18  ;;  %v6572_v60 = vsub.s32 %v6406_v42, %v2608_v50 }
 0x25e   : > { %v2231_v35 = vmul.u32 20, %v2230_v57  ;;  %v2254_v49 = vsel %vm2253_vm8, 1, %v7306_v36  ;;  %v2248_v15 = vshrl.u32 %v2243_v6, 16  ;;  %v2444_v0 = vmul.u32 52429, %v2441_v11  ;;  %vm6582_vm0 = vmand %vm2909_vm2, %vm2941_vm9 }
 0x25f   : > { %v2256_v9 = vadd.s32 %v2254_v49, %v2252_v48  ;;  %v2445_v55 = vmul.u32 52428, %v2441_v11  ;;  %v3132_v8 = vmul.f32 %v6486_v56, %v6486_v56  ;;  %v2446_v39 = vmul.u32 52429, %v2442_v51 }
 0x260   : > { %v2232_v13 = vsub.s32 %v6474_v2, %v2231_v35  ;;  %v1763_v53 = vadd.s32 224, %v4799_v21  ;;  %v6588_v6 = vmul.f32 %v6489_v40, %v6489_v40  ;;  %v1758_v2 = vadd.s32 184, %v4799_v21 }
 0x261   : > { %v2257_v50 = vadd.s32 %v2256_v9, %v2246_v37  ;;  %v2448_v46 = vshll.u32 %v2445_v55, 16  ;;  %v2610_v57 = vsub.s32 0, %v6572_v60  ;;  %v2447_v11 = vmul.u32 52428, %v2442_v51 }
 0x262   : > { %v2233_v27 = vsub.s32 0, %v2232_v13  ;;  %v2450_v48 = vshll.u32 %v2446_v39, 16  ;;  %v6593_v49 = vadd.s32 %v4806_v45, %v1763_v53  ;;  %v6602_v25 = vadd.s32 %v4806_v45, %v1758_v2 }
 0x263   : > { %v2258_v35 = vadd.s32 %v2257_v50, %v2248_v15  ;;  %vm2452_vm1 = vc.u32 %v2444_v0, %v2448_v46  ;;  %v2454_v38 = vadd.s32 %v2448_v46, %v2444_v0  ;;  %v2449_v0 = vshrl.u32 %v2445_v55, 16 }
 0x264   : > { %v2234_v9 = vsel %vm2206_vm13, %v2233_v27, %v2232_v13  ;;  %v2453_v3 = vsel %vm2452_vm1, 1, %v7306_v36  ;;  %vm7111_vm5 = vcmp.lt.s32.totalorder %v6593_v49, 0  ;;  %vm2935_vm11 = vcmp.lt.s32.totalorder %v6492_v24, 260 }
 0x265   : > { %vm2742_vm9 = vcmp.ne.s32.totalorder %v2234_v9, 0  ;;  %vm2774_vm8 = vcmp.lt.s32.totalorder %v2234_v9, 0  ;;  %v2838_v51 = vadd.s32 20, %v2234_v9  ;;  %v2259_v15 = vshrl.u32 %v2258_v35, 4 }
 0x266   : > { %vm2806_vm2 = vmand %vm2774_vm8, %vm2742_vm9  ;;  %v2455_v53 = vadd.s32 %v2453_v3, %v2447_v11  ;;  %vm2456_vm6 = vc.u32 %v2454_v38, %v2450_v48  ;;  %v2613_v27 = vsub.s32 0, %v6593_v49  ;;  %v2451_v35 = vshrl.u32 %v2446_v39, 16  ;;  %v1647_v11 = vpop.f32.mrf.mxu2 }
 0x267   : > { %v2870_v50 = vsel %vm2806_vm2, %v2838_v51, %v2234_v9  ;;  %v2260_v46 = vmul.u32 20, %v2259_v15  ;;  %v2457_v13 = vsel %vm2456_vm6, 1, %v7306_v36  ;;  %vm7361_vm1 = vcmp.lt.s32.totalorder %v6462_v23, 260 }
 0x268   : > { %vm2902_vm13 = vcmp.lt.s32.totalorder %v2870_v50, 18  ;;  %v2459_v37 = vadd.s32 %v2457_v13, %v2455_v53  ;;  %v6617_v55 = vsel %vm7111_vm5, %v2613_v27, %v6593_v49  ;;  %vm7112_vm6 = vcmp.lt.s32.totalorder %v6602_v25, 0  ;;  %v6629_v50 = vld [vmem:[%s7008_s2] ss:$0 sm:$0xff] }
 0x269   : > { %vm2966_vm9 = vmand %vm2902_vm13, %vm7361_vm1  ;;  %v2261_v3 = vsub.s32 %v6513_v17, %v2260_v46  ;;  %v2468_v48 = vsub.s32 0, %v6602_v25  ;;  %v2615_v51 = vand.u32 65535, %v6617_v55  ;;  %v2616_v53 = vshrl.u32 %v6617_v55, 16 }
 0x26a   : > { %v3062_v38 = vsel %vm2966_vm9, %v6486_v56, 0.0  ;;  %v3164_v9 = vsel %vm2966_vm9, %v3132_v8, 0.0  ;;  %v2460_v39 = vadd.s32 %v2459_v37, %v2449_v0  ;;  %v6632_v46 = vadd.f32 %v6629_v50, %v1645_v14 }
 0x26b   : > { %v3093_v23 = vadd.f32 %v6363_v34, %v3062_v38  ;;  %v3195_v17 = vadd.f32 %v6365_v20, %v3164_v9  ;;  %v2262_v15 = vsub.s32 0, %v2261_v3  ;;  %v2619_v8 = vmul.u32 52428, %v2615_v51 }
 0x26c   : > { %v2461_v56 = vadd.s32 %v2460_v39, %v2451_v35  ;;  %v6635_v37 = vadd.f32 %v6629_v50, %v1647_v11  ;;  %vm7362_vm8 = vcmp.lt.s32.totalorder %v6492_v24, 0  ;;  %v2618_v20 = vmul.u32 52429, %v2615_v51  ;;  %v1660_v51 = vpop.f32.mrf.mxu3 }
 0x26d   : > { %v2263_v34 = vsel %vm7362_vm8, %v2262_v15, %v2261_v3  ;;  %v6639_v0 = vmul.u32 52429, %v2616_v53  ;;  %v6644_v13 = vsel %vm7112_vm6, %v2468_v48, %v6602_v25  ;;  %vm7363_vm1 = vcmp.lt.s32.totalorder %v6361_v59, 0 }
 0x26e   : > { %vm2743_vm2 = vcmp.ne.s32.totalorder %v2263_v34, 0  ;;  %vm2775_vm13 = vcmp.lt.s32.totalorder %v2263_v34, 0  ;;  %v2839_v14 = vadd.s32 20, %v2263_v34  ;;  %v2462_v27 = vshrl.u32 %v2461_v56, 4 }
 0x26f   : > { %v6649_v35 = vsel %vm7363_vm1, %v2610_v57, %v6572_v60  ;;  %vm2807_vm9 = vmand %vm2775_vm13, %vm2743_vm2  ;;  %v2621_v11 = vmul.u32 52428, %v2616_v53  ;;  %v2622_v3 = vshll.u32 %v2619_v8, 16  ;;  %v2624_v38 = vshll.u32 %v6639_v0, 16 }
 0x270   : > { %v2871_v9 = vsel %vm2807_vm9, %v2839_v14, %v2263_v34  ;;  %v2463_v39 = vmul.u32 20, %v2462_v27  ;;  %v3476_v48 = vpack.c.bf16 %v6635_v37, %v6632_v46  ;;  %v2470_v15 = vand.u32 65535, %v6644_v13 }
 0x271   : > { %vm2903_vm8 = vcmp.lt.s32.totalorder %v2871_v9, 18  ;;  %vm2626_vm5 = vc.u32 %v2618_v20, %v2622_v3  ;;  %v2628_v56 = vadd.s32 %v2622_v3, %v2618_v20  ;;  %v2471_v60 = vshrl.u32 %v6644_v13, 16 }
 0x272   : > { %vm2967_vm2 = vmand %vm2903_vm8, %vm2935_vm11  ;;  %v2464_v57 = vsub.s32 %v6563_v5, %v2463_v39  ;;  %v2623_v53 = vshrl.u32 %v2619_v8, 16  ;;  %v2627_v34 = vsel %vm2626_vm5, 1, %v7306_v36  ;;  %3508 = vst [vmem:[%s5230_s28 + $0x58] sm:$0xff] %v3476_v48   ;;  %v6661_v14 = vmul.u32 52428, %v2470_v15 }
 0x273   : > { %v3063_v27 = vsel %vm2967_vm2, %v6489_v40, 0.0  ;;  %v3165_v2 = vsel %vm2967_vm2, %v6588_v6, 0.0  ;;  %v2629_v9 = vadd.s32 %v2627_v34, %v2621_v11  ;;  %vm2630_vm13 = vc.u32 %v2628_v56, %v2624_v38  ;;  %v7373_v56 = vld [vmem:[#allocation3_spill] sm:$0xff] }
 0x274   : > { %vm6670_vm11 = vcmp.lt.s32.totalorder %v2881_v33, 18  ;;  %vm2945_vm5 = vcmp.lt.s32.totalorder %v5813_v58, 260  ;;  %v3094_v5 = vadd.f32 %v3093_v23, %v3063_v27  ;;  %v3196_v8 = vadd.f32 %v3195_v17, %v3165_v2  ;;  %v7367_v33 = vld [vmem:[#allocation10_spill] sm:$0xff]  ;;  %v7369_v2 = vld [vmem:[#allocation4_spill] sm:$0xff] }
 0x275   : > { %v2465_v20 = vsub.s32 0, %v2464_v57  ;;  %v2631_v40 = vsel %vm2630_vm13, 1, %v7306_v36  ;;  %vm2754_vm1 = vcmp.ne.s32.totalorder %v6546_v19, 0  ;;  %vm2786_vm9 = vcmp.lt.s32.totalorder %v6546_v19, 0 }
 0x276   : > { %v2633_v6 = vadd.s32 %v2631_v40, %v2629_v9  ;;  %v2473_v61 = vmul.u32 52429, %v2470_v15  ;;  %v2475_v11 = vmul.u32 52429, %v2471_v60  ;;  %v2477_v29 = vshll.u32 %v6661_v14, 16  ;;  %v7375_v9 = vld [vmem:[#allocation6_spill] sm:$0xff] }
 0x277   : > { %vm2755_vm10 = vcmp.ne.s32.totalorder %v6649_v35, 0  ;;  %v7368_v3 = vsel %vm5861_vm4, %v7367_v33, 0.0  ;;  %v7370_v17 = vsel %vm5861_vm4, %v7369_v2, 0.0  ;;  %vm7371_vm8 = vcmp.lt.s32.totalorder %v6524_v63, 0  ;;  %v7380_v2 = vld [vmem:[#allocation5_spill] sm:$0xff] }
 0x278   : > { %v3095_v23 = vadd.f32 %v3094_v5, %v7368_v3  ;;  %v3197_v38 = vadd.f32 %v3196_v8, %v7370_v17  ;;  %v2466_v39 = vsel %vm7371_vm8, %v2465_v20, %v2464_v57  ;;  %vm2787_vm2 = vcmp.lt.s32.totalorder %v6649_v35, 0 }
 0x279   : > { %vm2750_vm13 = vcmp.ne.s32.totalorder %v2466_v39, 0  ;;  %vm2782_vm6 = vcmp.lt.s32.totalorder %v2466_v39, 0  ;;  %v2476_v48 = vmul.u32 52428, %v2471_v60  ;;  %v7374_v34 = vsel %vm5879_vm12, %v7373_v56, 0.0  ;;  %v1662_v56 = vpop.f32.mrf.mxu3 }
 0x27a   : > { %v3096_v27 = vadd.f32 %v3095_v23, %v7374_v34  ;;  %v7376_v5 = vsel %vm5879_vm12, %v7375_v9, 0.0  ;;  %v2846_v41 = vadd.s32 20, %v2466_v39  ;;  %v2479_v8 = vshll.u32 %v2475_v11, 16  ;;  %vm6699_vm4 = vmand %vm2782_vm6, %vm2750_vm13 }
 0x27b   : > { %v3198_v40 = vadd.f32 %v3197_v38, %v7376_v5  ;;  %v2625_v57 = vshrl.u32 %v6639_v0, 16  ;;  %v2634_v20 = vadd.s32 %v2633_v6, %v2623_v53  ;;  %vm2481_vm8 = vc.u32 %v2473_v61, %v2477_v29  ;;  %vm6766_vm6 = vmand %vm2786_vm9, %vm2754_vm1 }
 0x27c   : > { %v2483_v60 = vadd.s32 %v2477_v29, %v2473_v61  ;;  %v7379_v3 = vsel %vm6091_vm14, %v5971_v52, 0.0  ;;  %v7381_v17 = vsel %vm6091_vm14, %v7380_v2, 0.0  ;;  %v2482_v15 = vsel %vm2481_vm8, 1, %v7306_v36  ;;  %vm6750_vm14 = vmand %vm6670_vm11, %vm2945_vm5 }
 0x27d   : > { %v3097_v23 = vadd.f32 %v3096_v27, %v7379_v3  ;;  %v3199_v38 = vadd.f32 %v3198_v40, %v7381_v17  ;;  %v1764_v34 = vadd.s32 232, %v4799_v21  ;;  %v6715_v0 = vadd.s32 20, %v6649_v35  ;;  %v7391_v40 = vld [vmem:[#allocation11_spill] sm:$0xff]  ;;  %vm6790_vm5 = vmand %vm2787_vm2, %vm2755_vm10 }
 0x27e   : > { %v6718_v53 = vadd.f32 %v6629_v50, %v1660_v51  ;;  %v2484_v6 = vadd.s32 %v2482_v15, %v2476_v48  ;;  %vm2485_vm12 = vc.u32 %v2483_v60, %v2479_v8  ;;  %v2878_v52 = vsel %vm6699_vm4, %v2846_v41, %v2466_v39  ;;  %v7392_v8 = vld [vmem:[#allocation9_spill] sm:$0xff] }
 0x27f   : > { %v3098_v18 = vadd.f32 %v3097_v23, %v3067_v1  ;;  %v3200_v61 = vadd.f32 %v3199_v38, %v3169_v44  ;;  %v2478_v29 = vshrl.u32 %v6661_v14, 16  ;;  %v2635_v27 = vadd.s32 %v2634_v20, %v2625_v57 }
 0x280   : > { %v2480_v51 = vshrl.u32 %v2475_v11, 16  ;;  %v2486_v48 = vsel %vm2485_vm12, 1, %v7306_v36  ;;  %v6733_v9 = vadd.f32 %v6629_v50, %v1662_v56  ;;  %v7382_v10 = vsel %vm6533_vm15, %v6521_v28, 0.0 }
 0x281   : > { %v3099_v30 = vadd.f32 %v3098_v18, %v3068_v7  ;;  %v3201_v54 = vadd.f32 %v3200_v61, %v7382_v10  ;;  %v2488_v1 = vadd.s32 %v2486_v48, %v2484_v6  ;;  %v6744_v44 = vadd.s32 %v4806_v45, %v1764_v34  ;;  %v1665_v61 = vpop.f32.mrf.mxu3 }
 0x282   : > { %vm6754_vm7 = vcmp.lt.s32.totalorder %v2878_v52, 18  ;;  %vm2942_vm15 = vcmp.lt.s32.totalorder %v6524_v63, 260  ;;  %v3491_v28 = vpack.c.bf16 %v6733_v9, %v6718_v53  ;;  %v1765_v12 = vadd.s32 240, %v4799_v21 }
 0x283   : > { %v7389_v7 = vsel %vm6582_vm0, %v6328_v62, 0.0  ;;  %v7390_v11 = vsel %vm6582_vm0, %v6550_v16, 0.0  ;;  %v2489_v5 = vadd.s32 %v2488_v1, %v2478_v29  ;;  %vm2641_vm11 = vcmp.lt.s32.totalorder %v6744_v44, 0  ;;  %vm6806_vm0 = vmand %vm6754_vm7, %vm2942_vm15 }
 0x284   : > { %v3100_v24 = vadd.f32 %v3099_v30, %v7389_v7  ;;  %v3202_v39 = vadd.f32 %v3201_v54, %v7390_v11  ;;  %v3174_v41 = vsel %vm6414_vm3, %v7391_v40, 0.0  ;;  %v6784_v33 = vmul.f32 %v7392_v8, %v7392_v8  ;;  %3511 = vst [vmem:[%s5230_s28 + $0x70] sm:$0xff] %v3491_v28  }
 0x285   : > { %v2642_v16 = vsub.s32 0, %v6744_v44  ;;  %v6797_v42 = vadd.s32 %v4806_v45, %v1765_v12  ;;  %v3073_v57 = vsel %vm6750_vm14, %v7392_v8, 0.0  ;;  %v3140_v60 = vmul.f32 %v6632_v46, %v6632_v46 }
 0x286   : > { %v2636_v3 = vshrl.u32 %v2635_v27, 4  ;;  %v2490_v23 = vadd.s32 %v2489_v5, %v2480_v51  ;;  %v6814_v2 = vmul.f32 %v6379_v43, %v6379_v43  ;;  %v2882_v38 = vsel %vm6766_vm6, %v6566_v26, %v6546_v19 }
 0x287   : > { %v6819_v17 = vsel %vm2641_vm11, %v2642_v16, %v6744_v44  ;;  %vm2670_vm1 = vcmp.lt.s32.totalorder %v6797_v42, 0  ;;  %v2671_v63 = vsub.s32 0, %v6797_v42  ;;  %v2883_v15 = vsel %vm6790_vm5, %v6715_v0, %v6649_v35 }
 0x288   : > { %v2491_v56 = vshrl.u32 %v2490_v23, 4  ;;  %v1766_v34 = vadd.s32 248, %v4799_v21  ;;  %v3070_v6 = vsel %vm6806_vm0, %v6632_v46, 0.0  ;;  %v2644_v52 = vand.u32 65535, %v6819_v17 }
 0x289   : > { %v2645_v18 = vshrl.u32 %v6819_v17, 16  ;;  %v6840_v19 = vsel %vm2670_vm1, %v2671_v63, %v6797_v42  ;;  %v3172_v26 = vsel %vm6806_vm0, %v3140_v60, 0.0  ;;  %v6844_v35 = vmul.u32 20, %v2636_v3 }
 0x28a   : > { %v2492_v21 = vmul.u32 20, %v2491_v56  ;;  %vm2943_vm9 = vcmp.lt.s32.totalorder %v6602_v25, 260  ;;  %v2673_v46 = vand.u32 65535, %v6840_v19  ;;  %v3141_v0 = vmul.f32 %v6635_v37, %v6635_v37  ;;  %v1667_v56 = vpop.f32.mrf.mxu3 }
 0x28b   : > { %v2647_v29 = vmul.u32 52429, %v2644_v52  ;;  %v2648_v27 = vmul.u32 52428, %v2644_v52  ;;  %v2649_v51 = vmul.u32 52429, %v2645_v18  ;;  %vm6850_vm10 = vcmp.lt.s32.totalorder %v2882_v38, 18 }
 0x28c   : > { %vm2946_vm2 = vcmp.lt.s32.totalorder %v6192_v32, 260  ;;  %v3101_v30 = vadd.f32 %v3100_v24, %v3070_v6  ;;  %v2493_v10 = vsub.s32 %v6644_v13, %v2492_v21  ;;  %v2674_v54 = vshrl.u32 %v6840_v19, 16 }
 0x28d   : > { %v6858_v1 = vadd.s32 %v4806_v45, %v1766_v34  ;;  %v3203_v4 = vadd.f32 %v3202_v39, %v3172_v26  ;;  %v2650_v28 = vmul.u32 52428, %v2645_v18  ;;  %v2651_v12 = vshll.u32 %v2648_v27, 16 }
 0x28e   : > { %v6861_v58 = vadd.f32 %v6629_v50, %v1665_v61  ;;  %vm6863_vm13 = vcmp.lt.s32.totalorder %v2883_v15, 18  ;;  %vm2947_vm4 = vcmp.lt.s32.totalorder %v6361_v59, 260  ;;  %v2494_v24 = vsub.s32 0, %v2493_v10 }
 0x28f   : > { %v2653_v11 = vshll.u32 %v2649_v51, 16  ;;  %v2676_v13 = vmul.u32 52429, %v2673_v46  ;;  %v2677_v5 = vmul.u32 52428, %v2673_v46  ;;  %v2652_v62 = vshrl.u32 %v2648_v27, 16 }
 0x290   : > { %vm2655_vm8 = vc.u32 %v2647_v29, %v2651_v12  ;;  %v2657_v45 = vadd.s32 %v2651_v12, %v2647_v29  ;;  %v2678_v16 = vmul.u32 52429, %v2674_v54  ;;  %vm7401_vm12 = vcmp.lt.s32.totalorder %v6602_v25, 0 }
 0x291   : > { %v2495_v39 = vsel %vm7401_vm12, %v2494_v24, %v2493_v10  ;;  %v2656_v20 = vsel %vm2655_vm8, 1, %v7306_v36  ;;  %v2679_v60 = vmul.u32 52428, %v2674_v54  ;;  %v2680_v3 = vshll.u32 %v2677_v5, 16 }
 0x292   : > { %vm2751_vm7 = vcmp.ne.s32.totalorder %v2495_v39, 0  ;;  %vm2783_vm15 = vcmp.lt.s32.totalorder %v2495_v39, 0  ;;  %v2847_v23 = vadd.s32 20, %v2495_v39  ;;  %v2658_v63 = vadd.s32 %v2656_v20, %v2650_v28 }
 0x293   : > { %vm2815_vm6 = vmand %vm2783_vm15, %vm2751_vm7  ;;  %v2654_v38 = vshrl.u32 %v2649_v51, 16  ;;  %vm2659_vm5 = vc.u32 %v2657_v45, %v2653_v11  ;;  %v2682_v15 = vshll.u32 %v2678_v16, 16  ;;  %vm2684_vm0 = vc.u32 %v2676_v13, %v2680_v3 }
 0x294   : > { %v2879_v34 = vsel %vm2815_vm6, %v2847_v23, %v2495_v39  ;;  %v2660_v6 = vsel %vm2659_vm5, 1, %v7306_v36  ;;  %v2685_v52 = vsel %vm2684_vm0, 1, %v7306_v36  ;;  %v2686_v18 = vadd.s32 %v2680_v3, %v2676_v13  ;;  %vm6885_vm6 = vmand %vm6850_vm10, %vm2946_vm2 }
 0x295   : > { %vm2911_vm12 = vcmp.lt.s32.totalorder %v2879_v34, 18  ;;  %v2662_v61 = vadd.s32 %v2660_v6, %v2658_v63  ;;  %v2681_v26 = vshrl.u32 %v2677_v5, 16  ;;  %v2687_v21 = vadd.s32 %v2685_v52, %v2679_v60 }
 0x296   : > { %vm2975_vm8 = vmand %vm2911_vm12, %vm2943_vm9  ;;  %v2683_v46 = vshrl.u32 %v2678_v16, 16  ;;  %vm2688_vm7 = vc.u32 %v2686_v18, %v2682_v15  ;;  %v6876_v29 = vadd.f32 %v6629_v50, %v1667_v56  ;;  %vm2699_vm15 = vcmp.lt.s32.totalorder %v6858_v1, 0 }
 0x297   : > { %v3071_v27 = vsel %vm2975_vm8, %v6635_v37, 0.0  ;;  %v3173_v51 = vsel %vm2975_vm8, %v3141_v0, 0.0  ;;  %v2663_v10 = vadd.s32 %v2662_v61, %v2652_v62  ;;  %v2689_v54 = vsel %vm2688_vm7, 1, %v7306_v36  ;;  %vm6901_vm9 = vmand %vm6863_vm13, %vm2947_vm4 }
 0x298   : > { %v3102_v28 = vadd.f32 %v3101_v30, %v3071_v27  ;;  %v3204_v50 = vadd.f32 %v3203_v4, %v3173_v51  ;;  %v2691_v12 = vadd.s32 %v2689_v54, %v2687_v21  ;;  %v3496_v24 = vpack.c.bf16 %v6876_v29, %v6861_v58 }
 0x299   : > { %v3175_v37 = vsel %vm6750_vm14, %v6784_v33, 0.0  ;;  %v2638_v0 = vsub.s32 %v6617_v55, %v6844_v35  ;;  %v2664_v32 = vadd.s32 %v2663_v10, %v2654_v38  ;;  %v2700_v48 = vsub.s32 0, %v6858_v1 }
 0x29a   : > { %v3145_v4 = vmul.f32 %v6383_v22, %v6383_v22  ;;  %v7406_v33 = vsel %vm6414_vm3, %v6007_v47, 0.0  ;;  %v3205_v55 = vadd.f32 %v3204_v50, %v3174_v41  ;;  %v2692_v59 = vadd.s32 %v2691_v12, %v2681_v26  ;;  %3512 = vst [vmem:[%s5230_s28 + $0x78] sm:$0xff] %v3496_v24  }
 0x29b   : > { %v3103_v11 = vadd.f32 %v3102_v28, %v7406_v33  ;;  %v3074_v35 = vsel %vm6885_vm6, %v6379_v43, 0.0  ;;  %v3176_v7 = vsel %vm6885_vm6, %v6814_v2, 0.0  ;;  %v2665_v13 = vshrl.u32 %v2664_v32, 4 }
 0x29c   : > { %v6925_v47 = vsel %vm2699_vm15, %v2700_v48, %v6858_v1  ;;  %v3206_v40 = vadd.f32 %v3205_v55, %v3175_v37  ;;  %v2693_v41 = vadd.s32 %v2692_v59, %v2683_v46  ;;  %v3075_v43 = vsel %vm6901_vm9, %v6383_v22, 0.0 }
 0x29d   : > { %v3104_v31 = vadd.f32 %v3103_v11, %v3073_v57  ;;  %v2702_v5 = vand.u32 65535, %v6925_v47  ;;  %v2639_v2 = vsub.s32 0, %v2638_v0  ;;  %v2666_v62 = vmul.u32 20, %v2665_v13 }
 0x29e   : > { %v2703_v45 = vshrl.u32 %v6925_v47, 16  ;;  %v3177_v16 = vsel %vm6901_vm9, %v3145_v4, 0.0  ;;  %v3207_v14 = vadd.f32 %v3206_v40, %v3176_v7  ;;  %v2694_v20 = vshrl.u32 %v2693_v41, 4 }
 0x29f   : > { %v3105_v39 = vadd.f32 %v3104_v31, %v3074_v35  ;;  %v2667_v8 = vsub.s32 %v6819_v17, %v2666_v62  ;;  %v2705_v57 = vmul.u32 52429, %v2702_v5  ;;  %v2706_v60 = vmul.u32 52428, %v2702_v5 }
 0x2a0   : > { %v2707_v3 = vmul.u32 52429, %v2703_v45  ;;  %v3208_v63 = vadd.f32 %v3207_v14, %v3177_v16  ;;  %v2695_v38 = vmul.u32 20, %v2694_v20  ;;  %vm7407_vm3 = vcmp.lt.s32.totalorder %v6593_v49, 0 }
 0x2a1   : > { %v3106_v23 = vadd.f32 %v3105_v39, %v3075_v43  ;;  %v2640_v22 = vsel %vm7407_vm3, %v2639_v2, %v2638_v0  ;;  %v2668_v15 = vsub.s32 0, %v2667_v8  ;;  %v2709_v56 = vshll.u32 %v2706_v60, 16 }
 0x2a2   : > { %v2711_v34 = vshll.u32 %v2707_v3, 16  ;;  %v2696_v6 = vsub.s32 %v6840_v19, %v2695_v38  ;;  %v2708_v52 = vmul.u32 52428, %v2703_v45  ;;  %vm2756_vm10 = vcmp.ne.s32.totalorder %v2640_v22, 0 }
 0x2a3   : > { %vm2713_vm14 = vc.u32 %v2705_v57, %v2709_v56  ;;  %v2715_v18 = vadd.s32 %v2709_v56, %v2705_v57  ;;  %vm2788_vm2 = vcmp.lt.s32.totalorder %v2640_v22, 0  ;;  %v2669_v17 = vsel %vm2641_vm11, %v2668_v15, %v2667_v8 }
 0x2a4   : > { %v2697_v61 = vsub.s32 0, %v2696_v6  ;;  %v2714_v26 = vsel %vm2713_vm14, 1, %v7306_v36  ;;  %v2710_v46 = vshrl.u32 %v2706_v60, 16  ;;  %v2852_v19 = vadd.s32 20, %v2640_v22  ;;  %vm2820_vm4 = vmand %vm2788_vm2, %vm2756_vm10 }
 0x2a5   : > { %vm2717_vm13 = vc.u32 %v2715_v18, %v2711_v34  ;;  %v2716_v27 = vadd.s32 %v2714_v26, %v2708_v52  ;;  %vm2757_vm5 = vcmp.ne.s32.totalorder %v2669_v17, 0  ;;  %vm2789_vm0 = vcmp.lt.s32.totalorder %v2669_v17, 0 }
 0x2a6   : > { %v2698_v21 = vsel %vm2670_vm1, %v2697_v61, %v2696_v6  ;;  %v2718_v51 = vsel %vm2717_vm13, 1, %v7306_v36  ;;  %v2712_v10 = vshrl.u32 %v2707_v3, 16  ;;  %v2853_v25 = vadd.s32 20, %v2669_v17  ;;  %vm2821_vm11 = vmand %vm2789_vm0, %vm2757_vm5 }
 0x2a7   : > { %v2720_v54 = vadd.s32 %v2718_v51, %v2716_v27  ;;  %vm2758_vm12 = vcmp.ne.s32.totalorder %v2698_v21, 0  ;;  %vm2790_vm8 = vcmp.lt.s32.totalorder %v2698_v21, 0  ;;  %v2884_v50 = vsel %vm2820_vm4, %v2852_v19, %v2640_v22 }
 0x2a8   : > { %v2854_v12 = vadd.s32 20, %v2698_v21  ;;  %vm2822_vm7 = vmand %vm2790_vm8, %vm2758_vm12  ;;  %vm2916_vm1 = vcmp.lt.s32.totalorder %v2884_v50, 18  ;;  %vm2948_vm6 = vcmp.lt.s32.totalorder %v6593_v49, 260  ;;  %v2885_v37 = vsel %vm2821_vm11, %v2853_v25, %v2669_v17 }
 0x2a9   : > { %v2721_v28 = vadd.s32 %v2720_v54, %v2710_v46  ;;  %v3146_v32 = vmul.f32 %v6718_v53, %v6718_v53  ;;  %vm2980_vm9 = vmand %vm2916_vm1, %vm2948_vm6  ;;  %vm2917_vm3 = vcmp.lt.s32.totalorder %v2885_v37, 18  ;;  %vm2949_vm14 = vcmp.lt.s32.totalorder %v6744_v44, 260 }
 0x2aa   : > { %v2886_v0 = vsel %vm2822_vm7, %v2854_v12, %v2698_v21  ;;  %vm2950_vm2 = vcmp.lt.s32.totalorder %v6797_v42, 260  ;;  %v3147_v4 = vmul.f32 %v6733_v9, %v6733_v9  ;;  %v3076_v49 = vsel %vm2980_vm9, %v6718_v53, 0.0  ;;  %vm6957_vm13 = vmand %vm2917_vm3, %vm2949_vm14 }
 0x2ab   : > { %v2722_v24 = vadd.s32 %v2721_v28, %v2712_v10  ;;  %vm2918_vm10 = vcmp.lt.s32.totalorder %v2886_v0, 18  ;;  %v3178_v33 = vsel %vm2980_vm9, %v3146_v32, 0.0  ;;  %v3148_v55 = vmul.f32 %v6861_v58, %v6861_v58 }
 0x2ac   : > { %v3107_v44 = vadd.f32 %v3106_v23, %v3076_v49  ;;  %v3209_v35 = vadd.f32 %v3208_v63, %v3178_v33  ;;  %vm6963_vm4 = vmand %vm2918_vm10, %vm2950_vm2  ;;  %vm2951_vm5 = vcmp.lt.s32.totalorder %v6858_v1, 260  ;;  %v3149_v13 = vmul.f32 %v6876_v29, %v6876_v29 }
 0x2ad   : > { %v2723_v36 = vshrl.u32 %v2722_v24, 4  ;;  %v3179_v31 = vsel %vm6957_vm13, %v3147_v4, 0.0  ;;  %v3078_v40 = vsel %vm6963_vm4, %v6861_v58, 0.0  ;;  %v3180_v41 = vsel %vm6963_vm4, %v3148_v55, 0.0 }
 0x2ae   : > { %v3210_v43 = vadd.f32 %v3209_v35, %v3179_v31 }
 0x2af   : > { %v2724_v48 = vmul.u32 20, %v2723_v36 }
 0x2b1   : > { %v2725_v30 = vsub.s32 %v6925_v47, %v2724_v48  ;;  %v3077_v47 = vsel %vm6957_vm13, %v6733_v9, 0.0  ;;  %v3211_v9 = vadd.f32 %v3210_v43, %v3180_v41 }
 0x2b2   : > { %v3108_v5 = vadd.f32 %v3107_v44, %v3077_v47 }
 0x2b3   : > { %v2726_v59 = vsub.s32 0, %v2725_v30 }
 0x2b4   : > { %v3109_v62 = vadd.f32 %v3108_v5, %v3078_v40 }
 0x2b5   : > { %v2727_v7 = vsel %vm2699_vm15, %v2726_v59, %v2725_v30 }
 0x2b6   : > { %vm2759_vm0 = vcmp.ne.s32.totalorder %v2727_v7, 0  ;;  %vm2791_vm12 = vcmp.lt.s32.totalorder %v2727_v7, 0  ;;  %v2855_v53 = vadd.s32 20, %v2727_v7 }
 0x2b7   : > { %vm2823_vm15 = vmand %vm2791_vm12, %vm2759_vm0 }
 0x2b8   : > { %v2887_v2 = vsel %vm2823_vm15, %v2855_v53, %v2727_v7 }
 0x2b9   : > { %vm2919_vm8 = vcmp.lt.s32.totalorder %v2887_v2, 18 }
 0x2ba   : > { %vm2983_vm11 = vmand %vm2919_vm8, %vm2951_vm5 }
 0x2bb   : > { %v3079_v45 = vsel %vm2983_vm11, %v6876_v29, 0.0  ;;  %v3181_v16 = vsel %vm2983_vm11, %v3149_v13, 0.0 }
 0x2bc   : > { %v3110_v39 = vadd.f32 %v3109_v62, %v3079_v45  ;;  %v3212_v58 = vadd.f32 %v3211_v9, %v3181_v16 }
 0x2be   : > { %v3111_v14 = vrot.slane %v3110_v39, 4  ;;  %v3213_v20 = vrot.slane %v3212_v58, 4 }
 0x2c0   : > { %v3112_v8 = vadd.f32 %v3111_v14, %v3110_v39  ;;  %v3214_v57 = vadd.f32 %v3213_v20, %v3212_v58 }
 0x2c2   : > { %v3113_v60 = vrot.slane %v3112_v8, 2  ;;  %v3215_v3 = vrot.slane %v3214_v57, 2 }
 0x2c4   : > { %v3114_v23 = vadd.f32 %v3113_v60, %v3112_v8  ;;  %v3216_v63 = vadd.f32 %v3215_v3, %v3214_v57 }
 0x2c6   : > { %v3115_v38 = vrot.slane %v3114_v23, 1  ;;  %v3217_v1 = vrot.slane %v3216_v63, 1 }
 0x2c8   : > { %v3116_v29 = vadd.f32 %v3115_v38, %v3114_v23  ;;  %v3218_v22 = vadd.f32 %v3217_v1, %v3216_v63 }
 0x2ca   : > { %3117 = vst [vmem:[%s295_s27] sm:$0x1] %v3116_v29 }
 0x2cb   : > { %3219 = vst [vmem:[%s295_s27 + $0x1] sm:$0x1] %v3218_v22 }
 0x2cc PF: > { %s17_s25 = sadd.s32 1, %s3625_s25   ;;  %s7412_s21 = smov %s3617_s23 }
 0x2cd   : > { %p14_p8 = scmp.ge.s32.totalorder %s17_s25, 6   ;;  %s7413_s22 = smov %s3621_s24 }
 0x2ce   : > { %s7414_s23 = smov %s7417_s3  ;;  %s7415_s24 = smov %s7421_s4 }
 0x2cf   :  { %16 = sbr.rel (!%p14_p8) target bundleno = 3 (0x3), region = 83 }

// kernel: tile.33
= control target key start
LH: loop header
LB: loop body
LE: loop exit
PB: predicated region body
PF: predicated region fallthrough
CT: control target
= control target key end

     0   :  { %s22_s0 = inlined_call_operand.vmem [shape: f32[64], index: 0, kind: input, shape index: {}]   ;;  %s23_s1 = inlined_call_operand.vmem [shape: f32[4,64], index: 1, kind: output, shape index: {}]  }
   0x1   :  { %v4_v0 = vld [vmem:[%s22_s0] ss:$0 sm:$0xff] }
   0x2   :  { %5 = vst [vmem:[%s23_s1] sm:$0xf] %v4_v0 }

// kernel: tile.34
= control target key start
LH: loop header
LB: loop body
LE: loop exit
PB: predicated region body
PF: predicated region fallthrough
CT: control target
= control target key end

     0   :  { %s6_s8 = smov 3  ;;  %vm8_vm0 = vcmask 523264   ;;  %s31_s9 = smov 64   ;;  %vm15_vm1 = vcmask 1048064   ;;  %s51_s0 = inlined_call_operand.vmem [shape: f32[4,64], index: 0, kind: input, shape index: {}]   ;;  %s52_s1 = inlined_call_operand.vmem [shape: f32[1,256], index: 1, kind: output, shape index: {}]  }
   0x1   :  { %v4_v0 = vld [vmem:[%s51_s0] sm:$0xf]  ;;  %s11_s0 = smov 3 }
   0x2   :  { %5 = vst [vmem:[#allocation1] sm:$0xf] %v4_v0 }
   0x9   :  { %v12_v1 = vld [vmem:[#allocation1 + $0x1] ss:$2 sm:%s11_s0]   ;;  %v7_v2 = vld [vmem:[#allocation1] ss:$2 sm:%s6_s8]  }
   0xa   :  { %13 = vrot.lane.b32.xlu0 %v12_v1, %s31_s9  ;;  %9 = vst.msk [vmem:[#allocation0] ss:$8 sm:$0x3] %vm8_vm0, %v7_v2  }
  0x7c   :  { %v14_v3 = vpop.permute.xlu0 %13  }
  0x7d   :  { %16 = vst.msk [vmem:[#allocation0] ss:$8 sm:$0x3] %vm15_vm1, %v14_v3  }
  0x84   :  { %v19_v4 = vld [vmem:[#allocation0] sm:$0x1]  ;;  %v24_v5 = vld [vmem:[#allocation0 + $0x8] sm:$0x1] }
  0x85   :  { %22 = vst [vmem:[%s52_s1] sm:$0x1] %v19_v4 }
  0x86   :  { %29 = vst [vmem:[%s52_s1 + $0x1] sm:$0x1] %v24_v5 }

// kernel: classification_network_forward.5
= control target key start
LH: loop header
LB: loop body
LE: loop exit
PB: predicated region body
PF: predicated region fallthrough
CT: control target
= control target key end

     0   :  { %s3772_s21 = smov 0   ;;  %s3774_s22 = smov 0   ;;  %s4626_s0 = inlined_call_operand.vmem [shape: bf16[2,266,128], index: 0, kind: input, shape index: {}]   ;;  %s4627_s1 = inlined_call_operand.vmem [shape: bf16[512,128], index: 1, kind: input, shape index: {}]   ;;  %s4628_s2 = inlined_call_operand.vmem [shape: f32[1,128], index: 2, kind: input, shape index: {}]   ;;  %s4629_s3 = inlined_call_operand.vmem [shape: f32[1,128], index: 3, kind: input, shape index: {}]   ;;  %s4630_s4 = inlined_call_operand.vmem [shape: f32[1,128], index: 4, kind: input, shape index: {}]   ;;  %s4631_s5 = inlined_call_operand.vmem [shape: bf16[2,256,128], index: 5, kind: output, shape index: {0}]   ;;  %s4632_s6 = inlined_call_operand.vmem [shape: f32[2,1,2,128], index: 6, kind: output, shape index: {1}]  }
   0x1   :  { %s3776_s23 = smov 0  }
   0x2 LB: > { %s29_s24 = sadd.s32 1, %s3730_s22  ;;  %p3338_p0 = scmp.ge.s32.totalorder %s3734_s23, 1  ;;  %s3734_s23 = sphi %s3776_s23, %s17_s23   ;;  %s3730_s22 = sphi %s3774_s22, %s4658_s22   ;;  %s3726_s21 = sphi %s3772_s21, %s4657_s21  }
   0x3   : > { %p31_p1 = scmp.ge.s32.totalorder %s29_s24, 2  ;;  %p231_p2 = scmp.lt.s32.totalorder %s3734_s23, 3 }
   0x5   : > { %s4660_s24 = smov (%p31_p1, %s29_s24), 0  ;;  %p232_p3 = pnand %p3338_p0, %p231_p2 }
   0x6   : > { %p272_p4 = scmp.lt.s32.totalorder (!%p232_p3), %s3726_s21, 1 }
   0x7   : > { %235 = sbr.rel (%p232_p3) target bundleno = 433 (0x1b1), region = 40 }
   0xc   : > { %v3481_v0 = vld [vmem:[%s4627_s1 + $0x38] sm:$0xff]  ;;  %v3480_v4 = vld [vmem:[%s4627_s1 + $0x30] sm:$0xff]  ;;  %s4662_s21 = smov (!%p272_p4, %s3726_s21), 1  ;;  %v3479_v8 = vld [vmem:[%s4627_s1 + $0x28] sm:$0xff]  ;;  %vm678_vm4 = vsmask.f32 7424 }
   0xd   : > { %v3489_v1 = vld [vmem:[%s4627_s1 + $0x78] sm:$0xff]  ;;  %1304 = vmatpush.bf16.msra.mxu0 %v3481_v0  ;;  %v3488_v5 = vld [vmem:[%s4627_s1 + $0x70] sm:$0xff]  ;;  %s3680_s17 = smul.u32 136, %s4662_s21  ;;  %v3487_v9 = vld [vmem:[%s4627_s1 + $0x68] sm:$0xff]  ;;  %vm994_vm6 = vcmask 1046528   ;;  %s3473_s19 = sshll.u32 %s4662_s21, 7 }
   0xe   : > { %v3497_v2 = vld [vmem:[%s4627_s1 + $0xb8] sm:$0xff]  ;;  %1393 = vmatpush.bf16.msra.mxu1 %v3489_v1  ;;  %v3496_v6 = vld [vmem:[%s4627_s1 + $0xb0] sm:$0xff]  ;;  %v3495_v10 = vld [vmem:[%s4627_s1 + $0xa8] sm:$0xff]  ;;  %s4355_s28 = scalar_lea.vmem %s4631_s5, %s3473_s19  ;;  %s3342_s29 = sshll.u32 %s4662_s21, 1 }
   0xf   : > { %v3505_v3 = vld [vmem:[%s4627_s1 + $0xf8] sm:$0xff]  ;;  %1482 = vmatpush.bf16.msra.mxu2 %v3497_v2  ;;  %v3504_v7 = vld [vmem:[%s4627_s1 + $0xf0] sm:$0xff]  ;;  %v3503_v11 = vld [vmem:[%s4627_s1 + $0xe8] sm:$0xff]  ;;  %s3832_s8 = scalar_lea.vmem %s4626_s0, %s3680_s17  ;;  %s293_s21 = scalar_lea.vmem %s4632_s6, %s3342_s29 }
  0x10   : > { %1571 = vmatpush.bf16.msra.mxu3 %v3505_v3  ;;  %v3478_v12 = vld [vmem:[%s4627_s1 + $0x20] sm:$0xff]  ;;  %v3650_v19 = vld [vmem:[%s3832_s8 + $0x8] sm:$0xff]   ;;  %v3651_v24 = vld [vmem:[%s3832_s8 + $0x10] sm:$0xff]  }
  0x11   : > { %1305 = vmatpush.bf16.msra.mxu0 %v3480_v4  ;;  %v3486_v13 = vld [vmem:[%s4627_s1 + $0x60] sm:$0xff]  ;;  %v3512_v21 = vunpack.c.l.bf16 %v3650_v19  ;;  %v3513_v23 = vunpack.c.h.bf16 %v3650_v19  ;;  %v3516_v27 = vunpack.c.l.bf16 %v3651_v24  ;;  %v3517_v28 = vunpack.c.h.bf16 %v3651_v24  ;;  %v3862_v29 = vld [vmem:[%s3832_s8 + $0x18] sm:$0xff]   ;;  %v3476_v40 = vld [vmem:[%s4627_s1 + $0x10] sm:$0xff] }
  0x12   : > { %1394 = vmatpush.bf16.msra.mxu1 %v3488_v5  ;;  %v3494_v14 = vld [vmem:[%s4627_s1 + $0xa0] sm:$0xff]  ;;  %v3477_v30 = vld [vmem:[%s4627_s1 + $0x18] sm:$0xff]  ;;  %v3520_v34 = vunpack.c.l.bf16 %v3862_v29  ;;  %v3484_v41 = vld [vmem:[%s4627_s1 + $0x50] sm:$0xff] }
  0x13   : > { %1483 = vmatpush.bf16.msra.mxu2 %v3496_v6  ;;  %v3502_v15 = vld [vmem:[%s4627_s1 + $0xe0] sm:$0xff]  ;;  %v3485_v31 = vld [vmem:[%s4627_s1 + $0x58] sm:$0xff]  ;;  %v3492_v50 = vld [vmem:[%s4627_s1 + $0x90] sm:$0xff] }
  0x14   : > { %1572 = vmatpush.bf16.msra.mxu3 %v3504_v7  ;;  %v3507_v16 = vld [vmem:[%s3832_s8] sm:$0xff]   ;;  %v3493_v35 = vld [vmem:[%s4627_s1 + $0x98] sm:$0xff]  ;;  %v3500_v51 = vld [vmem:[%s4627_s1 + $0xd0] sm:$0xff] }
  0x15   : > { %1306 = vmatpush.bf16.msra.mxu0 %v3479_v8  ;;  %v3508_v17 = vunpack.c.l.bf16 %v3507_v16  ;;  %v3509_v18 = vunpack.c.h.bf16 %v3507_v16  ;;  %v3851_v20 = vld [vmem:[%s4629_s3] ss:$0 sm:$0xff]  ;;  %v3501_v36 = vld [vmem:[%s4627_s1 + $0xd8] sm:$0xff]  ;;  %v3475_v62 = vld [vmem:[%s4627_s1 + $0x8] sm:$0xff] }
  0x16   : > { %1395 = vmatpush.bf16.msra.mxu1 %v3487_v9  ;;  %v3856_v22 = vld [vmem:[%s4630_s4] ss:$0 sm:$0xff]  ;;  %v373_v32 = vmul.f32 %v3851_v20, %v3512_v21  ;;  %v374_v33 = vmul.f32 %v3851_v20, %v3513_v23  ;;  %v375_v39 = vmul.f32 %v3851_v20, %v3516_v27  ;;  %v376_v44 = vmul.f32 %v3851_v20, %v3517_v28  ;;  %v3483_v63 = vld [vmem:[%s4627_s1 + $0x48] sm:$0xff] }
  0x17   : > { %1484 = vmatpush.bf16.msra.mxu2 %v3495_v10  ;;  %v371_v25 = vmul.f32 %v3851_v20, %v3508_v17  ;;  %v372_v26 = vmul.f32 %v3851_v20, %v3509_v18  ;;  %v377_v45 = vmul.f32 %v3851_v20, %v3520_v34  ;;  %v3491_v4 = vld [vmem:[%s4627_s1 + $0x88] sm:$0xff]  ;;  %v3521_v9 = vunpack.c.h.bf16 %v3862_v29  ;;  %v3474_v16 = vld [vmem:[%s4627_s1] sm:$0xff] }
  0x18   : > { %1573 = vmatpush.bf16.msra.mxu3 %v3503_v11  ;;  %v411_v42 = vadd.f32 %v3856_v22, %v373_v32  ;;  %v412_v43 = vadd.f32 %v3856_v22, %v374_v33  ;;  %v413_v54 = vadd.f32 %v3856_v22, %v375_v39  ;;  %v414_v2 = vadd.f32 %v3856_v22, %v376_v44  ;;  %v3499_v5 = vld [vmem:[%s4627_s1 + $0xc8] sm:$0xff]  ;;  %v3482_v17 = vld [vmem:[%s4627_s1 + $0x40] sm:$0xff] }
  0x19   : > { %1307 = vmatpush.bf16.msra.mxu0 %v3478_v12  ;;  %v409_v37 = vadd.f32 %v3856_v22, %v371_v25  ;;  %v410_v38 = vadd.f32 %v3856_v22, %v372_v26  ;;  %v415_v3 = vadd.f32 %v3856_v22, %v377_v45  ;;  %v3653_v24 = vld [vmem:[%s3832_s8 + $0x20] sm:$0xff]  }
  0x1a   : > { %1396 = vmatpush.bf16.msra.mxu1 %v3486_v13  ;;  %vm445_vm2 = vcmp.gt.f32.partialorder %v411_v42, 0.0  ;;  %v479_v48 = vmul.f32 0.2, %v411_v42  ;;  %vm446_vm3 = vcmp.gt.f32.partialorder %v412_v43, 0.0  ;;  %v480_v49 = vmul.f32 0.2, %v412_v43 }
  0x1b   : > { %1485 = vmatpush.bf16.msra.mxu2 %v3494_v14  ;;  %vm443_vm0 = vcmp.gt.f32.partialorder %v409_v37, 0.0  ;;  %vm444_vm1 = vcmp.gt.f32.partialorder %v410_v38, 0.0  ;;  %v477_v46 = vmul.f32 0.2, %v409_v37  ;;  %v478_v47 = vmul.f32 0.2, %v410_v38 }
  0x1c   : > { %1574 = vmatpush.bf16.msra.mxu3 %v3502_v15  ;;  %v513_v55 = vsel %vm445_vm2, %v411_v42, %v479_v48  ;;  %v514_v58 = vsel %vm446_vm3, %v412_v43, %v480_v49  ;;  %vm447_vm5 = vcmp.gt.f32.partialorder %v413_v54, 0.0  ;;  %v481_v61 = vmul.f32 0.2, %v413_v54  ;;  %v3490_v25 = vld [vmem:[%s4627_s1 + $0x80] sm:$0xff] }
  0x1d   : > { %1308 = vmatpush.bf16.msra.mxu0 %v3477_v30  ;;  %v511_v52 = vsel %vm443_vm0, %v409_v37, %v477_v46  ;;  %v512_v53 = vsel %vm444_vm1, %v410_v38, %v478_v47  ;;  %v547_v59 = vpack.c.bf16 %v513_v55, %v513_v55  ;;  %v548_v60 = vpack.c.bf16 %v514_v58, %v514_v58  ;;  %v3498_v26 = vld [vmem:[%s4627_s1 + $0xc0] sm:$0xff] }
  0x1e   : > { %1397 = vmatpush.bf16.msra.mxu1 %v3485_v31  ;;  %v545_v56 = vpack.c.bf16 %v511_v52, %v511_v52  ;;  %v546_v57 = vpack.c.bf16 %v512_v53, %v512_v53  ;;  %v515_v8 = vsel %vm447_vm5, %v413_v54, %v481_v61  ;;  %vm448_vm7 = vcmp.gt.f32.partialorder %v414_v2, 0.0 }
  0x1f   : > { %1486 = vmatpush.bf16.msra.mxu2 %v3493_v35  ;;  %v613_v6 = vunpack.c.l.b16 %v547_v59  ;;  %v614_v7 = vunpack.c.l.b16 %v548_v60  ;;  %v549_v11 = vpack.c.bf16 %v515_v8, %v515_v8  ;;  %v482_v12 = vmul.f32 0.2, %v414_v2  ;;  %v3654_v59 = vld [vmem:[%s3832_s8 + $0x28] sm:$0xff]  }
  0x20   : > { %1575 = vmatpush.bf16.msra.mxu3 %v3501_v36  ;;  %v611_v0 = vunpack.c.l.b16 %v545_v56  ;;  %v612_v1 = vunpack.c.l.b16 %v546_v57  ;;  %vm449_vm8 = vcmp.gt.f32.partialorder %v415_v3, 0.0  ;;  %v483_v15 = vmul.f32 0.2, %v415_v3 }
  0x21   : > { %1309 = vmatpush.bf16.msra.mxu0 %v3476_v40  ;;  %v3915_v14 = vpack.c.b16 %v614_v7, %v613_v6  ;;  %v615_v21 = vunpack.c.l.b16 %v549_v11  ;;  %v516_v23 = vsel %vm448_vm7, %v414_v2, %v482_v12  ;;  %v378_v30 = vmul.f32 %v3851_v20, %v3521_v9 }
  0x22   : > { %1398 = vmatpush.bf16.msra.mxu1 %v3484_v41  ;;  %v643_v10 = vpack.c.b16 %v612_v1, %v611_v0  ;;  %v829_v13 = vpack.c.b16 %v613_v6, %v612_v1  ;;  %v550_v34 = vpack.c.bf16 %v516_v23, %v516_v23  ;;  %v517_v37 = vsel %vm449_vm8, %v415_v3, %v483_v15 }
  0x23   : > { %1487 = vmatpush.bf16.msra.mxu2 %v3492_v50  ;;  %v687_v27 = vshll.u32 %v3915_v14, 16  ;;  %v830_v32 = vpack.c.b16 %v615_v21, %v614_v7  ;;  %v3524_v38 = vunpack.c.l.bf16 %v3653_v24  ;;  %v551_v44 = vpack.c.bf16 %v517_v37, %v517_v37 }
  0x24   : > { %1576 = vmatpush.bf16.msra.mxu3 %v3500_v51  ;;  %v680_v18 = vshrl.u32 %v643_v10, 16  ;;  %v682_v19 = vshll.u32 %v643_v10, 16  ;;  %v847_v28 = vshrl.u32 %v829_v13, 16  ;;  %v849_v29 = vshll.u32 %v829_v13, 16 }
  0x25   : > { %1310 = vmatpush.bf16.msra.mxu0 %v3475_v62  ;;  %v995_v33 = vrot.slane %v829_v13, 1  ;;  %v689_v35 = vrot.slane %v687_v27, 1  ;;  %v854_v40 = vshll.u32 %v830_v32, 16  ;;  %v996_v41 = vrot.slane %v830_v32, 1  ;;  %v3655_v27 = vld [vmem:[%s3832_s8 + $0x30] sm:$0xff]  }
  0x26   : > { %1399 = vmatpush.bf16.msra.mxu1 %v3483_v63  ;;  %v684_v31 = vrot.slane %v682_v19, 1  ;;  %v851_v36 = vrot.slane %v849_v29, 1  ;;  %v616_v42 = vunpack.c.l.b16 %v550_v34  ;;  %v416_v45 = vadd.f32 %v3856_v22, %v378_v30 }
  0x27   : > { %1488 = vmatpush.bf16.msra.mxu2 %v3491_v4  ;;  %v856_v47 = vrot.slane %v854_v40, 1  ;;  %v997_v48 = vsel %vm994_vm6, %v995_v33, %v996_v41  ;;  %v617_v49 = vunpack.c.l.b16 %v551_v44  ;;  %v379_v50 = vmul.f32 %v3851_v20, %v3524_v38 }
  0x28   : > { %1577 = vmatpush.bf16.msra.mxu3 %v3499_v5  ;;  %v685_v39 = vor.u32 %v684_v31, %v680_v18  ;;  %v852_v43 = vor.u32 %v851_v36, %v847_v28  ;;  %v3938_v52 = vpack.c.b16 %v616_v42, %v615_v21  ;;  %v484_v53 = vmul.f32 0.2, %v416_v45 }
  0x29   : > { %1311 = vmatpush.bf16.msra.mxu0 %v3474_v16  ;;  %v417_v54 = vadd.f32 %v3856_v22, %v379_v50  ;;  %v831_v55 = vpack.c.b16 %v617_v49, %v616_v42  ;;  %vm450_vm9 = vcmp.gt.f32.partialorder %v416_v45, 0.0  ;;  %v691_v57 = vshrl.u32 %v3915_v14, 16 }
  0x2a   : > { %1400 = vmatpush.bf16.msra.mxu1 %v3482_v17  ;;  %v690_v46 = vsel %vm678_vm4, %v685_v39, %v689_v35  ;;  %v857_v51 = vsel %vm678_vm4, %v852_v43, %v856_v47  ;;  %v695_v58 = vshll.u32 %v3938_v52, 16  ;;  %v518_v60 = vsel %vm450_vm9, %v416_v45, %v484_v53 }
  0x2b   : > { %1489 = vmatpush.bf16.msra.mxu2 %v3490_v25  ;;  %v485_v56 = vmul.f32 0.2, %v417_v54  ;;  %vm451_vm10 = vcmp.gt.f32.partialorder %v417_v54, 0.0  ;;  %v3525_v61 = vunpack.c.h.bf16 %v3653_v24  ;;  %v858_v62 = vshrl.u32 %v830_v32, 16 }
  0x2c   : > { %1578 = vmatpush.bf16.msra.mxu3 %v3498_v26  ;;  %1312 = vmatmul.bf16.vlgmr.msra.gmra.mxu0 %v643_v10  ;;  %v862_v63 = vshll.u32 %v831_v55, 16  ;;  %v3528_v1 = vunpack.c.l.bf16 %v3654_v59  ;;  %v693_v2 = vor.u32 %v691_v57, %v689_v35  ;;  %v697_v3 = vrot.slane %v695_v58, 1  ;;  %v3656_v57 = vld [vmem:[%s3832_s8 + $0x38] sm:$0xff]  }
  0x2d   : > { %1401 = vmatmul.bf16.vlgmr.msra.gmra.mxu1 %v690_v46  ;;  %v519_v0 = vsel %vm451_vm10, %v417_v54, %v485_v56  ;;  %v552_v4 = vpack.c.bf16 %v518_v60, %v518_v60  ;;  %v998_v5 = vrot.slane %v831_v55, 1  ;;  %v380_v6 = vmul.f32 %v3851_v20, %v3525_v61 }
  0x2e   : > { %1490 = vmatmul.bf16.vlgmr.msra.gmra.mxu2 %v857_v51  ;;  %v860_v7 = vor.u32 %v858_v62, %v856_v47  ;;  %v864_v8 = vrot.slane %v862_v63, 1  ;;  %v553_v9 = vpack.c.bf16 %v519_v0, %v519_v0  ;;  %v381_v10 = vmul.f32 %v3851_v20, %v3528_v1 }
  0x2f   : > { %1579 = vmatmul.bf16.vlgmr.msra.gmra.mxu3 %v997_v48  ;;  %v698_v11 = vsel %vm678_vm4, %v693_v2, %v697_v3  ;;  %v618_v12 = vunpack.c.l.b16 %v552_v4  ;;  %v999_v13 = vsel %vm994_vm6, %v996_v41, %v998_v5  ;;  %v418_v15 = vadd.f32 %v3856_v22, %v380_v6 }
  0x30   : > { %v865_v16 = vsel %vm678_vm4, %v860_v7, %v864_v8  ;;  %v619_v17 = vunpack.c.l.b16 %v553_v9  ;;  %v419_v18 = vadd.f32 %v3856_v22, %v381_v10  ;;  %v699_v25 = vshrl.u32 %v3938_v52, 16  ;;  %v3657_v10 = vld [vmem:[%s3832_s8 + $0x40] sm:$0xff]  }
  0x31   : > { %v3952_v19 = vpack.c.b16 %v618_v12, %v617_v49  ;;  %v486_v21 = vmul.f32 0.2, %v418_v15  ;;  %vm452_vm11 = vcmp.gt.f32.partialorder %v418_v15, 0.0  ;;  %v866_v29 = vshrl.u32 %v831_v55, 16 }
  0x32   : > { %v3954_v23 = vpack.c.b16 %v619_v17, %v618_v12  ;;  %v487_v24 = vmul.f32 0.2, %v419_v18  ;;  %vm453_vm12 = vcmp.gt.f32.partialorder %v419_v18, 0.0  ;;  %v3532_v32 = vunpack.c.l.bf16 %v3655_v27 }
  0x33   : > { %v703_v26 = vshll.u32 %v3952_v19, 16  ;;  %v520_v28 = vsel %vm452_vm11, %v418_v15, %v486_v21  ;;  %v701_v33 = vor.u32 %v699_v25, %v697_v3  ;;  %v868_v38 = vor.u32 %v866_v29, %v864_v8 }
  0x34   : > { %v870_v30 = vshll.u32 %v3954_v23, 16  ;;  %v521_v31 = vsel %vm453_vm12, %v419_v18, %v487_v24  ;;  %v554_v35 = vpack.c.bf16 %v520_v28, %v520_v28  ;;  %v1000_v36 = vrot.slane %v3954_v23, 1 }
  0x35   : > { %v705_v34 = vrot.slane %v703_v26, 1  ;;  %v555_v40 = vpack.c.bf16 %v521_v31, %v521_v31  ;;  %v383_v41 = vmul.f32 %v3851_v20, %v3532_v32  ;;  %v3533_v54 = vunpack.c.h.bf16 %v3655_v27 }
  0x36   : > { %v872_v39 = vrot.slane %v870_v30, 1  ;;  %v620_v43 = vunpack.c.l.b16 %v554_v35  ;;  %v1001_v44 = vsel %vm994_vm6, %v998_v5, %v1000_v36  ;;  %v707_v55 = vshrl.u32 %v3952_v19, 16 }
  0x37   : > { %v706_v42 = vsel %vm678_vm4, %v701_v33, %v705_v34  ;;  %v621_v47 = vunpack.c.l.b16 %v555_v40  ;;  %v421_v48 = vadd.f32 %v3856_v22, %v383_v41  ;;  %v874_v58 = vshrl.u32 %v3954_v23, 16 }
  0x38   : > { %v873_v46 = vsel %vm678_vm4, %v868_v38, %v872_v39  ;;  %v3969_v49 = vpack.c.b16 %v620_v43, %v619_v17  ;;  %v384_v61 = vmul.f32 %v3851_v20, %v3533_v54  ;;  %v3536_v62 = vunpack.c.l.bf16 %v3656_v57 }
  0x39   : > { %v3971_v51 = vpack.c.b16 %v621_v47, %v620_v43  ;;  %v489_v53 = vmul.f32 0.2, %v421_v48  ;;  %vm455_vm14 = vcmp.gt.f32.partialorder %v421_v48, 0.0  ;;  %v709_v63 = vor.u32 %v707_v55, %v705_v34 }
  0x3a   : > { %v711_v56 = vshll.u32 %v3969_v49, 16  ;;  %v876_v3 = vor.u32 %v874_v58, %v872_v39  ;;  %v422_v6 = vadd.f32 %v3856_v22, %v384_v61  ;;  %v385_v7 = vmul.f32 %v3851_v20, %v3536_v62 }
  0x3b   : > { %v523_v60 = vsel %vm455_vm14, %v421_v48, %v489_v53  ;;  %v1002_v2 = vrot.slane %v3971_v51, 1  ;;  %v3537_v12 = vunpack.c.h.bf16 %v3656_v57  ;;  %v3540_v18 = vunpack.c.l.bf16 %v3657_v10 }
  0x3c   : > { %1317 = vmatmul.bf16.gmra.mxu0 %v3915_v14  ;;  %v3529_v14 = vunpack.c.h.bf16 %v3654_v59  ;;  %v878_v59 = vshll.u32 %v3971_v51, 16  ;;  %v713_v0 = vrot.slane %v711_v56, 1  ;;  %v557_v5 = vpack.c.bf16 %v523_v60, %v523_v60 }
  0x3d   : > { %1406 = vmatmul.bf16.gmra.mxu1 %v698_v11  ;;  %v1003_v11 = vsel %vm994_vm6, %v1000_v36, %v1002_v2  ;;  %v423_v17 = vadd.f32 %v3856_v22, %v385_v7  ;;  %vm456_vm15 = vcmp.gt.f32.partialorder %v422_v6, 0.0  ;;  %v386_v23 = vmul.f32 %v3851_v20, %v3537_v12 }
  0x3e   : > { %1495 = vmatmul.bf16.gmra.mxu2 %v865_v16  ;;  %v382_v37 = vmul.f32 %v3851_v20, %v3529_v14  ;;  %v880_v4 = vrot.slane %v878_v59, 1  ;;  %v714_v8 = vsel %vm678_vm4, %v709_v63, %v713_v0  ;;  %v623_v15 = vunpack.c.l.b16 %v557_v5 }
  0x3f   : > { %1584 = vmatmul.bf16.gmra.mxu3 %v999_v13  ;;  %v490_v16 = vmul.f32 0.2, %v422_v6  ;;  %v491_v26 = vmul.f32 0.2, %v423_v17  ;;  %v387_v27 = vmul.f32 %v3851_v20, %v3540_v18  ;;  %vm457_vm0 = vcmp.gt.f32.partialorder %v423_v17, 0.0 }
  0x40   : > { %v420_v45 = vadd.f32 %v3856_v22, %v382_v37  ;;  %v881_v13 = vsel %vm678_vm4, %v876_v3, %v880_v4  ;;  %v882_v14 = vshrl.u32 %v3971_v51, 16  ;;  %v424_v29 = vadd.f32 %v3856_v22, %v386_v23 }
  0x41   : > { %v524_v25 = vsel %vm456_vm15, %v422_v6, %v490_v16  ;;  %v525_v32 = vsel %vm457_vm0, %v423_v17, %v491_v26  ;;  %v425_v33 = vadd.f32 %v3856_v22, %v387_v27  ;;  %v1724_v17 = vlaneseq  ;;  %v4030_v26 = vld [vmem:[%s3832_s8 + $0x50] sm:$0xff]  }
  0x42   : > { %v488_v50 = vmul.f32 0.2, %v420_v45  ;;  %vm454_vm13 = vcmp.gt.f32.partialorder %v420_v45, 0.0  ;;  %v558_v31 = vpack.c.bf16 %v524_v25, %v524_v25  ;;  %v884_v36 = vor.u32 %v882_v14, %v880_v4 }
  0x43   : > { %v492_v38 = vmul.f32 0.2, %v424_v29  ;;  %v559_v41 = vpack.c.bf16 %v525_v32, %v525_v32  ;;  %vm458_vm1 = vcmp.gt.f32.partialorder %v424_v29, 0.0  ;;  %vm459_vm2 = vcmp.gt.f32.partialorder %v425_v33, 0.0 }
  0x44   : > { %v624_v40 = vunpack.c.l.b16 %v558_v31  ;;  %v4034_v14 = vshrl.u32 %v1724_v17, 7 }
  0x45   : > { %v625_v53 = vunpack.c.l.b16 %v559_v41 }
  0x46   : > { %v4005_v51 = vpack.c.b16 %v624_v40, %v623_v15 }
  0x47   : > { %v4012_v59 = vpack.c.b16 %v625_v53, %v624_v40 }
  0x48   : > { %v731_v23 = vshrl.u32 %v4005_v51, 16 }
  0x49   : > { %v894_v3 = vshll.u32 %v4012_v59, 16  ;;  %v898_v27 = vshrl.u32 %v4012_v59, 16 }
  0x4b   : > { %v896_v12 = vrot.slane %v894_v3, 1 }
  0x4c   : > { %1322 = vmatmul.bf16.gmra.mxu0 %v3938_v52  ;;  %v522_v52 = vsel %vm454_vm13, %v420_v45, %v488_v50 }
  0x4d   : > { %1411 = vmatmul.bf16.gmra.mxu1 %v706_v42  ;;  %v556_v1 = vpack.c.bf16 %v522_v52, %v522_v52  ;;  %v493_v42 = vmul.f32 0.2, %v425_v33 }
  0x4e   : > { %1500 = vmatmul.bf16.gmra.mxu2 %v873_v46  ;;  %v526_v46 = vsel %vm458_vm1, %v424_v29, %v492_v38  ;;  %v900_v38 = vor.u32 %v898_v27, %v896_v12 }
  0x4f   : > { %1589 = vmatmul.bf16.gmra.mxu3 %v1001_v44  ;;  %v622_v9 = vunpack.c.l.b16 %v556_v1  ;;  %v3658_v44 = vld [vmem:[%s3832_s8 + $0x48] sm:$0xff]   ;;  %v527_v54 = vsel %vm459_vm2, %v425_v33, %v493_v42  ;;  %v560_v57 = vpack.c.bf16 %v526_v46, %v526_v46 }
  0x50   : > { %v3544_v48 = vunpack.c.l.bf16 %v3658_v44  ;;  %v561_v60 = vpack.c.bf16 %v527_v54, %v527_v54 }
  0x51   : > { %v3988_v21 = vpack.c.b16 %v622_v9, %v621_v47  ;;  %v3991_v24 = vpack.c.b16 %v623_v15, %v622_v9  ;;  %v3541_v47 = vunpack.c.h.bf16 %v3657_v10 }
  0x52   : > { %v389_v56 = vmul.f32 %v3851_v20, %v3544_v48  ;;  %v627_v4 = vunpack.c.l.b16 %v561_v60 }
  0x53   : > { %v719_v28 = vshll.u32 %v3988_v21, 16  ;;  %v886_v30 = vshll.u32 %v3991_v24, 16  ;;  %v1004_v37 = vrot.slane %v3991_v24, 1  ;;  %v388_v55 = vmul.f32 %v3851_v20, %v3541_v47 }
  0x54   : > { %v427_v58 = vadd.f32 %v3856_v22, %v389_v56  ;;  %v723_v61 = vshrl.u32 %v3988_v21, 16 }
  0x55   : > { %v721_v35 = vrot.slane %v719_v28, 1  ;;  %v888_v39 = vrot.slane %v886_v30, 1  ;;  %v1005_v45 = vsel %vm994_vm6, %v1002_v2, %v1004_v37  ;;  %v426_v52 = vadd.f32 %v3856_v22, %v388_v55 }
  0x56   : > { %v495_v63 = vmul.f32 0.2, %v427_v58  ;;  %vm461_vm5 = vcmp.gt.f32.partialorder %v427_v58, 0.0  ;;  %v890_v2 = vshrl.u32 %v3991_v24, 16  ;;  %v3548_v28 = vunpack.c.l.bf16 %v4030_v26 }
  0x57   : > { %v889_v50 = vsel %vm678_vm4, %v884_v36, %v888_v39  ;;  %v494_v62 = vmul.f32 0.2, %v426_v52  ;;  %vm460_vm3 = vcmp.gt.f32.partialorder %v426_v52, 0.0  ;;  %v725_v5 = vor.u32 %v723_v61, %v721_v35 }
  0x58   : > { %v529_v7 = vsel %vm461_vm5, %v427_v58, %v495_v63  ;;  %v391_v33 = vmul.f32 %v3851_v20, %v3548_v28  ;;  %v3736_v61 = vmov 0   ;;  %v4054_v63 = vadd.s32 8, %v4034_v14 }
  0x59   : > { %v528_v1 = vsel %vm460_vm3, %v426_v52, %v494_v62  ;;  %v563_v15 = vpack.c.bf16 %v529_v7, %v529_v7 }
  0x5a   : > { %v562_v10 = vpack.c.bf16 %v528_v1, %v528_v1  ;;  %v429_v40 = vadd.f32 %v3856_v22, %v391_v33 }
  0x5b   : > { %v629_v31 = vunpack.c.l.b16 %v563_v15 }
  0x5c   : > { %1327 = vmatmul.bf16.gmra.mxu0 %v3952_v19  ;;  %v715_v19 = vshrl.u32 %v3969_v49, 16  ;;  %v628_v25 = vunpack.c.l.b16 %v562_v10  ;;  %v497_v46 = vmul.f32 0.2, %v429_v40  ;;  %vm463_vm8 = vcmp.gt.f32.partialorder %v429_v40, 0.0 }
  0x5d   : > { %1416 = vmatmul.bf16.gmra.mxu1 %v714_v8  ;;  %v1006_v8 = vrot.slane %v4012_v59, 1 }
  0x5e   : > { %1505 = vmatmul.bf16.gmra.mxu2 %v881_v13  ;;  %v717_v34 = vor.u32 %v715_v19, %v713_v0  ;;  %v626_v0 = vunpack.c.l.b16 %v560_v57  ;;  %v3545_v19 = vunpack.c.h.bf16 %v3658_v44  ;;  %v531_v55 = vsel %vm463_vm8, %v429_v40, %v497_v46 }
  0x5f   : > { %1594 = vmatmul.bf16.gmra.mxu3 %v1003_v11  ;;  %v892_v11 = vor.u32 %v890_v2, %v888_v39  ;;  %v1007_v18 = vsel %vm994_vm6, %v1004_v37, %v1006_v8  ;;  %v4042_v37 = vpack.c.b16 %v628_v25, %v627_v4  ;;  %v565_v58 = vpack.c.bf16 %v531_v55, %v531_v55 }
  0x60   : > { %v722_v43 = vsel %vm678_vm4, %v717_v34, %v721_v35  ;;  %v4019_v9 = vpack.c.b16 %v626_v0, %v625_v53  ;;  %v4021_v13 = vpack.c.b16 %v627_v4, %v626_v0  ;;  %v390_v32 = vmul.f32 %v3851_v20, %v3545_v19 }
  0x61   : > { %v897_v29 = vsel %vm678_vm4, %v892_v11, %v896_v12  ;;  %v1793_v34 = vand.u32 65535, %v4034_v14  ;;  %v4060_v11 = vunpack.c.l.b16 %v565_v58 }
  0x62   : > { %v735_v24 = vshll.u32 %v4019_v9, 16  ;;  %v902_v30 = vshll.u32 %v4021_v13, 16  ;;  %v428_v39 = vadd.f32 %v3856_v22, %v390_v32  ;;  %v739_v42 = vshrl.u32 %v4019_v9, 16 }
  0x63   : > { %v1797_v44 = vmul.u32 58254, %v1793_v34  ;;  %v1796_v47 = vmul.u32 14564, %v1793_v34  ;;  %v1008_v60 = vrot.slane %v4021_v13, 1  ;;  %v906_v0 = vshrl.u32 %v4021_v13, 16 }
  0x64   : > { %v737_v36 = vrot.slane %v735_v24, 1  ;;  %v904_v41 = vrot.slane %v902_v30, 1  ;;  %vm462_vm7 = vcmp.gt.f32.partialorder %v428_v39, 0.0 }
  0x65   : > { %v1800_v53 = vshll.u32 %v1797_v44, 16  ;;  %v1801_v4 = vshrl.u32 %v1797_v44, 16 }
  0x66   : > { %v741_v7 = vor.u32 %v739_v42, %v737_v36  ;;  %v905_v24 = vsel %vm678_vm4, %v900_v38, %v904_v41  ;;  %v908_v33 = vor.u32 %v906_v0, %v904_v41  ;;  %v747_v38 = vshrl.u32 %v4042_v37, 16 }
  0x67   : > { %vm1804_vm9 = vc.u32 %v1796_v47, %v1800_v53  ;;  %v1806_v62 = vadd.s32 %v1800_v53, %v1796_v47  ;;  %v4090_v47 = vadd.s32 16, %v4034_v14 }
  0x6c   : > { %1332 = vmatmul.bf16.gmra.mxu0 %v3969_v49  ;;  %v727_v49 = vshll.u32 %v4005_v51, 16 }
  0x6d   : > { %1421 = vmatmul.bf16.gmra.mxu1 %v722_v43  ;;  %v4048_v43 = vpack.c.b16 %v629_v31, %v628_v25  ;;  %v1009_v25 = vsel %vm994_vm6, %v1006_v8, %v1008_v60 }
  0x6e   : > { %1510 = vmatmul.bf16.gmra.mxu2 %v889_v50  ;;  %v729_v6 = vrot.slane %v727_v49, 1  ;;  %v743_v50 = vshll.u32 %v4042_v37, 16  ;;  %v1805_v49 = vsel %vm1804_vm9, 1, %v3736_v61 }
  0x6f   : > { %1599 = vmatmul.bf16.gmra.mxu3 %v1005_v45  ;;  %v496_v45 = vmul.f32 0.2, %v428_v39  ;;  %v910_v1 = vshll.u32 %v4048_v43, 16 }
  0x70   : > { %v730_v16 = vsel %vm678_vm4, %v725_v5, %v729_v6  ;;  %v733_v35 = vor.u32 %v731_v23, %v729_v6  ;;  %v1822_v5 = vand.u32 65535, %v4054_v63  ;;  %v1823_v6 = vshrl.u32 %v4054_v63, 16 }
  0x71   : > { %v530_v54 = vsel %vm462_vm7, %v428_v39, %v496_v45  ;;  %v745_v10 = vrot.slane %v743_v50, 1  ;;  %v912_v34 = vrot.slane %v910_v1, 1  ;;  %v3549_v45 = vunpack.c.h.bf16 %v4030_v26 }
  0x72   : > { %v564_v52 = vpack.c.bf16 %v530_v54, %v530_v54  ;;  %v1825_v17 = vmul.u32 14564, %v1822_v5  ;;  %v738_v23 = vsel %vm678_vm4, %v733_v35, %v737_v36  ;;  %v1827_v28 = vmul.u32 14564, %v1823_v6  ;;  %v4081_v36 = vld [vmem:[%s3832_s8 + $0x58] sm:$0xff]  }
  0x73   : > { %v4073_v32 = vsel %vm678_vm4, %v741_v7, %v745_v10  ;;  %v1010_v35 = vrot.slane %v4048_v43, 1  ;;  %v3552_v46 = vunpack.c.l.bf16 %v4081_v36  ;;  %v913_v26 = vsel %vm678_vm4, %v908_v33, %v912_v34 }
  0x74   : > { %v630_v2 = vunpack.c.l.b16 %v564_v52  ;;  %v1832_v53 = vshrl.u32 %v1827_v28, 16  ;;  %v1851_v52 = vand.u32 65535, %v4090_v47 }
  0x75   : > { %v1011_v58 = vsel %vm994_vm6, %v1008_v60, %v1010_v35 }
  0x76   : > { %v4070_v27 = vpack.c.b16 %v630_v2, %v629_v31  ;;  %v4078_v59 = vpack.c.b16 %v4060_v11, %v630_v2  ;;  %v1831_v31 = vshll.u32 %v1827_v28, 16  ;;  %v1855_v7 = vmul.u32 58254, %v1851_v52 }
  0x78   : > { %v751_v39 = vshll.u32 %v4070_v27, 16  ;;  %v1012_v60 = vrot.slane %v4078_v59, 1 }
  0x7a   : > { %v753_v0 = vrot.slane %v751_v39, 1 }
  0x7c   : > { %1337 = vmatmul.bf16.gmra.mxu0 %v3988_v21  ;;  %v1794_v21 = vshrl.u32 %v4034_v14, 16 }
  0x7d   : > { %1426 = vmatmul.bf16.gmra.mxu1 %v730_v16 }
  0x7e   : > { %1515 = vmatmul.bf16.gmra.mxu2 %v897_v29  ;;  %v1798_v48 = vmul.u32 14564, %v1794_v21  ;;  %v1799_v56 = vmul.u32 58254, %v1794_v21  ;;  %v1828_v29 = vmul.u32 58254, %v1823_v6 }
  0x7f   : > { %1604 = vmatmul.bf16.gmra.mxu3 %v1007_v18  ;;  %v1826_v18 = vmul.u32 58254, %v1822_v5 }
  0x80   : > { %v1802_v57 = vshll.u32 %v1798_v48, 16  ;;  %v1807_v3 = vadd.s32 %v1805_v49, %v1799_v56  ;;  %v1803_v15 = vshrl.u32 %v1798_v48, 16  ;;  %v918_v48 = vshll.u32 %v4078_v59, 16 }
  0x81   : > { %v1829_v30 = vshll.u32 %v1826_v18, 16  ;;  %v1830_v42 = vshrl.u32 %v1826_v18, 16  ;;  %v392_v56 = vmul.f32 %v3851_v20, %v3549_v45  ;;  %v749_v49 = vor.u32 %v747_v38, %v745_v10 }
  0x82   : > { %vm1808_vm10 = vc.u32 %v1806_v62, %v1802_v57  ;;  %v393_v57 = vmul.f32 %v3851_v20, %v3552_v46  ;;  %v1852_v62 = vshrl.u32 %v4090_v47, 16  ;;  %v920_v5 = vrot.slane %v918_v48, 1 }
  0x83   : > { %v1809_v12 = vsel %vm1808_vm10, 1, %v3736_v61  ;;  %vm1833_vm11 = vc.u32 %v1825_v17, %v1829_v30  ;;  %v1835_v21 = vadd.s32 %v1829_v30, %v1825_v17  ;;  %v430_v2 = vadd.f32 %v3856_v22, %v392_v56 }
  0x84   : > { %v1811_v16 = vadd.s32 %v1809_v12, %v1807_v3  ;;  %v1834_v40 = vsel %vm1833_vm11, 1, %v3736_v61  ;;  %v431_v3 = vadd.f32 %v3856_v22, %v393_v57  ;;  %v4111_v17 = vsel %vm678_vm4, %v749_v49, %v753_v0 }
  0x85   : > { %v1836_v44 = vadd.s32 %v1834_v40, %v1828_v29  ;;  %vm1837_vm12 = vc.u32 %v1835_v21, %v1831_v31  ;;  %vm464_vm13 = vcmp.gt.f32.partialorder %v430_v2, 0.0  ;;  %v498_v13 = vmul.f32 0.2, %v430_v2 }
  0x86   : > { %v1812_v19 = vadd.s32 %v1811_v16, %v1801_v4  ;;  %v1838_v54 = vsel %vm1837_vm12, 1, %v3736_v61  ;;  %vm465_vm14 = vcmp.gt.f32.partialorder %v431_v3, 0.0  ;;  %v499_v10 = vmul.f32 0.2, %v431_v3 }
  0x87   : > { %v1840_v55 = vadd.s32 %v1838_v54, %v1836_v44  ;;  %v1856_v16 = vmul.u32 14564, %v1852_v62  ;;  %v4114_v29 = vadd.s32 24, %v4034_v14  ;;  %v1859_v21 = vshrl.u32 %v1855_v7, 16 }
  0x88   : > { %v1813_v8 = vadd.s32 %v1812_v19, %v1803_v15  ;;  %v1854_v15 = vmul.u32 14564, %v1851_v52  ;;  %v533_v19 = vsel %vm465_vm14, %v431_v3, %v499_v10 }
  0x89   : > { %v1841_v1 = vadd.s32 %v1840_v55, %v1830_v42  ;;  %v1860_v28 = vshll.u32 %v1856_v16, 16  ;;  %v567_v33 = vpack.c.bf16 %v533_v19, %v533_v19  ;;  %v1880_v44 = vand.u32 65535, %v4114_v29 }
  0x8a   : > { %v1814_v41 = vshrl.u32 %v1813_v8, 3  ;;  %v1857_v8 = vmul.u32 58254, %v1852_v62  ;;  %v1881_v48 = vshrl.u32 %v4114_v29, 16  ;;  %v1861_v56 = vshrl.u32 %v1856_v16, 16  ;;  %v4169_v62 = vld [vmem:[%s3832_s8 + $0x60] sm:$0xff]  }
  0x8b   : > { %v1842_v12 = vadd.s32 %v1841_v1, %v1832_v53  ;;  %v4124_v40 = vunpack.c.l.b16 %v567_v33  ;;  %v1883_v52 = vmul.u32 14564, %v1880_v44 }
  0x8c   : > { %1342 = vmatmul.bf16.gmra.mxu0 %v4005_v51  ;;  %v914_v51 = vshrl.u32 %v4048_v43, 16  ;;  %v1815_v50 = vmul.u32 9, %v1814_v41  ;;  %v755_v41 = vshrl.u32 %v4070_v27, 16  ;;  %v1885_v49 = vmul.u32 14564, %v1881_v48 }
  0x8d   : > { %1431 = vmatmul.bf16.gmra.mxu1 %v738_v23  ;;  %v1843_v18 = vshrl.u32 %v1842_v12, 3  ;;  %v532_v23 = vsel %vm464_vm13, %v430_v2, %v498_v13  ;;  %v1886_v3 = vmul.u32 58254, %v1881_v48 }
  0x8e   : > { %1520 = vmatmul.bf16.gmra.mxu2 %v905_v24  ;;  %v916_v4 = vor.u32 %v914_v51, %v912_v34  ;;  %v4107_v6 = vsub.s32 %v4034_v14, %v1815_v50  ;;  %v1858_v24 = vshll.u32 %v1855_v7, 16  ;;  %v757_v43 = vor.u32 %v755_v41, %v753_v0  ;;  %v4197_v41 = vld [vmem:[%s4630_s4] ss:$0 sm:$0xff] }
  0x8f   : > { %1609 = vmatmul.bf16.gmra.mxu3 %v1009_v25  ;;  %v566_v25 = vpack.c.bf16 %v532_v23, %v532_v23  ;;  %v1844_v30 = vmul.u32 9, %v1843_v18  ;;  %v1889_v13 = vshll.u32 %v1885_v49, 16  ;;  %v3553_v0 = vunpack.c.h.bf16 %v4081_v36 }
  0x90   : > { %vm2718_vm15 = vcmp.ne.s32.totalorder %v4107_v6, 0  ;;  %vm2750_vm0 = vcmp.lt.s32.totalorder %v4107_v6, 0  ;;  %vm1862_vm1 = vc.u32 %v1854_v15, %v1858_v24  ;;  %v1864_v31 = vadd.s32 %v1858_v24, %v1854_v15 }
  0x91   : > { %v632_v34 = vunpack.c.l.b16 %v566_v25  ;;  %v4119_v38 = vadd.s32 9, %v4107_v6  ;;  %v4122_v39 = vsub.s32 %v4054_v63, %v1844_v30  ;;  %vm4128_vm2 = vmand %vm2750_vm0, %vm2718_vm15  ;;  %v1863_v42 = vsel %vm1862_vm1, 1, %v3736_v61  ;;  %v4187_v25 = vld [vmem:[%s4628_s2] ss:$0 sm:$0xff] }
  0x92   : > { %vm1866_vm3 = vc.u32 %v1864_v31, %v1860_v28  ;;  %v922_v63 = vshrl.u32 %v4078_v59, 16  ;;  %v1865_v45 = vadd.s32 %v1863_v42, %v1857_v8  ;;  %v4147_v50 = vsel %vm678_vm4, %v916_v4, %v920_v5 }
  0x93   : > { %vm2719_vm5 = vcmp.ne.s32.totalorder %v4122_v39, 0  ;;  %vm2751_vm7 = vcmp.lt.s32.totalorder %v4122_v39, 0  ;;  %v1867_v46 = vsel %vm1866_vm3, 1, %v3736_v61  ;;  %v2846_v53 = vsel %vm4128_vm2, %v4119_v38, %v4107_v6 }
  0x94   : > { %vm4160_vm8 = vmand %vm2751_vm7, %vm2719_vm5  ;;  %v4165_v55 = vpack.c.b16 %v4124_v40, %v632_v34  ;;  %v1869_v57 = vadd.s32 %v1867_v46, %v1865_v45  ;;  %v3556_v15 = vunpack.c.l.bf16 %v4169_v62  ;;  %v394_v23 = vmul.f32 %v3851_v20, %v3553_v0 }
  0x95   : > { %v4182_v24 = vadd.s32 32, %v4034_v14  ;;  %v1890_v45 = vshrl.u32 %v1885_v49, 16  ;;  %vm4233_vm13 = vcmp.lt.s32.totalorder %v2846_v53, 8 }
  0x96   : > { %v1870_v2 = vadd.s32 %v1869_v57, %v1859_v21  ;;  %v926_v7 = vshll.u32 %v4165_v55, 16  ;;  %v1014_v12 = vrot.slane %v4165_v55, 1  ;;  %v395_v28 = vmul.f32 %v3851_v20, %v3556_v15 }
  0x97   : > { %v432_v8 = vadd.f32 %v3856_v22, %v394_v23  ;;  %v1909_v48 = vand.u32 65535, %v4182_v24  ;;  %v1910_v49 = vshrl.u32 %v4182_v24, 16 }
  0x98   : > { %v1871_v10 = vadd.s32 %v1870_v2, %v1861_v56  ;;  %v4190_v33 = vrot.slane %v926_v7, 1  ;;  %v433_v42 = vadd.f32 %v4197_v41, %v395_v28 }
  0x99   : > { %vm466_vm11 = vcmp.gt.f32.partialorder %v432_v8, 0.0  ;;  %v500_v46 = vmul.f32 0.2, %v432_v8  ;;  %v1912_v7 = vmul.u32 14564, %v1909_v48  ;;  %v4241_v6 = vmul.u32 14564, %v1910_v49 }
  0x9a   : > { %v1872_v19 = vshrl.u32 %v1871_v10, 3  ;;  %vm467_vm12 = vcmp.gt.f32.partialorder %v433_v42, 0.0  ;;  %v930_v10 = vshrl.u32 %v4165_v55, 16 }
  0x9c   : > { %1347 = vmatmul.bf16.gmra.mxu0 %v4019_v9  ;;  %v4138_v9 = vpack.c.b16 %v632_v34, %v4060_v11  ;;  %v4154_v11 = vsel %vm994_vm6, %v1010_v35, %v1012_v60  ;;  %v1873_v31 = vmul.u32 9, %v1872_v19  ;;  %v1915_v19 = vmul.u32 58254, %v1910_v49 }
  0x9d   : > { %1436 = vmatmul.bf16.gmra.mxu1 %v4073_v32  ;;  %v4142_v32 = vadd.s32 9, %v4122_v39 }
  0x9e   : > { %1525 = vmatmul.bf16.gmra.mxu2 %v913_v26  ;;  %v1884_v26 = vmul.u32 58254, %v1880_v44  ;;  %v759_v35 = vshll.u32 %v4138_v9, 16  ;;  %v4201_v44 = vadd.s32 40, %v4034_v14  ;;  %v4206_v56 = vsub.s32 %v4090_v47, %v1873_v31 }
  0x9f   : > { %1614 = vmatmul.bf16.gmra.mxu3 %v1011_v58  ;;  %v924_v58 = vor.u32 %v922_v63, %v920_v5  ;;  %v2847_v1 = vsel %vm4160_vm8, %v4142_v32, %v4122_v39  ;;  %v763_v59 = vshrl.u32 %v4138_v9, 16 }
  0xa0   : > { %v1887_v4 = vshll.u32 %v1884_v26, 16  ;;  %v1888_v16 = vshrl.u32 %v1884_v26, 16  ;;  %v761_v30 = vrot.slane %v759_v35, 1  ;;  %v534_v26 = vsel %vm466_vm11, %v432_v8, %v500_v46 }
  0xa1   : > { %v501_v35 = vmul.f32 0.2, %v433_v42  ;;  %v4223_v2 = vsel %vm678_vm4, %v924_v58, %v4190_v33  ;;  %vm2720_vm14 = vcmp.ne.s32.totalorder %v4206_v56, 0  ;;  %vm2752_vm15 = vcmp.lt.s32.totalorder %v4206_v56, 0 }
  0xa2   : > { %vm1891_vm9 = vc.u32 %v1883_v52, %v1887_v4  ;;  %v1893_v5 = vadd.s32 %v1887_v4, %v1883_v52  ;;  %v4213_v52 = vsel %vm994_vm6, %v1012_v60, %v1014_v12  ;;  %v4219_v47 = vsel %vm678_vm4, %v757_v43, %v761_v30  ;;  %vm4259_vm0 = vmand %vm2752_vm15, %vm2720_vm14 }
  0xa3   : > { %v1892_v18 = vsel %vm1891_vm9, 1, %v3736_v61  ;;  %v1938_v60 = vand.u32 65535, %v4201_v44  ;;  %v568_v43 = vpack.c.bf16 %v534_v26, %v534_v26  ;;  %v535_v58 = vsel %vm467_vm12, %v433_v42, %v501_v35 }
  0xa4   : > { %v1894_v36 = vadd.s32 %v1892_v18, %v1886_v3  ;;  %vm1895_vm10 = vc.u32 %v1893_v5, %v1889_v13  ;;  %v569_v4 = vpack.c.bf16 %v535_v58, %v535_v58  ;;  %v4243_v53 = vor.u32 %v763_v59, %v761_v30 }
  0xa5   : > { %v1896_v34 = vsel %vm1895_vm10, 1, %v3736_v61  ;;  %v634_v13 = vunpack.c.l.b16 %v568_v43  ;;  %v1919_v26 = vshrl.u32 %v4241_v6, 16  ;;  %vm4294_vm5 = vcmp.lt.s32.totalorder %v2847_v1, 8 }
  0xa6   : > { %v1898_v21 = vadd.s32 %v1896_v34, %v1894_v36  ;;  %v4245_v0 = vunpack.c.l.b16 %v569_v4 }
  0xa7   : > { %v4252_v23 = vpack.c.b16 %v634_v13, %v4124_v40 }
  0xa8   : > { %v1899_v57 = vadd.s32 %v1898_v21, %v1888_v16  ;;  %v4249_v16 = vadd.s32 9, %v4206_v56  ;;  %v4264_v8 = vpack.c.b16 %v4245_v0, %v634_v13  ;;  %v1918_v21 = vshll.u32 %v4241_v6, 16 }
  0xa9   : > { %v1313_v20 = vpop.f32.mrf.mxu0  ;;  %v767_v31 = vshll.u32 %v4252_v23, 16 }
  0xaa   : > { %v1402_v63 = vpop.f32.mrf.mxu1  ;;  %v1314_v22 = vadd.f32 %v4187_v25, %v1313_v20  ;;  %v934_v59 = vshll.u32 %v4264_v8, 16 }
  0xab   : > { %v4302_v49 = vrot.slane %v767_v31, 1  ;;  %v4366_v31 = vld [vmem:[%s3832_s8 + $0x68] sm:$0xff]  }
  0xac   : > { %1352 = vmatmul.bf16.gmra.mxu0 %v4042_v37  ;;  %v1403_v3 = vadd.f32 %v1402_v63, %v1314_v22  ;;  %v4274_v63 = vor.u32 %v930_v10, %v4190_v33 }
  0xad   : > { %1441 = vmatmul.bf16.gmra.mxu1 %v4111_v17  ;;  %v1900_v17 = vadd.s32 %v1899_v57, %v1890_v45  ;;  %v1016_v45 = vrot.slane %v4264_v8, 1 }
  0xae   : > { %1530 = vmatmul.bf16.gmra.mxu2 %v4147_v50 }
  0xaf   : > { %1619 = vmatmul.bf16.gmra.mxu3 %v4154_v11  ;;  %v1913_v11 = vmul.u32 58254, %v1909_v48  ;;  %v1901_v51 = vshrl.u32 %v1900_v17, 3  ;;  %v1939_v48 = vshrl.u32 %v4201_v44, 16  ;;  %v4317_v1 = vsel %vm994_vm6, %v1014_v12, %v1016_v45 }
  0xb1   : > { %v1916_v5 = vshll.u32 %v1913_v11, 16  ;;  %v1491_v50 = vpop.f32.mrf.mxu2  ;;  %v1315_v15 = vpop.f32.mrf.mxu0  ;;  %v1902_v18 = vmul.u32 9, %v1901_v51  ;;  %v1917_v33 = vshrl.u32 %v1913_v11, 16  ;;  %v1942_v11 = vmul.u32 58254, %v1938_v60 }
  0xb2   : > { %v1580_v38 = vpop.f32.mrf.mxu3  ;;  %v1492_v36 = vadd.f32 %v1491_v50, %v1403_v3  ;;  %v1316_v28 = vadd.f32 %v4187_v25, %v1315_v15  ;;  %v1404_v30 = vpop.f32.mrf.mxu1  ;;  %v4324_v51 = vmul.u32 14564, %v1939_v48 }
  0xb3   : > { %vm1920_vm1 = vc.u32 %v1912_v7, %v1916_v5  ;;  %v4267_v40 = vsub.s32 %v4114_v29, %v1902_v18  ;;  %v1922_v42 = vadd.s32 %v1916_v5, %v1912_v7  ;;  %v2848_v29 = vsel %vm4259_vm0, %v4249_v16, %v4206_v56 }
  0xb4   : > { %v4271_v20 = vadd.f32 %v1580_v38, %v1492_v36  ;;  %v1921_v46 = vsel %vm1920_vm1, 1, %v3736_v61  ;;  %v1405_v22 = vadd.f32 %v1404_v30, %v1316_v28  ;;  %v1941_v7 = vmul.u32 14564, %v1938_v60 }
  0xb5   : > { %vm2721_vm2 = vcmp.ne.s32.totalorder %v4267_v40, 0  ;;  %vm2753_vm3 = vcmp.lt.s32.totalorder %v4267_v40, 0  ;;  %v4286_v57 = vadd.s32 9, %v4267_v40  ;;  %v1923_v3 = vadd.s32 %v1921_v46, %v1915_v19 }
  0xb6   : > { %vm4298_vm7 = vmand %vm2753_vm3, %vm2721_vm2  ;;  %vm1924_vm9 = vc.u32 %v1922_v42, %v1918_v21  ;;  %v3038_v54 = vsel %vm4233_vm13, %v4271_v20, 0.0  ;;  %v4310_v39 = vmul.f32 %v4271_v20, %v4271_v20  ;;  %v3557_v38 = vunpack.c.h.bf16 %v4169_v62  ;;  %v4346_v62 = vld [vmem:[%s4629_s3] ss:$0 sm:$0xff] }
  0xb7   : > { %v1925_v17 = vsel %vm1924_vm9, 1, %v3736_v61  ;;  %v2849_v12 = vsel %vm4298_vm7, %v4286_v57, %v4267_v40  ;;  %v1944_v5 = vmul.u32 58254, %v1939_v48  ;;  %v1945_v50 = vshll.u32 %v1942_v11, 16 }
  0xb8   : > { %v1927_v4 = vadd.s32 %v1925_v17, %v1923_v3  ;;  %v1947_v15 = vshll.u32 %v4324_v51, 16  ;;  %v4339_v16 = vsel %vm678_vm4, %v4243_v53, %v4302_v49  ;;  %v4341_v18 = vrot.slane %v934_v59, 1 }
  0xb9   : > { %v1493_v43 = vpop.f32.mrf.mxu2  ;;  %v1318_v58 = vpop.f32.mrf.mxu0  ;;  %v396_v19 = vmul.f32 %v4346_v62, %v3557_v38  ;;  %vm4358_vm8 = vcmp.lt.s32.totalorder %v2848_v29, 8  ;;  %vm1949_vm10 = vc.u32 %v1941_v7, %v1945_v50  ;;  %v1951_v36 = vadd.s32 %v1945_v50, %v1941_v7 }
  0xba   : > { %v1582_v32 = vpop.f32.mrf.mxu3  ;;  %v1494_v13 = vadd.f32 %v1493_v43, %v1405_v22  ;;  %v1319_v55 = vadd.f32 %v4187_v25, %v1318_v58  ;;  %v1407_v6 = vpop.f32.mrf.mxu1  ;;  %v1928_v10 = vadd.s32 %v1927_v4, %v1917_v33  ;;  %v1946_v34 = vshrl.u32 %v1942_v11, 16 }
  0xbb   : > { %v1950_v40 = vsel %vm1949_vm10, 1, %v3736_v61  ;;  %vm1953_vm11 = vc.u32 %v1951_v36, %v1947_v15  ;;  %v4372_v29 = vsel %vm678_vm4, %v4274_v63, %v4341_v18  ;;  %v1948_v48 = vshrl.u32 %v4324_v51, 16 }
  0xbc   : > { %v1583_v60 = vadd.f32 %v1582_v32, %v1494_v13  ;;  %1357 = vmatmul.bf16.gmra.mxu0 %v4070_v27  ;;  %v3140_v27 = vsel %vm4233_vm13, %v4310_v39, 0.0  ;;  %v1929_v53 = vadd.s32 %v1928_v10, %v1919_v26  ;;  %v1408_v30 = vadd.f32 %v1407_v6, %v1319_v55 }
  0xbd   : > { %1446 = vmatmul.bf16.gmra.mxu1 %v4219_v47  ;;  %v434_v22 = vadd.f32 %v4197_v41, %v396_v19  ;;  %v771_v59 = vshrl.u32 %v4252_v23, 16  ;;  %v3560_v3 = vunpack.c.l.bf16 %v4366_v31  ;;  %vm4383_vm14 = vcmp.lt.s32.totalorder %v2849_v12, 8 }
  0xbe   : > { %v3573_v28 = vpack.c.bf16 %v1583_v60, %v4271_v20  ;;  %1535 = vmatmul.bf16.gmra.mxu2 %v4223_v2  ;;  %v3109_v21 = vmul.f32 %v1583_v60, %v1583_v60  ;;  %v1930_v42 = vshrl.u32 %v1929_v53, 3  ;;  %v1954_v2 = vsel %vm1953_vm11, 1, %v3736_v61 }
  0xbf   : > { %1624 = vmatmul.bf16.gmra.mxu3 %v4213_v52  ;;  %v1952_v52 = vadd.s32 %v1950_v40, %v1944_v5  ;;  %v3039_v39 = vsel %vm4294_vm5, %v1583_v60, 0.0  ;;  %vm468_vm12 = vcmp.gt.f32.partialorder %v434_v22, 0.0  ;;  %v502_v17 = vmul.f32 0.2, %v434_v22 }
  0xc0   : > { %3574 = vst [vmem:[%s4355_s28] sm:$0xff] %v3573_v28   ;;  %v1931_v26 = vmul.u32 9, %v1930_v42  ;;  %v3141_v43 = vsel %vm4294_vm5, %v3109_v21, 0.0  ;;  %v397_v11 = vmul.f32 %v4346_v62, %v3560_v3  ;;  %v4391_v6 = vadd.s32 48, %v4034_v14 }
  0xc1   : > { %v1496_v57 = vpop.f32.mrf.mxu2  ;;  %v1320_v33 = vpop.f32.mrf.mxu0  ;;  %v1956_v35 = vadd.s32 %v1954_v2, %v1952_v52  ;;  %v536_v55 = vsel %vm468_vm12, %v434_v22, %v502_v17  ;;  %v3070_v12 = vadd.f32 %v3039_v39, %v3038_v54  ;;  %v4402_v5 = vor.u32 %v771_v59, %v4302_v49 }
  0xc2   : > { %v1585_v46 = vpop.f32.mrf.mxu3  ;;  %v1497_v32 = vadd.f32 %v1496_v57, %v1408_v30  ;;  %v1409_v63 = vpop.f32.mrf.mxu1  ;;  %v1932_v4 = vsub.s32 %v4182_v24, %v1931_v26  ;;  %v1321_v13 = vadd.f32 %v4187_v25, %v1320_v33  ;;  %v570_v10 = vpack.c.bf16 %v536_v55, %v536_v55 }
  0xc3   : > { %v1957_v7 = vadd.s32 %v1956_v35, %v1946_v34  ;;  %v435_v14 = vadd.f32 %v4197_v41, %v397_v11  ;;  %v3172_v50 = vadd.f32 %v3141_v43, %v3140_v27  ;;  %v938_v19 = vshrl.u32 %v4264_v8, 16 }
  0xc4   : > { %v1586_v51 = vadd.f32 %v1585_v46, %v1497_v32  ;;  %vm2722_vm15 = vcmp.ne.s32.totalorder %v1932_v4, 0  ;;  %vm2754_vm0 = vcmp.lt.s32.totalorder %v1932_v4, 0  ;;  %v2818_v56 = vadd.s32 9, %v1932_v4 }
  0xc5   : > { %v1958_v38 = vadd.s32 %v1957_v7, %v1948_v48  ;;  %vm4397_vm1 = vmand %vm2754_vm0, %vm2722_vm15  ;;  %v1410_v20 = vadd.f32 %v1409_v63, %v1321_v13  ;;  %v636_v53 = vunpack.c.l.b16 %v570_v10  ;;  %vm469_vm13 = vcmp.gt.f32.partialorder %v435_v14, 0.0 }
  0xc6   : > { %v3110_v15 = vmul.f32 %v1586_v51, %v1586_v51  ;;  %v3040_v37 = vsel %vm4358_vm8, %v1586_v51, 0.0  ;;  %v2850_v49 = vsel %vm4397_vm1, %v2818_v56, %v1932_v4  ;;  %v503_v34 = vmul.f32 0.2, %v435_v14 }
  0xc7   : > { %v1959_v60 = vshrl.u32 %v1958_v38, 3  ;;  %v1967_v27 = vand.u32 65535, %v4391_v6  ;;  %v4413_v52 = vpack.c.b16 %v636_v53, %v4245_v0  ;;  %v1968_v46 = vshrl.u32 %v4391_v6, 16 }
  0xc8   : > { %v3142_v48 = vsel %vm4358_vm8, %v3110_v15, 0.0  ;;  %v537_v22 = vsel %vm469_vm13, %v435_v14, %v503_v34  ;;  %v3071_v39 = vadd.f32 %v3070_v12, %v3040_v37  ;;  %vm4430_vm5 = vcmp.lt.s32.totalorder %v2850_v49, 8  ;;  %v3663_v49 = vld [vmem:[%s3832_s8 + $0x70] sm:$0xff]  }
  0xc9   : > { %v1498_v36 = vpop.f32.mrf.mxu2  ;;  %v1323_v28 = vpop.f32.mrf.mxu0  ;;  %v1960_v30 = vmul.u32 9, %v1959_v60  ;;  %v1970_v57 = vmul.u32 14564, %v1967_v27  ;;  %v775_v26 = vshll.u32 %v4413_v52, 16  ;;  %v571_v35 = vpack.c.bf16 %v537_v22, %v537_v22 }
  0xca   : > { %v1587_v54 = vpop.f32.mrf.mxu3  ;;  %v1499_v40 = vadd.f32 %v1498_v36, %v1410_v20  ;;  %v1324_v21 = vadd.f32 %v4187_v25, %v1323_v28  ;;  %v1412_v42 = vpop.f32.mrf.mxu1  ;;  %v4422_v59 = vmul.u32 58254, %v1967_v27  ;;  %v4425_v47 = vmul.u32 14564, %v1968_v46 }
  0xcb   : > { %v1961_v2 = vsub.s32 %v4201_v44, %v1960_v30  ;;  %v940_v17 = vor.u32 %v938_v19, %v4341_v18  ;;  %v3173_v43 = vadd.f32 %v3172_v50, %v3142_v48  ;;  %v777_v7 = vrot.slane %v775_v26, 1 }
  0xcc   : > { %v1588_v33 = vadd.f32 %v1587_v54, %v1499_v40  ;;  %1362 = vmatmul.bf16.gmra.mxu0 %v4138_v9  ;;  %v1413_v0 = vadd.f32 %v1412_v42, %v1324_v21  ;;  %v1973_v11 = vmul.u32 58254, %v1968_v46  ;;  %v1976_v12 = vshll.u32 %v4425_v47, 16 }
  0xcd   : > { %1451 = vmatmul.bf16.gmra.mxu1 %v4339_v16  ;;  %vm2723_vm2 = vcmp.ne.s32.totalorder %v1961_v2, 0  ;;  %vm2755_vm3 = vcmp.lt.s32.totalorder %v1961_v2, 0  ;;  %v2819_v16 = vadd.s32 9, %v1961_v2  ;;  %v778_v20 = vsel %vm678_vm4, %v4402_v5, %v777_v7 }
  0xce   : > { %v3578_v44 = vpack.c.bf16 %v1588_v33, %v1586_v51  ;;  %v3041_v3 = vsel %vm4383_vm14, %v1588_v33, 0.0  ;;  %v3111_v9 = vmul.f32 %v1588_v33, %v1588_v33  ;;  %1540 = vmatmul.bf16.gmra.mxu2 %v4372_v29  ;;  %vm4434_vm7 = vmand %vm2755_vm3, %vm2723_vm2  ;;  %v1974_v29 = vshll.u32 %v4422_v59, 16 }
  0xcf   : > { %1629 = vmatmul.bf16.gmra.mxu3 %v4317_v1  ;;  %v4438_v1 = vunpack.c.l.b16 %v571_v35  ;;  %v3072_v51 = vadd.f32 %v3071_v39, %v3041_v3  ;;  %v2851_v14 = vsel %vm4434_vm7, %v2819_v16, %v1961_v2  ;;  %v1975_v36 = vshrl.u32 %v4422_v59, 16  ;;  %v4485_v16 = vld [vmem:[%s3832_s8 + $0x78] sm:$0xff]  }
  0xd0   : > { %3665 = vst [vmem:[%s4355_s28 + $0x8] sm:$0xff] %v3578_v44   ;;  %v3143_v13 = vsel %vm4383_vm14, %v3111_v9, 0.0  ;;  %vm1978_vm9 = vc.u32 %v1970_v57, %v1974_v29  ;;  %v1980_v60 = vadd.s32 %v1974_v29, %v1970_v57  ;;  %v3561_v28 = vunpack.c.h.bf16 %v4366_v31 }
  0xd1   : > { %v1501_v55 = vpop.f32.mrf.mxu2  ;;  %v1325_v56 = vpop.f32.mrf.mxu0  ;;  %v4446_v38 = vpack.c.b16 %v4438_v1, %v636_v53  ;;  %v1979_v15 = vsel %vm1978_vm9, 1, %v3736_v61  ;;  %v3174_v19 = vadd.f32 %v3173_v43, %v3143_v13  ;;  %vm4462_vm10 = vcmp.lt.s32.totalorder %v2851_v14, 8 }
  0xd2   : > { %v1590_v4 = vpop.f32.mrf.mxu3  ;;  %v1502_v24 = vadd.f32 %v1501_v55, %v1413_v0  ;;  %v1326_v18 = vadd.f32 %v4187_v25, %v1325_v56  ;;  %v1414_v10 = vpop.f32.mrf.mxu1  ;;  %v1981_v54 = vadd.s32 %v1979_v15, %v1973_v11  ;;  %vm1982_vm8 = vc.u32 %v1980_v60, %v1976_v12 }
  0xd3   : > { %v942_v50 = vshll.u32 %v4446_v38, 16  ;;  %v1018_v58 = vrot.slane %v4446_v38, 1  ;;  %v1977_v40 = vshrl.u32 %v4425_v47, 16  ;;  %v1983_v5 = vsel %vm1982_vm8, 1, %v3736_v61 }
  0xd4   : > { %v1591_v37 = vadd.f32 %v1590_v4, %v1502_v24  ;;  %v1415_v21 = vadd.f32 %v1414_v10, %v1326_v18  ;;  %v1985_v42 = vadd.s32 %v1983_v5, %v1981_v54  ;;  %v398_v46 = vmul.f32 %v4346_v62, %v3561_v28 }
  0xd5   : > { %v944_v53 = vrot.slane %v942_v50, 1  ;;  %v1019_v31 = vsel %vm994_vm6, %v1016_v45, %v1018_v58  ;;  %v779_v57 = vshrl.u32 %v4413_v52, 16  ;;  %v3564_v33 = vunpack.c.l.bf16 %v3663_v49 }
  0xd6   : > { %v3042_v30 = vsel %vm4430_vm5, %v1591_v37, 0.0  ;;  %v3112_v34 = vmul.f32 %v1591_v37, %v1591_v37  ;;  %v1986_v8 = vadd.s32 %v1985_v42, %v1975_v36  ;;  %v436_v45 = vadd.f32 %v4197_v41, %v398_v46 }
  0xd7   : > { %v4474_v48 = vadd.f32 %v3072_v51, %v3042_v30  ;;  %v945_v22 = vsel %vm678_vm4, %v940_v17, %v944_v53  ;;  %v3565_v59 = vunpack.c.h.bf16 %v3663_v49  ;;  %v399_v3 = vmul.f32 %v4346_v62, %v3564_v33 }
  0xd8   : > { %v3144_v61 = vsel %vm4430_vm5, %v3112_v34, 0.0  ;;  %v946_v9 = vshrl.u32 %v4446_v38, 16  ;;  %v1987_v39 = vadd.s32 %v1986_v8, %v1977_v40  ;;  %vm470_vm11 = vcmp.gt.f32.partialorder %v436_v45, 0.0  ;;  %v331_v38 = vld [vmem:[%s3832_s8 + $0x80] sm:$0xf] }
  0xd9   : > { %v1503_v26 = vpop.f32.mrf.mxu2  ;;  %v1328_v35 = vpop.f32.mrf.mxu0  ;;  %v504_v32 = vmul.f32 0.2, %v436_v45  ;;  %v400_v63 = vmul.f32 %v4346_v62, %v3565_v59  ;;  %vm2916_vm12 = vcmp.lt.s32.totalorder %v4391_v6, 54  ;;  %v4490_v43 = vor.u32 %v779_v57, %v777_v7 }
  0xda   : > { %v1592_v2 = vpop.f32.mrf.mxu3  ;;  %v1504_v0 = vadd.f32 %v1503_v26, %v1415_v21  ;;  %v1329_v47 = vadd.f32 %v4187_v25, %v1328_v35  ;;  %v1417_v44 = vpop.f32.mrf.mxu1  ;;  %v437_v4 = vadd.f32 %v4197_v41, %v399_v3  ;;  %v1988_v11 = vshrl.u32 %v1987_v39, 3 }
  0xdb   : > { %v538_v29 = vsel %vm470_vm11, %v436_v45, %v504_v32  ;;  %v438_v51 = vadd.f32 %v4197_v41, %v400_v63  ;;  %v3568_v13 = vunpack.c.l.bf16 %v4485_v16  ;;  %v3175_v55 = vadd.f32 %v3174_v19, %v3144_v61 }
  0xdc   : > { %v1593_v17 = vadd.f32 %v1592_v2, %v1504_v0  ;;  %1367 = vmatmul.bf16.gmra.mxu0 %v4252_v23  ;;  %v1418_v12 = vadd.f32 %v1417_v44, %v1329_v47  ;;  %v572_v23 = vpack.c.bf16 %v538_v29, %v538_v29  ;;  %v1989_v24 = vmul.u32 9, %v1988_v11 }
  0xdd   : > { %1456 = vmatmul.bf16.gmra.mxu1 %v778_v20  ;;  %vm471_vm14 = vcmp.gt.f32.partialorder %v437_v4, 0.0  ;;  %v505_v18 = vmul.f32 0.2, %v437_v4  ;;  %v4495_v7 = vor.u32 %v946_v9, %v944_v53  ;;  %vm472_vm15 = vcmp.gt.f32.partialorder %v438_v51, 0.0 }
  0xde   : > { %v3583_v56 = vpack.c.bf16 %v1593_v17, %v1591_v37  ;;  %1545 = vmatmul.bf16.gmra.mxu2 %v945_v22  ;;  %v3113_v10 = vmul.f32 %v1593_v17, %v1593_v17  ;;  %v638_v50 = vunpack.c.l.b16 %v572_v23  ;;  %v506_v15 = vmul.f32 0.2, %v438_v51 }
  0xdf   : > { %1634 = vmatmul.bf16.gmra.mxu3 %v1019_v31  ;;  %v3043_v60 = vsel %vm4462_vm10, %v1593_v17, 0.0  ;;  %v1990_v19 = vsub.s32 %v4391_v6, %v1989_v24  ;;  %v539_v54 = vsel %vm471_vm14, %v437_v4, %v505_v18  ;;  %v401_v36 = vmul.f32 %v4346_v62, %v3568_v13 }
  0xe0   : > { %3666 = vst [vmem:[%s4355_s28 + $0x10] sm:$0xff] %v3583_v56   ;;  %v4504_v30 = vpack.c.b16 %v638_v50, %v4438_v1  ;;  %v573_v34 = vpack.c.bf16 %v539_v54, %v539_v54  ;;  %v540_v5 = vsel %vm472_vm15, %v438_v51, %v506_v15  ;;  %v3145_v21 = vsel %vm4462_vm10, %v3113_v10, 0.0 }
  0xe1   : > { %v1506_v20 = vpop.f32.mrf.mxu2  ;;  %v1330_v37 = vpop.f32.mrf.mxu0  ;;  %vm2724_vm0 = vcmp.ne.s32.totalorder %v1990_v19, 0  ;;  %vm2756_vm1 = vcmp.lt.s32.totalorder %v1990_v19, 0  ;;  %v2820_v40 = vadd.s32 9, %v1990_v19  ;;  %v574_v22 = vpack.c.bf16 %v540_v5, %v540_v5 }
  0xe2   : > { %v1595_v14 = vpop.f32.mrf.mxu3  ;;  %v1507_v28 = vadd.f32 %v1506_v20, %v1418_v12  ;;  %v1331_v53 = vadd.f32 %v4187_v25, %v1330_v37  ;;  %v1419_v49 = vpop.f32.mrf.mxu1  ;;  %vm2788_vm13 = vmand %vm2756_vm1, %vm2724_vm0  ;;  %v783_v42 = vshll.u32 %v4504_v30, 16  ;;  %v639_v46 = vunpack.c.l.b16 %v573_v34 }
  0xe3   : > { %v2852_v2 = vsel %vm2788_vm13, %v2820_v40, %v1990_v19  ;;  %v439_v57 = vadd.f32 %v4197_v41, %v401_v36  ;;  %v3569_v1 = vunpack.c.h.bf16 %v4485_v16  ;;  %v3074_v35 = vadd.f32 %v4474_v48, %v3043_v60 }
  0xe4   : > { %v1596_v31 = vadd.f32 %v1595_v14, %v1507_v28  ;;  %vm2884_vm2 = vcmp.lt.s32.totalorder %v2852_v2, 8  ;;  %v785_v61 = vrot.slane %v783_v42, 1  ;;  %v4512_v26 = vpack.c.b16 %v639_v46, %v638_v50 }
  0xe5   : > { %v3176_v27 = vadd.f32 %v3175_v55, %v3145_v21  ;;  %vm2948_vm3 = vmand %vm2884_vm2, %vm2916_vm12  ;;  %v1420_v8 = vadd.f32 %v1419_v49, %v1331_v53  ;;  %v640_v45 = vunpack.c.l.b16 %v574_v22  ;;  %v507_v3 = vmul.f32 0.2, %v439_v57  ;;  %v332_v49 = vld [vmem:[%s3832_s8 + $0x84] sm:$0x1] }
  0xe6   : > { %v3114_v33 = vmul.f32 %v1596_v31, %v1596_v31  ;;  %v3044_v59 = vsel %vm2948_vm3, %v1596_v31, 0.0  ;;  %v950_v44 = vshll.u32 %v4512_v26, 16  ;;  %v786_v63 = vsel %vm678_vm4, %v4490_v43, %v785_v61 }
  0xe7   : > { %v3075_v9 = vadd.f32 %v3074_v35, %v3044_v59  ;;  %v1020_v48 = vrot.slane %v4512_v26, 1  ;;  %vm473_vm5 = vcmp.gt.f32.partialorder %v439_v57, 0.0  ;;  %v402_v11 = vmul.f32 %v4346_v62, %v3569_v1 }
  0xe8   : > { %v3146_v0 = vsel %vm2948_vm3, %v3114_v33, 0.0  ;;  %v952_v4 = vrot.slane %v950_v44, 1  ;;  %v4527_v55 = vpack.c.b16 %v640_v45, %v639_v46  ;;  %v787_v24 = vshrl.u32 %v4504_v30, 16 }
  0xe9   : > { %v3177_v16 = vadd.f32 %v3176_v27, %v3146_v0  ;;  %v1508_v39 = vpop.f32.mrf.mxu2  ;;  %v1333_v32 = vpop.f32.mrf.mxu0  ;;  %v3101_v29 = vrot.slane %v3075_v9, 4  ;;  %v1021_v13 = vsel %vm994_vm6, %v1018_v58, %v1020_v48  ;;  %v541_v18 = vsel %vm473_vm5, %v439_v57, %v507_v3 }
  0xea   : > { %v1597_v47 = vpop.f32.mrf.mxu3  ;;  %v1509_v17 = vadd.f32 %v1508_v39, %v1420_v8  ;;  %v1422_v6 = vpop.f32.mrf.mxu1  ;;  %v953_v56 = vsel %vm678_vm4, %v4495_v7, %v952_v4  ;;  %v1334_v58 = vadd.f32 %v4187_v25, %v1333_v32  ;;  %v575_v14 = vpack.c.bf16 %v541_v18, %v541_v18 }
  0xeb   : > { %v3203_v51 = vrot.slane %v3177_v16, 4  ;;  %v3102_v12 = vadd.f32 %v3101_v29, %v3075_v9  ;;  %v791_v7 = vshll.u32 %v4527_v55, 16  ;;  %v365_v37 = vunpack.c.l.bf16 %v331_v38 }
  0xec   : > { %v1598_v43 = vadd.f32 %v1597_v47, %v1509_v17  ;;  %1372 = vmatmul.bf16.gmra.mxu0 %v4413_v52  ;;  %v440_v52 = vadd.f32 %v4197_v41, %v402_v11  ;;  %v641_v20 = vunpack.c.l.b16 %v575_v14  ;;  %v1423_v34 = vadd.f32 %v1422_v6, %v1334_v58 }
  0xed   : > { %1461 = vmatmul.bf16.gmra.mxu1 %v786_v63  ;;  %v3204_v23 = vadd.f32 %v3203_v51, %v3177_v16  ;;  %v3103_v50 = vrot.slane %v3102_v12, 2  ;;  %v789_v5 = vor.u32 %v787_v24, %v785_v61  ;;  %v954_v2 = vshrl.u32 %v4512_v26, 16 }
  0xee   : > { %v3588_v10 = vpack.c.bf16 %v1598_v43, %v1596_v31  ;;  %1550 = vmatmul.bf16.gmra.mxu2 %v953_v56  ;;  %vm474_vm7 = vcmp.gt.f32.partialorder %v440_v52, 0.0  ;;  %v508_v19 = vmul.f32 0.2, %v440_v52  ;;  %v4540_v21 = vpack.c.b16 %v641_v20, %v640_v45 }
  0xef   : > { %1639 = vmatmul.bf16.gmra.mxu3 %v1021_v13  ;;  %v3205_v15 = vrot.slane %v3204_v23, 2  ;;  %v3104_v54 = vadd.f32 %v3103_v50, %v3102_v12  ;;  %v403_v22 = vmul.f32 %v4346_v62, %v365_v37  ;;  %v793_v1 = vrot.slane %v791_v7, 1 }
  0xf0   : > { %3667 = vst [vmem:[%s4355_s28 + $0x18] sm:$0xff] %v3588_v10   ;;  %v542_v31 = vsel %vm474_vm7, %v440_v52, %v508_v19  ;;  %v958_v33 = vshll.u32 %v4540_v21, 16  ;;  %v366_v35 = vunpack.c.l.bf16 %v332_v49  ;;  %v1022_v59 = vrot.slane %v4540_v21, 1 }
  0xf1   : > { %v3206_v36 = vadd.f32 %v3205_v15, %v3204_v23  ;;  %v1511_v28 = vpop.f32.mrf.mxu2  ;;  %v1335_v53 = vpop.f32.mrf.mxu0  ;;  %v3105_v42 = vrot.slane %v3104_v54, 1  ;;  %v576_v8 = vpack.c.bf16 %v542_v31, %v542_v31  ;;  %v441_v45 = vadd.f32 %v4197_v41, %v403_v22 }
  0xf2   : > { %v1600_v60 = vpop.f32.mrf.mxu3  ;;  %v1424_v40 = vpop.f32.mrf.mxu1  ;;  %v1336_v57 = vadd.f32 %v4187_v25, %v1335_v53  ;;  %v956_v0 = vor.u32 %v954_v2, %v952_v4  ;;  %v960_v47 = vrot.slane %v958_v33, 1  ;;  %v1512_v3 = vadd.f32 %v1511_v28, %v1423_v34 }
  0xf3   : > { %v3207_v46 = vrot.slane %v3206_v36, 1  ;;  %v3106_v61 = vadd.f32 %v3105_v42, %v3104_v54  ;;  %vm475_vm9 = vcmp.gt.f32.partialorder %v441_v45, 0.0  ;;  %v509_v44 = vmul.f32 0.2, %v441_v45 }
  0xf4   : > { %v1425_v9 = vadd.f32 %v1424_v40, %v1336_v57  ;;  %v404_v39 = vmul.f32 %v4346_v62, %v366_v35  ;;  %v794_v17 = vsel %vm678_vm4, %v789_v5, %v793_v1  ;;  %v642_v6 = vunpack.c.l.b16 %v576_v8 }
  0xf5   : > { %v3208_v27 = vadd.f32 %v3207_v46, %v3206_v36  ;;  %3107 = vst [vmem:[%s293_s21] sm:$0x1] %v3106_v61  ;;  %v543_v11 = vsel %vm475_vm9, %v441_v45, %v509_v44  ;;  %v1023_v4 = vsel %vm994_vm6, %v1020_v48, %v1022_v59  ;;  %v961_v43 = vsel %vm678_vm4, %v956_v0, %v960_v47 }
  0xf6   : > { %v577_v13 = vpack.c.bf16 %v543_v11, %v543_v11  ;;  %v1601_v56 = vadd.f32 %v1600_v60, %v1512_v3  ;;  %v442_v23 = vadd.f32 %v4197_v41, %v404_v39  ;;  %v4559_v24 = vpack.c.b16 %v642_v6, %v641_v20 }
  0xf7   : > { %3209 = vst [vmem:[%s293_s21 + $0x1] sm:$0x1] %v3208_v27  ;;  %v962_v50 = vshrl.u32 %v4540_v21, 16 }
  0xf8   : > { %v676_v62 = vunpack.c.l.b16 %v577_v13  ;;  %v510_v10 = vmul.f32 0.2, %v442_v23  ;;  %v799_v52 = vshll.u32 %v4559_v24, 16  ;;  %vm476_vm8 = vcmp.gt.f32.partialorder %v442_v23, 0.0 }
  0xf9   : > { %v1513_v32 = vpop.f32.mrf.mxu2  ;;  %v1338_v63 = vpop.f32.mrf.mxu0  ;;  %v964_v36 = vor.u32 %v962_v50, %v960_v47  ;;  %v4589_v50 = vld [vmem:[%s4628_s2] ss:$0 sm:$0xff] }
  0xfa   : > { %v1602_v16 = vpop.f32.mrf.mxu3  ;;  %v1514_v29 = vadd.f32 %v1513_v32, %v1425_v9  ;;  %v1427_v51 = vpop.f32.mrf.mxu1  ;;  %v4561_v38 = vpack.c.b16 %v676_v62, %v642_v6  ;;  %v1339_v26 = vadd.f32 %v4187_v25, %v1338_v63  ;;  %v544_v20 = vsel %vm476_vm8, %v442_v23, %v510_v10 }
  0xfb   : > { %v801_v37 = vrot.slane %v799_v52, 1  ;;  %v578_v53 = vpack.c.bf16 %v544_v20, %v544_v20  ;;  %v677_v35 = vpack.c.b16 %v676_v62, %v676_v62 }
  0xfc   : > { %v1603_v12 = vadd.f32 %v1602_v16, %v1514_v29  ;;  %1377 = vmatmul.bf16.gmra.mxu0 %v4504_v30  ;;  %v795_v30 = vshrl.u32 %v4527_v55, 16  ;;  %v966_v15 = vshll.u32 %v4561_v38, 16  ;;  %v1428_v7 = vadd.f32 %v1427_v51, %v1339_v26 }
  0xfd   : > { %1466 = vmatmul.bf16.gmra.mxu1 %v794_v17  ;;  %v1024_v54 = vrot.slane %v4561_v38, 1  ;;  %v828_v57 = vunpack.c.l.b16 %v578_v53  ;;  %v807_v44 = vshll.u32 %v677_v35, 16  ;;  %v970_v9 = vshrl.u32 %v4561_v38, 16 }
  0xfe   : > { %v3593_v18 = vpack.c.bf16 %v1603_v12, %v1601_v56  ;;  %1555 = vmatmul.bf16.gmra.mxu2 %v961_v43  ;;  %v797_v19 = vor.u32 %v795_v30, %v793_v1  ;;  %v968_v28 = vrot.slane %v966_v15, 1 }
  0xff   : > { %1644 = vmatmul.bf16.gmra.mxu3 %v1023_v4  ;;  %v1025_v2 = vsel %vm994_vm6, %v1022_v59, %v1024_v54  ;;  %v845_v27 = vpack.c.b16 %v828_v57, %v828_v57  ;;  %v803_v59 = vshrl.u32 %v4559_v24, 16  ;;  %v809_v63 = vrot.slane %v807_v44, 1 }
 0x100   : > { %3668 = vst [vmem:[%s4355_s28 + $0x20] sm:$0xff] %v3593_v18   ;;  %v802_v21 = vsel %vm678_vm4, %v797_v19, %v801_v37  ;;  %v969_v22 = vsel %vm678_vm4, %v964_v36, %v968_v28  ;;  %v972_v6 = vor.u32 %v970_v9, %v968_v28 }
 0x101   : > { %v1516_v58 = vpop.f32.mrf.mxu2  ;;  %v1340_v14 = vpop.f32.mrf.mxu0  ;;  %v974_v16 = vshll.u32 %v845_v27, 16  ;;  %v805_v32 = vor.u32 %v803_v59, %v801_v37  ;;  %v1026_v17 = vrot.slane %v845_v27, 1 }
 0x102   : > { %v1605_v48 = vpop.f32.mrf.mxu3  ;;  %v1429_v41 = vpop.f32.mrf.mxu1  ;;  %v1341_v60 = vadd.f32 %v4187_v25, %v1340_v14  ;;  %v1517_v49 = vadd.f32 %v1516_v58, %v1428_v7 }
 0x103   : > { %v976_v11 = vrot.slane %v974_v16, 1  ;;  %v810_v56 = vsel %vm678_vm4, %v805_v32, %v809_v63  ;;  %v1027_v23 = vsel %vm994_vm6, %v1024_v54, %v1026_v17 }
 0x104   : > { %v1430_v34 = vadd.f32 %v1429_v41, %v1341_v60  ;;  %v1606_v1 = vadd.f32 %v1605_v48, %v1517_v49 }
 0x105   : > { %v977_v18 = vsel %vm678_vm4, %v972_v6, %v976_v11 }
 0x109   : > { %v1518_v5 = vpop.f32.mrf.mxu2  ;;  %v1343_v31 = vpop.f32.mrf.mxu0 }
 0x10a   : > { %v1607_v40 = vpop.f32.mrf.mxu3  ;;  %v1519_v42 = vadd.f32 %v1518_v5, %v1430_v34  ;;  %v1432_v46 = vpop.f32.mrf.mxu1  ;;  %v1344_v8 = vadd.f32 %v4187_v25, %v1343_v31 }
 0x10c   : > { %v1608_v33 = vadd.f32 %v1607_v40, %v1519_v42  ;;  %1382 = vmatmul.bf16.gmra.mxu0 %v4527_v55  ;;  %v1433_v55 = vadd.f32 %v1432_v46, %v1344_v8 }
 0x10d   : > { %1471 = vmatmul.bf16.gmra.mxu1 %v802_v21 }
 0x10e   : > { %v3598_v61 = vpack.c.bf16 %v1608_v33, %v1606_v1  ;;  %1560 = vmatmul.bf16.gmra.mxu2 %v969_v22 }
 0x10f   : > { %1649 = vmatmul.bf16.gmra.mxu3 %v1025_v2 }
 0x110   : > { %3669 = vst [vmem:[%s4355_s28 + $0x28] sm:$0xff] %v3598_v61  }
 0x111   : > { %v1521_v0 = vpop.f32.mrf.mxu2  ;;  %v1345_v47 = vpop.f32.mrf.mxu0 }
 0x112   : > { %v1610_v45 = vpop.f32.mrf.mxu3  ;;  %v1434_v3 = vpop.f32.mrf.mxu1  ;;  %v1346_v39 = vadd.f32 %v4187_v25, %v1345_v47  ;;  %v1522_v29 = vadd.f32 %v1521_v0, %v1433_v55 }
 0x114   : > { %v1435_v51 = vadd.f32 %v1434_v3, %v1346_v39  ;;  %v1611_v38 = vadd.f32 %v1610_v45, %v1522_v29 }
 0x119   : > { %v1523_v13 = vpop.f32.mrf.mxu2  ;;  %v1348_v43 = vpop.f32.mrf.mxu0 }
 0x11a   : > { %v1612_v4 = vpop.f32.mrf.mxu3  ;;  %v1524_v12 = vadd.f32 %v1523_v13, %v1435_v51  ;;  %v1437_v62 = vpop.f32.mrf.mxu1  ;;  %v1349_v10 = vadd.f32 %v4187_v25, %v1348_v43 }
 0x11c   : > { %v1613_v26 = vadd.f32 %v1612_v4, %v1524_v12  ;;  %1387 = vmatmul.bf16.gmra.mxu0 %v4559_v24  ;;  %v1438_v41 = vadd.f32 %v1437_v62, %v1349_v10 }
 0x11d   : > { %1476 = vmatmul.bf16.gmra.mxu1 %v810_v56 }
 0x11e   : > { %v3603_v48 = vpack.c.bf16 %v1613_v26, %v1611_v38  ;;  %1565 = vmatmul.bf16.gmra.mxu2 %v977_v18 }
 0x11f   : > { %1654 = vmatmul.bf16.gmra.mxu3 %v1027_v23 }
 0x120   : > { %3670 = vst [vmem:[%s4355_s28 + $0x30] sm:$0xff] %v3603_v48  }
 0x121   : > { %v1526_v14 = vpop.f32.mrf.mxu2  ;;  %v1350_v30 = vpop.f32.mrf.mxu0 }
 0x122   : > { %v1615_v58 = vpop.f32.mrf.mxu3  ;;  %v1439_v52 = vpop.f32.mrf.mxu1  ;;  %v1351_v24 = vadd.f32 %v4589_v50, %v1350_v30  ;;  %v1527_v15 = vadd.f32 %v1526_v14, %v1438_v41 }
 0x124   : > { %v1440_v7 = vadd.f32 %v1439_v52, %v1351_v24  ;;  %v1616_v54 = vadd.f32 %v1615_v58, %v1527_v15 }
 0x129   : > { %v1528_v20 = vpop.f32.mrf.mxu2  ;;  %v1353_v19 = vpop.f32.mrf.mxu0 }
 0x12a   : > { %v1617_v60 = vpop.f32.mrf.mxu3  ;;  %v1529_v37 = vadd.f32 %v1528_v20, %v1440_v7  ;;  %v1442_v25 = vpop.f32.mrf.mxu1  ;;  %v1354_v53 = vadd.f32 %v4589_v50, %v1353_v19 }
 0x12c   : > { %v1618_v36 = vadd.f32 %v1617_v60, %v1529_v37  ;;  %v1443_v31 = vadd.f32 %v1442_v25, %v1354_v53 }
 0x12e   : > { %v3608_v28 = vpack.c.bf16 %v1618_v36, %v1616_v54 }
 0x130   : > { %3671 = vst [vmem:[%s4355_s28 + $0x38] sm:$0xff] %v3608_v28  }
 0x131   : > { %v1531_v34 = vpop.f32.mrf.mxu2  ;;  %v1355_v40 = vpop.f32.mrf.mxu0 }
 0x132   : > { %v1620_v49 = vpop.f32.mrf.mxu3  ;;  %v1444_v5 = vpop.f32.mrf.mxu1  ;;  %v1356_v21 = vadd.f32 %v4589_v50, %v1355_v40  ;;  %v1532_v42 = vadd.f32 %v1531_v34, %v1443_v31 }
 0x134   : > { %v1445_v46 = vadd.f32 %v1444_v5, %v1356_v21  ;;  %v1621_v35 = vadd.f32 %v1620_v49, %v1532_v42 }
 0x139   : > { %v1533_v22 = vpop.f32.mrf.mxu2  ;;  %v1358_v57 = vpop.f32.mrf.mxu0 }
 0x13a   : > { %v1622_v2 = vpop.f32.mrf.mxu3  ;;  %v1534_v1 = vadd.f32 %v1533_v22, %v1445_v46  ;;  %v1447_v33 = vpop.f32.mrf.mxu1  ;;  %v1359_v8 = vadd.f32 %v4589_v50, %v1358_v57 }
 0x13c   : > { %v1623_v61 = vadd.f32 %v1622_v2, %v1534_v1  ;;  %v1448_v44 = vadd.f32 %v1447_v33, %v1359_v8 }
 0x13e   : > { %v3613_v27 = vpack.c.bf16 %v1623_v61, %v1621_v35 }
 0x140   : > { %3672 = vst [vmem:[%s4355_s28 + $0x40] sm:$0xff] %v3613_v27  }
 0x141   : > { %v1536_v0 = vpop.f32.mrf.mxu2  ;;  %v1360_v47 = vpop.f32.mrf.mxu0 }
 0x142   : > { %v1625_v45 = vpop.f32.mrf.mxu3  ;;  %v1449_v59 = vpop.f32.mrf.mxu1  ;;  %v1361_v3 = vadd.f32 %v4589_v50, %v1360_v47  ;;  %v1537_v9 = vadd.f32 %v1536_v0, %v1448_v44 }
 0x144   : > { %v1450_v16 = vadd.f32 %v1449_v59, %v1361_v3  ;;  %v1626_v6 = vadd.f32 %v1625_v45, %v1537_v9 }
 0x149   : > { %v1538_v39 = vpop.f32.mrf.mxu2  ;;  %v1363_v32 = vpop.f32.mrf.mxu0 }
 0x14a   : > { %v1627_v55 = vpop.f32.mrf.mxu3  ;;  %v1539_v63 = vadd.f32 %v1538_v39, %v1450_v16  ;;  %v1452_v17 = vpop.f32.mrf.mxu1  ;;  %v1364_v51 = vadd.f32 %v4589_v50, %v1363_v32 }
 0x14c   : > { %v1628_v11 = vadd.f32 %v1627_v55, %v1539_v63  ;;  %v1453_v12 = vadd.f32 %v1452_v17, %v1364_v51 }
 0x14e   : > { %v3618_v29 = vpack.c.bf16 %v1628_v11, %v1626_v6 }
 0x150   : > { %3673 = vst [vmem:[%s4355_s28 + $0x48] sm:$0xff] %v3618_v29  }
 0x151   : > { %v1541_v13 = vpop.f32.mrf.mxu2  ;;  %v1365_v43 = vpop.f32.mrf.mxu0 }
 0x152   : > { %v1630_v4 = vpop.f32.mrf.mxu3  ;;  %v1454_v56 = vpop.f32.mrf.mxu1  ;;  %v1366_v62 = vadd.f32 %v4589_v50, %v1365_v43  ;;  %v1542_v23 = vadd.f32 %v1541_v13, %v1453_v12 }
 0x154   : > { %v1455_v18 = vadd.f32 %v1454_v56, %v1366_v62  ;;  %v1631_v14 = vadd.f32 %v1630_v4, %v1542_v23 }
 0x159   : > { %v1543_v26 = vpop.f32.mrf.mxu2  ;;  %v1368_v48 = vpop.f32.mrf.mxu0 }
 0x15a   : > { %v1632_v38 = vpop.f32.mrf.mxu3  ;;  %v1544_v10 = vadd.f32 %v1543_v26, %v1455_v18  ;;  %v1457_v58 = vpop.f32.mrf.mxu1  ;;  %v1369_v41 = vadd.f32 %v4589_v50, %v1368_v48 }
 0x15c   : > { %v1633_v30 = vadd.f32 %v1632_v38, %v1544_v10  ;;  %v1458_v20 = vadd.f32 %v1457_v58, %v1369_v41 }
 0x15e   : > { %v3623_v52 = vpack.c.bf16 %v1633_v30, %v1631_v14 }
 0x160   : > { %3674 = vst [vmem:[%s4355_s28 + $0x50] sm:$0xff] %v3623_v52  }
 0x161   : > { %v1546_v15 = vpop.f32.mrf.mxu2  ;;  %v1370_v7 = vpop.f32.mrf.mxu0 }
 0x162   : > { %v1635_v24 = vpop.f32.mrf.mxu3  ;;  %v1459_v60 = vpop.f32.mrf.mxu1  ;;  %v1371_v19 = vadd.f32 %v4589_v50, %v1370_v7  ;;  %v1547_v37 = vadd.f32 %v1546_v15, %v1458_v20 }
 0x164   : > { %v1460_v25 = vadd.f32 %v1459_v60, %v1371_v19  ;;  %v1636_v34 = vadd.f32 %v1635_v24, %v1547_v37 }
 0x169   : > { %v1548_v36 = vpop.f32.mrf.mxu2  ;;  %v1373_v28 = vpop.f32.mrf.mxu0 }
 0x16a   : > { %v1637_v54 = vpop.f32.mrf.mxu3  ;;  %v1549_v53 = vadd.f32 %v1548_v36, %v1460_v25  ;;  %v1462_v49 = vpop.f32.mrf.mxu1  ;;  %v1374_v31 = vadd.f32 %v4589_v50, %v1373_v28 }
 0x16c   : > { %v1638_v40 = vadd.f32 %v1637_v54, %v1549_v53  ;;  %v1463_v22 = vadd.f32 %v1462_v49, %v1374_v31 }
 0x16e   : > { %v3628_v5 = vpack.c.bf16 %v1638_v40, %v1636_v34 }
 0x170   : > { %3675 = vst [vmem:[%s4355_s28 + $0x58] sm:$0xff] %v3628_v5  }
 0x171   : > { %v1551_v42 = vpop.f32.mrf.mxu2  ;;  %v1375_v46 = vpop.f32.mrf.mxu0 }
 0x172   : > { %v1640_v21 = vpop.f32.mrf.mxu3  ;;  %v1464_v2 = vpop.f32.mrf.mxu1  ;;  %v1376_v57 = vadd.f32 %v4589_v50, %v1375_v46  ;;  %v1552_v1 = vadd.f32 %v1551_v42, %v1463_v22 }
 0x174   : > { %v1465_v33 = vadd.f32 %v1464_v2, %v1376_v57  ;;  %v1641_v0 = vadd.f32 %v1640_v21, %v1552_v1 }
 0x179   : > { %v1553_v61 = vpop.f32.mrf.mxu2  ;;  %v1378_v27 = vpop.f32.mrf.mxu0 }
 0x17a   : > { %v1642_v35 = vpop.f32.mrf.mxu3  ;;  %v1554_v8 = vadd.f32 %v1553_v61, %v1465_v33  ;;  %v1467_v45 = vpop.f32.mrf.mxu1  ;;  %v1379_v44 = vadd.f32 %v4589_v50, %v1378_v27 }
 0x17c   : > { %v1643_v47 = vadd.f32 %v1642_v35, %v1554_v8  ;;  %v1468_v39 = vadd.f32 %v1467_v45, %v1379_v44 }
 0x17e   : > { %v3633_v59 = vpack.c.bf16 %v1643_v47, %v1641_v0 }
 0x180   : > { %3676 = vst [vmem:[%s4355_s28 + $0x60] sm:$0xff] %v3633_v59  }
 0x181   : > { %v1556_v9 = vpop.f32.mrf.mxu2  ;;  %v1380_v16 = vpop.f32.mrf.mxu0 }
 0x182   : > { %v1645_v3 = vpop.f32.mrf.mxu3  ;;  %v1469_v55 = vpop.f32.mrf.mxu1  ;;  %v1381_v32 = vadd.f32 %v4589_v50, %v1380_v16  ;;  %v1557_v63 = vadd.f32 %v1556_v9, %v1468_v39 }
 0x184   : > { %v1470_v17 = vadd.f32 %v1469_v55, %v1381_v32  ;;  %v1646_v13 = vadd.f32 %v1645_v3, %v1557_v63 }
 0x189   : > { %v1558_v11 = vpop.f32.mrf.mxu2  ;;  %v1383_v29 = vpop.f32.mrf.mxu0 }
 0x18a   : > { %v1647_v6 = vpop.f32.mrf.mxu3  ;;  %v1559_v51 = vadd.f32 %v1558_v11, %v1470_v17  ;;  %v1472_v4 = vpop.f32.mrf.mxu1  ;;  %v1384_v12 = vadd.f32 %v4589_v50, %v1383_v29 }
 0x18c   : > { %v1648_v43 = vadd.f32 %v1647_v6, %v1559_v51  ;;  %v1473_v26 = vadd.f32 %v1472_v4, %v1384_v12 }
 0x18e   : > { %v3638_v56 = vpack.c.bf16 %v1648_v43, %v1646_v13 }
 0x190   : > { %3677 = vst [vmem:[%s4355_s28 + $0x68] sm:$0xff] %v3638_v56  }
 0x191   : > { %v1561_v23 = vpop.f32.mrf.mxu2  ;;  %v1385_v18 = vpop.f32.mrf.mxu0 }
 0x192   : > { %v1650_v62 = vpop.f32.mrf.mxu3  ;;  %v1474_v38 = vpop.f32.mrf.mxu1  ;;  %v1386_v48 = vadd.f32 %v4589_v50, %v1385_v18  ;;  %v1562_v10 = vadd.f32 %v1561_v23, %v1473_v26 }
 0x194   : > { %v1475_v58 = vadd.f32 %v1474_v38, %v1386_v48  ;;  %v1651_v24 = vadd.f32 %v1650_v62, %v1562_v10 }
 0x199   : > { %v1563_v30 = vpop.f32.mrf.mxu2  ;;  %v1388_v52 = vpop.f32.mrf.mxu0 }
 0x19a   : > { %v1652_v14 = vpop.f32.mrf.mxu3  ;;  %v1564_v41 = vadd.f32 %v1563_v30, %v1475_v58  ;;  %v1477_v7 = vpop.f32.mrf.mxu1  ;;  %v1389_v20 = vadd.f32 %v4589_v50, %v1388_v52 }
 0x19c   : > { %v1653_v15 = vadd.f32 %v1652_v14, %v1564_v41  ;;  %v1478_v54 = vadd.f32 %v1477_v7, %v1389_v20 }
 0x19e   : > { %v3643_v60 = vpack.c.bf16 %v1653_v15, %v1651_v24 }
 0x1a0   : > { %3678 = vst [vmem:[%s4355_s28 + $0x70] sm:$0xff] %v3643_v60  }
 0x1a1   : > { %v1566_v37 = vpop.f32.mrf.mxu2  ;;  %v1390_v25 = vpop.f32.mrf.mxu0 }
 0x1a2   : > { %v1655_v19 = vpop.f32.mrf.mxu3  ;;  %v1391_v36 = vadd.f32 %v4589_v50, %v1390_v25  ;;  %v1479_v28 = vpop.f32.mrf.mxu1  ;;  %v1567_v53 = vadd.f32 %v1566_v37, %v1478_v54 }
 0x1a4   : > { %v1480_v49 = vadd.f32 %v1479_v28, %v1391_v36  ;;  %v1656_v31 = vadd.f32 %v1655_v19, %v1567_v53 }
 0x1a9   : > { %v1568_v34 = vpop.f32.mrf.mxu2 }
 0x1aa   : > { %v1569_v40 = vadd.f32 %v1568_v34, %v1480_v49  ;;  %v1657_v5 = vpop.f32.mrf.mxu3 }
 0x1ac   : > { %v1658_v21 = vadd.f32 %v1657_v5, %v1569_v40 }
 0x1ae   : > { %v3648_v42 = vpack.c.bf16 %v1658_v21, %v1656_v31 }
 0x1b0   : > { %3679 = vst [vmem:[%s4355_s28 + $0x78] sm:$0xff] %v3648_v42  }
 0x1b1 PF: > { %s17_s23 = sadd.s32 1, %s3734_s23   ;;  %s4657_s21 = smov %s3730_s22 }
 0x1b2   : > { %p14_p5 = scmp.ge.s32.totalorder %s17_s23, 4   ;;  %s4658_s22 = smov %s4660_s24 }
 0x1b4   :  { %16 = sbr.rel (!%p14_p5) target bundleno = 2 (0x2), region = 83 }

// kernel: classification_network_forward.6
= control target key start
LH: loop header
LB: loop body
LE: loop exit
PB: predicated region body
PF: predicated region fallthrough
CT: control target
= control target key end

     0   :  { %s4217_s21 = smov 0   ;;  %s4219_s22 = smov 0   ;;  %s5416_s0 = inlined_call_operand.vmem [shape: bf16[2,261,256], index: 0, kind: input, shape index: {}]   ;;  %s5417_s1 = inlined_call_operand.vmem [shape: bf16[1024,128], index: 1, kind: input, shape index: {}]   ;;  %s5418_s2 = inlined_call_operand.vmem [shape: f32[1,128], index: 2, kind: input, shape index: {}]   ;;  %s5419_s3 = inlined_call_operand.vmem [shape: f32[1,256], index: 3, kind: input, shape index: {}]   ;;  %s5420_s4 = inlined_call_operand.vmem [shape: f32[1,256], index: 4, kind: input, shape index: {}]   ;;  %s5421_s5 = inlined_call_operand.vmem [shape: bf16[2,256,128], index: 5, kind: output, shape index: {0}]   ;;  %s5422_s6 = inlined_call_operand.vmem [shape: f32[2,1,2,128], index: 6, kind: output, shape index: {1}]  }
   0x1   :  { %s4221_s23 = smov 0  }
   0x2 LB: > { %s29_s24 = sadd.s32 1, %s4176_s22  ;;  %p3708_p0 = scmp.ge.s32.totalorder %s4180_s23, 1  ;;  %s4180_s23 = sphi %s4221_s23, %s17_s23   ;;  %s4176_s22 = sphi %s4219_s22, %s5590_s22   ;;  %s4172_s21 = sphi %s4217_s21, %s5589_s21  }
   0x3   : > { %p31_p1 = scmp.ge.s32.totalorder %s29_s24, 2  ;;  %p231_p2 = scmp.lt.s32.totalorder %s4180_s23, 3 }
   0x5   : > { %s5592_s24 = smov (%p31_p1, %s29_s24), 0  ;;  %p232_p3 = pnand %p3708_p0, %p231_p2 }
   0x7   : > { %235 = sbr.rel (%p232_p3) target bundleno = 691 (0x2b3), region = 40 }
   0xc   : > { %v3979_v0 = vld [vmem:[%s5417_s1 + $0x38] sm:$0xff]  ;;  %p272_p4 = scmp.lt.s32.totalorder %s4172_s21, 1  ;;  %v3978_v4 = vld [vmem:[%s5417_s1 + $0x30] sm:$0xff]  ;;  %v3977_v8 = vld [vmem:[%s5417_s1 + $0x28] sm:$0xff]  ;;  %vm939_vm8 = vsmask.f32 7424 }
   0xd   : > { %v3987_v1 = vld [vmem:[%s5417_s1 + $0x78] sm:$0xff]  ;;  %2022 = vmatpush.bf16.msra.mxu0 %v3979_v0  ;;  %v3986_v5 = vld [vmem:[%s5417_s1 + $0x70] sm:$0xff]  ;;  %v3985_v9 = vld [vmem:[%s5417_s1 + $0x68] sm:$0xff] }
   0xe   : > { %v3995_v2 = vld [vmem:[%s5417_s1 + $0xb8] sm:$0xff]  ;;  %2111 = vmatpush.bf16.msra.mxu1 %v3987_v1  ;;  %s5594_s21 = smov (!%p272_p4, %s4172_s21), 1  ;;  %v3994_v6 = vld [vmem:[%s5417_s1 + $0xb0] sm:$0xff]  ;;  %v3993_v10 = vld [vmem:[%s5417_s1 + $0xa8] sm:$0xff] }
   0xf   : > { %v4003_v3 = vld [vmem:[%s5417_s1 + $0xf8] sm:$0xff]  ;;  %2200 = vmatpush.bf16.msra.mxu2 %v3995_v2  ;;  %v4002_v7 = vld [vmem:[%s5417_s1 + $0xf0] sm:$0xff]  ;;  %s4131_s17 = smul.u32 264, %s5594_s21  ;;  %v4001_v11 = vld [vmem:[%s5417_s1 + $0xe8] sm:$0xff]  ;;  %s3971_s29 = sshll.u32 %s5594_s21, 7 }
  0x10   : > { %2289 = vmatpush.bf16.msra.mxu3 %v4003_v3  ;;  %v3976_v12 = vld [vmem:[%s5417_s1 + $0x20] sm:$0xff]  ;;  %v3975_v32 = vld [vmem:[%s5417_s1 + $0x18] sm:$0xff]  ;;  %v3974_v48 = vld [vmem:[%s5417_s1 + $0x10] sm:$0xff]  ;;  %s3712_s30 = sshll.u32 %s5594_s21, 1  ;;  %s5270_s10 = scalar_lea.vmem %s5421_s5, %s3971_s29 }
  0x11   : > { %2023 = vmatpush.bf16.msra.mxu0 %v3978_v4  ;;  %s4277_s8 = scalar_lea.vmem %s5416_s0, %s4131_s17  ;;  %v3984_v13 = vld [vmem:[%s5417_s1 + $0x60] sm:$0xff]  ;;  %v3983_v33 = vld [vmem:[%s5417_s1 + $0x58] sm:$0xff]  ;;  %v3982_v49 = vld [vmem:[%s5417_s1 + $0x50] sm:$0xff]  ;;  %s293_s13 = scalar_lea.vmem %s5422_s6, %s3712_s30 }
  0x12   : > { %2112 = vmatpush.bf16.msra.mxu1 %v3986_v5  ;;  %v3992_v14 = vld [vmem:[%s5417_s1 + $0xa0] sm:$0xff]  ;;  %v301_v17 = vld [vmem:[%s4277_s8 + $0x8] sm:$0xff]  ;;  %v302_v26 = vld [vmem:[%s4277_s8 + $0x10] sm:$0xff] }
  0x13   : > { %2201 = vmatpush.bf16.msra.mxu2 %v3994_v6  ;;  %v4000_v15 = vld [vmem:[%s5417_s1 + $0xe0] sm:$0xff]  ;;  %v335_v22 = vunpack.c.l.bf16 %v301_v17  ;;  %v336_v23 = vunpack.c.h.bf16 %v301_v17  ;;  %v303_v27 = vld [vmem:[%s4277_s8 + $0x18] sm:$0xff]  ;;  %v337_v30 = vunpack.c.l.bf16 %v302_v26  ;;  %v338_v31 = vunpack.c.h.bf16 %v302_v26  ;;  %v3990_v54 = vld [vmem:[%s5417_s1 + $0x90] sm:$0xff] }
  0x14   : > { %2290 = vmatpush.bf16.msra.mxu3 %v4002_v7  ;;  %v300_v16 = vld [vmem:[%s4277_s8] sm:$0xff]  ;;  %v339_v37 = vunpack.c.l.bf16 %v303_v27  ;;  %v3991_v38 = vld [vmem:[%s5417_s1 + $0x98] sm:$0xff]  ;;  %v340_v41 = vunpack.c.h.bf16 %v303_v27  ;;  %v3998_v56 = vld [vmem:[%s5417_s1 + $0xd0] sm:$0xff] }
  0x15   : > { %2024 = vmatpush.bf16.msra.mxu0 %v3977_v8  ;;  %v333_v18 = vunpack.c.l.bf16 %v300_v16  ;;  %v334_v19 = vunpack.c.h.bf16 %v300_v16  ;;  %v399_v20 = vld [vmem:[%s5419_s3] sm:$0x3]  ;;  %v3999_v39 = vld [vmem:[%s5417_s1 + $0xd8] sm:$0xff]  ;;  %v3973_v63 = vld [vmem:[%s5417_s1 + $0x8] sm:$0xff] }
  0x16   : > { %2113 = vmatpush.bf16.msra.mxu1 %v3985_v9  ;;  %v471_v21 = vld [vmem:[%s5420_s4] sm:$0x3]  ;;  %v4299_v24 = vperm.slane %v399_v20, 0  ;;  %v4301_v25 = vperm.slane %v399_v20, 1  ;;  %v3981_v0 = vld [vmem:[%s5417_s1 + $0x48] sm:$0xff] }
  0x17   : > { %2202 = vmatpush.bf16.msra.mxu2 %v3993_v10  ;;  %v4305_v28 = vperm.slane %v471_v21, 0  ;;  %v4307_v29 = vperm.slane %v471_v21, 1  ;;  %v304_v3 = vld [vmem:[%s4277_s8 + $0x20] sm:$0xff]  ;;  %v3989_v4 = vld [vmem:[%s5417_s1 + $0x88] sm:$0xff] }
  0x18   : > { %2291 = vmatpush.bf16.msra.mxu3 %v4001_v11  ;;  %v405_v34 = vmul.f32 %v4299_v24, %v333_v18  ;;  %v406_v35 = vmul.f32 %v4301_v25, %v334_v19  ;;  %v407_v36 = vmul.f32 %v4299_v24, %v335_v22  ;;  %v408_v40 = vmul.f32 %v4301_v25, %v336_v23  ;;  %v3997_v5 = vld [vmem:[%s5417_s1 + $0xc8] sm:$0xff]  ;;  %v3972_v22 = vld [vmem:[%s5417_s1] sm:$0xff] }
  0x19   : > { %2025 = vmatpush.bf16.msra.mxu0 %v3976_v12  ;;  %v409_v42 = vmul.f32 %v4299_v24, %v337_v30  ;;  %v410_v43 = vmul.f32 %v4301_v25, %v338_v31  ;;  %v411_v47 = vmul.f32 %v4299_v24, %v339_v37  ;;  %v412_v51 = vmul.f32 %v4301_v25, %v340_v41  ;;  %v305_v9 = vld [vmem:[%s4277_s8 + $0x28] sm:$0xff]  ;;  %v3980_v23 = vld [vmem:[%s5417_s1 + $0x40] sm:$0xff]  ;;  %v4011_v41 = vld [vmem:[%s5417_s1 + $0x138] sm:$0xff] }
  0x1a   : > { %2114 = vmatpush.bf16.msra.mxu1 %v3984_v13  ;;  %v477_v44 = vadd.f32 %v4305_v28, %v405_v34  ;;  %v478_v45 = vadd.f32 %v4307_v29, %v406_v35  ;;  %v479_v46 = vadd.f32 %v4305_v28, %v407_v36  ;;  %v480_v50 = vadd.f32 %v4307_v29, %v408_v40  ;;  %v4027_v40 = vld [vmem:[%s5417_s1 + $0x1b8] sm:$0xff] }
  0x1b   : > { %2203 = vmatpush.bf16.msra.mxu2 %v3992_v14  ;;  %v481_v52 = vadd.f32 %v4305_v28, %v409_v42  ;;  %v482_v53 = vadd.f32 %v4307_v29, %v410_v43  ;;  %v483_v59 = vadd.f32 %v4305_v28, %v411_v47  ;;  %v484_v62 = vadd.f32 %v4307_v29, %v412_v51  ;;  %v4019_v51 = vld [vmem:[%s5417_s1 + $0x178] sm:$0xff] }
  0x1c   : > { %2292 = vmatpush.bf16.msra.mxu3 %v4000_v15  ;;  %vm543_vm0 = vcmp.gt.f32.partialorder %v477_v44, 0.0  ;;  %vm544_vm1 = vcmp.gt.f32.partialorder %v478_v45, 0.0  ;;  %vm545_vm2 = vcmp.gt.f32.partialorder %v479_v46, 0.0  ;;  %v609_v55 = vmul.f32 0.2, %v477_v44 }
  0x1d   : > { %2026 = vmatpush.bf16.msra.mxu0 %v3975_v32  ;;  %vm546_vm3 = vcmp.gt.f32.partialorder %v480_v50, 0.0  ;;  %v610_v57 = vmul.f32 0.2, %v478_v45  ;;  %v611_v58 = vmul.f32 0.2, %v479_v46  ;;  %vm547_vm4 = vcmp.gt.f32.partialorder %v481_v52, 0.0 }
  0x1e   : > { %2115 = vmatpush.bf16.msra.mxu1 %v3983_v33  ;;  %v612_v60 = vmul.f32 0.2, %v480_v50  ;;  %v675_v61 = vsel %vm543_vm0, %v477_v44, %v609_v55  ;;  %vm548_vm5 = vcmp.gt.f32.partialorder %v482_v53, 0.0  ;;  %vm549_vm6 = vcmp.gt.f32.partialorder %v483_v59, 0.0  ;;  %v3988_v32 = vld [vmem:[%s5417_s1 + $0x80] sm:$0xff] }
  0x1f   : > { %2204 = vmatpush.bf16.msra.mxu2 %v3991_v38  ;;  %v676_v1 = vsel %vm544_vm1, %v478_v45, %v610_v57  ;;  %v677_v2 = vsel %vm545_vm2, %v479_v46, %v611_v58  ;;  %vm550_vm7 = vcmp.gt.f32.partialorder %v484_v62, 0.0  ;;  %v613_v8 = vmul.f32 0.2, %v481_v52  ;;  %v3996_v33 = vld [vmem:[%s5417_s1 + $0xc0] sm:$0xff] }
  0x20   : > { %2293 = vmatpush.bf16.msra.mxu3 %v3999_v39  ;;  %v678_v6 = vsel %vm546_vm3, %v480_v50, %v612_v60  ;;  %v741_v7 = vpack.c.bf16 %v676_v1, %v675_v61  ;;  %v614_v11 = vmul.f32 0.2, %v482_v53  ;;  %v615_v12 = vmul.f32 0.2, %v483_v59  ;;  %v4035_v50 = vld [vmem:[%s5417_s1 + $0x1f8] sm:$0xff] }
  0x21   : > { %2027 = vmatpush.bf16.msra.mxu0 %v3974_v48  ;;  %v742_v10 = vpack.c.bf16 %v678_v6, %v677_v2  ;;  %v616_v13 = vmul.f32 0.2, %v484_v62  ;;  %v679_v16 = vsel %vm547_vm4, %v481_v52, %v613_v8  ;;  %v341_v17 = vunpack.c.l.bf16 %v304_v3 }
  0x22   : > { %2116 = vmatpush.bf16.msra.mxu1 %v3982_v49  ;;  %v806_v14 = vunpack.c.l.b16 %v741_v7  ;;  %v807_v15 = vunpack.c.h.b16 %v741_v7  ;;  %v680_v20 = vsel %vm548_vm5, %v482_v53, %v614_v11  ;;  %v681_v21 = vsel %vm549_vm6, %v483_v59, %v615_v12 }
  0x23   : > { %2205 = vmatpush.bf16.msra.mxu2 %v3990_v54  ;;  %v808_v18 = vunpack.c.l.b16 %v742_v10  ;;  %v809_v19 = vunpack.c.h.b16 %v742_v10  ;;  %v682_v26 = vsel %vm550_vm7, %v484_v62, %v616_v13  ;;  %v743_v27 = vpack.c.bf16 %v680_v20, %v679_v16  ;;  %v4010_v16 = vld [vmem:[%s5417_s1 + $0x130] sm:$0xff] }
  0x24   : > { %2294 = vmatpush.bf16.msra.mxu3 %v3998_v56  ;;  %v342_v30 = vunpack.c.h.bf16 %v304_v3  ;;  %v343_v31 = vunpack.c.l.bf16 %v305_v9  ;;  %v744_v36 = vpack.c.bf16 %v682_v26, %v681_v21  ;;  %v344_v37 = vunpack.c.h.bf16 %v305_v9  ;;  %v307_v21 = vld [vmem:[%s4277_s8 + $0x38] sm:$0xff] }
  0x25   : > { %2028 = vmatpush.bf16.msra.mxu0 %v3973_v63  ;;  %v4382_v34 = vpack.c.b16 %v808_v18, %v806_v14  ;;  %v4384_v35 = vpack.c.b16 %v809_v19, %v807_v15  ;;  %v810_v38 = vunpack.c.l.b16 %v743_v27  ;;  %v811_v39 = vunpack.c.h.b16 %v743_v27  ;;  %v4026_v15 = vld [vmem:[%s5417_s1 + $0x1b0] sm:$0xff] }
  0x26   : > { %2117 = vmatpush.bf16.msra.mxu1 %v3981_v0  ;;  %v413_v42 = vmul.f32 %v4299_v24, %v341_v17  ;;  %v414_v43 = vmul.f32 %v4301_v25, %v342_v30  ;;  %v812_v44 = vunpack.c.l.b16 %v744_v36  ;;  %v813_v47 = vunpack.c.h.b16 %v744_v36  ;;  %v4034_v17 = vld [vmem:[%s5417_s1 + $0x1f0] sm:$0xff]  ;;  %v308_v30 = vld [vmem:[%s4277_s8 + $0x40] sm:$0xff] }
  0x27   : > { %2206 = vmatpush.bf16.msra.mxu2 %v3989_v4  ;;  %v5464_v45 = vshrl.u32 %v4382_v34, 16  ;;  %v5460_v46 = vshll.u32 %v4382_v34, 16  ;;  %v5462_v48 = vshrl.u32 %v4384_v35, 16  ;;  %v5455_v49 = vshll.u32 %v4384_v35, 16  ;;  %v306_v4 = vld [vmem:[%s4277_s8 + $0x30] sm:$0xff] }
  0x28   : > { %2295 = vmatpush.bf16.msra.mxu3 %v3997_v5  ;;  %v415_v52 = vmul.f32 %v4299_v24, %v343_v31  ;;  %v416_v53 = vmul.f32 %v4301_v25, %v344_v37  ;;  %v4406_v54 = vpack.c.b16 %v812_v44, %v810_v38  ;;  %v4410_v56 = vpack.c.b16 %v813_v47, %v811_v39 }
  0x29   : > { %2029 = vmatpush.bf16.msra.mxu0 %v3972_v22  ;;  %v945_v55 = vrot.slane %v5460_v46, 1  ;;  %v957_v57 = vrot.slane %v5455_v49, 1  ;;  %v485_v58 = vadd.f32 %v4305_v28, %v413_v42  ;;  %v486_v59 = vadd.f32 %v4307_v29, %v414_v43 }
  0x2a   : > { %2118 = vmatpush.bf16.msra.mxu1 %v3980_v23  ;;  %v5463_v61 = vshll.u32 %v4406_v54, 16  ;;  %v5454_v62 = vshll.u32 %v4410_v56, 16  ;;  %v487_v63 = vadd.f32 %v4305_v28, %v415_v52  ;;  %v488_v1 = vadd.f32 %v4307_v29, %v416_v53  ;;  %v4018_v23 = vld [vmem:[%s5417_s1 + $0x170] sm:$0xff] }
  0x2b   : > { %2207 = vmatpush.bf16.msra.mxu2 %v3988_v32  ;;  %v946_v60 = vor.u32 %v945_v55, %v5464_v45  ;;  %v958_v0 = vor.u32 %v957_v57, %v5462_v48  ;;  %vm551_vm9 = vcmp.gt.f32.partialorder %v485_v58, 0.0  ;;  %vm552_vm10 = vcmp.gt.f32.partialorder %v486_v59, 0.0 }
  0x2c   : > { %2296 = vmatpush.bf16.msra.mxu3 %v3996_v33  ;;  %2030 = vmatmul.bf16.vlgmr.msra.gmra.mxu0 %v4382_v34  ;;  %v950_v2 = vrot.slane %v5463_v61, 1  ;;  %v962_v3 = vrot.slane %v5454_v62, 1  ;;  %vm553_vm11 = vcmp.gt.f32.partialorder %v487_v63, 0.0  ;;  %vm554_vm12 = vcmp.gt.f32.partialorder %v488_v1, 0.0 }
  0x2d   : > { %2378 = vmatpush.bf16.msrb.mxu0 %v4011_v41  ;;  %2119 = vmatmul.bf16.vlgmr.msra.gmra.mxu1 %v4384_v35  ;;  %v617_v5 = vmul.f32 0.2, %v485_v58  ;;  %v618_v6 = vmul.f32 0.2, %v486_v59  ;;  %v619_v9 = vmul.f32 0.2, %v487_v63  ;;  %v345_v22 = vunpack.c.l.bf16 %v306_v4 }
  0x2e   : > { %2467 = vmatpush.bf16.msrb.mxu1 %v4019_v51  ;;  %v951_v7 = vsel %vm939_vm8, %v946_v60, %v950_v2  ;;  %v963_v8 = vsel %vm939_vm8, %v958_v0, %v962_v3  ;;  %v620_v10 = vmul.f32 0.2, %v488_v1  ;;  %v5461_v13 = vshrl.u32 %v4406_v54, 16  ;;  %v309_v41 = vld [vmem:[%s4277_s8 + $0x48] sm:$0xff] }
  0x2f   : > { %2556 = vmatpush.bf16.msrb.mxu2 %v4027_v40  ;;  %2297 = vmatmul.bf16.vlgmr.msra.gmra.mxu3 %v963_v8  ;;  %v683_v11 = vsel %vm551_vm9, %v485_v58, %v617_v5  ;;  %v684_v12 = vsel %vm552_vm10, %v486_v59, %v618_v6  ;;  %v5453_v14 = vshrl.u32 %v4410_v56, 16  ;;  %v685_v18 = vsel %vm553_vm11, %v487_v63, %v619_v9 }
  0x30   : > { %2645 = vmatpush.bf16.msrb.mxu3 %v4035_v50  ;;  %2208 = vmatmul.bf16.vlgmr.msra.gmra.mxu2 %v951_v7  ;;  %v686_v19 = vsel %vm554_vm12, %v488_v1, %v620_v10  ;;  %v745_v20 = vpack.c.bf16 %v684_v12, %v683_v11  ;;  %v966_v27 = vor.u32 %v5461_v13, %v950_v2  ;;  %v346_v36 = vunpack.c.h.bf16 %v306_v4 }
  0x31   : > { %v746_v26 = vpack.c.bf16 %v686_v19, %v685_v18  ;;  %2379 = vmatpush.bf16.msrb.mxu0 %v4010_v16  ;;  %v974_v33 = vor.u32 %v5453_v14, %v962_v3  ;;  %v347_v39 = vunpack.c.l.bf16 %v307_v21  ;;  %v348_v40 = vunpack.c.h.bf16 %v307_v21 }
  0x32   : > { %v814_v31 = vunpack.c.l.b16 %v745_v20  ;;  %v815_v32 = vunpack.c.h.b16 %v745_v20  ;;  %2468 = vmatpush.bf16.msrb.mxu1 %v4018_v23  ;;  %v417_v42 = vmul.f32 %v4299_v24, %v345_v22  ;;  %v418_v43 = vmul.f32 %v4301_v25, %v346_v36 }
  0x33   : > { %2557 = vmatpush.bf16.msrb.mxu2 %v4026_v15  ;;  %v816_v37 = vunpack.c.l.b16 %v746_v26  ;;  %v817_v38 = vunpack.c.h.b16 %v746_v26  ;;  %v349_v44 = vunpack.c.l.bf16 %v308_v30  ;;  %v350_v47 = vunpack.c.h.bf16 %v308_v30 }
  0x34   : > { %2646 = vmatpush.bf16.msrb.mxu3 %v4034_v17  ;;  %v419_v52 = vmul.f32 %v4299_v24, %v347_v39  ;;  %v420_v53 = vmul.f32 %v4301_v25, %v348_v40  ;;  %v489_v55 = vadd.f32 %v4305_v28, %v417_v42  ;;  %v490_v57 = vadd.f32 %v4307_v29, %v418_v43  ;;  %v310_v39 = vld [vmem:[%s4277_s8 + $0x50] sm:$0xff] }
  0x35   : > { %v4458_v50 = vpack.c.b16 %v816_v37, %v814_v31  ;;  %v4460_v51 = vpack.c.b16 %v817_v38, %v815_v32  ;;  %v351_v58 = vunpack.c.l.bf16 %v309_v41  ;;  %v352_v59 = vunpack.c.h.bf16 %v309_v41  ;;  %v311_v41 = vld [vmem:[%s4277_s8 + $0x58] sm:$0xff] }
  0x36   : > { %v491_v0 = vadd.f32 %v4305_v28, %v419_v52  ;;  %v492_v1 = vadd.f32 %v4307_v29, %v420_v53  ;;  %vm555_vm13 = vcmp.gt.f32.partialorder %v489_v55, 0.0  ;;  %vm556_vm14 = vcmp.gt.f32.partialorder %v490_v57, 0.0 }
  0x37   : > { %v5451_v60 = vshll.u32 %v4458_v50, 16  ;;  %v5449_v63 = vshll.u32 %v4460_v51, 16  ;;  %v621_v2 = vmul.f32 0.2, %v489_v55  ;;  %v622_v3 = vmul.f32 0.2, %v490_v57 }
  0x38   : > { %vm557_vm15 = vcmp.gt.f32.partialorder %v491_v0, 0.0  ;;  %vm558_vm0 = vcmp.gt.f32.partialorder %v492_v1, 0.0  ;;  %v623_v6 = vmul.f32 0.2, %v491_v0  ;;  %v624_v7 = vmul.f32 0.2, %v492_v1 }
  0x39   : > { %v970_v4 = vrot.slane %v5451_v60, 1  ;;  %v978_v5 = vrot.slane %v5449_v63, 1  ;;  %v687_v8 = vsel %vm555_vm13, %v489_v55, %v621_v2  ;;  %v688_v9 = vsel %vm556_vm14, %v490_v57, %v622_v3 }
  0x3a   : > { %v747_v11 = vpack.c.bf16 %v688_v9, %v687_v8  ;;  %v689_v15 = vsel %vm557_vm15, %v491_v0, %v623_v6  ;;  %v690_v16 = vsel %vm558_vm0, %v492_v1, %v624_v7  ;;  %v421_v17 = vmul.f32 %v4299_v24, %v349_v44 }
  0x3b   : > { %v971_v10 = vsel %vm939_vm8, %v966_v27, %v970_v4  ;;  %v979_v12 = vsel %vm939_vm8, %v974_v33, %v978_v5  ;;  %v748_v18 = vpack.c.bf16 %v690_v16, %v689_v15  ;;  %v422_v21 = vmul.f32 %v4301_v25, %v350_v47 }
  0x3c   : > { %2035 = vmatmul.bf16.gmra.mxu0 %v4406_v54  ;;  %v818_v19 = vunpack.c.l.b16 %v747_v11  ;;  %v819_v20 = vunpack.c.h.b16 %v747_v11  ;;  %v423_v22 = vmul.f32 %v4299_v24, %v351_v58  ;;  %v424_v23 = vmul.f32 %v4301_v25, %v352_v59 }
  0x3d   : > { %2124 = vmatmul.bf16.gmra.mxu1 %v4410_v56  ;;  %v820_v26 = vunpack.c.l.b16 %v748_v18  ;;  %v821_v27 = vunpack.c.h.b16 %v748_v18  ;;  %v493_v30 = vadd.f32 %v4305_v28, %v421_v17  ;;  %v494_v31 = vadd.f32 %v4307_v29, %v422_v21 }
  0x3e   : > { %v495_v32 = vadd.f32 %v4305_v28, %v423_v22  ;;  %v496_v33 = vadd.f32 %v4307_v29, %v424_v23  ;;  %v5452_v42 = vshrl.u32 %v4458_v50, 16  ;;  %v5450_v43 = vshrl.u32 %v4460_v51, 16 }
  0x3f   : > { %2302 = vmatmul.bf16.gmra.mxu3 %v979_v12  ;;  %v4486_v36 = vpack.c.b16 %v820_v26, %v818_v19  ;;  %v4488_v37 = vpack.c.b16 %v821_v27, %v819_v20  ;;  %vm559_vm1 = vcmp.gt.f32.partialorder %v493_v30, 0.0  ;;  %v625_v38 = vmul.f32 0.2, %v493_v30 }
  0x40   : > { %2213 = vmatmul.bf16.gmra.mxu2 %v971_v10  ;;  %vm560_vm2 = vcmp.gt.f32.partialorder %v494_v31, 0.0  ;;  %vm561_vm3 = vcmp.gt.f32.partialorder %v495_v32, 0.0  ;;  %vm562_vm4 = vcmp.gt.f32.partialorder %v496_v33, 0.0  ;;  %v626_v40 = vmul.f32 0.2, %v494_v31 }
  0x41   : > { %v627_v44 = vmul.f32 0.2, %v495_v32  ;;  %v628_v47 = vmul.f32 0.2, %v496_v33  ;;  %v5447_v52 = vshll.u32 %v4486_v36, 16  ;;  %v5433_v53 = vshll.u32 %v4488_v37, 16 }
  0x42   : > { %v691_v55 = vsel %vm559_vm1, %v493_v30, %v625_v38  ;;  %v692_v57 = vsel %vm560_vm2, %v494_v31, %v626_v40  ;;  %v353_v0 = vunpack.c.l.bf16 %v310_v39  ;;  %v354_v1 = vunpack.c.h.bf16 %v310_v39  ;;  %v312_v30 = vld [vmem:[%s4277_s8 + $0x60] sm:$0xff]  ;;  %v4025_v39 = vld [vmem:[%s5417_s1 + $0x1a8] sm:$0xff] }
  0x43   : > { %v693_v58 = vsel %vm561_vm3, %v495_v32, %v627_v44  ;;  %v694_v59 = vsel %vm562_vm4, %v496_v33, %v628_v47  ;;  %v749_v2 = vpack.c.bf16 %v692_v57, %v691_v55  ;;  %v355_v6 = vunpack.c.l.bf16 %v311_v41  ;;  %v4009_v40 = vld [vmem:[%s5417_s1 + $0x128] sm:$0xff]  ;;  %2558 = vmatpush.bf16.msrb.mxu2 %v4025_v39 }
  0x44   : > { %v750_v3 = vpack.c.bf16 %v694_v59, %v693_v58  ;;  %v356_v7 = vunpack.c.h.bf16 %v311_v41  ;;  %v982_v8 = vor.u32 %v5452_v42, %v970_v4  ;;  %v986_v9 = vrot.slane %v5447_v52, 1  ;;  %v4033_v47 = vld [vmem:[%s5417_s1 + $0x1e8] sm:$0xff]  ;;  %2380 = vmatpush.bf16.msrb.mxu0 %v4009_v40 }
  0x45   : > { %v990_v10 = vor.u32 %v5450_v43, %v978_v5  ;;  %v994_v11 = vrot.slane %v5433_v53, 1  ;;  %v425_v12 = vmul.f32 %v4299_v24, %v353_v0  ;;  %v426_v15 = vmul.f32 %v4301_v25, %v354_v1  ;;  %v4017_v55 = vld [vmem:[%s5417_s1 + $0x168] sm:$0xff]  ;;  %2647 = vmatpush.bf16.msrb.mxu3 %v4033_v47 }
  0x46   : > { %v427_v16 = vmul.f32 %v4299_v24, %v355_v6  ;;  %v428_v17 = vmul.f32 %v4301_v25, %v356_v7  ;;  %v822_v4 = vunpack.c.l.b16 %v749_v2  ;;  %v824_v18 = vunpack.c.l.b16 %v750_v3  ;;  %v313_v59 = vld [vmem:[%s4277_s8 + $0x68] sm:$0xff]  ;;  %2469 = vmatpush.bf16.msrb.mxu1 %v4017_v55 }
  0x47   : > { %v823_v19 = vunpack.c.h.b16 %v749_v2  ;;  %v825_v5 = vunpack.c.h.b16 %v750_v3  ;;  %v497_v20 = vadd.f32 %v4305_v28, %v425_v12  ;;  %v498_v21 = vadd.f32 %v4307_v29, %v426_v15 }
  0x48   : > { %v987_v22 = vsel %vm939_vm8, %v982_v8, %v986_v9  ;;  %v995_v23 = vsel %vm939_vm8, %v990_v10, %v994_v11  ;;  %v499_v26 = vadd.f32 %v4305_v28, %v427_v16  ;;  %v500_v27 = vadd.f32 %v4307_v29, %v428_v17 }
  0x49   : > { %v4517_v31 = vpack.c.b16 %v824_v18, %v822_v4  ;;  %v4519_v32 = vpack.c.b16 %v825_v5, %v823_v19  ;;  %v629_v33 = vmul.f32 0.2, %v497_v20  ;;  %v630_v38 = vmul.f32 0.2, %v498_v21 }
  0x4a   : > { %v631_v41 = vmul.f32 0.2, %v499_v26  ;;  %v632_v44 = vmul.f32 0.2, %v500_v27  ;;  %vm563_vm5 = vcmp.gt.f32.partialorder %v497_v20, 0.0  ;;  %vm564_vm6 = vcmp.gt.f32.partialorder %v498_v21, 0.0 }
  0x4b   : > { %vm565_vm7 = vcmp.gt.f32.partialorder %v499_v26, 0.0  ;;  %vm566_vm9 = vcmp.gt.f32.partialorder %v500_v27, 0.0  ;;  %v5448_v57 = vshrl.u32 %v4486_v36, 16  ;;  %v5438_v58 = vshrl.u32 %v4488_v37, 16 }
  0x4c   : > { %2040 = vmatmul.bf16.gmra.mxu0 %v4458_v50  ;;  %v5431_v0 = vshll.u32 %v4517_v31, 16  ;;  %v5425_v1 = vshll.u32 %v4519_v32, 16  ;;  %v357_v2 = vunpack.c.l.bf16 %v312_v30  ;;  %v358_v3 = vunpack.c.h.bf16 %v312_v30 }
  0x4d   : > { %2129 = vmatmul.bf16.gmra.mxu1 %v4460_v51  ;;  %v695_v6 = vsel %vm563_vm5, %v497_v20, %v629_v33  ;;  %v696_v7 = vsel %vm564_vm6, %v498_v21, %v630_v38  ;;  %v697_v8 = vsel %vm565_vm7, %v499_v26, %v631_v41  ;;  %v698_v10 = vsel %vm566_vm9, %v500_v27, %v632_v44  ;;  %v314_v44 = vld [vmem:[%s4277_s8 + $0x70] sm:$0xff] }
  0x4e   : > { %v359_v12 = vunpack.c.l.bf16 %v313_v59  ;;  %v360_v15 = vunpack.c.h.bf16 %v313_v59  ;;  %v998_v16 = vor.u32 %v5448_v57, %v986_v9  ;;  %v1006_v17 = vor.u32 %v5438_v58, %v994_v11  ;;  %v315_v59 = vld [vmem:[%s4277_s8 + $0x78] sm:$0xff] }
  0x4f   : > { %2307 = vmatmul.bf16.gmra.mxu3 %v995_v23  ;;  %v751_v4 = vpack.c.bf16 %v696_v7, %v695_v6  ;;  %v752_v18 = vpack.c.bf16 %v698_v10, %v697_v8  ;;  %v1002_v19 = vrot.slane %v5431_v0, 1  ;;  %v1010_v5 = vrot.slane %v5425_v1, 1 }
  0x50   : > { %2218 = vmatmul.bf16.gmra.mxu2 %v987_v22  ;;  %v429_v20 = vmul.f32 %v4299_v24, %v357_v2  ;;  %v430_v21 = vmul.f32 %v4301_v25, %v358_v3  ;;  %v431_v22 = vmul.f32 %v4299_v24, %v359_v12  ;;  %v432_v9 = vmul.f32 %v4301_v25, %v360_v15 }
  0x51   : > { %v826_v11 = vunpack.c.l.b16 %v751_v4  ;;  %v828_v23 = vunpack.c.l.b16 %v752_v18  ;;  %v827_v26 = vunpack.c.h.b16 %v751_v4  ;;  %v829_v27 = vunpack.c.h.b16 %v752_v18 }
  0x52   : > { %v1003_v30 = vsel %vm939_vm8, %v998_v16, %v1002_v19  ;;  %v1011_v33 = vsel %vm939_vm8, %v1006_v17, %v1010_v5  ;;  %v501_v38 = vadd.f32 %v4305_v28, %v429_v20  ;;  %v502_v39 = vadd.f32 %v4307_v29, %v430_v21 }
  0x53   : > { %v503_v40 = vadd.f32 %v4305_v28, %v431_v22  ;;  %v504_v41 = vadd.f32 %v4307_v29, %v432_v9  ;;  %v4559_v47 = vpack.c.b16 %v828_v23, %v826_v11  ;;  %v4561_v55 = vpack.c.b16 %v829_v27, %v827_v26 }
  0x54   : > { %vm567_vm10 = vcmp.gt.f32.partialorder %v501_v38, 0.0  ;;  %vm568_vm11 = vcmp.gt.f32.partialorder %v502_v39, 0.0  ;;  %v633_v2 = vmul.f32 0.2, %v501_v38  ;;  %v634_v3 = vmul.f32 0.2, %v502_v39 }
  0x55   : > { %v635_v6 = vmul.f32 0.2, %v503_v40  ;;  %v636_v7 = vmul.f32 0.2, %v504_v41  ;;  %v361_v8 = vunpack.c.l.bf16 %v314_v44  ;;  %v362_v10 = vunpack.c.h.bf16 %v314_v44 }
  0x56   : > { %v5432_v12 = vshrl.u32 %v4517_v31, 16  ;;  %vm569_vm12 = vcmp.gt.f32.partialorder %v503_v40, 0.0  ;;  %vm570_vm13 = vcmp.gt.f32.partialorder %v504_v41, 0.0  ;;  %v363_v15 = vunpack.c.l.bf16 %v315_v59 }
  0x57   : > { %v5424_v16 = vshll.u32 %v4559_v47, 16  ;;  %v5426_v17 = vshrl.u32 %v4519_v32, 16  ;;  %v5423_v4 = vshll.u32 %v4561_v55, 16  ;;  %v364_v18 = vunpack.c.h.bf16 %v315_v59 }
  0x58   : > { %v699_v20 = vsel %vm567_vm10, %v501_v38, %v633_v2  ;;  %v700_v21 = vsel %vm568_vm11, %v502_v39, %v634_v3  ;;  %v701_v22 = vsel %vm569_vm12, %v503_v40, %v635_v6  ;;  %v702_v9 = vsel %vm570_vm13, %v504_v41, %v636_v7 }
  0x59   : > { %v433_v11 = vmul.f32 %v4299_v24, %v361_v8  ;;  %v434_v23 = vmul.f32 %v4301_v25, %v362_v10  ;;  %v1014_v26 = vor.u32 %v5432_v12, %v1002_v19  ;;  %v435_v27 = vmul.f32 %v4299_v24, %v363_v15 }
  0x5a   : > { %v1026_v38 = vrot.slane %v5423_v4, 1  ;;  %v436_v39 = vmul.f32 %v4301_v25, %v364_v18  ;;  %v753_v40 = vpack.c.bf16 %v700_v21, %v699_v20  ;;  %v754_v41 = vpack.c.bf16 %v702_v9, %v701_v22  ;;  %v4024_v22 = vld [vmem:[%s5417_s1 + $0x1a0] sm:$0xff] }
  0x5b   : > { %v505_v44 = vadd.f32 %v4305_v28, %v433_v11  ;;  %v506_v59 = vadd.f32 %v4307_v29, %v434_v23  ;;  %v507_v19 = vadd.f32 %v4305_v28, %v435_v27  ;;  %v4008_v9 = vld [vmem:[%s5417_s1 + $0x120] sm:$0xff]  ;;  %2559 = vmatpush.bf16.msrb.mxu2 %v4024_v22 }
  0x5c   : > { %2045 = vmatmul.bf16.gmra.mxu0 %v4486_v36  ;;  %v508_v3 = vadd.f32 %v4307_v29, %v436_v39  ;;  %v830_v6 = vunpack.c.l.b16 %v753_v40  ;;  %v832_v7 = vunpack.c.l.b16 %v754_v41  ;;  %v831_v8 = vunpack.c.h.b16 %v753_v40  ;;  %v4032_v11 = vld [vmem:[%s5417_s1 + $0x1e0] sm:$0xff]  ;;  %v317_v39 = vld [vmem:[%s4277_s8 + $0x88] sm:$0xff] }
  0x5d   : > { %2134 = vmatmul.bf16.gmra.mxu1 %v4488_v37  ;;  %v833_v10 = vunpack.c.h.b16 %v754_v41  ;;  %vm571_vm14 = vcmp.gt.f32.partialorder %v505_v44, 0.0  ;;  %vm572_vm15 = vcmp.gt.f32.partialorder %v506_v59, 0.0  ;;  %v637_v15 = vmul.f32 0.2, %v505_v44  ;;  %v4016_v27 = vld [vmem:[%s5417_s1 + $0x160] sm:$0xff]  ;;  %2381 = vmatpush.bf16.msrb.mxu0 %v4008_v9 }
  0x5e   : > { %v638_v18 = vmul.f32 0.2, %v506_v59  ;;  %v639_v20 = vmul.f32 0.2, %v507_v19  ;;  %vm573_vm0 = vcmp.gt.f32.partialorder %v507_v19, 0.0  ;;  %v4599_v23 = vpack.c.b16 %v832_v7, %v830_v6  ;;  %2648 = vmatpush.bf16.msrb.mxu3 %v4032_v11  ;;  %2470 = vmatpush.bf16.msrb.mxu1 %v4016_v27 }
  0x5f   : > { %2312 = vmatmul.bf16.gmra.mxu3 %v1011_v33  ;;  %v1022_v33 = vor.u32 %v5426_v17, %v1010_v5  ;;  %v640_v21 = vmul.f32 0.2, %v508_v3  ;;  %vm574_vm1 = vcmp.gt.f32.partialorder %v508_v3, 0.0  ;;  %v5430_v40 = vshrl.u32 %v4559_v47, 16 }
  0x60   : > { %2223 = vmatmul.bf16.gmra.mxu2 %v1003_v30  ;;  %v1018_v30 = vrot.slane %v5424_v16, 1  ;;  %v703_v41 = vsel %vm571_vm14, %v505_v44, %v637_v15  ;;  %v5428_v4 = vshll.u32 %v4599_v23, 16  ;;  %v5429_v16 = vshrl.u32 %v4561_v55, 16 }
  0x61   : > { %v1027_v5 = vsel %vm939_vm8, %v1022_v33, %v1026_v38  ;;  %v316_v33 = vld [vmem:[%s4277_s8 + $0x80] sm:$0xff]  ;;  %v706_v6 = vsel %vm574_vm1, %v508_v3, %v640_v21  ;;  %v368_v9 = vunpack.c.h.bf16 %v317_v39 }
  0x62   : > { %v1019_v2 = vsel %vm939_vm8, %v1014_v26, %v1018_v30  ;;  %v4601_v26 = vpack.c.b16 %v833_v10, %v831_v8  ;;  %v365_v7 = vunpack.c.l.bf16 %v316_v33  ;;  %v366_v8 = vunpack.c.h.bf16 %v316_v33 }
  0x63   : > { %v367_v10 = vunpack.c.l.bf16 %v317_v39  ;;  %v1030_v44 = vor.u32 %v5430_v40, %v1018_v30  ;;  %v1034_v15 = vrot.slane %v5428_v4, 1  ;;  %v440_v21 = vmul.f32 %v4301_v25, %v368_v9 }
  0x64   : > { %v5427_v22 = vshll.u32 %v4601_v26, 16 }
  0x65   : > { %v439_v3 = vmul.f32 %v4299_v24, %v367_v10 }
  0x6c   : > { %2050 = vmatmul.bf16.gmra.mxu0 %v4517_v31 }
  0x6d   : > { %2139 = vmatmul.bf16.gmra.mxu1 %v4519_v32 }
  0x6f   : > { %2317 = vmatmul.bf16.gmra.mxu3 %v1027_v5  ;;  %v705_v5 = vsel %vm573_vm0, %v507_v19, %v639_v20  ;;  %v438_v19 = vmul.f32 %v4301_v25, %v366_v8  ;;  %v1042_v20 = vrot.slane %v5427_v22, 1 }
  0x70   : > { %2228 = vmatmul.bf16.gmra.mxu2 %v1019_v2  ;;  %v704_v2 = vsel %vm572_vm15, %v506_v59, %v638_v18  ;;  %v756_v17 = vpack.c.bf16 %v706_v6, %v705_v5  ;;  %v437_v59 = vmul.f32 %v4299_v24, %v365_v7  ;;  %v1038_v18 = vor.u32 %v5429_v16, %v1026_v38 }
  0x71   : > { %v755_v1 = vpack.c.bf16 %v704_v2, %v703_v41  ;;  %v510_v41 = vadd.f32 %v4307_v29, %v438_v19  ;;  %v511_v2 = vadd.f32 %v4305_v28, %v439_v3  ;;  %v1035_v38 = vsel %vm939_vm8, %v1030_v44, %v1034_v15  ;;  %v318_v44 = vld [vmem:[%s4277_s8 + $0x90] sm:$0xff] }
  0x72   : > { %v836_v11 = vunpack.c.l.b16 %v756_v17  ;;  %v837_v33 = vunpack.c.h.b16 %v756_v17  ;;  %v509_v39 = vadd.f32 %v4305_v28, %v437_v59  ;;  %v1043_v5 = vsel %vm939_vm8, %v1038_v18, %v1042_v20  ;;  %v319_v59 = vld [vmem:[%s4277_s8 + $0x98] sm:$0xff] }
  0x73   : > { %v834_v30 = vunpack.c.l.b16 %v755_v1  ;;  %v835_v27 = vunpack.c.h.b16 %v755_v1  ;;  %v512_v6 = vadd.f32 %v4307_v29, %v440_v21  ;;  %v642_v8 = vmul.f32 0.2, %v510_v41 }
  0x74   : > { %v641_v17 = vmul.f32 0.2, %v509_v39  ;;  %v643_v10 = vmul.f32 0.2, %v511_v2  ;;  %vm575_vm2 = vcmp.gt.f32.partialorder %v509_v39, 0.0  ;;  %vm576_vm3 = vcmp.gt.f32.partialorder %v510_v41, 0.0 }
  0x75   : > { %v4635_v7 = vpack.c.b16 %v836_v11, %v834_v30  ;;  %v4637_v1 = vpack.c.b16 %v837_v33, %v835_v27  ;;  %vm577_vm4 = vcmp.gt.f32.partialorder %v511_v2, 0.0  ;;  %v644_v9 = vmul.f32 0.2, %v512_v6 }
  0x76   : > { %vm578_vm5 = vcmp.gt.f32.partialorder %v512_v6, 0.0  ;;  %v5437_v19 = vshrl.u32 %v4599_v23, 16  ;;  %v5436_v18 = vshrl.u32 %v4601_v26, 16  ;;  %v707_v30 = vsel %vm575_vm2, %v509_v39, %v641_v17 }
  0x77   : > { %v5435_v3 = vshll.u32 %v4635_v7, 16  ;;  %v5434_v21 = vshll.u32 %v4637_v1, 16  ;;  %v708_v11 = vsel %vm576_vm3, %v510_v41, %v642_v8  ;;  %v709_v27 = vsel %vm577_vm4, %v511_v2, %v643_v10 }
  0x78   : > { %v710_v33 = vsel %vm578_vm5, %v512_v6, %v644_v9  ;;  %v371_v22 = vunpack.c.l.bf16 %v319_v59  ;;  %v372_v4 = vunpack.c.h.bf16 %v319_v59  ;;  %v1046_v16 = vor.u32 %v5437_v19, %v1034_v15 }
  0x79   : > { %v1050_v40 = vrot.slane %v5435_v3, 1  ;;  %v1054_v0 = vor.u32 %v5436_v18, %v1042_v20  ;;  %v757_v12 = vpack.c.bf16 %v708_v11, %v707_v30  ;;  %v758_v53 = vpack.c.bf16 %v710_v33, %v709_v27  ;;  %v320_v11 = vld [vmem:[%s4277_s8 + $0xa0] sm:$0xff]  ;;  %v321_v27 = vld [vmem:[%s4277_s8 + $0xa8] sm:$0xff] }
  0x7a   : > { %v1058_v39 = vrot.slane %v5434_v21, 1  ;;  %v443_v6 = vmul.f32 %v4299_v24, %v371_v22  ;;  %v444_v15 = vmul.f32 %v4301_v25, %v372_v4 }
  0x7b   : > { %v1051_v20 = vsel %vm939_vm8, %v1046_v16, %v1050_v40  ;;  %v838_v17 = vunpack.c.l.b16 %v757_v12  ;;  %v840_v8 = vunpack.c.l.b16 %v758_v53  ;;  %v839_v10 = vunpack.c.h.b16 %v757_v12 }
  0x7c   : > { %2055 = vmatmul.bf16.gmra.mxu0 %v4559_v47  ;;  %v841_v9 = vunpack.c.h.b16 %v758_v53  ;;  %v515_v22 = vadd.f32 %v4305_v28, %v443_v6  ;;  %v516_v4 = vadd.f32 %v4307_v29, %v444_v15  ;;  %v5442_v16 = vshrl.u32 %v4635_v7, 16  ;;  %v4023_v53 = vld [vmem:[%s5417_s1 + $0x198] sm:$0xff] }
  0x7d   : > { %2144 = vmatmul.bf16.gmra.mxu1 %v4561_v55  ;;  %v4667_v33 = vpack.c.b16 %v840_v8, %v838_v17  ;;  %2560 = vmatpush.bf16.msrb.mxu2 %v4023_v53  ;;  %v373_v15 = vunpack.c.l.bf16 %v320_v11  ;;  %v375_v17 = vunpack.c.l.bf16 %v321_v27  ;;  %v4015_v53 = vld [vmem:[%s5417_s1 + $0x158] sm:$0xff] }
  0x7e   : > { %v4670_v12 = vpack.c.b16 %v841_v9, %v839_v10  ;;  %v648_v6 = vmul.f32 0.2, %v516_v4  ;;  %vm581_vm9 = vcmp.gt.f32.partialorder %v515_v22, 0.0  ;;  %vm582_vm10 = vcmp.gt.f32.partialorder %v516_v4, 0.0  ;;  %2471 = vmatpush.bf16.msrb.mxu1 %v4015_v53  ;;  %v322_v53 = vld [vmem:[%s4277_s8 + $0xb0] sm:$0xff] }
  0x7f   : > { %2322 = vmatmul.bf16.gmra.mxu3 %v1043_v5  ;;  %v370_v5 = vunpack.c.h.bf16 %v318_v44  ;;  %v5440_v8 = vshll.u32 %v4667_v33, 16  ;;  %v5441_v10 = vshrl.u32 %v4637_v1, 16  ;;  %v447_v58 = vmul.f32 %v4299_v24, %v375_v17 }
  0x80   : > { %2233 = vmatmul.bf16.gmra.mxu2 %v1035_v38  ;;  %v369_v38 = vunpack.c.l.bf16 %v318_v44  ;;  %v1059_v44 = vsel %vm939_vm8, %v1054_v0, %v1058_v39  ;;  %v4007_v0 = vld [vmem:[%s5417_s1 + $0x118] sm:$0xff]  ;;  %v5439_v9 = vshll.u32 %v4670_v12, 16  ;;  %v714_v19 = vsel %vm582_vm10, %v516_v4, %v648_v6 }
  0x81   : > { %v442_v2 = vmul.f32 %v4301_v25, %v370_v5  ;;  %2382 = vmatpush.bf16.msrb.mxu0 %v4007_v0  ;;  %v445_v0 = vmul.f32 %v4299_v24, %v373_v15 }
  0x82   : > { %v441_v41 = vmul.f32 %v4299_v24, %v369_v38  ;;  %v4031_v38 = vld [vmem:[%s5417_s1 + $0x1d8] sm:$0xff] }
  0x83   : > { %v514_v30 = vadd.f32 %v4307_v29, %v442_v2  ;;  %v647_v2 = vmul.f32 0.2, %v515_v22  ;;  %2649 = vmatpush.bf16.msrb.mxu3 %v4031_v38 }
  0x84   : > { %v513_v59 = vadd.f32 %v4305_v28, %v441_v41 }
  0x85   : > { %v646_v41 = vmul.f32 0.2, %v514_v30  ;;  %vm580_vm7 = vcmp.gt.f32.partialorder %v514_v30, 0.0  ;;  %v713_v18 = vsel %vm581_vm9, %v515_v22, %v647_v2  ;;  %v519_v2 = vadd.f32 %v4305_v28, %v447_v58 }
  0x86   : > { %v645_v5 = vmul.f32 0.2, %v513_v59  ;;  %vm579_vm6 = vcmp.gt.f32.partialorder %v513_v59, 0.0 }
  0x87   : > { %v712_v3 = vsel %vm580_vm7, %v514_v30, %v646_v41  ;;  %v1074_v30 = vrot.slane %v5439_v9, 1  ;;  %vm585_vm13 = vcmp.gt.f32.partialorder %v519_v2, 0.0 }
  0x88   : > { %v711_v21 = vsel %vm579_vm6, %v513_v59, %v645_v5  ;;  %v1070_v59 = vor.u32 %v5441_v10, %v1058_v39  ;;  %v760_v5 = vpack.c.bf16 %v714_v19, %v713_v18 }
  0x89   : > { %v759_v4 = vpack.c.bf16 %v712_v3, %v711_v21 }
  0x8a   : > { %v1075_v6 = vsel %vm939_vm8, %v1070_v59, %v1074_v30  ;;  %v844_v19 = vunpack.c.l.b16 %v760_v5  ;;  %v845_v21 = vunpack.c.h.b16 %v760_v5  ;;  %v377_v59 = vunpack.c.l.bf16 %v322_v53 }
  0x8b   : > { %v842_v3 = vunpack.c.l.b16 %v759_v4  ;;  %v843_v18 = vunpack.c.h.b16 %v759_v4  ;;  %v378_v5 = vunpack.c.h.bf16 %v322_v53 }
  0x8c   : > { %2060 = vmatmul.bf16.gmra.mxu0 %v4599_v23 }
  0x8d   : > { %2149 = vmatmul.bf16.gmra.mxu1 %v4601_v26 }
  0x8f   : > { %2327 = vmatmul.bf16.gmra.mxu3 %v1059_v44  ;;  %v376_v44 = vunpack.c.h.bf16 %v321_v27  ;;  %v1066_v27 = vrot.slane %v5440_v8, 1  ;;  %v5446_v8 = vshrl.u32 %v4667_v33, 16 }
  0x90   : > { %2238 = vmatmul.bf16.gmra.mxu2 %v1051_v20  ;;  %v374_v20 = vunpack.c.h.bf16 %v320_v11  ;;  %v1062_v11 = vor.u32 %v5442_v16, %v1050_v40  ;;  %v517_v40 = vadd.f32 %v4305_v28, %v445_v0  ;;  %v323_v0 = vld [vmem:[%s4277_s8 + $0xb8] sm:$0xff]  ;;  %v4717_v16 = vld [vmem:[%s5418_s2] ss:$0 sm:$0xff] }
  0x91   : > { %v448_v22 = vmul.f32 %v4301_v25, %v376_v44  ;;  %v651_v44 = vmul.f32 0.2, %v519_v2  ;;  %v379_v9 = vunpack.c.l.bf16 %v323_v0 }
  0x92   : > { %v446_v38 = vmul.f32 %v4301_v25, %v374_v20  ;;  %v1067_v39 = vsel %vm939_vm8, %v1062_v11, %v1066_v27  ;;  %v649_v20 = vmul.f32 0.2, %v517_v40  ;;  %vm583_vm11 = vcmp.gt.f32.partialorder %v517_v40, 0.0 }
  0x93   : > { %v520_v15 = vadd.f32 %v4307_v29, %v448_v22  ;;  %v4709_v11 = vpack.c.b16 %v844_v19, %v842_v3  ;;  %v717_v10 = vsel %vm585_vm13, %v519_v2, %v651_v44  ;;  %v5445_v19 = vshrl.u32 %v4670_v12, 16 }
  0x94   : > { %v518_v41 = vadd.f32 %v4307_v29, %v446_v38  ;;  %v4711_v38 = vpack.c.b16 %v845_v21, %v843_v18  ;;  %v715_v22 = vsel %vm583_vm11, %v517_v40, %v649_v20  ;;  %v450_v20 = vmul.f32 %v4301_v25, %v378_v5 }
  0x95   : > { %v652_v58 = vmul.f32 0.2, %v520_v15  ;;  %vm586_vm14 = vcmp.gt.f32.partialorder %v520_v15, 0.0  ;;  %v5444_v3 = vshll.u32 %v4709_v11, 16  ;;  %v451_v2 = vmul.f32 %v4299_v24, %v379_v9 }
  0x96   : > { %v650_v17 = vmul.f32 0.2, %v518_v41  ;;  %vm584_vm12 = vcmp.gt.f32.partialorder %v518_v41, 0.0  ;;  %v5443_v18 = vshll.u32 %v4711_v38, 16  ;;  %v1078_v44 = vor.u32 %v5446_v8, %v1066_v27  ;;  %v325_v8 = vld [vmem:[%s4277_s8 + $0xc8] sm:$0xff] }
  0x97   : > { %v522_v5 = vadd.f32 %v4307_v29, %v450_v20  ;;  %v383_v62 = vunpack.c.l.bf16 %v325_v8 }
  0x98   : > { %v716_v4 = vsel %vm584_vm12, %v518_v41, %v650_v17  ;;  %v449_v41 = vmul.f32 %v4299_v24, %v377_v59  ;;  %v1086_v59 = vor.u32 %v5445_v19, %v1074_v30 }
  0x99   : > { %v761_v40 = vpack.c.bf16 %v716_v4, %v715_v22  ;;  %vm588_vm0 = vcmp.gt.f32.partialorder %v522_v5, 0.0 }
  0x9a   : > { %v521_v9 = vadd.f32 %v4305_v28, %v449_v41 }
  0x9b   : > { %v846_v22 = vunpack.c.l.b16 %v761_v40 }
  0x9c   : > { %2065 = vmatmul.bf16.gmra.mxu0 %v4635_v7  ;;  %v653_v19 = vmul.f32 0.2, %v521_v9  ;;  %vm587_vm15 = vcmp.gt.f32.partialorder %v521_v9, 0.0 }
  0x9d   : > { %2154 = vmatmul.bf16.gmra.mxu1 %v4637_v1 }
  0x9e   : > { %v719_v60 = vsel %vm587_vm15, %v521_v9, %v653_v19  ;;  %v384_v19 = vunpack.c.h.bf16 %v325_v8  ;;  %v455_v8 = vmul.f32 %v4299_v24, %v383_v62 }
  0x9f   : > { %2332 = vmatmul.bf16.gmra.mxu3 %v1075_v6  ;;  %v380_v6 = vunpack.c.h.bf16 %v323_v0  ;;  %v1082_v0 = vrot.slane %v5444_v3, 1 }
  0xa0   : > { %2243 = vmatmul.bf16.gmra.mxu2 %v1067_v39  ;;  %v718_v39 = vsel %vm586_vm14, %v520_v15, %v652_v58 }
  0xa1   : > { %v762_v21 = vpack.c.bf16 %v718_v39, %v717_v10  ;;  %v452_v53 = vmul.f32 %v4301_v25, %v380_v6  ;;  %v1090_v10 = vrot.slane %v5443_v18, 1  ;;  %v523_v39 = vadd.f32 %v4305_v28, %v451_v2 }
  0xa2   : > { %v1083_v30 = vsel %vm939_vm8, %v1078_v44, %v1082_v0  ;;  %v847_v18 = vunpack.c.h.b16 %v761_v40  ;;  %v4022_v44 = vld [vmem:[%s5417_s1 + $0x190] sm:$0xff] }
  0xa3   : > { %v848_v27 = vunpack.c.l.b16 %v762_v21  ;;  %v524_v6 = vadd.f32 %v4307_v29, %v452_v53  ;;  %v849_v3 = vunpack.c.h.b16 %v762_v21  ;;  %v4006_v40 = vld [vmem:[%s5417_s1 + $0x110] sm:$0xff]  ;;  %vm589_vm1 = vcmp.gt.f32.partialorder %v523_v39, 0.0  ;;  %2561 = vmatpush.bf16.msrb.mxu2 %v4022_v44 }
  0xa4   : > { %v4030_v21 = vld [vmem:[%s5417_s1 + $0x1d0] sm:$0xff]  ;;  %2383 = vmatpush.bf16.msrb.mxu0 %v4006_v40 }
  0xa5   : > { %v4743_v41 = vpack.c.b16 %v848_v27, %v846_v22  ;;  %v656_v53 = vmul.f32 0.2, %v524_v6  ;;  %v4755_v22 = vpack.c.b16 %v849_v3, %v847_v18  ;;  %vm590_vm2 = vcmp.gt.f32.partialorder %v524_v6, 0.0  ;;  %v324_v27 = vld [vmem:[%s4277_s8 + $0xc0] sm:$0xff]  ;;  %2650 = vmatpush.bf16.msrb.mxu3 %v4030_v21 }
  0xa6   : > { %v381_v14 = vunpack.c.l.bf16 %v324_v27  ;;  %v382_v40 = vunpack.c.h.bf16 %v324_v27 }
  0xa7   : > { %v5457_v43 = vshll.u32 %v4743_v41, 16  ;;  %v722_v42 = vsel %vm590_vm2, %v524_v6, %v656_v53  ;;  %v5456_v44 = vshll.u32 %v4755_v22, 16 }
  0xa9   : > { %v2031_v15 = vpop.f32.mrf.mxu0 }
  0xaa   : > { %v2120_v17 = vpop.f32.mrf.mxu1  ;;  %v2032_v58 = vadd.f32 %v4717_v16, %v2031_v15  ;;  %v1091_v15 = vsel %vm939_vm8, %v1086_v59, %v1090_v10 }
  0xac   : > { %v2121_v4 = vadd.f32 %v2120_v17, %v2032_v58  ;;  %2070 = vmatmul.bf16.gmra.mxu0 %v4667_v33  ;;  %v654_v17 = vmul.f32 0.2, %v522_v5  ;;  %v655_v58 = vmul.f32 0.2, %v523_v39 }
  0xad   : > { %2159 = vmatmul.bf16.gmra.mxu1 %v4670_v12 }
  0xae   : > { %v720_v3 = vsel %vm588_vm0, %v522_v5, %v654_v17 }
  0xaf   : > { %2337 = vmatmul.bf16.gmra.mxu3 %v1091_v15  ;;  %v5458_v15 = vshrl.u32 %v4711_v38, 16  ;;  %v763_v9 = vpack.c.bf16 %v720_v3, %v719_v60  ;;  %v1106_v60 = vrot.slane %v5456_v44, 1 }
  0xb0   : > { %2248 = vmatmul.bf16.gmra.mxu2 %v1083_v30  ;;  %v5459_v30 = vshrl.u32 %v4709_v11, 16 }
  0xb1   : > { %v2033_v20 = vpop.f32.mrf.mxu0  ;;  %v1102_v6 = vor.u32 %v5458_v15, %v1090_v10  ;;  %v851_v3 = vunpack.c.h.b16 %v763_v9 }
  0xb2   : > { %v2122_v2 = vpop.f32.mrf.mxu1  ;;  %v2034_v59 = vadd.f32 %v4717_v16, %v2033_v20  ;;  %v2298_v57 = vpop.f32.mrf.mxu3  ;;  %v721_v20 = vsel %vm589_vm1, %v523_v39, %v655_v58  ;;  %v1098_v39 = vrot.slane %v5457_v43, 1 }
  0xb3   : > { %v2209_v52 = vpop.f32.mrf.mxu2  ;;  %v764_v5 = vpack.c.bf16 %v722_v42, %v721_v20  ;;  %v454_v42 = vmul.f32 %v4301_v25, %v382_v40  ;;  %v1107_v62 = vsel %vm939_vm8, %v1102_v6, %v1106_v60  ;;  %v5467_v6 = vshrl.u32 %v4755_v22, 16 }
  0xb4   : > { %v2123_v63 = vadd.f32 %v2122_v2, %v2034_v59  ;;  %v2210_v18 = vadd.f32 %v2209_v52, %v2121_v4  ;;  %v4014_v2 = vld [vmem:[%s5417_s1 + $0x150] sm:$0xff]  ;;  %v1094_v4 = vor.u32 %v5459_v30, %v1082_v0  ;;  %v456_v0 = vmul.f32 %v4301_v25, %v384_v19 }
  0xb5   : > { %2472 = vmatpush.bf16.msrb.mxu1 %v4014_v2  ;;  %v852_v10 = vunpack.c.l.b16 %v764_v5  ;;  %v526_v2 = vadd.f32 %v4307_v29, %v454_v42  ;;  %v527_v19 = vadd.f32 %v4305_v28, %v455_v8 }
  0xb6   : > { %v4767_v49 = vadd.f32 %v2298_v57, %v2210_v18  ;;  %v453_v57 = vmul.f32 %v4299_v24, %v381_v14  ;;  %v850_v14 = vunpack.c.l.b16 %v763_v9  ;;  %v853_v18 = vunpack.c.h.b16 %v764_v5 }
  0xb7   : > { %v1099_v40 = vsel %vm939_vm8, %v1094_v4, %v1098_v39  ;;  %v5468_v4 = vshrl.u32 %v4743_v41, 16  ;;  %vm592_vm4 = vcmp.gt.f32.partialorder %v526_v2, 0.0  ;;  %vm593_vm5 = vcmp.gt.f32.partialorder %v527_v19, 0.0 }
  0xb8   : > { %v525_v20 = vadd.f32 %v4305_v28, %v453_v57  ;;  %v4799_v57 = vpack.c.b16 %v853_v18, %v851_v3 }
  0xb9   : > { %v2036_v17 = vpop.f32.mrf.mxu0 }
  0xba   : > { %v2125_v52 = vpop.f32.mrf.mxu1  ;;  %v2037_v58 = vadd.f32 %v4717_v16, %v2036_v17  ;;  %v2300_v21 = vpop.f32.mrf.mxu3  ;;  %5493 = vst [vmem:[#allocation3_spill] sm:$0xff] %v4799_v57  ;;  %v657_v42 = vmul.f32 0.2, %v525_v20  ;;  %vm591_vm3 = vcmp.gt.f32.partialorder %v525_v20, 0.0  ;;  %v5465_v15 = vshll.u32 %v4799_v57, 16 }
  0xbb   : > { %v2211_v53 = vpop.f32.mrf.mxu2 }
  0xbc   : > { %v2126_v59 = vadd.f32 %v2125_v52, %v2037_v58  ;;  %2075 = vmatmul.bf16.gmra.mxu0 %v4709_v11  ;;  %v2212_v27 = vadd.f32 %v2211_v53, %v2123_v63  ;;  %v528_v52 = vadd.f32 %v4307_v29, %v456_v0  ;;  %v4795_v58 = vpack.c.b16 %v852_v10, %v850_v14  ;;  %v326_v63 = vld [vmem:[%s4277_s8 + $0xd0] sm:$0xff]  ;;  %v327_v53 = vld [vmem:[%s4277_s8 + $0xd8] sm:$0xff] }
  0xbd   : > { %2164 = vmatmul.bf16.gmra.mxu1 %v4711_v38  ;;  %v659_v0 = vmul.f32 0.2, %v527_v19  ;;  %v385_v10 = vunpack.c.l.bf16 %v326_v63  ;;  %v386_v44 = vunpack.c.h.bf16 %v326_v63  ;;  %v387_v3 = vunpack.c.l.bf16 %v327_v53 }
  0xbe   : > { %v4792_v17 = vadd.f32 %v2300_v21, %v2212_v27  ;;  %5492 = vst [vmem:[#allocation2_spill] sm:$0xff] %v4795_v58  ;;  %v658_v21 = vmul.f32 0.2, %v526_v2  ;;  %v660_v14 = vmul.f32 0.2, %v528_v52  ;;  %vm594_vm6 = vcmp.gt.f32.partialorder %v528_v52, 0.0 }
  0xbf   : > { %2342 = vmatmul.bf16.gmra.mxu3 %v1107_v62  ;;  %v5466_v43 = vshll.u32 %v4795_v58, 16  ;;  %v388_v30 = vunpack.c.h.bf16 %v327_v53  ;;  %v725_v48 = vsel %vm593_vm5, %v527_v19, %v659_v0  ;;  %v457_v45 = vmul.f32 %v4299_v24, %v385_v10 }
  0xc0   : > { %2253 = vmatmul.bf16.gmra.mxu2 %v1099_v40  ;;  %v724_v46 = vsel %vm592_vm4, %v526_v2, %v658_v21  ;;  %v726_v61 = vsel %vm594_vm6, %v528_v52, %v660_v14  ;;  %v1110_v63 = vor.u32 %v5468_v4, %v1098_v39  ;;  %v1118_v2 = vor.u32 %v5467_v6, %v1106_v60 }
  0xc1   : > { %v2038_v9 = vpop.f32.mrf.mxu0  ;;  %v4823_v19 = vrot.slane %v5465_v15, 1  ;;  %v460_v52 = vmul.f32 %v4301_v25, %v388_v30  ;;  %v529_v53 = vadd.f32 %v4305_v28, %v457_v45  ;;  %vm1335_vm6 = vsmask.f32 5376 }
  0xc2   : > { %v2127_v5 = vpop.f32.mrf.mxu1  ;;  %v2039_v8 = vadd.f32 %v4717_v16, %v2038_v9  ;;  %v2303_v40 = vpop.f32.mrf.mxu3  ;;  %v723_v9 = vsel %vm591_vm3, %v525_v20, %v657_v42  ;;  %v4817_v20 = vrot.slane %v5466_v43, 1  ;;  %v766_v42 = vpack.c.bf16 %v726_v61, %v725_v48 }
  0xc3   : > { %v2214_v27 = vpop.f32.mrf.mxu2  ;;  %v532_v45 = vadd.f32 %v4307_v29, %v460_v52  ;;  %vm595_vm7 = vcmp.gt.f32.partialorder %v529_v53, 0.0  ;;  %v4021_v52 = vld [vmem:[%s5417_s1 + $0x188] sm:$0xff] }
  0xc4   : > { %v2128_v62 = vadd.f32 %v2127_v5, %v2039_v8  ;;  %v2215_v18 = vadd.f32 %v2214_v27, %v2126_v59  ;;  %v458_v59 = vmul.f32 %v4301_v25, %v386_v44  ;;  %v459_v5 = vmul.f32 %v4299_v24, %v387_v3  ;;  %2562 = vmatpush.bf16.msrb.mxu2 %v4021_v52 }
  0xc5   : > { %v765_v44 = vpack.c.bf16 %v724_v46, %v723_v9  ;;  %v1115_v30 = vsel %vm939_vm8, %v1110_v63, %v4817_v20  ;;  %v1123_v46 = vsel %vm939_vm8, %v1118_v2, %v4823_v19  ;;  %v856_v61 = vunpack.c.l.b16 %v766_v42 }
  0xc6   : > { %v4807_v13 = vadd.f32 %v2303_v40, %v2215_v18  ;;  %v530_v60 = vadd.f32 %v4307_v29, %v458_v59  ;;  %v531_v10 = vadd.f32 %v4305_v28, %v459_v5  ;;  %v857_v18 = vunpack.c.h.b16 %v766_v42  ;;  %v328_v5 = vld [vmem:[%s4277_s8 + $0xe0] sm:$0xff] }
  0xc7   : > { %v854_v48 = vunpack.c.l.b16 %v765_v44  ;;  %v855_v3 = vunpack.c.h.b16 %v765_v44  ;;  %v661_v59 = vmul.f32 0.2, %v529_v53  ;;  %v664_v2 = vmul.f32 0.2, %v532_v45  ;;  %v4029_v44 = vld [vmem:[%s5417_s1 + $0x1c8] sm:$0xff] }
  0xc8   : > { %5494 = vst [vmem:[#allocation4_spill] sm:$0xff] %v4807_v13  ;;  %vm596_vm9 = vcmp.gt.f32.partialorder %v530_v60, 0.0  ;;  %vm597_vm10 = vcmp.gt.f32.partialorder %v531_v10, 0.0  ;;  %vm598_vm11 = vcmp.gt.f32.partialorder %v532_v45, 0.0  ;;  %2651 = vmatpush.bf16.msrb.mxu3 %v4029_v44 }
  0xc9   : > { %v2041_v8 = vpop.f32.mrf.mxu0  ;;  %v727_v15 = vsel %vm595_vm7, %v529_v53, %v661_v59 }
  0xca   : > { %v2130_v27 = vpop.f32.mrf.mxu1  ;;  %v2042_v39 = vadd.f32 %v4717_v16, %v2041_v8  ;;  %v2305_v0 = vpop.f32.mrf.mxu3  ;;  %v662_v8 = vmul.f32 0.2, %v530_v60 }
  0xcb   : > { %v2216_v21 = vpop.f32.mrf.mxu2 }
  0xcc   : > { %v2131_v14 = vadd.f32 %v2130_v27, %v2042_v39  ;;  %2080 = vmatmul.bf16.gmra.mxu0 %v4743_v41  ;;  %v2217_v40 = vadd.f32 %v2216_v21, %v2128_v62  ;;  %v663_v62 = vmul.f32 0.2, %v531_v10  ;;  %v4005_v39 = vld [vmem:[%s5417_s1 + $0x108] sm:$0xff]  ;;  %v4850_v21 = vpack.c.b16 %v856_v61, %v854_v48 }
  0xcd   : > { %2169 = vmatmul.bf16.gmra.mxu1 %v4755_v22  ;;  %2384 = vmatpush.bf16.msrb.mxu0 %v4005_v39  ;;  %v389_v61 = vunpack.c.l.bf16 %v328_v5 }
  0xce   : > { %v4837_v9 = vadd.f32 %v2305_v0, %v2217_v40  ;;  %v4852_v0 = vpack.c.b16 %v857_v18, %v855_v3  ;;  %v329_v40 = vld [vmem:[%s4277_s8 + $0xe8] sm:$0xff]  ;;  %v729_v48 = vsel %vm597_vm10, %v531_v10, %v663_v62  ;;  %v730_v18 = vsel %vm598_vm11, %v532_v45, %v664_v2 }
  0xcf   : > { %2347 = vmatmul.bf16.gmra.mxu3 %v1123_v46  ;;  %v391_v13 = vunpack.c.l.bf16 %v329_v40  ;;  %v392_v53 = vunpack.c.h.bf16 %v329_v40  ;;  %v461_v10 = vmul.f32 %v4299_v24, %v389_v61 }
  0xd0   : > { %5495 = vst [vmem:[#allocation5_spill] sm:$0xff] %v4837_v9  ;;  %2258 = vmatmul.bf16.gmra.mxu2 %v1115_v30  ;;  %v728_v9 = vsel %vm596_vm9, %v530_v60, %v662_v8  ;;  %v5470_v30 = vshll.u32 %v4850_v21, 16  ;;  %v5469_v46 = vshll.u32 %v4852_v0, 16  ;;  %v4013_v60 = vld [vmem:[%s5417_s1 + $0x148] sm:$0xff]  ;;  %v768_v8 = vpack.c.bf16 %v730_v18, %v729_v48 }
  0xd1   : > { %v2043_v63 = vpop.f32.mrf.mxu0  ;;  %v767_v52 = vpack.c.bf16 %v728_v9, %v727_v15  ;;  %2473 = vmatpush.bf16.msrb.mxu1 %v4013_v60  ;;  %v464_v44 = vmul.f32 %v4301_v25, %v392_v53 }
  0xd2   : > { %v2132_v27 = vpop.f32.mrf.mxu1  ;;  %v2044_v42 = vadd.f32 %v4717_v16, %v2043_v63  ;;  %v2308_v6 = vpop.f32.mrf.mxu3  ;;  %v390_v63 = vunpack.c.h.bf16 %v328_v5  ;;  %v5498_v5 = vshrl.u32 %v4799_v57, 16  ;;  %v1130_v2 = vrot.slane %v5470_v30, 1 }
  0xd3   : > { %v2219_v43 = vpop.f32.mrf.mxu2  ;;  %v1138_v39 = vrot.slane %v5469_v46, 1  ;;  %v861_v61 = vunpack.c.h.b16 %v768_v8 }
  0xd4   : > { %v2133_v4 = vadd.f32 %v2132_v27, %v2044_v42  ;;  %v2220_v3 = vadd.f32 %v2219_v43, %v2131_v14  ;;  %v5497_v14 = vshrl.u32 %v4795_v58, 16  ;;  %v1134_v27 = vor.u32 %v5498_v5, %v4823_v19 }
  0xd5   : > { %v462_v15 = vmul.f32 %v4301_v25, %v390_v63  ;;  %v859_v42 = vunpack.c.h.b16 %v767_v52 }
  0xd6   : > { %v4862_v59 = vadd.f32 %v2308_v6, %v2220_v3  ;;  %v1126_v45 = vor.u32 %v5497_v14, %v4817_v20  ;;  %v463_v6 = vmul.f32 %v4299_v24, %v391_v13  ;;  %v858_v20 = vunpack.c.l.b16 %v767_v52 }
  0xd7   : > { %v860_v13 = vunpack.c.l.b16 %v768_v8  ;;  %v533_v3 = vadd.f32 %v4305_v28, %v461_v10  ;;  %v534_v63 = vadd.f32 %v4307_v29, %v462_v15  ;;  %v1139_v52 = vsel %vm939_vm8, %v1134_v27, %v1138_v39 }
  0xd8   : > { %5496 = vst [vmem:[#allocation6_spill] sm:$0xff] %v4862_v59  ;;  %v535_v60 = vadd.f32 %v4305_v28, %v463_v6  ;;  %v1131_v53 = vsel %vm939_vm8, %v1126_v45, %v1130_v2  ;;  %v4894_v5 = vpack.c.b16 %v861_v61, %v859_v42 }
  0xd9   : > { %v2046_v62 = vpop.f32.mrf.mxu0  ;;  %v4892_v14 = vpack.c.b16 %v860_v13, %v858_v20  ;;  %vm599_vm12 = vcmp.gt.f32.partialorder %v533_v3, 0.0  ;;  %v665_v10 = vmul.f32 0.2, %v533_v3  ;;  %v666_v15 = vmul.f32 0.2, %v534_v63  ;;  %v331_v20 = vld [vmem:[%s4277_s8 + $0xf8] sm:$0xff] }
  0xda   : > { %v2135_v43 = vpop.f32.mrf.mxu1  ;;  %v2047_v9 = vadd.f32 %v4717_v16, %v2046_v62  ;;  %v2310_v48 = vpop.f32.mrf.mxu3  ;;  %v536_v62 = vadd.f32 %v4307_v29, %v464_v44  ;;  %v667_v45 = vmul.f32 0.2, %v535_v60  ;;  %vm600_vm13 = vcmp.gt.f32.partialorder %v534_v63, 0.0  ;;  %v330_v44 = vld [vmem:[%s4277_s8 + $0xf0] sm:$0xff] }
  0xdb   : > { %v2221_v40 = vpop.f32.mrf.mxu2  ;;  %vm601_vm14 = vcmp.gt.f32.partialorder %v535_v60, 0.0  ;;  %v5475_v13 = vshll.u32 %v4892_v14, 16  ;;  %v395_v59 = vunpack.c.l.bf16 %v331_v20 }
  0xdc   : > { %v2136_v19 = vadd.f32 %v2135_v43, %v2047_v9  ;;  %2085 = vmatmul.bf16.gmra.mxu0 %v4795_v58  ;;  %v2222_v18 = vadd.f32 %v2221_v40, %v2133_v4  ;;  %v668_v6 = vmul.f32 0.2, %v536_v62  ;;  %vm602_vm15 = vcmp.gt.f32.partialorder %v536_v62, 0.0 }
  0xdd   : > { %2174 = vmatmul.bf16.gmra.mxu1 %v4799_v57  ;;  %v733_v46 = vsel %vm601_vm14, %v535_v60, %v667_v45  ;;  %v394_v9 = vunpack.c.h.bf16 %v330_v44  ;;  %v396_v58 = vunpack.c.h.bf16 %v331_v20  ;;  %v4910_v61 = vrot.slane %v5475_v13, 1 }
  0xde   : > { %v4890_v43 = vadd.f32 %v2310_v48, %v2222_v18  ;;  %v734_v30 = vsel %vm602_vm15, %v536_v62, %v668_v6  ;;  %v5502_v60 = vshll.u32 %v4894_v5, 16  ;;  %v467_v6 = vmul.f32 %v4299_v24, %v395_v59 }
  0xdf   : > { %2352 = vmatmul.bf16.gmra.mxu3 %v1139_v52  ;;  %v731_v52 = vsel %vm599_vm12, %v533_v3, %v665_v10  ;;  %v5501_v3 = vshrl.u32 %v4852_v0, 16  ;;  %v770_v10 = vpack.c.bf16 %v734_v30, %v733_v46 }
  0xe0   : > { %5499 = vst [vmem:[#allocation7_spill] sm:$0xff] %v4890_v43  ;;  %2263 = vmatmul.bf16.gmra.mxu2 %v1131_v53  ;;  %v393_v43 = vunpack.c.l.bf16 %v330_v44  ;;  %v4916_v62 = vrot.slane %v5502_v60, 1  ;;  %v468_v44 = vmul.f32 %v4301_v25, %v396_v58  ;;  %v4004_v60 = vld [vmem:[%s5417_s1 + $0x100] sm:$0xff] }
  0xe1   : > { %v2048_v4 = vpop.f32.mrf.mxu0  ;;  %2385 = vmatpush.bf16.msrb.mxu0 %v4004_v60 }
  0xe2   : > { %v2137_v8 = vpop.f32.mrf.mxu1  ;;  %v2049_v27 = vadd.f32 %v4717_v16, %v2048_v4  ;;  %v2313_v40 = vpop.f32.mrf.mxu3  ;;  %v732_v4 = vsel %vm600_vm13, %v534_v63, %v666_v15  ;;  %v1150_v63 = vor.u32 %v5501_v3, %v1138_v39  ;;  %v465_v45 = vmul.f32 %v4299_v24, %v393_v43 }
  0xe3   : > { %v2224_v42 = vpop.f32.mrf.mxu2  ;;  %v769_v18 = vpack.c.bf16 %v732_v4, %v731_v52  ;;  %v864_v52 = vunpack.c.l.b16 %v770_v10  ;;  %v865_v4 = vunpack.c.h.b16 %v770_v10  ;;  %v4028_v10 = vld [vmem:[%s5417_s1 + $0x1c0] sm:$0xff] }
  0xe4   : > { %v2138_v48 = vadd.f32 %v2137_v8, %v2049_v27  ;;  %v2225_v53 = vadd.f32 %v2224_v42, %v2136_v19  ;;  %v5500_v8 = vshrl.u32 %v4850_v21, 16  ;;  %v1155_v59 = vsel %vm939_vm8, %v1150_v63, %v4916_v62  ;;  %v4020_v63 = vld [vmem:[%s5417_s1 + $0x180] sm:$0xff]  ;;  %2652 = vmatpush.bf16.msrb.mxu3 %v4028_v10 }
  0xe5   : > { %v862_v46 = vunpack.c.l.b16 %v769_v18  ;;  %v863_v43 = vunpack.c.h.b16 %v769_v18  ;;  %v537_v58 = vadd.f32 %v4305_v28, %v465_v45  ;;  %2563 = vmatpush.bf16.msrb.mxu2 %v4020_v63  ;;  %v4012_v10 = vld [vmem:[%s5417_s1 + $0x140] sm:$0xff] }
  0xe6   : > { %v4904_v57 = vadd.f32 %v2313_v40, %v2225_v53  ;;  %v1142_v27 = vor.u32 %v5500_v8, %v1130_v2  ;;  %v466_v2 = vmul.f32 %v4301_v25, %v394_v9  ;;  %v539_v8 = vadd.f32 %v4305_v28, %v467_v6  ;;  %2474 = vmatpush.bf16.msrb.mxu1 %v4012_v10 }
  0xe7   : > { %v4935_v3 = vpack.c.b16 %v864_v52, %v862_v46  ;;  %v4937_v18 = vpack.c.b16 %v865_v4, %v863_v43  ;;  %v669_v45 = vmul.f32 0.2, %v537_v58  ;;  %vm603_vm0 = vcmp.gt.f32.partialorder %v537_v58, 0.0 }
  0xe8   : > { %v1147_v30 = vsel %vm939_vm8, %v1142_v27, %v4910_v61  ;;  %v538_v9 = vadd.f32 %v4307_v29, %v466_v2  ;;  %v671_v6 = vmul.f32 0.2, %v539_v8  ;;  %vm605_vm2 = vcmp.gt.f32.partialorder %v539_v8, 0.0 }
  0xe9   : > { %v2051_v19 = vpop.f32.mrf.mxu0  ;;  %5503 = vst [vmem:[#allocation8_spill] sm:$0xff] %v4935_v3  ;;  %v5476_v46 = vshrl.u32 %v4892_v14, 16  ;;  %v5481_v4 = vshrl.u32 %v4894_v5, 16 }
  0xea   : > { %v2140_v42 = vpop.f32.mrf.mxu1  ;;  %v2052_v15 = vadd.f32 %v4717_v16, %v2051_v19  ;;  %v2315_v40 = vpop.f32.mrf.mxu3  ;;  %5504 = vst [vmem:[#allocation9_spill] sm:$0xff] %v4937_v18  ;;  %v670_v2 = vmul.f32 0.2, %v538_v9  ;;  %vm604_vm1 = vcmp.gt.f32.partialorder %v538_v9, 0.0  ;;  %v737_v60 = vsel %vm605_vm2, %v539_v8, %v671_v6 }
  0xeb   : > { %v2226_v20 = vpop.f32.mrf.mxu2  ;;  %v1166_v8 = vor.u32 %v5481_v4, %v4916_v62 }
  0xec   : > { %v2141_v53 = vadd.f32 %v2140_v42, %v2052_v15  ;;  %2090 = vmatmul.bf16.gmra.mxu0 %v4850_v21  ;;  %v2227_v39 = vadd.f32 %v2226_v20, %v2138_v48  ;;  %v540_v42 = vadd.f32 %v4307_v29, %v468_v44  ;;  %v736_v63 = vsel %vm604_vm1, %v538_v9, %v670_v2 }
  0xed   : > { %2179 = vmatmul.bf16.gmra.mxu1 %v4852_v0 }
  0xee   : > { %v4932_v19 = vadd.f32 %v2315_v40, %v2227_v39  ;;  %v672_v44 = vmul.f32 0.2, %v540_v42  ;;  %vm606_vm3 = vcmp.gt.f32.partialorder %v540_v42, 0.0  ;;  %v332_v39 = vld [vmem:[%s4277_s8 + $0x100] sm:$0x77] }
  0xef   : > { %2357 = vmatmul.bf16.gmra.mxu3 %v1155_v59  ;;  %v1158_v59 = vor.u32 %v5476_v46, %v4910_v61 }
  0xf0   : > { %2268 = vmatmul.bf16.gmra.mxu2 %v1147_v30 }
  0xf1   : > { %v2053_v27 = vpop.f32.mrf.mxu0 }
  0xf2   : > { %v2142_v48 = vpop.f32.mrf.mxu1  ;;  %v2054_v15 = vadd.f32 %v4717_v16, %v2053_v27  ;;  %v2318_v40 = vpop.f32.mrf.mxu3  ;;  %v735_v27 = vsel %vm603_vm0, %v537_v58, %v669_v45  ;;  %v5505_v58 = vshll.u32 %v4935_v3, 16 }
  0xf3   : > { %v2229_v20 = vpop.f32.mrf.mxu2  ;;  %v771_v6 = vpack.c.bf16 %v736_v63, %v735_v27 }
  0xf4   : > { %v2143_v30 = vadd.f32 %v2142_v48, %v2054_v15  ;;  %v2230_v52 = vadd.f32 %v2229_v20, %v2141_v53  ;;  %v738_v48 = vsel %vm606_vm3, %v540_v42, %v672_v44  ;;  %v397_v53 = vunpack.c.l.bf16 %v332_v39 }
  0xf5   : > { %v398_v15 = vunpack.c.h.bf16 %v332_v39  ;;  %v1162_v9 = vrot.slane %v5505_v58, 1  ;;  %v5506_v42 = vshll.u32 %v4937_v18, 16  ;;  %v772_v44 = vpack.c.bf16 %v738_v48, %v737_v60 }
  0xf6   : > { %v4957_v13 = vadd.f32 %v2318_v40, %v2230_v52  ;;  %v469_v40 = vmul.f32 %v4299_v24, %v397_v53  ;;  %v867_v27 = vunpack.c.h.b16 %v771_v6 }
  0xf7   : > { %v1170_v45 = vrot.slane %v5506_v42, 1  ;;  %v470_v39 = vmul.f32 %v4301_v25, %v398_v15  ;;  %v1163_v58 = vsel %vm939_vm8, %v1158_v59, %v1162_v9  ;;  %v866_v42 = vunpack.c.l.b16 %v771_v6 }
  0xf8   : > { %v869_v63 = vunpack.c.h.b16 %v772_v44  ;;  %v541_v24 = vadd.f32 %v4305_v28, %v469_v40  ;;  %v5479_v40 = vshrl.u32 %v4937_v18, 16 }
  0xf9   : > { %v2056_v20 = vpop.f32.mrf.mxu0  ;;  %v1171_v10 = vsel %vm939_vm8, %v1166_v8, %v1170_v45  ;;  %v542_v25 = vadd.f32 %v4307_v29, %v470_v39  ;;  %v5480_v29 = vshrl.u32 %v4935_v3, 16 }
  0xfa   : > { %v2145_v43 = vpop.f32.mrf.mxu1  ;;  %v2057_v2 = vadd.f32 %v4717_v16, %v2056_v20  ;;  %v2320_v52 = vpop.f32.mrf.mxu3  ;;  %v868_v20 = vunpack.c.l.b16 %v772_v44  ;;  %v4986_v59 = vpack.c.b16 %v869_v63, %v867_v27  ;;  %v673_v15 = vmul.f32 0.2, %v541_v24 }
  0xfb   : > { %v2231_v61 = vpop.f32.mrf.mxu2  ;;  %v674_v8 = vmul.f32 0.2, %v542_v25  ;;  %vm607_vm4 = vcmp.gt.f32.partialorder %v541_v24, 0.0  ;;  %vm608_vm5 = vcmp.gt.f32.partialorder %v542_v25, 0.0 }
  0xfc   : > { %v2146_v46 = vadd.f32 %v2145_v43, %v2057_v2  ;;  %2095 = vmatmul.bf16.gmra.mxu0 %v4892_v14  ;;  %v2232_v62 = vadd.f32 %v2231_v61, %v2143_v30  ;;  %v4984_v53 = vpack.c.b16 %v868_v20, %v866_v42  ;;  %v5477_v61 = vshll.u32 %v4986_v59, 16 }
  0xfd   : > { %2184 = vmatmul.bf16.gmra.mxu1 %v4894_v5  ;;  %v1174_v20 = vor.u32 %v5480_v29, %v1162_v9  ;;  %v5511_v9 = vshrl.u32 %v4384_v35, 16 }
  0xfe   : > { %v4979_v60 = vadd.f32 %v2320_v52, %v2232_v62  ;;  %v5478_v39 = vshll.u32 %v4984_v53, 16  ;;  %v739_v62 = vsel %vm607_vm4, %v541_v24, %v673_v15  ;;  %v5509_v24 = vshrl.u32 %v4382_v34, 16 }
  0xff   : > { %2362 = vmatmul.bf16.gmra.mxu3 %v1171_v10 }
 0x100   : > { %5507 = vst [vmem:[#allocation10_spill] sm:$0xff] %v4979_v60  ;;  %2273 = vmatmul.bf16.gmra.mxu2 %v1163_v58  ;;  %v740_v58 = vsel %vm608_vm5, %v542_v25, %v674_v8  ;;  %v1178_v63 = vrot.slane %v5478_v39, 1  ;;  %v1336_v25 = vrot.slane %v5509_v24, 2  ;;  %v1343_v8 = vrot.slane %v5511_v9, 2 }
 0x101   : > { %v2058_v43 = vpop.f32.mrf.mxu0  ;;  %v5514_v24 = vshll.u32 %v4384_v35, 16  ;;  %v5516_v9 = vshrl.u32 %v4410_v56, 16 }
 0x102   : > { %v2147_v48 = vpop.f32.mrf.mxu1  ;;  %v2059_v30 = vadd.f32 %v4717_v16, %v2058_v43  ;;  %v2323_v6 = vpop.f32.mrf.mxu3  ;;  %v1186_v43 = vrot.slane %v5477_v61, 1  ;;  %v1179_v29 = vsel %vm939_vm8, %v1174_v20, %v1178_v63 }
 0x103   : > { %v2234_v2 = vpop.f32.mrf.mxu2  ;;  %v1344_v61 = vrot.slane %v5514_v24, 3 }
 0x104   : > { %v2148_v44 = vadd.f32 %v2147_v48, %v2059_v30  ;;  %v2235_v28 = vadd.f32 %v2234_v2, %v2146_v46  ;;  %v1182_v46 = vor.u32 %v5479_v40, %v1170_v45  ;;  %v773_v48 = vpack.c.bf16 %v740_v58, %v739_v62 }
 0x105   : > { %v5510_v30 = vshll.u32 %v4406_v54, 16  ;;  %v5512_v45 = vshrl.u32 %v4406_v54, 16  ;;  %v5513_v62 = vshll.u32 %v4382_v34, 16  ;;  %v1346_v40 = vrot.slane %v5516_v9, 2 }
 0x106   : > { %v4992_v52 = vadd.f32 %v2323_v6, %v2235_v28  ;;  %v936_v4 = vunpack.c.h.b16 %v773_v48  ;;  %v1345_v24 = vor.u32 %v1344_v61, %v1343_v8 }
 0x107   : > { %v1340_v15 = vrot.slane %v5510_v30, 3  ;;  %v1339_v2 = vrot.slane %v5512_v45, 2  ;;  %v1337_v58 = vrot.slane %v5513_v62, 3  ;;  %v5515_v30 = vshll.u32 %v4410_v56, 16 }
 0x108   : > { %5508 = vst [vmem:[#allocation11_spill] sm:$0xff] %v4992_v52 }
 0x109   : > { %v2061_v10 = vpop.f32.mrf.mxu0  ;;  %v1347_v39 = vrot.slane %v5515_v30, 3  ;;  %v1338_v62 = vor.u32 %v1337_v58, %v1336_v25  ;;  %v5025_v60 = vor.u32 %v1340_v15, %v1339_v2  ;;  %v5489_v2 = vshrl.u32 %v4984_v53, 16 }
 0x10a   : > { %v2150_v42 = vpop.f32.mrf.mxu1  ;;  %v2062_v27 = vadd.f32 %v4717_v16, %v2061_v10  ;;  %v2325_v28 = vpop.f32.mrf.mxu3 }
 0x10b   : > { %v2236_v6 = vpop.f32.mrf.mxu2  ;;  %v1190_v9 = vor.u32 %v5489_v2, %v1178_v63 }
 0x10c   : > { %v2151_v10 = vadd.f32 %v2150_v42, %v2062_v27  ;;  %2100 = vmatmul.bf16.gmra.mxu0 %v4935_v3  ;;  %v2237_v45 = vadd.f32 %v2236_v6, %v2148_v44  ;;  %v1187_v42 = vsel %vm939_vm8, %v1182_v46, %v1186_v43  ;;  %v935_v27 = vunpack.c.l.b16 %v773_v48 }
 0x10d   : > { %2189 = vmatmul.bf16.gmra.mxu1 %v4937_v18  ;;  %v5027_v3 = vor.u32 %v1347_v39, %v1346_v40  ;;  %v5032_v46 = vpack.c.b16 %v936_v4, %v936_v4  ;;  %v1342_v48 = vsel %vm1335_vm6, %v1338_v62, %v5025_v60  ;;  %v5488_v39 = vshrl.u32 %v4986_v59, 16 }
 0x10e   : > { %v5023_v52 = vadd.f32 %v2325_v28, %v2237_v45  ;;  %v5030_v20 = vpack.c.b16 %v935_v27, %v935_v27 }
 0x10f   : > { %2367 = vmatmul.bf16.gmra.mxu3 %v1187_v42  ;;  %v1349_v25 = vsel %vm1335_vm6, %v1345_v24, %v5027_v3  ;;  %v5486_v6 = vshll.u32 %v5032_v46, 16 }
 0x110   : > { %2278 = vmatmul.bf16.gmra.mxu2 %v1179_v29  ;;  %v5487_v40 = vshll.u32 %v5030_v20, 16 }
 0x111   : > { %v2063_v30 = vpop.f32.mrf.mxu0  ;;  %v1202_v42 = vrot.slane %v5486_v6, 1 }
 0x112   : > { %v2152_v18 = vpop.f32.mrf.mxu1  ;;  %v2064_v44 = vadd.f32 %v4717_v16, %v2063_v30  ;;  %v2328_v61 = vpop.f32.mrf.mxu3 }
 0x113   : > { %v2239_v15 = vpop.f32.mrf.mxu2 }
 0x114   : > { %v2153_v29 = vadd.f32 %v2152_v18, %v2064_v44  ;;  %v2240_v8 = vadd.f32 %v2239_v15, %v2151_v10  ;;  %v1194_v18 = vrot.slane %v5487_v40, 1  ;;  %v1198_v10 = vor.u32 %v5488_v39, %v1186_v43 }
 0x116   : > { %v5042_v4 = vadd.f32 %v2328_v61, %v2240_v8  ;;  %v1195_v63 = vsel %vm939_vm8, %v1190_v9, %v1194_v18  ;;  %v1203_v44 = vsel %vm939_vm8, %v1198_v10, %v1202_v42  ;;  %v1240_v9 = vrot.slane %v4384_v35, 2 }
 0x117   : > { %v1241_v18 = vrot.slane %v4410_v56, 2  ;;  %vm1236_vm8 = vcmask 1045504  }
 0x119   : > { %v2066_v28 = vpop.f32.mrf.mxu0 }
 0x11a   : > { %v2155_v58 = vpop.f32.mrf.mxu1  ;;  %v2067_v45 = vadd.f32 %v4717_v16, %v2066_v28  ;;  %v2330_v62 = vpop.f32.mrf.mxu3 }
 0x11b   : > { %v2241_v27 = vpop.f32.mrf.mxu2 }
 0x11c   : > { %v2156_v24 = vadd.f32 %v2155_v58, %v2067_v45  ;;  %2105 = vmatmul.bf16.gmra.mxu0 %v4984_v53  ;;  %v2242_v30 = vadd.f32 %v2241_v27, %v2153_v29  ;;  %v1237_v45 = vrot.slane %v4382_v34, 2  ;;  %v1238_v29 = vrot.slane %v4406_v54, 2 }
 0x11d   : > { %2194 = vmatmul.bf16.gmra.mxu1 %v4986_v59 }
 0x11e   : > { %v5057_v15 = vadd.f32 %v2330_v62, %v2242_v30  ;;  %v1239_v62 = vsel %vm1236_vm8, %v1237_v45, %v1238_v29  ;;  %v1242_v30 = vsel %vm1236_vm8, %v1240_v9, %v1241_v18  ;;  %v1243_v45 = vrot.slane %v4458_v50, 2 }
 0x11f   : > { %2372 = vmatmul.bf16.gmra.mxu3 %v1203_v44  ;;  %v1245_v9 = vrot.slane %v4460_v51, 2 }
 0x120   : > { %2283 = vmatmul.bf16.gmra.mxu2 %v1195_v63 }
 0x121   : > { %v2068_v43 = vpop.f32.mrf.mxu0 }
 0x122   : > { %v2157_v61 = vpop.f32.mrf.mxu1  ;;  %v2069_v8 = vadd.f32 %v4717_v16, %v2068_v43  ;;  %v2333_v6 = vpop.f32.mrf.mxu3 }
 0x123   : > { %v2244_v28 = vpop.f32.mrf.mxu2 }
 0x124   : > { %v2158_v58 = vadd.f32 %v2157_v61, %v2069_v8  ;;  %v2245_v40 = vadd.f32 %v2244_v28, %v2156_v24 }
 0x126   : > { %v5064_v10 = vadd.f32 %v2333_v6, %v2245_v40 }
 0x129   : > { %v2071_v42 = vpop.f32.mrf.mxu0 }
 0x12a   : > { %v2160_v27 = vpop.f32.mrf.mxu1  ;;  %v2072_v63 = vadd.f32 %v4717_v16, %v2071_v42  ;;  %v2335_v34 = vpop.f32.mrf.mxu3  ;;  %v5517_v42 = vshrl.u32 %v4458_v50, 16 }
 0x12b   : > { %v2246_v44 = vpop.f32.mrf.mxu2 }
 0x12c   : > { %v2161_v24 = vadd.f32 %v2160_v27, %v2072_v63  ;;  %2386 = vmatmul.bf16.vlgmr.msrb.gmra.mxu0 %v1239_v62  ;;  %v2247_v54 = vadd.f32 %v2246_v44, %v2158_v58  ;;  %v1350_v27 = vrot.slane %v5517_v42, 2  ;;  %v5518_v58 = vshll.u32 %v4458_v50, 16 }
 0x12d   : > { %2475 = vmatmul.bf16.vlgmr.msrb.gmra.mxu1 %v1242_v30  ;;  %v5520_v30 = vshll.u32 %v4460_v51, 16 }
 0x12e   : > { %v5069_v35 = vadd.f32 %v2335_v34, %v2247_v54  ;;  %v1351_v62 = vrot.slane %v5518_v58, 3  ;;  %v1244_v54 = vsel %vm1236_vm8, %v1238_v29, %v1243_v45 }
 0x12f   : > { %2653 = vmatmul.bf16.vlgmr.msrb.gmra.mxu3 %v1349_v25  ;;  %v1355_v63 = vrot.slane %v5520_v30, 3  ;;  %v1247_v30 = vrot.slane %v4486_v36, 2 }
 0x130   : > { %2564 = vmatmul.bf16.vlgmr.msrb.gmra.mxu2 %v1342_v48  ;;  %v5519_v48 = vshrl.u32 %v4460_v51, 16 }
 0x131   : > { %v2073_v56 = vpop.f32.mrf.mxu0 }
 0x132   : > { %v2162_v40 = vpop.f32.mrf.mxu1  ;;  %v2074_v6 = vadd.f32 %v4717_v16, %v2073_v56  ;;  %v2338_v61 = vpop.f32.mrf.mxu3  ;;  %v1354_v25 = vrot.slane %v5519_v48, 2  ;;  %v1246_v56 = vsel %vm1236_vm8, %v1241_v18, %v1245_v9  ;;  %v5096_v18 = vld [vmem:[%s5418_s2] ss:$0 sm:$0xff] }
 0x133   : > { %v2249_v43 = vpop.f32.mrf.mxu2 }
 0x134   : > { %v2163_v8 = vadd.f32 %v2162_v40, %v2074_v6  ;;  %v2250_v28 = vadd.f32 %v2249_v43, %v2161_v24  ;;  %v1352_v6 = vor.u32 %v1351_v62, %v1350_v27  ;;  %v1356_v43 = vor.u32 %v1355_v63, %v1354_v25 }
 0x135   : > { %v5521_v63 = vshrl.u32 %v4486_v36, 16 }
 0x136   : > { %v5082_v44 = vadd.f32 %v2338_v61, %v2250_v28  ;;  %v1353_v51 = vsel %vm1335_vm6, %v5025_v60, %v1352_v6  ;;  %v1357_v61 = vsel %vm1335_vm6, %v5027_v3, %v1356_v43  ;;  %v1249_v3 = vrot.slane %v4488_v37, 2 }
 0x139   : > { %v2076_v34 = vpop.f32.mrf.mxu0 }
 0x13a   : > { %v2165_v24 = vpop.f32.mrf.mxu1  ;;  %v2077_v40 = vadd.f32 %v4717_v16, %v2076_v34  ;;  %v2340_v42 = vpop.f32.mrf.mxu3  ;;  %v1358_v34 = vrot.slane %v5521_v63, 2 }
 0x13b   : > { %v2251_v50 = vpop.f32.mrf.mxu2 }
 0x13c   : > { %v2166_v58 = vadd.f32 %v2165_v24, %v2077_v40  ;;  %2391 = vmatmul.bf16.gmra.mxu0 %v1244_v54  ;;  %v2252_v48 = vadd.f32 %v2251_v50, %v2163_v8  ;;  %v5522_v24 = vshll.u32 %v4486_v36, 16  ;;  %v5524_v50 = vshll.u32 %v4488_v37, 16 }
 0x13d   : > { %2480 = vmatmul.bf16.gmra.mxu1 %v1246_v56  ;;  %v5523_v56 = vshrl.u32 %v4488_v37, 16 }
 0x13e   : > { %v5091_v28 = vadd.f32 %v2340_v42, %v2252_v48  ;;  %v1359_v54 = vrot.slane %v5522_v24, 3  ;;  %v1363_v42 = vrot.slane %v5524_v50, 3 }
 0x13f   : > { %2658 = vmatmul.bf16.gmra.mxu3 %v1357_v61  ;;  %v1362_v40 = vrot.slane %v5523_v56, 2  ;;  %v1248_v61 = vsel %vm1236_vm8, %v1243_v45, %v1247_v30 }
 0x140   : > { %2569 = vmatmul.bf16.gmra.mxu2 %v1353_v51 }
 0x141   : > { %v2078_v29 = vpop.f32.mrf.mxu0 }
 0x142   : > { %v2167_v16 = vpop.f32.mrf.mxu1  ;;  %v2079_v27 = vadd.f32 %v5096_v18, %v2078_v29  ;;  %v2343_v62 = vpop.f32.mrf.mxu3  ;;  %v1250_v29 = vsel %vm1236_vm8, %v1245_v9, %v1249_v3 }
 0x143   : > { %v2254_v8 = vpop.f32.mrf.mxu2 }
 0x144   : > { %v2168_v25 = vadd.f32 %v2167_v16, %v2079_v27  ;;  %v2255_v60 = vadd.f32 %v2254_v8, %v2166_v58  ;;  %v1360_v27 = vor.u32 %v1359_v54, %v1358_v34  ;;  %v1364_v8 = vor.u32 %v1363_v42, %v1362_v40 }
 0x146   : > { %v5109_v48 = vadd.f32 %v2343_v62, %v2255_v60  ;;  %v1361_v37 = vsel %vm1335_vm6, %v1352_v6, %v1360_v27  ;;  %v1365_v62 = vsel %vm1335_vm6, %v1356_v43, %v1364_v8  ;;  %v5525_v6 = vshrl.u32 %v4517_v31, 16 }
 0x147   : > { %v5526_v43 = vshll.u32 %v4517_v31, 16 }
 0x149   : > { %v2081_v51 = vpop.f32.mrf.mxu0 }
 0x14a   : > { %v2170_v58 = vpop.f32.mrf.mxu1  ;;  %v2082_v16 = vadd.f32 %v5096_v18, %v2081_v51  ;;  %v2345_v63 = vpop.f32.mrf.mxu3  ;;  %v1251_v51 = vrot.slane %v4517_v31, 2 }
 0x14b   : > { %v2256_v36 = vpop.f32.mrf.mxu2 }
 0x14c   : > { %v2171_v24 = vadd.f32 %v2170_v58, %v2082_v16  ;;  %2396 = vmatmul.bf16.gmra.mxu0 %v1248_v61  ;;  %v2257_v56 = vadd.f32 %v2256_v36, %v2168_v25  ;;  %v1253_v25 = vrot.slane %v4519_v32, 2  ;;  %v1366_v58 = vrot.slane %v5525_v6, 2 }
 0x14d   : > { %2485 = vmatmul.bf16.gmra.mxu1 %v1250_v29  ;;  %v1367_v61 = vrot.slane %v5526_v43, 3  ;;  %v5527_v29 = vshrl.u32 %v4519_v32, 16  ;;  %v5528_v36 = vshll.u32 %v4519_v32, 16 }
 0x14e   : > { %v5116_v60 = vadd.f32 %v2345_v63, %v2257_v56 }
 0x14f   : > { %2663 = vmatmul.bf16.gmra.mxu3 %v1365_v62  ;;  %v1370_v16 = vrot.slane %v5527_v29, 2  ;;  %v1371_v63 = vrot.slane %v5528_v36, 3  ;;  %v1252_v62 = vsel %vm1236_vm8, %v1247_v30, %v1251_v51 }
 0x150   : > { %2574 = vmatmul.bf16.gmra.mxu2 %v1361_v37 }
 0x151   : > { %v2083_v45 = vpop.f32.mrf.mxu0 }
 0x152   : > { %v2172_v9 = vpop.f32.mrf.mxu1  ;;  %v2084_v50 = vadd.f32 %v5096_v18, %v2083_v45  ;;  %v2348_v54 = vpop.f32.mrf.mxu3  ;;  %v1254_v45 = vsel %vm1236_vm8, %v1249_v3, %v1253_v25 }
 0x153   : > { %v2259_v34 = vpop.f32.mrf.mxu2 }
 0x154   : > { %v2173_v40 = vadd.f32 %v2172_v9, %v2084_v50  ;;  %v2260_v42 = vadd.f32 %v2259_v34, %v2171_v24  ;;  %v1368_v50 = vor.u32 %v1367_v61, %v1366_v58  ;;  %v1372_v34 = vor.u32 %v1371_v63, %v1370_v16 }
 0x156   : > { %v5129_v56 = vadd.f32 %v2348_v54, %v2260_v42  ;;  %v1369_v32 = vsel %vm1335_vm6, %v1360_v27, %v1368_v50  ;;  %v1373_v54 = vsel %vm1335_vm6, %v1364_v8, %v1372_v34  ;;  %v5529_v27 = vshrl.u32 %v4559_v47, 16 }
 0x157   : > { %v5530_v8 = vshll.u32 %v4559_v47, 16 }
 0x159   : > { %v2086_v37 = vpop.f32.mrf.mxu0 }
 0x15a   : > { %v2175_v24 = vpop.f32.mrf.mxu1  ;;  %v2087_v9 = vadd.f32 %v5096_v18, %v2086_v37  ;;  %v2350_v6 = vpop.f32.mrf.mxu3  ;;  %v1255_v37 = vrot.slane %v4559_v47, 2 }
 0x15b   : > { %v2261_v31 = vpop.f32.mrf.mxu2 }
 0x15c   : > { %v2176_v43 = vadd.f32 %v2175_v24, %v2087_v9  ;;  %2401 = vmatmul.bf16.gmra.mxu0 %v1252_v62  ;;  %v2262_v29 = vadd.f32 %v2261_v31, %v2173_v40  ;;  %v1257_v40 = vrot.slane %v4561_v55, 2  ;;  %v1374_v24 = vrot.slane %v5529_v27, 2 }
 0x15d   : > { %2490 = vmatmul.bf16.gmra.mxu1 %v1254_v45  ;;  %v1375_v62 = vrot.slane %v5530_v8, 3  ;;  %v5531_v45 = vshrl.u32 %v4561_v55, 16  ;;  %v5532_v31 = vshll.u32 %v4561_v55, 16 }
 0x15e   : > { %v5136_v42 = vadd.f32 %v2350_v6, %v2262_v29 }
 0x15f   : > { %2668 = vmatmul.bf16.gmra.mxu3 %v1373_v54  ;;  %v1378_v9 = vrot.slane %v5531_v45, 2  ;;  %v1379_v6 = vrot.slane %v5532_v31, 3  ;;  %v1256_v54 = vsel %vm1236_vm8, %v1251_v51, %v1255_v37 }
 0x160   : > { %2579 = vmatmul.bf16.gmra.mxu2 %v1369_v32 }
 0x161   : > { %v2088_v30 = vpop.f32.mrf.mxu0 }
 0x162   : > { %v2177_v3 = vpop.f32.mrf.mxu1  ;;  %v2089_v36 = vadd.f32 %v5096_v18, %v2088_v30  ;;  %v2353_v61 = vpop.f32.mrf.mxu3  ;;  %v1258_v30 = vsel %vm1236_vm8, %v1253_v25, %v1257_v40 }
 0x163   : > { %v2264_v58 = vpop.f32.mrf.mxu2 }
 0x164   : > { %v2178_v16 = vadd.f32 %v2177_v3, %v2089_v36  ;;  %v2265_v63 = vadd.f32 %v2264_v58, %v2176_v43  ;;  %v1376_v36 = vor.u32 %v1375_v62, %v1374_v24  ;;  %v1380_v58 = vor.u32 %v1379_v6, %v1378_v9 }
 0x166   : > { %v5149_v29 = vadd.f32 %v2353_v61, %v2265_v63  ;;  %v1377_v55 = vsel %vm1335_vm6, %v1368_v50, %v1376_v36  ;;  %v1381_v61 = vsel %vm1335_vm6, %v1372_v34, %v1380_v58  ;;  %v5533_v50 = vshrl.u32 %v4599_v23, 16 }
 0x167   : > { %v5534_v34 = vshll.u32 %v4599_v23, 16 }
 0x169   : > { %v2091_v32 = vpop.f32.mrf.mxu0 }
 0x16a   : > { %v2180_v43 = vpop.f32.mrf.mxu1  ;;  %v2092_v3 = vadd.f32 %v5096_v18, %v2091_v32  ;;  %v2355_v27 = vpop.f32.mrf.mxu3  ;;  %v1259_v32 = vrot.slane %v4599_v23, 2 }
 0x16b   : > { %v2266_v47 = vpop.f32.mrf.mxu2 }
 0x16c   : > { %v2181_v8 = vadd.f32 %v2180_v43, %v2092_v3  ;;  %2406 = vmatmul.bf16.gmra.mxu0 %v1256_v54  ;;  %v2267_v45 = vadd.f32 %v2266_v47, %v2178_v16  ;;  %v1261_v16 = vrot.slane %v4601_v26, 2  ;;  %v1382_v43 = vrot.slane %v5533_v50, 2 }
 0x16d   : > { %2495 = vmatmul.bf16.gmra.mxu1 %v1258_v30  ;;  %v1383_v54 = vrot.slane %v5534_v34, 3  ;;  %v5535_v30 = vshrl.u32 %v4601_v26, 16  ;;  %v5536_v47 = vshll.u32 %v4601_v26, 16 }
 0x16e   : > { %v5156_v63 = vadd.f32 %v2355_v27, %v2267_v45 }
 0x16f   : > { %2673 = vmatmul.bf16.gmra.mxu3 %v1381_v61  ;;  %v1386_v3 = vrot.slane %v5535_v30, 2  ;;  %v1387_v27 = vrot.slane %v5536_v47, 3  ;;  %v1260_v61 = vsel %vm1236_vm8, %v1255_v37, %v1259_v32 }
 0x170   : > { %2584 = vmatmul.bf16.gmra.mxu2 %v1377_v55 }
 0x171   : > { %v2093_v51 = vpop.f32.mrf.mxu0 }
 0x172   : > { %v2182_v25 = vpop.f32.mrf.mxu1  ;;  %v2094_v31 = vadd.f32 %v5096_v18, %v2093_v51  ;;  %v2358_v62 = vpop.f32.mrf.mxu3  ;;  %v1262_v51 = vsel %vm1236_vm8, %v1257_v40, %v1261_v16 }
 0x173   : > { %v2269_v24 = vpop.f32.mrf.mxu2 }
 0x174   : > { %v2183_v9 = vadd.f32 %v2182_v25, %v2094_v31  ;;  %v2270_v6 = vadd.f32 %v2269_v24, %v2181_v8  ;;  %v1384_v31 = vor.u32 %v1383_v54, %v1382_v43  ;;  %v1388_v24 = vor.u32 %v1387_v27, %v1386_v3 }
 0x176   : > { %v5169_v45 = vadd.f32 %v2358_v62, %v2270_v6  ;;  %v1385_v26 = vsel %vm1335_vm6, %v1376_v36, %v1384_v31  ;;  %v1389_v62 = vsel %vm1335_vm6, %v1380_v58, %v1388_v24  ;;  %v5537_v36 = vshrl.u32 %v4635_v7, 16 }
 0x177   : > { %v5538_v58 = vshll.u32 %v4635_v7, 16 }
 0x179   : > { %v2096_v55 = vpop.f32.mrf.mxu0 }
 0x17a   : > { %v2185_v8 = vpop.f32.mrf.mxu1  ;;  %v2097_v25 = vadd.f32 %v5096_v18, %v2096_v55  ;;  %v2360_v50 = vpop.f32.mrf.mxu3  ;;  %v1263_v55 = vrot.slane %v4635_v7, 2 }
 0x17b   : > { %v2271_v23 = vpop.f32.mrf.mxu2 }
 0x17c   : > { %v2186_v34 = vadd.f32 %v2185_v8, %v2097_v25  ;;  %2411 = vmatmul.bf16.gmra.mxu0 %v1260_v61  ;;  %v2272_v30 = vadd.f32 %v2271_v23, %v2183_v9  ;;  %v1265_v9 = vrot.slane %v4637_v1, 2  ;;  %v1390_v8 = vrot.slane %v5537_v36, 2 }
 0x17d   : > { %2500 = vmatmul.bf16.gmra.mxu1 %v1262_v51  ;;  %v1391_v61 = vrot.slane %v5538_v58, 3  ;;  %v5539_v51 = vshrl.u32 %v4637_v1, 16  ;;  %v5540_v23 = vshll.u32 %v4637_v1, 16 }
 0x17e   : > { %v5176_v6 = vadd.f32 %v2360_v50, %v2272_v30 }
 0x17f   : > { %2678 = vmatmul.bf16.gmra.mxu3 %v1389_v62  ;;  %v1394_v25 = vrot.slane %v5539_v51, 2  ;;  %v1395_v50 = vrot.slane %v5540_v23, 3  ;;  %v1264_v62 = vsel %vm1236_vm8, %v1259_v32, %v1263_v55 }
 0x180   : > { %2589 = vmatmul.bf16.gmra.mxu2 %v1385_v26 }
 0x181   : > { %v2098_v37 = vpop.f32.mrf.mxu0 }
 0x182   : > { %v2187_v40 = vpop.f32.mrf.mxu1  ;;  %v2099_v47 = vadd.f32 %v5096_v18, %v2098_v37  ;;  %v2363_v54 = vpop.f32.mrf.mxu3  ;;  %v1266_v37 = vsel %vm1236_vm8, %v1261_v16, %v1265_v9 }
 0x183   : > { %v2274_v43 = vpop.f32.mrf.mxu2 }
 0x184   : > { %v2188_v3 = vadd.f32 %v2187_v40, %v2099_v47  ;;  %v2275_v27 = vadd.f32 %v2274_v43, %v2186_v34  ;;  %v1392_v47 = vor.u32 %v1391_v61, %v1390_v8  ;;  %v1396_v43 = vor.u32 %v1395_v50, %v1394_v25 }
 0x186   : > { %v5189_v30 = vadd.f32 %v2363_v54, %v2275_v27  ;;  %v1393_v1 = vsel %vm1335_vm6, %v1384_v31, %v1392_v47  ;;  %v1397_v54 = vsel %vm1335_vm6, %v1388_v24, %v1396_v43  ;;  %v5541_v31 = vshrl.u32 %v4667_v33, 16 }
 0x187   : > { %v5542_v24 = vshll.u32 %v4667_v33, 16 }
 0x189   : > { %v2101_v26 = vpop.f32.mrf.mxu0 }
 0x18a   : > { %v2190_v34 = vpop.f32.mrf.mxu1  ;;  %v2102_v40 = vadd.f32 %v5096_v18, %v2101_v26  ;;  %v2365_v36 = vpop.f32.mrf.mxu3  ;;  %v1267_v26 = vrot.slane %v4667_v33, 2 }
 0x18b   : > { %v2276_v7 = vpop.f32.mrf.mxu2 }
 0x18c   : > { %v2191_v58 = vadd.f32 %v2190_v34, %v2102_v40  ;;  %2416 = vmatmul.bf16.gmra.mxu0 %v1264_v62  ;;  %v2277_v51 = vadd.f32 %v2276_v7, %v2188_v3  ;;  %v1269_v3 = vrot.slane %v4670_v12, 2  ;;  %v1398_v34 = vrot.slane %v5541_v31, 2 }
 0x18d   : > { %2505 = vmatmul.bf16.gmra.mxu1 %v1266_v37  ;;  %v1399_v62 = vrot.slane %v5542_v24, 3  ;;  %v5543_v37 = vshrl.u32 %v4670_v12, 16  ;;  %v5544_v7 = vshll.u32 %v4670_v12, 16 }
 0x18e   : > { %v5196_v27 = vadd.f32 %v2365_v36, %v2277_v51 }
 0x18f   : > { %2683 = vmatmul.bf16.gmra.mxu3 %v1397_v54  ;;  %v1402_v40 = vrot.slane %v5543_v37, 2  ;;  %v1403_v36 = vrot.slane %v5544_v7, 3  ;;  %v1268_v54 = vsel %vm1236_vm8, %v1263_v55, %v1267_v26 }
 0x190   : > { %2594 = vmatmul.bf16.gmra.mxu2 %v1393_v1 }
 0x191   : > { %v2103_v32 = vpop.f32.mrf.mxu0 }
 0x192   : > { %v2192_v16 = vpop.f32.mrf.mxu1  ;;  %v2104_v23 = vadd.f32 %v5096_v18, %v2103_v32  ;;  %v2368_v61 = vpop.f32.mrf.mxu3  ;;  %v1270_v32 = vsel %vm1236_vm8, %v1265_v9, %v1269_v3 }
 0x193   : > { %v2279_v8 = vpop.f32.mrf.mxu2 }
 0x194   : > { %v2193_v25 = vadd.f32 %v2192_v16, %v2104_v23  ;;  %v2280_v50 = vadd.f32 %v2279_v8, %v2191_v58  ;;  %v1400_v23 = vor.u32 %v1399_v62, %v1398_v34  ;;  %v1404_v8 = vor.u32 %v1403_v36, %v1402_v40 }
 0x196   : > { %v5209_v51 = vadd.f32 %v2368_v61, %v2280_v50  ;;  %v1401_v12 = vsel %vm1335_vm6, %v1392_v47, %v1400_v23  ;;  %v1405_v61 = vsel %vm1335_vm6, %v1396_v43, %v1404_v8  ;;  %v5545_v47 = vshrl.u32 %v4709_v11, 16 }
 0x197   : > { %v5546_v43 = vshll.u32 %v4709_v11, 16 }
 0x199   : > { %v2106_v1 = vpop.f32.mrf.mxu0 }
 0x19a   : > { %v2195_v58 = vpop.f32.mrf.mxu1  ;;  %v2107_v16 = vadd.f32 %v5096_v18, %v2106_v1  ;;  %v2370_v31 = vpop.f32.mrf.mxu3  ;;  %v1271_v1 = vrot.slane %v4709_v11, 2 }
 0x19b   : > { %v2281_v33 = vpop.f32.mrf.mxu2 }
 0x19c   : > { %v2196_v24 = vadd.f32 %v2195_v58, %v2107_v16  ;;  %2421 = vmatmul.bf16.gmra.mxu0 %v1268_v54  ;;  %v2282_v37 = vadd.f32 %v2281_v33, %v2193_v25  ;;  %v1273_v25 = vrot.slane %v4711_v38, 2  ;;  %v1406_v58 = vrot.slane %v5545_v47, 2 }
 0x19d   : > { %2510 = vmatmul.bf16.gmra.mxu1 %v1270_v32  ;;  %v1407_v54 = vrot.slane %v5546_v43, 3  ;;  %v5547_v32 = vshrl.u32 %v4711_v38, 16  ;;  %v5548_v33 = vshll.u32 %v4711_v38, 16 }
 0x19e   : > { %v5216_v50 = vadd.f32 %v2370_v31, %v2282_v37 }
 0x19f   : > { %2688 = vmatmul.bf16.gmra.mxu3 %v1405_v61  ;;  %v1410_v16 = vrot.slane %v5547_v32, 2  ;;  %v1274_v61 = vsel %vm1236_vm8, %v1269_v3, %v1273_v25 }
 0x1a0   : > { %2599 = vmatmul.bf16.gmra.mxu2 %v1401_v12  ;;  %v1272_v12 = vsel %vm1236_vm8, %v1267_v26, %v1271_v1 }
 0x1a1   : > { %v2108_v55 = vpop.f32.mrf.mxu0 }
 0x1a2   : > { %v2197_v9 = vpop.f32.mrf.mxu1  ;;  %v2109_v7 = vadd.f32 %v5096_v18, %v2108_v55  ;;  %v2373_v62 = vpop.f32.mrf.mxu3  ;;  %v1411_v18 = vrot.slane %v5548_v33, 3  ;;  %v2798_v55 = vlaneseq }
 0x1a3   : > { %v2284_v34 = vpop.f32.mrf.mxu2 }
 0x1a4   : > { %v2198_v40 = vadd.f32 %v2197_v9, %v2109_v7  ;;  %v2285_v36 = vadd.f32 %v2284_v34, %v2196_v24  ;;  %v1408_v9 = vor.u32 %v1407_v54, %v1406_v58  ;;  %v1412_v7 = vor.u32 %v1411_v18, %v1410_v16 }
 0x1a5   : > { %v2799_v43 = vshrl.u32 %v2798_v55, 7  ;;  %v5553_v55 = vshrl.u32 %v4755_v22, 16 }
 0x1a6   : > { %v5229_v31 = vadd.f32 %v2373_v62, %v2285_v36  ;;  %v1409_v38 = vsel %vm1335_vm6, %v1400_v23, %v1408_v9  ;;  %v1413_v62 = vsel %vm1335_vm6, %v1404_v8, %v1412_v7  ;;  %v5490_v23 = vrot.slane %v4743_v41, 2 }
 0x1a7   : > { %v2868_v26 = vand.u32 3, %v2799_v43  ;;  %v5491_v8 = vrot.slane %v4755_v22, 2 }
 0x1a9   : > { %v2387_v37 = vpop.f32.mrf.mxu0  ;;  %vm5238_vm7 = vcmp.lt.s32.totalorder %v2868_v26, 3 }
 0x1aa   : > { %v2476_v24 = vpop.f32.mrf.mxu1  ;;  %v2375_v11 = vpop.f32.mrf.mxu3  ;;  %v2388_v32 = vadd.f32 %v2387_v37, %v4767_v49  ;;  %v5552_v37 = vshll.u32 %v4743_v41, 16 }
 0x1ab   : > { %v2286_v34 = vpop.f32.mrf.mxu2 }
 0x1ac   : > { %2426 = vmatmul.bf16.gmra.mxu0 %v1272_v12  ;;  %v2287_v47 = vadd.f32 %v2286_v34, %v2198_v40  ;;  %v2477_v54 = vadd.f32 %v2476_v24, %v2388_v32  ;;  %v5551_v12 = vshrl.u32 %v4743_v41, 16  ;;  %v1418_v24 = vrot.slane %v5553_v55, 2 }
 0x1ad   : > { %2515 = vmatmul.bf16.gmra.mxu1 %v1274_v61  ;;  %v1415_v61 = vrot.slane %v5552_v37, 3  ;;  %v5554_v34 = vshll.u32 %v4755_v22, 16 }
 0x1ae   : > { %v5235_v36 = vadd.f32 %v2375_v11, %v2287_v47  ;;  %v1414_v49 = vrot.slane %v5551_v12, 2 }
 0x1af   : > { %2693 = vmatmul.bf16.gmra.mxu3 %v1413_v62  ;;  %v1419_v11 = vrot.slane %v5554_v34, 3 }
 0x1b0   : > { %2604 = vmatmul.bf16.gmra.mxu2 %v1409_v38  ;;  %v1416_v37 = vor.u32 %v1415_v61, %v1414_v49 }
 0x1b1   : > { %v2389_v3 = vpop.f32.mrf.mxu0 }
 0x1b2   : > { %v2478_v58 = vpop.f32.mrf.mxu1  ;;  %v2654_v33 = vpop.f32.mrf.mxu3  ;;  %v2390_v43 = vadd.f32 %v2389_v3, %v4792_v17 }
 0x1b3   : > { %v2565_v16 = vpop.f32.mrf.mxu2 }
 0x1b4   : > { %v2566_v18 = vadd.f32 %v2565_v16, %v2477_v54  ;;  %v1276_v54 = vsel %vm1236_vm8, %v1271_v1, %v5490_v23  ;;  %v1278_v16 = vsel %vm1236_vm8, %v1273_v25, %v5491_v8  ;;  %v2479_v3 = vadd.f32 %v2478_v58, %v2390_v43 }
 0x1b5   : > { %v1417_v25 = vsel %vm1335_vm6, %v1408_v9, %v1416_v37  ;;  %v5563_v8 = vrot.slane %v4743_v41, 2 }
 0x1b6   : > { %v2655_v47 = vadd.f32 %v2654_v33, %v2566_v18  ;;  %v1420_v33 = vor.u32 %v1419_v11, %v1418_v24 }
 0x1b8   : > { %v3408_v38 = vsel %vm5238_vm7, %v2655_v47, 0.0  ;;  %v3478_v62 = vmul.f32 %v2655_v47, %v2655_v47  ;;  %v1421_v49 = vsel %vm1335_vm6, %v1412_v7, %v1420_v33 }
 0x1b9   : > { %v2392_v32 = vpop.f32.mrf.mxu0  ;;  %v3471_v12 = vrot.slane %v3408_v38, 4 }
 0x1ba   : > { %v2481_v26 = vpop.f32.mrf.mxu1  ;;  %v3510_v17 = vsel %vm5238_vm7, %v3478_v62, 0.0  ;;  %v2656_v39 = vpop.f32.mrf.mxu3 }
 0x1bb   : > { %v3472_v18 = vadd.f32 %v3471_v12, %v3408_v38  ;;  %v3573_v55 = vrot.slane %v3510_v17, 4  ;;  %v2567_v34 = vpop.f32.mrf.mxu2  ;;  %v5556_v12 = vld [vmem:[#allocation2_spill] sm:$0xff] }
 0x1bc   : > { %2431 = vmatmul.bf16.gmra.mxu0 %v1276_v54  ;;  %v2568_v2 = vadd.f32 %v2567_v34, %v2479_v3  ;;  %v5555_v54 = vld [vmem:[#allocation4_spill] sm:$0xff]  ;;  %v5559_v34 = vshll.u32 %v5556_v12, 16 }
 0x1bd   : > { %2520 = vmatmul.bf16.gmra.mxu1 %v1278_v16  ;;  %v3473_v1 = vrot.slane %v3472_v18, 2  ;;  %v3574_v23 = vadd.f32 %v3573_v55, %v3510_v17  ;;  %v2393_v16 = vadd.f32 %v2392_v32, %v5555_v54  ;;  %v1279_v17 = vrot.slane %v5556_v12, 2 }
 0x1be   : > { %v2657_v61 = vadd.f32 %v2656_v39, %v2568_v2 }
 0x1bf   : > { %v3474_v40 = vadd.f32 %v3473_v1, %v3472_v18  ;;  %v3575_v24 = vrot.slane %v3574_v23, 2  ;;  %2698 = vmatmul.bf16.gmra.mxu3 %v1421_v49  ;;  %v5558_v18 = vshrl.u32 %v5556_v12, 16  ;;  %v1423_v1 = vrot.slane %v5559_v34, 3 }
 0x1c0   : > { %v4039_v58 = vpack.c.bf16 %v2657_v61, %v2655_v47  ;;  %2609 = vmatmul.bf16.gmra.mxu2 %v1417_v25  ;;  %v5557_v47 = vld [vmem:[#allocation3_spill] sm:$0xff] }
 0x1c1   : > { %v2394_v11 = vpop.f32.mrf.mxu0  ;;  %v3475_v38 = vrot.slane %v3474_v40, 1  ;;  %v3576_v62 = vadd.f32 %v3575_v24, %v3574_v23  ;;  %v1281_v3 = vrot.slane %v5557_v47, 2  ;;  %v1422_v55 = vrot.slane %v5558_v18, 2  ;;  %v5562_v24 = vld [vmem:[#allocation5_spill] sm:$0xff] }
 0x1c2   : > { %v2483_v43 = vpop.f32.mrf.mxu1  ;;  %4040 = vst [vmem:[%s5270_s10] sm:$0xff] %v4039_v58   ;;  %v2659_v7 = vpop.f32.mrf.mxu3  ;;  %v5560_v25 = vshrl.u32 %v5557_v47, 16  ;;  %v5561_v61 = vshll.u32 %v5557_v47, 16  ;;  %v2395_v32 = vadd.f32 %v2394_v11, %v5562_v24  ;;  %v2482_v58 = vadd.f32 %v2481_v26, %v2393_v16 }
 0x1c3   : > { %v3476_v2 = vadd.f32 %v3475_v38, %v3474_v40  ;;  %v3577_v39 = vrot.slane %v3576_v62, 1  ;;  %v2570_v9 = vpop.f32.mrf.mxu2  ;;  %v1424_v12 = vor.u32 %v1423_v1, %v1422_v55  ;;  %v1285_v24 = vrot.slane %v4852_v0, 2 }
 0x1c4   : > { %v1426_v49 = vrot.slane %v5560_v25, 2  ;;  %v1427_v40 = vrot.slane %v5561_v61, 3  ;;  %v2571_v34 = vadd.f32 %v2570_v9, %v2482_v58  ;;  %v2484_v47 = vadd.f32 %v2483_v43, %v2395_v32  ;;  %v5565_v43 = vld [vmem:[#allocation6_spill] sm:$0xff] }
 0x1c5   : > { %3477 = vst [vmem:[%s293_s13] sm:$0x1] %v3476_v2  ;;  %v3578_v23 = vadd.f32 %v3577_v39, %v3576_v62  ;;  %v1280_v2 = vsel %vm1236_vm8, %v5563_v8, %v1279_v17  ;;  %v5564_v62 = vrot.slane %v4755_v22, 2  ;;  %v1425_v11 = vsel %vm1335_vm6, %v1416_v37, %v1424_v12 }
 0x1c6   : > { %v1428_v18 = vor.u32 %v1427_v40, %v1426_v49  ;;  %v2660_v16 = vadd.f32 %v2659_v7, %v2571_v34  ;;  %v1283_v40 = vrot.slane %v4850_v21, 2  ;;  %v5566_v37 = vshrl.u32 %v4850_v21, 16  ;;  %v5570_v34 = vld [vmem:[#allocation7_spill] sm:$0xff] }
 0x1c7   : > { %3579 = vst [vmem:[%s293_s13 + $0x1] sm:$0x1] %v3578_v23  ;;  %v1282_v39 = vsel %vm1236_vm8, %v5564_v62, %v1281_v3  ;;  %v5568_v58 = vshrl.u32 %v4852_v0, 16  ;;  %v5569_v62 = vshll.u32 %v4852_v0, 16 }
 0x1c8   : > { %v1429_v41 = vsel %vm1335_vm6, %v1420_v33, %v1428_v18  ;;  %v1430_v32 = vrot.slane %v5566_v37, 2  ;;  %v5567_v33 = vshll.u32 %v4850_v21, 16 }
 0x1c9   : > { %v2397_v38 = vpop.f32.mrf.mxu0 }
 0x1ca   : > { %v2486_v54 = vpop.f32.mrf.mxu1  ;;  %v2661_v61 = vpop.f32.mrf.mxu3  ;;  %v2398_v49 = vadd.f32 %v2397_v38, %v5565_v43  ;;  %v1431_v7 = vrot.slane %v5567_v33, 3 }
 0x1cb   : > { %v2572_v25 = vpop.f32.mrf.mxu2 }
 0x1cc   : > { %2436 = vmatmul.bf16.gmra.mxu0 %v1280_v2  ;;  %v2573_v26 = vadd.f32 %v2572_v25, %v2484_v47  ;;  %v1434_v2 = vrot.slane %v5568_v58, 2  ;;  %v2487_v25 = vadd.f32 %v2486_v54, %v2398_v49  ;;  %v1289_v58 = vrot.slane %v4894_v5, 2 }
 0x1cd   : > { %2525 = vmatmul.bf16.gmra.mxu1 %v1282_v39  ;;  %v1435_v39 = vrot.slane %v5569_v62, 3  ;;  %v5573_v62 = vshrl.u32 %v4894_v5, 16 }
 0x1ce   : > { %v2662_v8 = vadd.f32 %v2661_v61, %v2573_v26  ;;  %v1284_v26 = vsel %vm1236_vm8, %v1279_v17, %v1283_v40 }
 0x1cf   : > { %2703 = vmatmul.bf16.gmra.mxu3 %v1429_v41  ;;  %v1432_v41 = vor.u32 %v1431_v7, %v1430_v32  ;;  %v1287_v7 = vrot.slane %v4892_v14, 2 }
 0x1d0   : > { %v4044_v23 = vpack.c.bf16 %v2662_v8, %v2660_v16  ;;  %2614 = vmatmul.bf16.gmra.mxu2 %v1425_v11  ;;  %v1286_v11 = vsel %vm1236_vm8, %v1281_v3, %v1285_v24  ;;  %v1436_v16 = vor.u32 %v1435_v39, %v1434_v2  ;;  %v1442_v39 = vrot.slane %v5573_v62, 2 }
 0x1d1   : > { %v2399_v22 = vpop.f32.mrf.mxu0  ;;  %v1433_v37 = vsel %vm1335_vm6, %v1424_v12, %v1432_v41  ;;  %v5571_v12 = vshrl.u32 %v4892_v14, 16 }
 0x1d2   : > { %v2488_v55 = vpop.f32.mrf.mxu1  ;;  %4116 = vst [vmem:[%s5270_s10 + $0x8] sm:$0xff] %v4044_v23   ;;  %v2664_v1 = vpop.f32.mrf.mxu3  ;;  %v2400_v47 = vadd.f32 %v2399_v22, %v5570_v34  ;;  %v1437_v54 = vsel %vm1335_vm6, %v1428_v18, %v1436_v16  ;;  %v5572_v18 = vshll.u32 %v4892_v14, 16  ;;  %v5574_v34 = vshll.u32 %v4894_v5, 16 }
 0x1d3   : > { %v2575_v9 = vpop.f32.mrf.mxu2  ;;  %v1438_v2 = vrot.slane %v5571_v12, 2  ;;  %v5576_v12 = vld [vmem:[#allocation9_spill] sm:$0xff] }
 0x1d4   : > { %v2576_v8 = vadd.f32 %v2575_v9, %v2487_v25  ;;  %v2489_v21 = vadd.f32 %v2488_v55, %v2400_v47  ;;  %v1443_v47 = vrot.slane %v5574_v34, 3 }
 0x1d6   : > { %v2665_v22 = vadd.f32 %v2664_v1, %v2576_v8  ;;  %v1439_v1 = vrot.slane %v5572_v18, 3  ;;  %v1290_v8 = vsel %vm1236_vm8, %v1285_v24, %v1289_v58 }
 0x1d9   : > { %v2402_v38 = vpop.f32.mrf.mxu0 }
 0x1da   : > { %v2491_v61 = vpop.f32.mrf.mxu1  ;;  %v2666_v43 = vpop.f32.mrf.mxu3  ;;  %v2403_v55 = vadd.f32 %v2402_v38, %v4904_v57 }
 0x1db   : > { %v2577_v23 = vpop.f32.mrf.mxu2 }
 0x1dc   : > { %2441 = vmatmul.bf16.gmra.mxu0 %v1284_v26  ;;  %v2578_v0 = vadd.f32 %v2577_v23, %v2489_v21  ;;  %v2492_v26 = vadd.f32 %v2491_v61, %v2403_v55  ;;  %v1440_v21 = vor.u32 %v1439_v1, %v1438_v2  ;;  %v1444_v23 = vor.u32 %v1443_v47, %v1442_v39  ;;  %v5581_v47 = vld [vmem:[#allocation10_spill] sm:$0xff] }
 0x1dd   : > { %2530 = vmatmul.bf16.gmra.mxu1 %v1286_v11  ;;  %v1288_v11 = vsel %vm1236_vm8, %v1283_v40, %v1287_v7  ;;  %v1293_v2 = vrot.slane %v5576_v12, 2  ;;  %v5579_v1 = vshrl.u32 %v5576_v12, 16  ;;  %v5580_v39 = vshll.u32 %v5576_v12, 16 }
 0x1de   : > { %v2667_v49 = vadd.f32 %v2666_v43, %v2578_v0  ;;  %v1295_v12 = vrot.slane %v4984_v53, 2 }
 0x1df   : > { %2708 = vmatmul.bf16.gmra.mxu3 %v1437_v54  ;;  %v1441_v54 = vsel %vm1335_vm6, %v1432_v41, %v1440_v21  ;;  %v1450_v62 = vrot.slane %v5579_v1, 2  ;;  %v1451_v34 = vrot.slane %v5580_v39, 3  ;;  %v5586_v1 = vshll.u32 %v4986_v59, 16 }
 0x1e0   : > { %v4049_v33 = vpack.c.bf16 %v2667_v49, %v2665_v22  ;;  %2619 = vmatmul.bf16.gmra.mxu2 %v1433_v37 }
 0x1e1   : > { %v2404_v17 = vpop.f32.mrf.mxu0 }
 0x1e2   : > { %v2493_v3 = vpop.f32.mrf.mxu1  ;;  %4117 = vst [vmem:[%s5270_s10 + $0x10] sm:$0xff] %v4049_v33   ;;  %v2669_v32 = vpop.f32.mrf.mxu3  ;;  %v2405_v25 = vadd.f32 %v2404_v17, %v4932_v19  ;;  %v1445_v19 = vsel %vm1335_vm6, %v1436_v16, %v1444_v23 }
 0x1e3   : > { %v2580_v9 = vpop.f32.mrf.mxu2 }
 0x1e4   : > { %v2581_v43 = vadd.f32 %v2580_v9, %v2492_v26  ;;  %v2494_v14 = vadd.f32 %v2493_v3, %v2405_v25  ;;  %v5575_v9 = vld [vmem:[#allocation8_spill] sm:$0xff] }
 0x1e5   : > { %v1291_v55 = vrot.slane %v5575_v9, 2  ;;  %v5577_v41 = vshrl.u32 %v5575_v9, 16  ;;  %v5578_v16 = vshll.u32 %v5575_v9, 16 }
 0x1e6   : > { %v2670_v61 = vadd.f32 %v2669_v32, %v2581_v43 }
 0x1e7   : > { %v1446_v18 = vrot.slane %v5577_v41, 2  ;;  %v1447_v32 = vrot.slane %v5578_v16, 3  ;;  %v1297_v41 = vrot.slane %v4986_v59, 2  ;;  %v5585_v16 = vshrl.u32 %v4986_v59, 16 }
 0x1e9   : > { %v2407_v57 = vpop.f32.mrf.mxu0  ;;  %v1448_v43 = vor.u32 %v1447_v32, %v1446_v18  ;;  %v1458_v32 = vrot.slane %v5585_v16, 2 }
 0x1ea   : > { %v2496_v38 = vpop.f32.mrf.mxu1  ;;  %v2671_v37 = vpop.f32.mrf.mxu3  ;;  %v2408_v3 = vadd.f32 %v2407_v57, %v4957_v13 }
 0x1eb   : > { %v2582_v0 = vpop.f32.mrf.mxu2 }
 0x1ec   : > { %2446 = vmatmul.bf16.gmra.mxu0 %v1288_v11  ;;  %v2583_v5 = vadd.f32 %v2582_v0, %v2494_v14  ;;  %v2497_v26 = vadd.f32 %v2496_v38, %v2408_v3  ;;  %v1292_v11 = vsel %vm1236_vm8, %v1287_v7, %v1291_v55  ;;  %v1452_v14 = vor.u32 %v1451_v34, %v1450_v62 }
 0x1ed   : > { %2535 = vmatmul.bf16.gmra.mxu1 %v1290_v8  ;;  %v1294_v8 = vsel %vm1236_vm8, %v1289_v58, %v1293_v2  ;;  %v1459_v62 = vrot.slane %v5586_v1, 3 }
 0x1ee   : > { %v2672_v22 = vadd.f32 %v2671_v37, %v2583_v5  ;;  %v1453_v38 = vsel %vm1335_vm6, %v1444_v23, %v1452_v14  ;;  %v5584_v23 = vshll.u32 %v4984_v53, 16 }
 0x1ef   : > { %2713 = vmatmul.bf16.gmra.mxu3 %v1445_v19 }
 0x1f0   : > { %v4054_v49 = vpack.c.bf16 %v2672_v22, %v2670_v61  ;;  %2624 = vmatmul.bf16.gmra.mxu2 %v1441_v54  ;;  %v1449_v61 = vsel %vm1335_vm6, %v1440_v21, %v1448_v43  ;;  %v5583_v21 = vshrl.u32 %v4984_v53, 16 }
 0x1f1   : > { %v2409_v40 = vpop.f32.mrf.mxu0 }
 0x1f2   : > { %v2498_v24 = vpop.f32.mrf.mxu1  ;;  %4118 = vst [vmem:[%s5270_s10 + $0x18] sm:$0xff] %v4054_v49   ;;  %v2674_v17 = vpop.f32.mrf.mxu3  ;;  %v2410_v25 = vadd.f32 %v2409_v40, %v5581_v47  ;;  %v1454_v18 = vrot.slane %v5583_v21, 2 }
 0x1f3   : > { %v2585_v33 = vpop.f32.mrf.mxu2 }
 0x1f4   : > { %v2586_v0 = vadd.f32 %v2585_v33, %v2497_v26  ;;  %v2499_v37 = vadd.f32 %v2498_v24, %v2410_v25  ;;  %v5582_v24 = vld [vmem:[#allocation11_spill] sm:$0xff]  ;;  %v1296_v26 = vsel %vm1236_vm8, %v1291_v55, %v1295_v12 }
 0x1f6   : > { %v2675_v22 = vadd.f32 %v2674_v17, %v2586_v0  ;;  %v1455_v17 = vrot.slane %v5584_v23, 3 }
 0x1f9   : > { %v2412_v13 = vpop.f32.mrf.mxu0 }
 0x1fa   : > { %v2501_v57 = vpop.f32.mrf.mxu1  ;;  %v2676_v54 = vpop.f32.mrf.mxu3  ;;  %v2413_v9 = vadd.f32 %v2412_v13, %v5582_v24  ;;  %v1298_v13 = vsel %vm1236_vm8, %v1293_v2, %v1297_v41 }
 0x1fb   : > { %v2587_v5 = vpop.f32.mrf.mxu2 }
 0x1fc   : > { %2451 = vmatmul.bf16.gmra.mxu0 %v1292_v11  ;;  %v2588_v19 = vadd.f32 %v2587_v5, %v2499_v37  ;;  %v2502_v34 = vadd.f32 %v2501_v57, %v2413_v9  ;;  %v1456_v11 = vor.u32 %v1455_v17, %v1454_v18  ;;  %v5588_v9 = vshll.u32 %v5032_v46, 16 }
 0x1fd   : > { %2540 = vmatmul.bf16.gmra.mxu1 %v1294_v8  ;;  %v1460_v8 = vor.u32 %v1459_v62, %v1458_v32 }
 0x1fe   : > { %v2677_v49 = vadd.f32 %v2676_v54, %v2588_v19  ;;  %v1457_v54 = vsel %vm1335_vm6, %v1448_v43, %v1456_v11  ;;  %v1299_v43 = vrot.slane %v5030_v20, 2  ;;  %v1471_v21 = vrot.slane %v5588_v9, 3 }
 0x1ff   : > { %2718 = vmatmul.bf16.gmra.mxu3 %v1453_v38  ;;  %v1462_v38 = vshrl.u32 %v5030_v20, 16 }
 0x200   : > { %v4059_v40 = vpack.c.bf16 %v2677_v49, %v2675_v22  ;;  %2629 = vmatmul.bf16.gmra.mxu2 %v1449_v61  ;;  %v1468_v22 = vshrl.u32 %v5032_v46, 16  ;;  %v1300_v32 = vsel %vm1236_vm8, %v1295_v12, %v1299_v43 }
 0x201   : > { %v2414_v7 = vpop.f32.mrf.mxu0 }
 0x202   : > { %v2503_v58 = vpop.f32.mrf.mxu1  ;;  %4119 = vst [vmem:[%s5270_s10 + $0x20] sm:$0xff] %v4059_v40   ;;  %v2679_v3 = vpop.f32.mrf.mxu3  ;;  %v2415_v39 = vadd.f32 %v2414_v7, %v5023_v52  ;;  %v1461_v52 = vsel %vm1335_vm6, %v1452_v14, %v1460_v8  ;;  %v1301_v14 = vrot.slane %v5032_v46, 2  ;;  %v1470_v24 = vrot.slane %v1468_v22, 2 }
 0x203   : > { %v2590_v33 = vpop.f32.mrf.mxu2 }
 0x204   : > { %v2591_v0 = vadd.f32 %v2590_v33, %v2502_v34  ;;  %v2504_v53 = vadd.f32 %v2503_v58, %v2415_v39  ;;  %v1464_v58 = vrot.slane %v1462_v38, 2  ;;  %v5587_v33 = vshll.u32 %v5030_v20, 16 }
 0x205   : > { %v1472_v62 = vor.u32 %v1471_v21, %v1470_v24 }
 0x206   : > { %v2680_v57 = vadd.f32 %v2679_v3, %v2591_v0  ;;  %v1465_v3 = vrot.slane %v5587_v33, 3 }
 0x208   : > { %v1466_v1 = vor.u32 %v1465_v3, %v1464_v58 }
 0x209   : > { %v2417_v47 = vpop.f32.mrf.mxu0 }
 0x20a   : > { %v2506_v25 = vpop.f32.mrf.mxu1  ;;  %v2681_v5 = vpop.f32.mrf.mxu3  ;;  %v2418_v7 = vadd.f32 %v2417_v47, %v5042_v4  ;;  %v1302_v4 = vsel %vm1236_vm8, %v1297_v41, %v1301_v14 }
 0x20b   : > { %v2592_v37 = vpop.f32.mrf.mxu2 }
 0x20c   : > { %2456 = vmatmul.bf16.gmra.mxu0 %v1296_v26  ;;  %v2593_v59 = vadd.f32 %v2592_v37, %v2504_v53  ;;  %v2507_v23 = vadd.f32 %v2506_v25, %v2418_v7  ;;  %v1467_v26 = vsel %vm1335_vm6, %v1456_v11, %v1466_v1 }
 0x20d   : > { %2545 = vmatmul.bf16.gmra.mxu1 %v1298_v13 }
 0x20e   : > { %v2682_v19 = vadd.f32 %v2681_v5, %v2593_v59 }
 0x20f   : > { %2723 = vmatmul.bf16.gmra.mxu3 %v1461_v52 }
 0x210   : > { %v4064_v61 = vpack.c.bf16 %v2682_v19, %v2680_v57  ;;  %2634 = vmatmul.bf16.gmra.mxu2 %v1457_v54 }
 0x211   : > { %v2419_v55 = vpop.f32.mrf.mxu0 }
 0x212   : > { %v2508_v2 = vpop.f32.mrf.mxu1  ;;  %4120 = vst [vmem:[%s5270_s10 + $0x28] sm:$0xff] %v4064_v61   ;;  %v2684_v40 = vpop.f32.mrf.mxu3  ;;  %v2420_v18 = vadd.f32 %v2419_v55, %v5057_v15  ;;  %v1473_v15 = vsel %vm1335_vm6, %v1460_v8, %v1472_v62 }
 0x213   : > { %v2595_v49 = vpop.f32.mrf.mxu2 }
 0x214   : > { %v2596_v39 = vadd.f32 %v2595_v49, %v2507_v23  ;;  %v2509_v34 = vadd.f32 %v2508_v2, %v2420_v18 }
 0x216   : > { %v2685_v25 = vadd.f32 %v2684_v40, %v2596_v39 }
 0x219   : > { %v2422_v17 = vpop.f32.mrf.mxu0 }
 0x21a   : > { %v2511_v16 = vpop.f32.mrf.mxu1  ;;  %v2686_v47 = vpop.f32.mrf.mxu3  ;;  %v2423_v5 = vadd.f32 %v2422_v17, %v5064_v10 }
 0x21b   : > { %v2597_v20 = vpop.f32.mrf.mxu2 }
 0x21c   : > { %2461 = vmatmul.bf16.gmra.mxu0 %v1300_v32  ;;  %v2598_v46 = vadd.f32 %v2597_v20, %v2509_v34  ;;  %v2512_v54 = vadd.f32 %v2511_v16, %v2423_v5 }
 0x21d   : > { %2550 = vmatmul.bf16.gmra.mxu1 %v1302_v4 }
 0x21e   : > { %v2687_v13 = vadd.f32 %v2686_v47, %v2598_v46 }
 0x21f   : > { %2728 = vmatmul.bf16.gmra.mxu3 %v1473_v15 }
 0x220   : > { %v4069_v0 = vpack.c.bf16 %v2687_v13, %v2685_v25  ;;  %2639 = vmatmul.bf16.gmra.mxu2 %v1467_v26 }
 0x221   : > { %v2424_v12 = vpop.f32.mrf.mxu0 }
 0x222   : > { %v2513_v41 = vpop.f32.mrf.mxu1  ;;  %4121 = vst [vmem:[%s5270_s10 + $0x30] sm:$0xff] %v4069_v0   ;;  %v2689_v37 = vpop.f32.mrf.mxu3  ;;  %v2425_v59 = vadd.f32 %v2424_v12, %v5069_v35 }
 0x223   : > { %v2600_v53 = vpop.f32.mrf.mxu2 }
 0x224   : > { %v2601_v57 = vadd.f32 %v2600_v53, %v2512_v54  ;;  %v2514_v8 = vadd.f32 %v2513_v41, %v2425_v59 }
 0x226   : > { %v2690_v2 = vadd.f32 %v2689_v37, %v2601_v57 }
 0x229   : > { %v2427_v52 = vpop.f32.mrf.mxu0 }
 0x22a   : > { %v2516_v11 = vpop.f32.mrf.mxu1  ;;  %v2691_v61 = vpop.f32.mrf.mxu3  ;;  %v2428_v10 = vadd.f32 %v2427_v52, %v5082_v44 }
 0x22b   : > { %v2602_v19 = vpop.f32.mrf.mxu2 }
 0x22c   : > { %v2603_v55 = vadd.f32 %v2602_v19, %v2514_v8  ;;  %v2517_v14 = vadd.f32 %v2516_v11, %v2428_v10 }
 0x22e   : > { %v2692_v38 = vadd.f32 %v2691_v61, %v2603_v55 }
 0x230   : > { %v4074_v22 = vpack.c.bf16 %v2692_v38, %v2690_v2 }
 0x231   : > { %v2429_v49 = vpop.f32.mrf.mxu0 }
 0x232   : > { %v2518_v40 = vpop.f32.mrf.mxu1  ;;  %4122 = vst [vmem:[%s5270_s10 + $0x38] sm:$0xff] %v4074_v22   ;;  %v2694_v43 = vpop.f32.mrf.mxu3  ;;  %v2430_v35 = vadd.f32 %v2429_v49, %v5091_v28 }
 0x233   : > { %v2605_v7 = vpop.f32.mrf.mxu2 }
 0x234   : > { %v2606_v3 = vadd.f32 %v2605_v7, %v2517_v14  ;;  %v2519_v24 = vadd.f32 %v2518_v40, %v2430_v35 }
 0x236   : > { %v2695_v23 = vadd.f32 %v2694_v43, %v2606_v3 }
 0x239   : > { %v2432_v58 = vpop.f32.mrf.mxu0 }
 0x23a   : > { %v2521_v33 = vpop.f32.mrf.mxu1  ;;  %v2696_v21 = vpop.f32.mrf.mxu3  ;;  %v2433_v44 = vadd.f32 %v2432_v58, %v5109_v48 }
 0x23b   : > { %v2607_v9 = vpop.f32.mrf.mxu2 }
 0x23c   : > { %v2608_v18 = vadd.f32 %v2607_v9, %v2519_v24  ;;  %v2522_v39 = vadd.f32 %v2521_v33, %v2433_v44 }
 0x23e   : > { %v2697_v17 = vadd.f32 %v2696_v21, %v2608_v18 }
 0x240   : > { %v4079_v16 = vpack.c.bf16 %v2697_v17, %v2695_v23 }
 0x241   : > { %v2434_v32 = vpop.f32.mrf.mxu0 }
 0x242   : > { %v2523_v4 = vpop.f32.mrf.mxu1  ;;  %4123 = vst [vmem:[%s5270_s10 + $0x40] sm:$0xff] %v4079_v16   ;;  %v2699_v62 = vpop.f32.mrf.mxu3  ;;  %v2435_v28 = vadd.f32 %v2434_v32, %v5116_v60 }
 0x243   : > { %v2610_v1 = vpop.f32.mrf.mxu2 }
 0x244   : > { %v2611_v47 = vadd.f32 %v2610_v1, %v2522_v39  ;;  %v2524_v46 = vadd.f32 %v2523_v4, %v2435_v28 }
 0x246   : > { %v2700_v13 = vadd.f32 %v2699_v62, %v2611_v47 }
 0x249   : > { %v2437_v34 = vpop.f32.mrf.mxu0 }
 0x24a   : > { %v2526_v20 = vpop.f32.mrf.mxu1  ;;  %v2701_v15 = vpop.f32.mrf.mxu3  ;;  %v2438_v48 = vadd.f32 %v2437_v34, %v5129_v56 }
 0x24b   : > { %v2612_v26 = vpop.f32.mrf.mxu2 }
 0x24c   : > { %v2613_v25 = vadd.f32 %v2612_v26, %v2524_v46  ;;  %v2527_v59 = vadd.f32 %v2526_v20, %v2438_v48 }
 0x24e   : > { %v2702_v0 = vadd.f32 %v2701_v15, %v2613_v25 }
 0x250   : > { %v4084_v12 = vpack.c.bf16 %v2702_v0, %v2700_v13 }
 0x251   : > { %v2439_v41 = vpop.f32.mrf.mxu0 }
 0x252   : > { %v2528_v53 = vpop.f32.mrf.mxu1  ;;  %4124 = vst [vmem:[%s5270_s10 + $0x48] sm:$0xff] %v4084_v12   ;;  %v2704_v5 = vpop.f32.mrf.mxu3  ;;  %v2440_v60 = vadd.f32 %v2439_v41, %v5136_v42 }
 0x253   : > { %v2615_v37 = vpop.f32.mrf.mxu2 }
 0x254   : > { %v2616_v11 = vadd.f32 %v2615_v37, %v2527_v59  ;;  %v2529_v57 = vadd.f32 %v2528_v53, %v2440_v60 }
 0x256   : > { %v2705_v55 = vadd.f32 %v2704_v5, %v2616_v11 }
 0x259   : > { %v2442_v54 = vpop.f32.mrf.mxu0 }
 0x25a   : > { %v2531_v52 = vpop.f32.mrf.mxu1  ;;  %v2706_v19 = vpop.f32.mrf.mxu3  ;;  %v2443_v56 = vadd.f32 %v2442_v54, %v5149_v29 }
 0x25b   : > { %v2617_v8 = vpop.f32.mrf.mxu2 }
 0x25c   : > { %v2618_v61 = vadd.f32 %v2617_v8, %v2529_v57  ;;  %v2532_v43 = vadd.f32 %v2531_v52, %v2443_v56 }
 0x25e   : > { %v2707_v2 = vadd.f32 %v2706_v19, %v2618_v61 }
 0x260   : > { %v4089_v38 = vpack.c.bf16 %v2707_v2, %v2705_v55 }
 0x261   : > { %v2444_v22 = vpop.f32.mrf.mxu0 }
 0x262   : > { %v2533_v49 = vpop.f32.mrf.mxu1  ;;  %4125 = vst [vmem:[%s5270_s10 + $0x50] sm:$0xff] %v4089_v38   ;;  %v2709_v7 = vpop.f32.mrf.mxu3  ;;  %v2445_v42 = vadd.f32 %v2444_v22, %v5156_v63 }
 0x263   : > { %v2620_v40 = vpop.f32.mrf.mxu2 }
 0x264   : > { %v2621_v14 = vadd.f32 %v2620_v40, %v2532_v43  ;;  %v2534_v58 = vadd.f32 %v2533_v49, %v2445_v42 }
 0x266   : > { %v2710_v9 = vadd.f32 %v2709_v7, %v2621_v14 }
 0x269   : > { %v2447_v10 = vpop.f32.mrf.mxu0 }
 0x26a   : > { %v2536_v35 = vpop.f32.mrf.mxu1  ;;  %v2711_v3 = vpop.f32.mrf.mxu3  ;;  %v2448_v29 = vadd.f32 %v2447_v10, %v5169_v45 }
 0x26b   : > { %v2622_v33 = vpop.f32.mrf.mxu2 }
 0x26c   : > { %v2623_v24 = vadd.f32 %v2622_v33, %v2534_v58  ;;  %v2537_v4 = vadd.f32 %v2536_v35, %v2448_v29 }
 0x26e   : > { %v2712_v21 = vadd.f32 %v2711_v3, %v2623_v24 }
 0x270   : > { %v4094_v18 = vpack.c.bf16 %v2712_v21, %v2710_v9 }
 0x271   : > { %v2449_v23 = vpop.f32.mrf.mxu0 }
 0x272   : > { %v2538_v17 = vpop.f32.mrf.mxu1  ;;  %4126 = vst [vmem:[%s5270_s10 + $0x58] sm:$0xff] %v4094_v18   ;;  %v2714_v32 = vpop.f32.mrf.mxu3  ;;  %v2450_v63 = vadd.f32 %v2449_v23, %v5176_v6 }
 0x273   : > { %v2625_v16 = vpop.f32.mrf.mxu2 }
 0x274   : > { %v2626_v44 = vadd.f32 %v2625_v16, %v2537_v4  ;;  %v2539_v28 = vadd.f32 %v2538_v17, %v2450_v63 }
 0x276   : > { %v2715_v47 = vadd.f32 %v2714_v32, %v2626_v44 }
 0x279   : > { %v2452_v1 = vpop.f32.mrf.mxu0 }
 0x27a   : > { %v2541_v62 = vpop.f32.mrf.mxu1  ;;  %v2716_v34 = vpop.f32.mrf.mxu3  ;;  %v2453_v45 = vadd.f32 %v2452_v1, %v5189_v30 }
 0x27b   : > { %v2627_v39 = vpop.f32.mrf.mxu2 }
 0x27c   : > { %v2628_v20 = vadd.f32 %v2627_v39, %v2539_v28  ;;  %v2542_v12 = vadd.f32 %v2541_v62, %v2453_v45 }
 0x27e   : > { %v2717_v46 = vadd.f32 %v2716_v34, %v2628_v20 }
 0x280   : > { %v4099_v26 = vpack.c.bf16 %v2717_v46, %v2715_v47 }
 0x281   : > { %v2454_v15 = vpop.f32.mrf.mxu0 }
 0x282   : > { %v2543_v25 = vpop.f32.mrf.mxu1  ;;  %4127 = vst [vmem:[%s5270_s10 + $0x60] sm:$0xff] %v4099_v26   ;;  %v2719_v0 = vpop.f32.mrf.mxu3  ;;  %v2455_v6 = vadd.f32 %v2454_v15, %v5196_v27 }
 0x283   : > { %v2630_v13 = vpop.f32.mrf.mxu2 }
 0x284   : > { %v2631_v53 = vadd.f32 %v2630_v13, %v2542_v12  ;;  %v2544_v37 = vadd.f32 %v2543_v25, %v2455_v6 }
 0x286   : > { %v2720_v54 = vadd.f32 %v2719_v0, %v2631_v53 }
 0x289   : > { %v2457_v41 = vpop.f32.mrf.mxu0 }
 0x28a   : > { %v2546_v5 = vpop.f32.mrf.mxu1  ;;  %v2721_v60 = vpop.f32.mrf.mxu3  ;;  %v2458_v30 = vadd.f32 %v2457_v41, %v5209_v51 }
 0x28b   : > { %v2632_v48 = vpop.f32.mrf.mxu2 }
 0x28c   : > { %v2633_v59 = vadd.f32 %v2632_v48, %v2544_v37  ;;  %v2547_v55 = vadd.f32 %v2546_v5, %v2458_v30 }
 0x28e   : > { %v2722_v52 = vadd.f32 %v2721_v60, %v2633_v59 }
 0x290   : > { %v4104_v11 = vpack.c.bf16 %v2722_v52, %v2720_v54 }
 0x291   : > { %v2459_v57 = vpop.f32.mrf.mxu0 }
 0x292   : > { %4128 = vst [vmem:[%s5270_s10 + $0x68] sm:$0xff] %v4104_v11   ;;  %v2724_v19 = vpop.f32.mrf.mxu3  ;;  %v2548_v61 = vpop.f32.mrf.mxu1  ;;  %v2460_v27 = vadd.f32 %v2459_v57, %v5216_v50 }
 0x293   : > { %v2635_v8 = vpop.f32.mrf.mxu2 }
 0x294   : > { %v2636_v38 = vadd.f32 %v2635_v8, %v2547_v55  ;;  %v2549_v22 = vadd.f32 %v2548_v61, %v2460_v27 }
 0x296   : > { %v2725_v56 = vadd.f32 %v2724_v19, %v2636_v38 }
 0x299   : > { %v2462_v2 = vpop.f32.mrf.mxu0 }
 0x29a   : > { %v2726_v40 = vpop.f32.mrf.mxu3  ;;  %v2551_v43 = vpop.f32.mrf.mxu1  ;;  %v2463_v51 = vadd.f32 %v2462_v2, %v5229_v31 }
 0x29b   : > { %v2637_v49 = vpop.f32.mrf.mxu2 }
 0x29c   : > { %v2638_v7 = vadd.f32 %v2637_v49, %v2549_v22  ;;  %v2552_v33 = vadd.f32 %v2551_v43, %v2463_v51 }
 0x29e   : > { %v2727_v42 = vadd.f32 %v2726_v40, %v2638_v7 }
 0x2a0   : > { %v4109_v10 = vpack.c.bf16 %v2727_v42, %v2725_v56 }
 0x2a1   : > { %v2464_v35 = vpop.f32.mrf.mxu0 }
 0x2a2   : > { %4129 = vst [vmem:[%s5270_s10 + $0x70] sm:$0xff] %v4109_v10   ;;  %v2729_v58 = vpop.f32.mrf.mxu3  ;;  %v2465_v50 = vadd.f32 %v2464_v35, %v5235_v36  ;;  %v2553_v3 = vpop.f32.mrf.mxu1 }
 0x2a3   : > { %v2640_v14 = vpop.f32.mrf.mxu2 }
 0x2a4   : > { %v2641_v24 = vadd.f32 %v2640_v14, %v2552_v33  ;;  %v2554_v9 = vadd.f32 %v2553_v3, %v2465_v50 }
 0x2a6   : > { %v2730_v17 = vadd.f32 %v2729_v58, %v2641_v24 }
 0x2aa   : > { %v2731_v23 = vpop.f32.mrf.mxu3 }
 0x2ab   : > { %v2642_v21 = vpop.f32.mrf.mxu2 }
 0x2ac   : > { %v2643_v18 = vadd.f32 %v2642_v21, %v2554_v9 }
 0x2ae   : > { %v2732_v16 = vadd.f32 %v2731_v23, %v2643_v18 }
 0x2b0   : > { %v4114_v32 = vpack.c.bf16 %v2732_v16, %v2730_v17 }
 0x2b2   : > { %4130 = vst [vmem:[%s5270_s10 + $0x78] sm:$0xff] %v4114_v32  }
 0x2b3 PF: > { %s17_s23 = sadd.s32 1, %s4180_s23   ;;  %s5589_s21 = smov %s4176_s22 }
 0x2b4   : > { %p14_p5 = scmp.ge.s32.totalorder %s17_s23, 4   ;;  %s5590_s22 = smov %s5592_s24 }
 0x2b6   :  { %16 = sbr.rel (!%p14_p5) target bundleno = 2 (0x2), region = 83 }

// kernel: classification_network_forward.7
= control target key start
LH: loop header
LB: loop body
LE: loop exit
PB: predicated region body
PF: predicated region fallthrough
CT: control target
= control target key end

     0   :  { %vm48_vm0 = vcmask 1041408   ;;  %vm50_vm1 = vcmask 1045508   ;;  %vm52_vm2 = vcmask 1043456   ;;  %s5447_s0 = inlined_call_operand.vmem [shape: bf16[2,768], index: 0, kind: input, shape index: {}]   ;;  %s5448_s1 = inlined_call_operand.vmem [shape: f32[1,128], index: 1, kind: input, shape index: {}]   ;;  %s5449_s2 = inlined_call_operand.vmem [shape: f32[1,128], index: 2, kind: input, shape index: {}]   ;;  %s5450_s3 = inlined_call_operand.vmem [shape: bf16[768,512], index: 3, kind: input, shape index: {}]   ;;  %s5451_s4 = inlined_call_operand.vmem [shape: f32[1,512], index: 4, kind: input, shape index: {}]   ;;  %s5452_s5 = inlined_call_operand.vmem [shape: bf16[512,256], index: 5, kind: input, shape index: {}]   ;;  %s5453_s6 = inlined_call_operand.vmem [shape: f32[1,256], index: 6, kind: input, shape index: {}]   ;;  %s5454_s7 = inlined_call_operand.vmem [shape: bf16[256,128], index: 7, kind: input, shape index: {}]   ;;  %s5455_s8 = inlined_call_operand.vmem [shape: f32[1,128], index: 8, kind: input, shape index: {}]   ;;  %s5456_s9 = inlined_call_operand.hbm [shape: f32[2,128], index: 9, kind: output, shape index: {}]  }
   0x1   :  { %v2427_v0 = vld [vmem:[%s5450_s3 + $0xe0] sm:$0xf]  ;;  %v3431_v1 = vld [vmem:[%s5450_s3 + $0xec] sm:$0xf0] }
   0x2   :  { %v2555_v2 = vld [vmem:[%s5450_s3 + $0x1e0] sm:$0xf]  ;;  %v2428_v3 = vor.u32 %v3431_v1, %v2427_v0  ;;  %v3463_v4 = vld [vmem:[%s5450_s3 + $0x1ec] sm:$0xf0] }
   0x3   :  { %v2683_v5 = vld [vmem:[%s5450_s3 + $0x2e0] sm:$0xf]  ;;  %v3495_v6 = vld [vmem:[%s5450_s3 + $0x2ec] sm:$0xf0]  ;;  %v2556_v7 = vor.u32 %v3463_v4, %v2555_v2 }
   0x4   :  { %v2684_v8 = vor.u32 %v3495_v6, %v2683_v5  ;;  %v2811_v9 = vld [vmem:[%s5450_s3 + $0x3e0] sm:$0xf]  ;;  %v3527_v10 = vld [vmem:[%s5450_s3 + $0x3ec] sm:$0xf0]  ;;  %1252 = vmatpush.bf16.msra.mxu0 %v2428_v3 }
   0x5   :  { %v2411_v11 = vld [vmem:[%s5450_s3 + $0xc0] sm:$0xf]  ;;  %v2812_v12 = vor.u32 %v3527_v10, %v2811_v9  ;;  %v3427_v13 = vld [vmem:[%s5450_s3 + $0xcc] sm:$0xf0]  ;;  %1265 = vmatpush.bf16.msra.mxu1 %v2556_v7 }
   0x6   :  { %v2539_v14 = vld [vmem:[%s5450_s3 + $0x1c0] sm:$0xf]  ;;  %v3459_v15 = vld [vmem:[%s5450_s3 + $0x1cc] sm:$0xf0]  ;;  %1278 = vmatpush.bf16.msra.mxu2 %v2684_v8  ;;  %v2412_v16 = vor.u32 %v3427_v13, %v2411_v11 }
   0x7   :  { %v2540_v17 = vor.u32 %v3459_v15, %v2539_v14  ;;  %v2667_v18 = vld [vmem:[%s5450_s3 + $0x2c0] sm:$0xf]  ;;  %v3491_v19 = vld [vmem:[%s5450_s3 + $0x2cc] sm:$0xf0]  ;;  %1291 = vmatpush.bf16.msra.mxu3 %v2812_v12 }
   0x8   :  { %v2795_v20 = vld [vmem:[%s5450_s3 + $0x3c0] sm:$0xf]  ;;  %v2668_v21 = vor.u32 %v3491_v19, %v2667_v18  ;;  %v3523_v22 = vld [vmem:[%s5450_s3 + $0x3cc] sm:$0xf0]  ;;  %1253 = vmatpush.bf16.msra.mxu0 %v2412_v16 }
   0x9   :  { %v2395_v23 = vld [vmem:[%s5450_s3 + $0xa0] sm:$0xf]  ;;  %v3423_v24 = vld [vmem:[%s5450_s3 + $0xac] sm:$0xf0]  ;;  %v2796_v25 = vor.u32 %v3523_v22, %v2795_v20  ;;  %1266 = vmatpush.bf16.msra.mxu1 %v2540_v17 }
   0xa   :  { %v2523_v26 = vld [vmem:[%s5450_s3 + $0x1a0] sm:$0xf]  ;;  %v3455_v27 = vld [vmem:[%s5450_s3 + $0x1ac] sm:$0xf0]  ;;  %v2396_v29 = vor.u32 %v3423_v24, %v2395_v23  ;;  %1279 = vmatpush.bf16.msra.mxu2 %v2668_v21 }
   0xb   :  { %v2651_v28 = vld [vmem:[%s5450_s3 + $0x2a0] sm:$0xf]  ;;  %v3487_v30 = vld [vmem:[%s5450_s3 + $0x2ac] sm:$0xf0]  ;;  %v2524_v33 = vor.u32 %v3455_v27, %v2523_v26  ;;  %1292 = vmatpush.bf16.msra.mxu3 %v2796_v25 }
   0xc   :  { %v2779_v31 = vld [vmem:[%s5450_s3 + $0x3a0] sm:$0xf]  ;;  %v3519_v32 = vld [vmem:[%s5450_s3 + $0x3ac] sm:$0xf0]  ;;  %v2652_v34 = vor.u32 %v3487_v30, %v2651_v28  ;;  %1254 = vmatpush.bf16.msra.mxu0 %v2396_v29 }
   0xd   :  { %v2379_v35 = vld [vmem:[%s5450_s3 + $0x80] sm:$0xf]  ;;  %v3419_v36 = vld [vmem:[%s5450_s3 + $0x8c] sm:$0xf0]  ;;  %v2780_v38 = vor.u32 %v3519_v32, %v2779_v31  ;;  %1267 = vmatpush.bf16.msra.mxu1 %v2524_v33  ;;  %v3429_v33 = vld [vmem:[%s5450_s3 + $0xe4] sm:$0xf] }
   0xe   :  { %v2507_v37 = vld [vmem:[%s5450_s3 + $0x180] sm:$0xf]  ;;  %v3451_v39 = vld [vmem:[%s5450_s3 + $0x18c] sm:$0xf0]  ;;  %v2380_v44 = vor.u32 %v3419_v36, %v2379_v35  ;;  %1280 = vmatpush.bf16.msra.mxu2 %v2652_v34  ;;  %v2429_v34 = vld [vmem:[%s5450_s3 + $0xf0] sm:$0xf0] }
   0xf   :  { %v2635_v40 = vld [vmem:[%s5450_s3 + $0x280] sm:$0xf]  ;;  %v3483_v41 = vld [vmem:[%s5450_s3 + $0x28c] sm:$0xf0]  ;;  %v2508_v45 = vor.u32 %v3451_v39, %v2507_v37  ;;  %1293 = vmatpush.bf16.msra.mxu3 %v2780_v38  ;;  %v3461_v37 = vld [vmem:[%s5450_s3 + $0x1e4] sm:$0xf] }
  0x10   :  { %v2763_v42 = vld [vmem:[%s5450_s3 + $0x380] sm:$0xf]  ;;  %v3515_v43 = vld [vmem:[%s5450_s3 + $0x38c] sm:$0xf0]  ;;  %v2636_v46 = vor.u32 %v3483_v41, %v2635_v40  ;;  %1255 = vmatpush.bf16.msra.mxu0 %v2380_v44  ;;  %v2557_v38 = vld [vmem:[%s5450_s3 + $0x1f0] sm:$0xf0] }
  0x11   :  { %v2363_v47 = vld [vmem:[%s5450_s3 + $0x60] sm:$0xf]  ;;  %v3415_v48 = vld [vmem:[%s5450_s3 + $0x6c] sm:$0xf0]  ;;  %v2764_v50 = vor.u32 %v3515_v43, %v2763_v42  ;;  %1268 = vmatpush.bf16.msra.mxu1 %v2508_v45  ;;  %v2432_v42 = vor.u32 %v3429_v33, %v2429_v34  ;;  %v3413_v33 = vld [vmem:[%s5450_s3 + $0x64] sm:$0xf] }
  0x12   :  { %v2491_v49 = vld [vmem:[%s5450_s3 + $0x160] sm:$0xf]  ;;  %v3447_v51 = vld [vmem:[%s5450_s3 + $0x16c] sm:$0xf0]  ;;  %v2364_v56 = vor.u32 %v3415_v48, %v2363_v47  ;;  %1281 = vmatpush.bf16.msra.mxu2 %v2636_v46  ;;  %v2560_v46 = vor.u32 %v3461_v37, %v2557_v38  ;;  %v3425_v48 = vld [vmem:[%s5450_s3 + $0xc4] sm:$0xf] }
  0x13   :  { %v2619_v52 = vld [vmem:[%s5450_s3 + $0x260] sm:$0xf]  ;;  %v3479_v53 = vld [vmem:[%s5450_s3 + $0x26c] sm:$0xf0]  ;;  %v2492_v57 = vor.u32 %v3447_v51, %v2491_v49  ;;  %1294 = vmatpush.bf16.msra.mxu3 %v2764_v50  ;;  %v2413_v49 = vld [vmem:[%s5450_s3 + $0xd0] sm:$0xf0] }
  0x14   :  { %v2747_v54 = vld [vmem:[%s5450_s3 + $0x360] sm:$0xf]  ;;  %v3511_v55 = vld [vmem:[%s5450_s3 + $0x36c] sm:$0xf0]  ;;  %v2620_v58 = vor.u32 %v3479_v53, %v2619_v52  ;;  %1256 = vmatpush.bf16.msra.mxu0 %v2364_v56  ;;  %v3457_v50 = vld [vmem:[%s5450_s3 + $0x1c4] sm:$0xf] }
  0x15   :  { %v2347_v59 = vld [vmem:[%s5450_s3 + $0x40] sm:$0xf]  ;;  %v3411_v60 = vld [vmem:[%s5450_s3 + $0x4c] sm:$0xf0]  ;;  %v2748_v62 = vor.u32 %v3511_v55, %v2747_v54  ;;  %1269 = vmatpush.bf16.msra.mxu1 %v2492_v57  ;;  %v2541_v51 = vld [vmem:[%s5450_s3 + $0x1d0] sm:$0xf0] }
  0x16   :  { %v2475_v61 = vld [vmem:[%s5450_s3 + $0x140] sm:$0xf]  ;;  %v3443_v63 = vld [vmem:[%s5450_s3 + $0x14c] sm:$0xf0]  ;;  %v2348_v4 = vor.u32 %v3411_v60, %v2347_v59  ;;  %1282 = vmatpush.bf16.msra.mxu2 %v2620_v58  ;;  %v2416_v58 = vor.u32 %v3425_v48, %v2413_v49  ;;  %v3421_v59 = vld [vmem:[%s5450_s3 + $0xa4] sm:$0xf] }
  0x17   :  { %v2603_v0 = vld [vmem:[%s5450_s3 + $0x240] sm:$0xf]  ;;  %v3475_v1 = vld [vmem:[%s5450_s3 + $0x24c] sm:$0xf0]  ;;  %v2476_v5 = vor.u32 %v3443_v63, %v2475_v61  ;;  %1295 = vmatpush.bf16.msra.mxu3 %v2748_v62  ;;  %v2397_v60 = vld [vmem:[%s5450_s3 + $0xb0] sm:$0xf0]  ;;  %v2544_v62 = vor.u32 %v3457_v50, %v2541_v51 }
  0x18   :  { %v2731_v2 = vld [vmem:[%s5450_s3 + $0x340] sm:$0xf]  ;;  %v3507_v3 = vld [vmem:[%s5450_s3 + $0x34c] sm:$0xf0]  ;;  %v2604_v6 = vor.u32 %v3475_v1, %v2603_v0  ;;  %1257 = vmatpush.bf16.msra.mxu0 %v2348_v4  ;;  %v3453_v61 = vld [vmem:[%s5450_s3 + $0x1a4] sm:$0xf] }
  0x19   :  { %v2331_v7 = vld [vmem:[%s5450_s3 + $0x20] sm:$0xf]  ;;  %v3407_v8 = vld [vmem:[%s5450_s3 + $0x2c] sm:$0xf0]  ;;  %v2732_v10 = vor.u32 %v3507_v3, %v2731_v2  ;;  %1270 = vmatpush.bf16.msra.mxu1 %v2476_v5  ;;  %v2525_v63 = vld [vmem:[%s5450_s3 + $0x1b0] sm:$0xf0] }
  0x1a   :  { %v2459_v9 = vld [vmem:[%s5450_s3 + $0x120] sm:$0xf]  ;;  %v3439_v11 = vld [vmem:[%s5450_s3 + $0x12c] sm:$0xf0]  ;;  %v2332_v16 = vor.u32 %v3407_v8, %v2331_v7  ;;  %1283 = vmatpush.bf16.msra.mxu2 %v2604_v6  ;;  %v3417_v6 = vld [vmem:[%s5450_s3 + $0x84] sm:$0xf]  ;;  %v2400_v7 = vor.u32 %v3421_v59, %v2397_v60  ;;  %v2528_v8 = vor.u32 %v3453_v61, %v2525_v63 }
  0x1b   :  { %v2587_v12 = vld [vmem:[%s5450_s3 + $0x220] sm:$0xf]  ;;  %v3471_v13 = vld [vmem:[%s5450_s3 + $0x22c] sm:$0xf0]  ;;  %v2460_v19 = vor.u32 %v3439_v11, %v2459_v9  ;;  %1296 = vmatpush.bf16.msra.mxu3 %v2732_v10  ;;  %v2381_v10 = vld [vmem:[%s5450_s3 + $0x90] sm:$0xf0] }
  0x1c   :  { %v2715_v14 = vld [vmem:[%s5450_s3 + $0x320] sm:$0xf]  ;;  %v3503_v15 = vld [vmem:[%s5450_s3 + $0x32c] sm:$0xf0]  ;;  %v2588_v20 = vor.u32 %v3471_v13, %v2587_v12  ;;  %1258 = vmatpush.bf16.msra.mxu0 %v2332_v16  ;;  %v2365_v34 = vld [vmem:[%s5450_s3 + $0x70] sm:$0xf0] }
  0x1d   :  { %v2315_v17 = vld [vmem:[%s5450_s3] sm:$0xf]  ;;  %v3403_v18 = vld [vmem:[%s5450_s3 + $0xc] sm:$0xf0]  ;;  %v2716_v24 = vor.u32 %v3503_v15, %v2715_v14  ;;  %1271 = vmatpush.bf16.msra.mxu1 %v2460_v19  ;;  %v3449_v14 = vld [vmem:[%s5450_s3 + $0x184] sm:$0xf] }
  0x1e   :  { %v2443_v21 = vld [vmem:[%s5450_s3 + $0x100] sm:$0xf]  ;;  %v3435_v22 = vld [vmem:[%s5450_s3 + $0x10c] sm:$0xf0]  ;;  %v2316_v31 = vor.u32 %v3403_v18, %v2315_v17  ;;  %1284 = vmatpush.bf16.msra.mxu2 %v2588_v20  ;;  %v2509_v17 = vld [vmem:[%s5450_s3 + $0x190] sm:$0xf0] }
  0x1f   :  { %v2571_v23 = vld [vmem:[%s5450_s3 + $0x200] sm:$0xf]  ;;  %v3467_v25 = vld [vmem:[%s5450_s3 + $0x20c] sm:$0xf0]  ;;  %v2444_v35 = vor.u32 %v3435_v22, %v2443_v21  ;;  %1297 = vmatpush.bf16.msra.mxu3 %v2716_v24  ;;  %v3445_v38 = vld [vmem:[%s5450_s3 + $0x164] sm:$0xf] }
  0x20   :  { %v2699_v26 = vld [vmem:[%s5450_s3 + $0x300] sm:$0xf]  ;;  %v3499_v27 = vld [vmem:[%s5450_s3 + $0x30c] sm:$0xf0]  ;;  %v2572_v36 = vor.u32 %v3467_v25, %v2571_v23  ;;  %1259 = vmatpush.bf16.msra.mxu0 %v2316_v31  ;;  %v2384_v25 = vor.u32 %v3417_v6, %v2381_v10  ;;  %v2512_v31 = vor.u32 %v3449_v14, %v2509_v17  ;;  %v2461_v6 = vld [vmem:[%s5450_s3 + $0x130] sm:$0xf0] }
  0x21   :  { %v2939_v28 = vld [vmem:[%s5450_s3 + $0x4e0] sm:$0xf]  ;;  %v3559_v29 = vld [vmem:[%s5450_s3 + $0x4ec] sm:$0xf0]  ;;  %v2700_v39 = vor.u32 %v3499_v27, %v2699_v26  ;;  %1272 = vmatpush.bf16.msra.mxu1 %v2444_v35  ;;  %v2317_v17 = vld [vmem:[%s5450_s3 + $0x10] sm:$0xf0] }
  0x22   :  { %v3067_v30 = vld [vmem:[%s5450_s3 + $0x5e0] sm:$0xf]  ;;  %v3591_v32 = vld [vmem:[%s5450_s3 + $0x5ec] sm:$0xf0]  ;;  %v2940_v40 = vor.u32 %v3559_v29, %v2939_v28  ;;  %1285 = vmatpush.bf16.msra.mxu2 %v2572_v36 }
  0x23   :  { %v3068_v41 = vor.u32 %v3591_v32, %v3067_v30  ;;  %v2923_v43 = vld [vmem:[%s5450_s3 + $0x4c0] sm:$0xf]  ;;  %v3555_v44 = vld [vmem:[%s5450_s3 + $0x4cc] sm:$0xf0]  ;;  %1298 = vmatpush.bf16.msra.mxu3 %v2700_v39  ;;  %v2493_v39 = vld [vmem:[%s5450_s3 + $0x170] sm:$0xf0] }
  0x24   :  { %v3051_v45 = vld [vmem:[%s5450_s3 + $0x5c0] sm:$0xf]  ;;  %v3587_v47 = vld [vmem:[%s5450_s3 + $0x5cc] sm:$0xf0]  ;;  %1304 = vmatpush.bf16.msrb.mxu0 %v2940_v40  ;;  %v2924_v53 = vor.u32 %v3555_v44, %v2923_v43  ;;  %v2496_v51 = vor.u32 %v3445_v38, %v2493_v39 }
  0x25   :  { %v2907_v52 = vld [vmem:[%s5450_s3 + $0x4a0] sm:$0xf]  ;;  %v3551_v54 = vld [vmem:[%s5450_s3 + $0x4ac] sm:$0xf0]  ;;  %1317 = vmatpush.bf16.msrb.mxu1 %v3068_v41  ;;  %v3052_v57 = vor.u32 %v3587_v47, %v3051_v45 }
  0x26   :  { %v3035_v55 = vld [vmem:[%s5450_s3 + $0x5a0] sm:$0xf]  ;;  %v3583_v56 = vld [vmem:[%s5450_s3 + $0x5ac] sm:$0xf0]  ;;  %1330 = vmatpush.bf16.msrb.mxu2 %v2432_v42  ;;  %v2908_v4 = vor.u32 %v3551_v54, %v2907_v52  ;;  %v3409_v52 = vld [vmem:[%s5450_s3 + $0x44] sm:$0xf] }
  0x27   :  { %1343 = vmatpush.bf16.msrb.mxu3 %v2560_v46  ;;  %v2891_v0 = vld [vmem:[%s5450_s3 + $0x480] sm:$0xf]  ;;  %v3547_v1 = vld [vmem:[%s5450_s3 + $0x48c] sm:$0xf0]  ;;  %v3036_v5 = vor.u32 %v3583_v56, %v3035_v55  ;;  %v2368_v46 = vor.u32 %v3413_v33, %v2365_v34  ;;  %v3441_v54 = vld [vmem:[%s5450_s3 + $0x144] sm:$0xf] }
  0x28   :  { %v3019_v2 = vld [vmem:[%s5450_s3 + $0x580] sm:$0xf]  ;;  %v3579_v3 = vld [vmem:[%s5450_s3 + $0x58c] sm:$0xf0]  ;;  %1305 = vmatpush.bf16.msrb.mxu0 %v2924_v53  ;;  %v2892_v9 = vor.u32 %v3547_v1, %v2891_v0  ;;  %v2349_v53 = vld [vmem:[%s5450_s3 + $0x50] sm:$0xf0] }
  0x29   :  { %1318 = vmatpush.bf16.msrb.mxu1 %v3052_v57  ;;  %v40_v11 = vld [vmem:[%s5447_s0] sm:$0x3f]  ;;  %v3020_v13 = vor.u32 %v3579_v3, %v3019_v2  ;;  %v3543_v27 = vld [vmem:[%s5450_s3 + $0x46c] sm:$0xf0]  ;;  %v2477_v55 = vld [vmem:[%s5450_s3 + $0x150] sm:$0xf0]  ;;  %v2352_v61 = vor.u32 %v3409_v52, %v2349_v53 }
  0x2a   :  { %1331 = vmatpush.bf16.msrb.mxu2 %v2416_v58  ;;  %v3674_v12 = vld [vmem:[%s5448_s1] ss:$0 sm:$0xff]  ;;  %v41_v15 = vunpack.c.l.bf16 %v40_v11  ;;  %v42_v24 = vunpack.c.h.bf16 %v40_v11  ;;  %v3575_v32 = vld [vmem:[%s5450_s3 + $0x56c] sm:$0xf0]  ;;  %v2480_v2 = vor.u32 %v3441_v54, %v2477_v55  ;;  %v3405_v3 = vld [vmem:[%s5450_s3 + $0x24] sm:$0xf] }
  0x2b   :  { %1344 = vmatpush.bf16.msrb.mxu3 %v2544_v62  ;;  %v3675_v16 = vld [vmem:[%s5449_s2] ss:$0 sm:$0xff]  ;;  %v45_v18 = vrot.slane %v3674_v12, 6  ;;  %v46_v19 = vrot.slane %v3674_v12, 4  ;;  %v47_v20 = vrot.slane %v3674_v12, 2 }
  0x2c   :  { %1306 = vmatpush.bf16.msrb.mxu0 %v2908_v4  ;;  %v60_v21 = vrot.slane %v3675_v16, 6  ;;  %v61_v22 = vrot.slane %v3675_v16, 4  ;;  %v62_v23 = vrot.slane %v3675_v16, 2  ;;  %v2875_v26 = vld [vmem:[%s5450_s3 + $0x460] sm:$0xf] }
  0x2d   :  { %1319 = vmatpush.bf16.msrb.mxu1 %v3036_v5  ;;  %v3003_v28 = vld [vmem:[%s5450_s3 + $0x560] sm:$0xf]  ;;  %v49_v29 = vsel %vm48_vm0, %v3674_v12, %v45_v18  ;;  %v51_v30 = vsel %vm50_vm1, %v46_v19, %v47_v20  ;;  %v2876_v42 = vor.u32 %v3543_v27, %v2875_v26  ;;  %v3539_v47 = vld [vmem:[%s5450_s3 + $0x44c] sm:$0xf0]  ;;  %v2333_v4 = vld [vmem:[%s5450_s3 + $0x30] sm:$0xf0] }
  0x2e   :  { %1332 = vmatpush.bf16.msrb.mxu2 %v2400_v7  ;;  %v53_v35 = vsel %vm52_vm2, %v49_v29, %v51_v30  ;;  %v63_v36 = vsel %vm48_vm0, %v3675_v16, %v60_v21  ;;  %v64_v37 = vsel %vm50_vm1, %v61_v22, %v62_v23  ;;  %v2859_v43 = vld [vmem:[%s5450_s3 + $0x440] sm:$0xf]  ;;  %v57_v44 = vmul.f32 %v49_v29, %v42_v24  ;;  %v3571_v49 = vld [vmem:[%s5450_s3 + $0x54c] sm:$0xf0]  ;;  %v3437_v5 = vld [vmem:[%s5450_s3 + $0x124] sm:$0xf] }
  0x2f   :  { %1345 = vmatpush.bf16.msrb.mxu3 %v2528_v8  ;;  %v56_v40 = vmul.f32 %v53_v35, %v41_v15  ;;  %v65_v41 = vsel %vm52_vm2, %v63_v36, %v64_v37  ;;  %v3004_v45 = vor.u32 %v3575_v32, %v3003_v28  ;;  %v2987_v48 = vld [vmem:[%s5450_s3 + $0x540] sm:$0xf]  ;;  %v2860_v58 = vor.u32 %v3539_v47, %v2859_v43  ;;  %v3535_v63 = vld [vmem:[%s5450_s3 + $0x42c] sm:$0xf0]  ;;  %v3401_v16 = vld [vmem:[%s5450_s3 + $0x4] sm:$0xf] }
  0x30   :  { %1307 = vmatpush.bf16.msrb.mxu0 %v2892_v9  ;;  %v69_v57 = vadd.f32 %v63_v36, %v57_v44  ;;  %v2843_v59 = vld [vmem:[%s5450_s3 + $0x420] sm:$0xf]  ;;  %v2988_v60 = vor.u32 %v3571_v49, %v2987_v48  ;;  %v3567_v1 = vld [vmem:[%s5450_s3 + $0x52c] sm:$0xf0]  ;;  %v2336_v10 = vor.u32 %v3405_v3, %v2333_v4  ;;  %v2464_v15 = vor.u32 %v3437_v5, %v2461_v6  ;;  %v3433_v18 = vld [vmem:[%s5450_s3 + $0x104] sm:$0xf] }
  0x31   :  { %1320 = vmatpush.bf16.msrb.mxu1 %v3020_v13  ;;  %v68_v50 = vadd.f32 %v65_v41, %v56_v40  ;;  %v2971_v0 = vld [vmem:[%s5450_s3 + $0x520] sm:$0xf]  ;;  %v2844_v7 = vor.u32 %v3535_v63, %v2843_v59  ;;  %v3531_v12 = vld [vmem:[%s5450_s3 + $0x40c] sm:$0xf0]  ;;  %v2445_v19 = vld [vmem:[%s5450_s3 + $0x110] sm:$0xf0]  ;;  %v2320_v39 = vor.u32 %v3401_v16, %v2317_v17 }
  0x32   :  { %1333 = vmatpush.bf16.msrb.mxu2 %v2384_v25  ;;  %vm71_vm4 = vcmp.gt.f32.partialorder %v69_v57, 0.0  ;;  %v73_v8 = vmul.f32 0.2, %v69_v57  ;;  %v2972_v9 = vor.u32 %v3567_v1, %v2971_v0  ;;  %v2827_v11 = vld [vmem:[%s5450_s3 + $0x400] sm:$0xf]  ;;  %v2448_v40 = vor.u32 %v3433_v18, %v2445_v19 }
  0x33   :  { %1346 = vmatpush.bf16.msrb.mxu3 %v2512_v31  ;;  %vm70_vm3 = vcmp.gt.f32.partialorder %v68_v50, 0.0  ;;  %v72_v56 = vmul.f32 0.2, %v68_v50  ;;  %v2955_v13 = vld [vmem:[%s5450_s3 + $0x500] sm:$0xf]  ;;  %v2828_v35 = vor.u32 %v3531_v12, %v2827_v11 }
  0x34   :  { %1308 = vmatpush.bf16.msrb.mxu0 %v2876_v42  ;;  %v3563_v14 = vld [vmem:[%s5450_s3 + $0x50c] sm:$0xf0]  ;;  %v75_v20 = vsel %vm71_vm4, %v69_v57, %v73_v8  ;;  %v3493_v21 = vld [vmem:[%s5450_s3 + $0x2e4] sm:$0xf]  ;;  %v2685_v22 = vld [vmem:[%s5450_s3 + $0x2f0] sm:$0xf0] }
  0x35   :  { %1321 = vmatpush.bf16.msrb.mxu1 %v3004_v45  ;;  %v74_v62 = vsel %vm70_vm3, %v68_v50, %v72_v56  ;;  %v3525_v23 = vld [vmem:[%s5450_s3 + $0x3e4] sm:$0xf]  ;;  %v2813_v24 = vld [vmem:[%s5450_s3 + $0x3f0] sm:$0xf0]  ;;  %81 = vst [vmem:[#allocation1 + $0x20] ss:$4 sm:$0xff] %v75_v20  ;;  %v2956_v36 = vor.u32 %v3563_v14, %v2955_v13  ;;  %v2688_v41 = vor.u32 %v3493_v21, %v2685_v22 }
  0x36   :  { %1334 = vmatpush.bf16.msrb.mxu2 %v2368_v46  ;;  %79 = vst [vmem:[#allocation1] ss:$4 sm:$0xff] %v74_v62  ;;  %v3557_v25 = vld [vmem:[%s5450_s3 + $0x4e4] sm:$0xf]  ;;  %v2941_v26 = vld [vmem:[%s5450_s3 + $0x4f0] sm:$0xf0]  ;;  %v2816_v42 = vor.u32 %v3525_v23, %v2813_v24 }
  0x37   :  { %1347 = vmatpush.bf16.msrb.mxu3 %v2496_v51  ;;  %v3589_v27 = vld [vmem:[%s5450_s3 + $0x5e4] sm:$0xf]  ;;  %v3069_v28 = vld [vmem:[%s5450_s3 + $0x5f0] sm:$0xf0]  ;;  %v2944_v45 = vor.u32 %v3557_v25, %v2941_v26 }
  0x38   :  { %1309 = vmatpush.bf16.msrb.mxu0 %v2860_v58  ;;  %v3489_v43 = vld [vmem:[%s5450_s3 + $0x2c4] sm:$0xf]  ;;  %v2669_v44 = vld [vmem:[%s5450_s3 + $0x2d0] sm:$0xf0]  ;;  %v3072_v46 = vor.u32 %v3589_v27, %v3069_v28 }
  0x39   :  { %1322 = vmatpush.bf16.msrb.mxu1 %v2988_v60  ;;  %v3521_v47 = vld [vmem:[%s5450_s3 + $0x3c4] sm:$0xf]  ;;  %v2797_v48 = vld [vmem:[%s5450_s3 + $0x3d0] sm:$0xf0]  ;;  %v2672_v53 = vor.u32 %v3489_v43, %v2669_v44 }
  0x3a   :  { %1335 = vmatpush.bf16.msrb.mxu2 %v2352_v61  ;;  %v3553_v49 = vld [vmem:[%s5450_s3 + $0x4c4] sm:$0xf]  ;;  %v2925_v50 = vld [vmem:[%s5450_s3 + $0x4d0] sm:$0xf0]  ;;  %v2800_v54 = vor.u32 %v3521_v47, %v2797_v48 }
  0x3b   :  { %1348 = vmatpush.bf16.msrb.mxu3 %v2480_v2  ;;  %v3585_v51 = vld [vmem:[%s5450_s3 + $0x5c4] sm:$0xf]  ;;  %v3053_v52 = vld [vmem:[%s5450_s3 + $0x5d0] sm:$0xf0]  ;;  %v2928_v57 = vor.u32 %v3553_v49, %v2925_v50 }
  0x3c   :  { %1310 = vmatpush.bf16.msrb.mxu0 %v2844_v7  ;;  %v3485_v55 = vld [vmem:[%s5450_s3 + $0x2a4] sm:$0xf]  ;;  %v2653_v56 = vld [vmem:[%s5450_s3 + $0x2b0] sm:$0xf0]  ;;  %v3056_v58 = vor.u32 %v3585_v51, %v3053_v52 }
  0x3d   :  { %v82_v29 = vld.sshfl [vmem:[#allocation1] sm:$0xff pattern:$0x73625140]  ;;  %v84_v30 = vld.sshfl [vmem:[#allocation1 + $0x10] sm:$0xff pattern:$0x73625140]  ;;  %1323 = vmatpush.bf16.msrb.mxu1 %v2972_v9  ;;  %v2656_v1 = vor.u32 %v3485_v55, %v2653_v56 }
  0x3e   :  { %1336 = vmatpush.bf16.msrb.mxu2 %v2336_v10  ;;  %v4182_v31 = vpack.c.bf16 %v82_v29, %v82_v29  ;;  %v4184_v32 = vpack.c.bf16 %v84_v30, %v84_v30  ;;  %v83_v33 = vld.sshfl [vmem:[#allocation1 + $0x8] sm:$0xff pattern:$0x73625140]  ;;  %v85_v34 = vld.sshfl [vmem:[#allocation1 + $0x18] sm:$0xff pattern:$0x73625140] }
  0x3f   :  { %1349 = vmatpush.bf16.msrb.mxu3 %v2464_v15  ;;  %v4186_v37 = vpack.c.bf16 %v83_v33, %v83_v33  ;;  %v4188_v38 = vpack.c.bf16 %v85_v34, %v85_v34  ;;  %v3517_v59 = vld [vmem:[%s5450_s3 + $0x3a4] sm:$0xf]  ;;  %v2781_v60 = vld [vmem:[%s5450_s3 + $0x3b0] sm:$0xf0] }
  0x40   :  { %1260 = vmatmul.bf16.vlgmr.msra.gmra.mxu0 %v4182_v31  ;;  %1286 = vmatmul.bf16.vlgmr.msra.gmra.mxu2 %v4184_v32  ;;  %v3549_v61 = vld [vmem:[%s5450_s3 + $0x4a4] sm:$0xf]  ;;  %v2909_v62 = vld [vmem:[%s5450_s3 + $0x4b0] sm:$0xf0]  ;;  %v2784_v2 = vor.u32 %v3517_v59, %v2781_v60 }
  0x41   :  { %1273 = vmatmul.bf16.vlgmr.msra.gmra.mxu1 %v4186_v37  ;;  %1299 = vmatmul.bf16.vlgmr.msra.gmra.mxu3 %v4188_v38  ;;  %v3581_v63 = vld [vmem:[%s5450_s3 + $0x5a4] sm:$0xf]  ;;  %v3037_v0 = vld [vmem:[%s5450_s3 + $0x5b0] sm:$0xf0]  ;;  %v2912_v7 = vor.u32 %v3549_v61, %v2909_v62 }
  0x42   :  { %1311 = vmatpush.bf16.msrb.mxu0 %v2828_v35  ;;  %1324 = vmatpush.bf16.msrb.mxu1 %v2956_v36  ;;  %v3481_v3 = vld [vmem:[%s5450_s3 + $0x284] sm:$0xf]  ;;  %v2637_v4 = vld [vmem:[%s5450_s3 + $0x290] sm:$0xf0]  ;;  %v3040_v8 = vor.u32 %v3581_v63, %v3037_v0 }
  0x43   :  { %1337 = vmatpush.bf16.msrb.mxu2 %v2320_v39  ;;  %1350 = vmatpush.bf16.msrb.mxu3 %v2448_v40  ;;  %v3513_v5 = vld [vmem:[%s5450_s3 + $0x384] sm:$0xf]  ;;  %v2765_v9 = vld [vmem:[%s5450_s3 + $0x390] sm:$0xf0]  ;;  %v2640_v18 = vor.u32 %v3481_v3, %v2637_v4  ;;  %v2563_v3 = vld [vmem:[%s5450_s3 + $0x1e8] sm:$0xf] }
  0x44   :  { %v86_v6 = vld.sshfl [vmem:[#allocation1 + $0x20] sm:$0xff pattern:$0x73625140]  ;;  %v87_v10 = vld.sshfl [vmem:[#allocation1 + $0x28] sm:$0xff pattern:$0x73625140]  ;;  %v2768_v16 = vor.u32 %v3513_v5, %v2765_v9 }
  0x45   :  { %v3545_v11 = vld [vmem:[%s5450_s3 + $0x484] sm:$0xf]  ;;  %v2893_v12 = vld [vmem:[%s5450_s3 + $0x490] sm:$0xf0]  ;;  %v4266_v15 = vpack.c.bf16 %v86_v6, %v86_v6  ;;  %v4268_v17 = vpack.c.bf16 %v87_v10, %v87_v10  ;;  %v3464_v4 = vld [vmem:[%s5450_s3 + $0x1f4] sm:$0xf0] }
  0x46   :  { %1356 = vmatpush.bf16.msra.mxu0 %v2688_v41  ;;  %1369 = vmatpush.bf16.msra.mxu1 %v2816_v42  ;;  %v3577_v13 = vld [vmem:[%s5450_s3 + $0x584] sm:$0xf]  ;;  %v3021_v14 = vld [vmem:[%s5450_s3 + $0x590] sm:$0xf0]  ;;  %v2896_v21 = vor.u32 %v3545_v11, %v2893_v12  ;;  %v3432_v9 = vld [vmem:[%s5450_s3 + $0xf4] sm:$0xf0] }
  0x47   :  { %1382 = vmatpush.bf16.msra.mxu2 %v2944_v45  ;;  %1395 = vmatpush.bf16.msra.mxu3 %v3072_v46  ;;  %v3509_v19 = vld [vmem:[%s5450_s3 + $0x364] sm:$0xf]  ;;  %v2749_v20 = vld [vmem:[%s5450_s3 + $0x370] sm:$0xf0]  ;;  %v3024_v22 = vor.u32 %v3577_v13, %v3021_v14  ;;  %v2691_v10 = vld [vmem:[%s5450_s3 + $0x2e8] sm:$0xf]  ;;  %v2564_v13 = vor.u32 %v3464_v4, %v2563_v3 }
  0x48   :  { %v3477_v23 = vld [vmem:[%s5450_s3 + $0x264] sm:$0xf]  ;;  %v2621_v24 = vld [vmem:[%s5450_s3 + $0x270] sm:$0xf0]  ;;  %v2752_v29 = vor.u32 %v3509_v19, %v2749_v20  ;;  %v3496_v11 = vld [vmem:[%s5450_s3 + $0x2f4] sm:$0xf0] }
  0x49   :  { %v3541_v25 = vld [vmem:[%s5450_s3 + $0x464] sm:$0xf]  ;;  %v2877_v26 = vld [vmem:[%s5450_s3 + $0x470] sm:$0xf0]  ;;  %v2624_v30 = vor.u32 %v3477_v23, %v2621_v24  ;;  %v2819_v14 = vld [vmem:[%s5450_s3 + $0x3e8] sm:$0xf] }
  0x4a   :  { %1357 = vmatpush.bf16.msra.mxu0 %v2672_v53  ;;  %1370 = vmatpush.bf16.msra.mxu1 %v2800_v54  ;;  %v3573_v27 = vld [vmem:[%s5450_s3 + $0x564] sm:$0xf]  ;;  %v3005_v28 = vld [vmem:[%s5450_s3 + $0x570] sm:$0xf0]  ;;  %v2880_v35 = vor.u32 %v3541_v25, %v2877_v26  ;;  %v2547_v23 = vld [vmem:[%s5450_s3 + $0x1c8] sm:$0xf] }
  0x4b   :  { %1383 = vmatpush.bf16.msra.mxu2 %v2928_v57  ;;  %1396 = vmatpush.bf16.msra.mxu3 %v3056_v58  ;;  %v3505_v33 = vld [vmem:[%s5450_s3 + $0x344] sm:$0xf]  ;;  %v2733_v34 = vld [vmem:[%s5450_s3 + $0x350] sm:$0xf0]  ;;  %v3008_v36 = vor.u32 %v3573_v27, %v3005_v28  ;;  %v3460_v24 = vld [vmem:[%s5450_s3 + $0x1d4] sm:$0xf0] }
  0x4c   :  { %v3473_v39 = vld [vmem:[%s5450_s3 + $0x244] sm:$0xf]  ;;  %v2605_v40 = vld [vmem:[%s5450_s3 + $0x250] sm:$0xf0]  ;;  %v2736_v45 = vor.u32 %v3505_v33, %v2733_v34  ;;  %v3428_v26 = vld [vmem:[%s5450_s3 + $0xd4] sm:$0xf0]  ;;  %v2548_v33 = vor.u32 %v3460_v24, %v2547_v23 }
  0x4d   :  { %v3537_v41 = vld [vmem:[%s5450_s3 + $0x444] sm:$0xf]  ;;  %v2861_v42 = vld [vmem:[%s5450_s3 + $0x450] sm:$0xf0]  ;;  %v2608_v46 = vor.u32 %v3473_v39, %v2605_v40  ;;  %v2675_v27 = vld [vmem:[%s5450_s3 + $0x2c8] sm:$0xf] }
  0x4e   :  { %1358 = vmatpush.bf16.msra.mxu0 %v2656_v1  ;;  %1371 = vmatpush.bf16.msra.mxu1 %v2784_v2  ;;  %v3569_v43 = vld [vmem:[%s5450_s3 + $0x544] sm:$0xf]  ;;  %v2989_v44 = vld [vmem:[%s5450_s3 + $0x550] sm:$0xf0]  ;;  %v2864_v49 = vor.u32 %v3537_v41, %v2861_v42  ;;  %v3492_v28 = vld [vmem:[%s5450_s3 + $0x2d4] sm:$0xf0] }
  0x4f   :  { %1384 = vmatpush.bf16.msra.mxu2 %v2912_v7  ;;  %1397 = vmatpush.bf16.msra.mxu3 %v3040_v8  ;;  %v3501_v47 = vld [vmem:[%s5450_s3 + $0x324] sm:$0xf]  ;;  %v2717_v48 = vld [vmem:[%s5450_s3 + $0x330] sm:$0xf0]  ;;  %v2992_v50 = vor.u32 %v3569_v43, %v2989_v44  ;;  %v2435_v7 = vld [vmem:[%s5450_s3 + $0xe8] sm:$0xf] }
  0x50   :  { %1312 = vmatmul.bf16.vlgmr.msrb.gmra.mxu0 %v4266_v15  ;;  %1338 = vmatmul.bf16.vlgmr.msrb.gmra.mxu2 %v4182_v31  ;;  %v3469_v51 = vld [vmem:[%s5450_s3 + $0x224] sm:$0xf]  ;;  %v2589_v52 = vld [vmem:[%s5450_s3 + $0x230] sm:$0xf0]  ;;  %v2720_v57 = vor.u32 %v3501_v47, %v2717_v48  ;;  %v2436_v20 = vor.u32 %v3432_v9, %v2435_v7  ;;  %v2531_v39 = vld [vmem:[%s5450_s3 + $0x1a8] sm:$0xf] }
  0x51   :  { %1325 = vmatmul.bf16.vlgmr.msrb.gmra.mxu1 %v4268_v17  ;;  %1351 = vmatmul.bf16.vlgmr.msrb.gmra.mxu3 %v4186_v37  ;;  %v3533_v53 = vld [vmem:[%s5450_s3 + $0x424] sm:$0xf]  ;;  %v2845_v54 = vld [vmem:[%s5450_s3 + $0x430] sm:$0xf0]  ;;  %v2592_v60 = vor.u32 %v3469_v51, %v2589_v52  ;;  %v3456_v40 = vld [vmem:[%s5450_s3 + $0x1b4] sm:$0xf0] }
  0x52   :  { %1372 = vmatpush.bf16.msra.mxu1 %v2768_v16  ;;  %1359 = vmatpush.bf16.msra.mxu0 %v2640_v18  ;;  %v3565_v55 = vld [vmem:[%s5450_s3 + $0x524] sm:$0xf]  ;;  %v2973_v56 = vld [vmem:[%s5450_s3 + $0x530] sm:$0xf0]  ;;  %v2848_v0 = vor.u32 %v3533_v53, %v2845_v54  ;;  %v3528_v16 = vld [vmem:[%s5450_s3 + $0x3f4] sm:$0xf0]  ;;  %v2532_v47 = vor.u32 %v3456_v40, %v2531_v39 }
  0x53   :  { %1385 = vmatpush.bf16.msra.mxu2 %v2896_v21  ;;  %1398 = vmatpush.bf16.msra.mxu3 %v3024_v22  ;;  %v3465_v58 = vld [vmem:[%s5450_s3 + $0x204] sm:$0xf]  ;;  %v2573_v59 = vld [vmem:[%s5450_s3 + $0x210] sm:$0xf0]  ;;  %v2976_v1 = vor.u32 %v3565_v55, %v2973_v56  ;;  %v2692_v21 = vor.u32 %v3496_v11, %v2691_v10  ;;  %v2419_v22 = vld [vmem:[%s5450_s3 + $0xc8] sm:$0xf]  ;;  %v2820_v25 = vor.u32 %v3528_v16, %v2819_v14 }
  0x54   :  { %v3497_v61 = vld [vmem:[%s5450_s3 + $0x304] sm:$0xf]  ;;  %v2701_v62 = vld [vmem:[%s5450_s3 + $0x310] sm:$0xf0]  ;;  %v2576_v12 = vor.u32 %v3465_v58, %v2573_v59  ;;  %v2420_v34 = vor.u32 %v3428_v26, %v2419_v22  ;;  %v3424_v42 = vld [vmem:[%s5450_s3 + $0xb4] sm:$0xf0] }
  0x55   :  { %v3529_v63 = vld [vmem:[%s5450_s3 + $0x404] sm:$0xf]  ;;  %v2829_v2 = vld [vmem:[%s5450_s3 + $0x410] sm:$0xf0]  ;;  %v2704_v8 = vor.u32 %v3497_v61, %v2701_v62  ;;  %v2659_v43 = vld [vmem:[%s5450_s3 + $0x2a8] sm:$0xf] }
  0x56   :  { %1373 = vmatpush.bf16.msra.mxu1 %v2752_v29  ;;  %1360 = vmatpush.bf16.msra.mxu0 %v2624_v30  ;;  %v3561_v5 = vld [vmem:[%s5450_s3 + $0x504] sm:$0xf]  ;;  %v2957_v6 = vld [vmem:[%s5450_s3 + $0x510] sm:$0xf0]  ;;  %v2832_v18 = vor.u32 %v3529_v63, %v2829_v2  ;;  %v2803_v29 = vld [vmem:[%s5450_s3 + $0x3c8] sm:$0xf] }
  0x57   :  { %1386 = vmatpush.bf16.msra.mxu2 %v2880_v35  ;;  %1399 = vmatpush.bf16.msra.mxu3 %v3008_v36  ;;  %v2960_v19 = vor.u32 %v3561_v5, %v2957_v6  ;;  %v3524_v30 = vld [vmem:[%s5450_s3 + $0x3d4] sm:$0xf0]  ;;  %v2676_v35 = vor.u32 %v3492_v28, %v2675_v27  ;;  %v2403_v36 = vld [vmem:[%s5450_s3 + $0xa8] sm:$0xf] }
  0x58   :  { %v2804_v41 = vor.u32 %v3524_v30, %v2803_v29  ;;  %v3488_v44 = vld [vmem:[%s5450_s3 + $0x2b4] sm:$0xf0]  ;;  %v2387_v48 = vld [vmem:[%s5450_s3 + $0x88] sm:$0xf] }
  0x59   :  { %v3420_v51 = vld [vmem:[%s5450_s3 + $0x94] sm:$0xf0]  ;;  %v2515_v52 = vld [vmem:[%s5450_s3 + $0x188] sm:$0xf] }
  0x5a   :  { %1374 = vmatpush.bf16.msra.mxu1 %v2736_v45  ;;  %1361 = vmatpush.bf16.msra.mxu0 %v2608_v46  ;;  %v2787_v45 = vld [vmem:[%s5450_s3 + $0x3a8] sm:$0xf]  ;;  %v3520_v46 = vld [vmem:[%s5450_s3 + $0x3b4] sm:$0xf0] }
  0x5b   :  { %1387 = vmatpush.bf16.msra.mxu2 %v2864_v49  ;;  %1400 = vmatpush.bf16.msra.mxu3 %v2992_v50  ;;  %v2404_v49 = vor.u32 %v3424_v42, %v2403_v36  ;;  %v2660_v50 = vor.u32 %v3488_v44, %v2659_v43  ;;  %v3452_v53 = vld [vmem:[%s5450_s3 + $0x194] sm:$0xf0]  ;;  %v2788_v54 = vor.u32 %v3520_v46, %v2787_v45  ;;  %v2643_v55 = vld [vmem:[%s5450_s3 + $0x288] sm:$0xf] }
  0x5c   :  { %v3484_v56 = vld [vmem:[%s5450_s3 + $0x294] sm:$0xf0] }
  0x5d   :  { %v3516_v58 = vld [vmem:[%s5450_s3 + $0x394] sm:$0xf0] }
  0x5e   :  { %1375 = vmatpush.bf16.msra.mxu1 %v2720_v57  ;;  %1362 = vmatpush.bf16.msra.mxu0 %v2592_v60  ;;  %v2771_v57 = vld [vmem:[%s5450_s3 + $0x388] sm:$0xf] }
  0x5f   :  { %1388 = vmatpush.bf16.msra.mxu2 %v2848_v0  ;;  %1401 = vmatpush.bf16.msra.mxu3 %v2976_v1 }
  0x62   :  { %1376 = vmatpush.bf16.msra.mxu1 %v2704_v8  ;;  %1363 = vmatpush.bf16.msra.mxu0 %v2576_v12 }
  0x63   :  { %1389 = vmatpush.bf16.msra.mxu2 %v2832_v18  ;;  %1402 = vmatpush.bf16.msra.mxu3 %v2960_v19 }
  0x65   :  { %1364 = vmatmul.bf16.vlgmr.msra.gmra.mxu0 %v4184_v32  ;;  %1377 = vmatmul.bf16.vlgmr.msra.gmra.mxu1 %v4188_v38 }
  0x66   :  { %1421 = vmatpush.bf16.msrb.mxu1 %v2564_v13  ;;  %1408 = vmatpush.bf16.msrb.mxu0 %v2436_v20 }
  0x67   :  { %1434 = vmatpush.bf16.msrb.mxu2 %v2692_v21  ;;  %1447 = vmatpush.bf16.msrb.mxu3 %v2820_v25 }
  0x68   :  { %1390 = vmatmul.bf16.vlgmr.msra.gmra.mxu2 %v4266_v15  ;;  %1403 = vmatmul.bf16.vlgmr.msra.gmra.mxu3 %v4268_v17 }
  0x6a   :  { %1422 = vmatpush.bf16.msrb.mxu1 %v2548_v33  ;;  %1409 = vmatpush.bf16.msrb.mxu0 %v2420_v34 }
  0x6b   :  { %1435 = vmatpush.bf16.msrb.mxu2 %v2676_v35  ;;  %1448 = vmatpush.bf16.msrb.mxu3 %v2804_v41 }
  0x6c   :  { %14 = vsyncpa [#allocation4], 0  ;;  %v2516_v59 = vor.u32 %v3452_v53, %v2515_v52  ;;  %v2388_v60 = vor.u32 %v3420_v51, %v2387_v48  ;;  %v2644_v61 = vor.u32 %v3484_v56, %v2643_v55  ;;  %v2371_v62 = vld [vmem:[%s5450_s3 + $0x68] sm:$0xf]  ;;  %v3448_v0 = vld [vmem:[%s5450_s3 + $0x174] sm:$0xf0]  ;;  %v2772_v1 = vor.u32 %v3516_v58, %v2771_v57 }
  0x6d   :  { %v2499_v63 = vld [vmem:[%s5450_s3 + $0x168] sm:$0xf]  ;;  %v3416_v2 = vld [vmem:[%s5450_s3 + $0x74] sm:$0xf0]  ;;  %v2437_v55 = vld [vmem:[%s5450_s3 + $0xf8] sm:$0xf0] }
  0x6e   :  { %1423 = vmatpush.bf16.msrb.mxu1 %v2532_v47  ;;  %1410 = vmatpush.bf16.msrb.mxu0 %v2404_v49  ;;  %v2627_v3 = vld [vmem:[%s5450_s3 + $0x268] sm:$0xf]  ;;  %v3480_v4 = vld [vmem:[%s5450_s3 + $0x274] sm:$0xf0]  ;;  %v2500_v7 = vor.u32 %v3448_v0, %v2499_v63  ;;  %v2372_v8 = vor.u32 %v3416_v2, %v2371_v62  ;;  %v3462_v58 = vld [vmem:[%s5450_s3 + $0x1ec] sm:$0xf] }
  0x6f   :  { %1436 = vmatpush.bf16.msrb.mxu2 %v2660_v50  ;;  %1449 = vmatpush.bf16.msrb.mxu3 %v2788_v54  ;;  %v2755_v5 = vld [vmem:[%s5450_s3 + $0x368] sm:$0xf]  ;;  %v3512_v6 = vld [vmem:[%s5450_s3 + $0x374] sm:$0xf0]  ;;  %v2628_v9 = vor.u32 %v3480_v4, %v2627_v3  ;;  %v3430_v54 = vld [vmem:[%s5450_s3 + $0xec] sm:$0xf] }
  0x70   :  { %v2355_v10 = vld [vmem:[%s5450_s3 + $0x48] sm:$0xf]  ;;  %v3444_v12 = vld [vmem:[%s5450_s3 + $0x154] sm:$0xf0]  ;;  %v2756_v13 = vor.u32 %v3512_v6, %v2755_v5  ;;  %v2440_v63 = vor.u32 %v3430_v54, %v2437_v55  ;;  %v3426_v5 = vld [vmem:[%s5450_s3 + $0xcc] sm:$0xf] }
  0x71   :  { %v2483_v11 = vld [vmem:[%s5450_s3 + $0x148] sm:$0xf]  ;;  %v3412_v14 = vld [vmem:[%s5450_s3 + $0x54] sm:$0xf0]  ;;  %v2421_v6 = vld [vmem:[%s5450_s3 + $0xd8] sm:$0xf0] }
  0x72   :  { %1424 = vmatpush.bf16.msrb.mxu1 %v2516_v59  ;;  %1411 = vmatpush.bf16.msrb.mxu0 %v2388_v60  ;;  %v2611_v16 = vld [vmem:[%s5450_s3 + $0x248] sm:$0xf]  ;;  %v3476_v18 = vld [vmem:[%s5450_s3 + $0x254] sm:$0xf0]  ;;  %v2484_v21 = vor.u32 %v3444_v12, %v2483_v11  ;;  %v2356_v22 = vor.u32 %v3412_v14, %v2355_v10  ;;  %v2565_v59 = vld [vmem:[%s5450_s3 + $0x1f8] sm:$0xf0]  ;;  %v2424_v11 = vor.u32 %v3426_v5, %v2421_v6 }
  0x73   :  { %1437 = vmatpush.bf16.msrb.mxu2 %v2644_v61  ;;  %1450 = vmatpush.bf16.msrb.mxu3 %v2772_v1  ;;  %v2739_v19 = vld [vmem:[%s5450_s3 + $0x348] sm:$0xf]  ;;  %v3508_v20 = vld [vmem:[%s5450_s3 + $0x354] sm:$0xf0]  ;;  %v2612_v23 = vor.u32 %v3476_v18, %v2611_v16  ;;  %v2568_v3 = vor.u32 %v3462_v58, %v2565_v59  ;;  %v3410_v59 = vld [vmem:[%s5450_s3 + $0x4c] sm:$0xf] }
  0x74   :  { %v2339_v24 = vld [vmem:[%s5450_s3 + $0x28] sm:$0xf]  ;;  %v3440_v26 = vld [vmem:[%s5450_s3 + $0x134] sm:$0xf0]  ;;  %v2740_v27 = vor.u32 %v3508_v20, %v2739_v19  ;;  %v3422_v19 = vld [vmem:[%s5450_s3 + $0xac] sm:$0xf] }
  0x75   :  { %v2467_v25 = vld [vmem:[%s5450_s3 + $0x128] sm:$0xf]  ;;  %v3408_v28 = vld [vmem:[%s5450_s3 + $0x34] sm:$0xf0]  ;;  %v2405_v20 = vld [vmem:[%s5450_s3 + $0xb8] sm:$0xf0] }
  0x76   :  { %1425 = vmatpush.bf16.msrb.mxu1 %v2500_v7  ;;  %1412 = vmatpush.bf16.msrb.mxu0 %v2372_v8  ;;  %v2595_v29 = vld [vmem:[%s5450_s3 + $0x228] sm:$0xf]  ;;  %v3472_v30 = vld [vmem:[%s5450_s3 + $0x234] sm:$0xf0]  ;;  %v2468_v35 = vor.u32 %v3440_v26, %v2467_v25  ;;  %v2340_v40 = vor.u32 %v3408_v28, %v2339_v24  ;;  %v3458_v7 = vld [vmem:[%s5450_s3 + $0x1cc] sm:$0xf]  ;;  %v2408_v25 = vor.u32 %v3422_v19, %v2405_v20 }
  0x77   :  { %1438 = vmatpush.bf16.msrb.mxu2 %v2628_v9  ;;  %1451 = vmatpush.bf16.msrb.mxu3 %v2756_v13  ;;  %v2723_v33 = vld [vmem:[%s5450_s3 + $0x328] sm:$0xf]  ;;  %v3504_v34 = vld [vmem:[%s5450_s3 + $0x334] sm:$0xf0]  ;;  %v2596_v41 = vor.u32 %v3472_v30, %v2595_v29  ;;  %v2549_v8 = vld [vmem:[%s5450_s3 + $0x1d8] sm:$0xf0] }
  0x78   :  { %v2323_v36 = vld [vmem:[%s5450_s3 + $0x8] sm:$0xf]  ;;  %v3404_v39 = vld [vmem:[%s5450_s3 + $0x14] sm:$0xf0]  ;;  %v2724_v45 = vor.u32 %v3504_v34, %v2723_v33  ;;  %v2552_v16 = vor.u32 %v3458_v7, %v2549_v8  ;;  %v3418_v33 = vld [vmem:[%s5450_s3 + $0x8c] sm:$0xf] }
  0x79   :  { %v2451_v42 = vld [vmem:[%s5450_s3 + $0x108] sm:$0xf]  ;;  %v3436_v43 = vld [vmem:[%s5450_s3 + $0x114] sm:$0xf0]  ;;  %v2324_v56 = vor.u32 %v3404_v39, %v2323_v36  ;;  %v2389_v34 = vld [vmem:[%s5450_s3 + $0x98] sm:$0xf0] }
  0x7a   :  { %1426 = vmatpush.bf16.msrb.mxu1 %v2484_v21  ;;  %1413 = vmatpush.bf16.msrb.mxu0 %v2356_v22  ;;  %v2579_v44 = vld [vmem:[%s5450_s3 + $0x208] sm:$0xf]  ;;  %v3468_v46 = vld [vmem:[%s5450_s3 + $0x214] sm:$0xf0]  ;;  %v2452_v52 = vor.u32 %v3436_v43, %v2451_v42  ;;  %v3454_v21 = vld [vmem:[%s5450_s3 + $0x1ac] sm:$0xf] }
  0x7b   :  { %1439 = vmatpush.bf16.msrb.mxu2 %v2612_v23  ;;  %1452 = vmatpush.bf16.msrb.mxu3 %v2740_v27  ;;  %v2707_v47 = vld [vmem:[%s5450_s3 + $0x308] sm:$0xf]  ;;  %v3500_v48 = vld [vmem:[%s5450_s3 + $0x314] sm:$0xf0]  ;;  %v2580_v57 = vor.u32 %v3468_v46, %v2579_v44  ;;  %v2533_v22 = vld [vmem:[%s5450_s3 + $0x1b8] sm:$0xf0] }
  0x7c   :  { %v2947_v49 = vld [vmem:[%s5450_s3 + $0x4e8] sm:$0xf]  ;;  %v3560_v50 = vld [vmem:[%s5450_s3 + $0x4f4] sm:$0xf0]  ;;  %v2708_v60 = vor.u32 %v3500_v48, %v2707_v47  ;;  %v2536_v29 = vor.u32 %v3454_v21, %v2533_v22  ;;  %v2517_v36 = vld [vmem:[%s5450_s3 + $0x198] sm:$0xf0] }
  0x7d   :  { %v3075_v51 = vld [vmem:[%s5450_s3 + $0x5e8] sm:$0xf]  ;;  %v3592_v53 = vld [vmem:[%s5450_s3 + $0x5f4] sm:$0xf0]  ;;  %v2948_v61 = vor.u32 %v3560_v50, %v2947_v49  ;;  %v3414_v47 = vld [vmem:[%s5450_s3 + $0x6c] sm:$0xf] }
  0x7e   :  { %1427 = vmatpush.bf16.msrb.mxu1 %v2468_v35  ;;  %1414 = vmatpush.bf16.msrb.mxu0 %v2340_v40  ;;  %v3076_v62 = vor.u32 %v3592_v53, %v3075_v51  ;;  %v2931_v0 = vld [vmem:[%s5450_s3 + $0x4c8] sm:$0xf]  ;;  %v3556_v1 = vld [vmem:[%s5450_s3 + $0x4d4] sm:$0xf0]  ;;  %v3450_v35 = vld [vmem:[%s5450_s3 + $0x18c] sm:$0xf] }
  0x7f   :  { %1440 = vmatpush.bf16.msrb.mxu2 %v2596_v41  ;;  %1453 = vmatpush.bf16.msrb.mxu3 %v2724_v45  ;;  %v3059_v2 = vld [vmem:[%s5450_s3 + $0x5c8] sm:$0xf]  ;;  %v3588_v4 = vld [vmem:[%s5450_s3 + $0x5d4] sm:$0xf0]  ;;  %v2932_v9 = vor.u32 %v3556_v1, %v2931_v0  ;;  %v2392_v41 = vor.u32 %v3418_v33, %v2389_v34  ;;  %v2520_v45 = vor.u32 %v3450_v35, %v2517_v36  ;;  %v2373_v48 = vld [vmem:[%s5450_s3 + $0x78] sm:$0xf0] }
  0x80   :  { %v3060_v10 = vor.u32 %v3588_v4, %v3059_v2  ;;  %v2915_v12 = vld [vmem:[%s5450_s3 + $0x4a8] sm:$0xf]  ;;  %v3552_v13 = vld [vmem:[%s5450_s3 + $0x4b4] sm:$0xf0]  ;;  %v3446_v49 = vld [vmem:[%s5450_s3 + $0x16c] sm:$0xf]  ;;  %v2376_v53 = vor.u32 %v3414_v47, %v2373_v48 }
  0x81   :  { %v3043_v14 = vld [vmem:[%s5450_s3 + $0x5a8] sm:$0xf]  ;;  %v3584_v18 = vld [vmem:[%s5450_s3 + $0x5b4] sm:$0xf0]  ;;  %v2916_v23 = vor.u32 %v3552_v13, %v2915_v12  ;;  %v2501_v50 = vld [vmem:[%s5450_s3 + $0x178] sm:$0xf0] }
  0x82   :  { %1428 = vmatpush.bf16.msrb.mxu1 %v2452_v52  ;;  %1415 = vmatpush.bf16.msrb.mxu0 %v2324_v56  ;;  %v3044_v24 = vor.u32 %v3584_v18, %v3043_v14  ;;  %v2899_v26 = vld [vmem:[%s5450_s3 + $0x488] sm:$0xf]  ;;  %v3548_v27 = vld [vmem:[%s5450_s3 + $0x494] sm:$0xf0]  ;;  %v3406_v7 = vld [vmem:[%s5450_s3 + $0x2c] sm:$0xf] }
  0x83   :  { %1441 = vmatpush.bf16.msrb.mxu2 %v2580_v57  ;;  %1454 = vmatpush.bf16.msrb.mxu3 %v2708_v60  ;;  %v3027_v28 = vld [vmem:[%s5450_s3 + $0x588] sm:$0xf]  ;;  %v3580_v30 = vld [vmem:[%s5450_s3 + $0x594] sm:$0xf0]  ;;  %v2900_v39 = vor.u32 %v3548_v27, %v2899_v26  ;;  %v2504_v57 = vor.u32 %v3446_v49, %v2501_v50  ;;  %v2357_v60 = vld [vmem:[%s5450_s3 + $0x58] sm:$0xf0] }
  0x84   :  { %v3028_v40 = vor.u32 %v3580_v30, %v3027_v28  ;;  %v2883_v42 = vld [vmem:[%s5450_s3 + $0x468] sm:$0xf]  ;;  %v3544_v43 = vld [vmem:[%s5450_s3 + $0x474] sm:$0xf0]  ;;  %v2360_v1 = vor.u32 %v3410_v59, %v2357_v60  ;;  %v2341_v8 = vld [vmem:[%s5450_s3 + $0x38] sm:$0xf0] }
  0x85   :  { %1416 = vmatmul.bf16.vlgmr.msrb.gmra.mxu0 %v4182_v31  ;;  %1429 = vmatmul.bf16.vlgmr.msrb.gmra.mxu1 %v4186_v37  ;;  %v3011_v44 = vld [vmem:[%s5450_s3 + $0x568] sm:$0xf]  ;;  %v3576_v46 = vld [vmem:[%s5450_s3 + $0x574] sm:$0xf0]  ;;  %v2884_v51 = vor.u32 %v3544_v43, %v2883_v42  ;;  %v3402_v20 = vld [vmem:[%s5450_s3 + $0xc] sm:$0xf] }
  0x86   :  { %1460 = vmatpush.bf16.msra.mxu0 %v2948_v61  ;;  %1473 = vmatpush.bf16.msra.mxu1 %v3076_v62  ;;  %v3012_v52 = vor.u32 %v3576_v46, %v3011_v44  ;;  %v2867_v54 = vld [vmem:[%s5450_s3 + $0x448] sm:$0xf]  ;;  %v3540_v55 = vld [vmem:[%s5450_s3 + $0x454] sm:$0xf0]  ;;  %v3442_v61 = vld [vmem:[%s5450_s3 + $0x14c] sm:$0xf] }
  0x87   :  { %1486 = vmatpush.bf16.msra.mxu2 %v2440_v63  ;;  %1499 = vmatpush.bf16.msra.mxu3 %v2568_v3  ;;  %v2995_v56 = vld [vmem:[%s5450_s3 + $0x548] sm:$0xf]  ;;  %v3572_v58 = vld [vmem:[%s5450_s3 + $0x554] sm:$0xf0]  ;;  %v2485_v62 = vld [vmem:[%s5450_s3 + $0x158] sm:$0xf0]  ;;  %v2868_v63 = vor.u32 %v3540_v55, %v2867_v54 }
  0x88   :  { %1442 = vmatmul.bf16.vlgmr.msrb.gmra.mxu2 %v4184_v32  ;;  %1455 = vmatmul.bf16.vlgmr.msrb.gmra.mxu3 %v4188_v38  ;;  %v2996_v0 = vor.u32 %v3572_v58, %v2995_v56  ;;  %v2851_v2 = vld [vmem:[%s5450_s3 + $0x428] sm:$0xf]  ;;  %v3536_v3 = vld [vmem:[%s5450_s3 + $0x434] sm:$0xf0]  ;;  %v2488_v5 = vor.u32 %v3442_v61, %v2485_v62  ;;  %v2325_v22 = vld [vmem:[%s5450_s3 + $0x18] sm:$0xf0] }
  0x89   :  { %v2979_v4 = vld [vmem:[%s5450_s3 + $0x528] sm:$0xf]  ;;  %v3568_v6 = vld [vmem:[%s5450_s3 + $0x534] sm:$0xf0]  ;;  %v2693_v26 = vld [vmem:[%s5450_s3 + $0x2f8] sm:$0xf0]  ;;  %v2328_v35 = vor.u32 %v3402_v20, %v2325_v22 }
  0x8a   :  { %1461 = vmatpush.bf16.msra.mxu0 %v2932_v9  ;;  %1474 = vmatpush.bf16.msra.mxu1 %v3060_v10  ;;  %v3438_v9 = vld [vmem:[%s5450_s3 + $0x12c] sm:$0xf]  ;;  %v2469_v10 = vld [vmem:[%s5450_s3 + $0x138] sm:$0xf0]  ;;  %v2835_v12 = vld [vmem:[%s5450_s3 + $0x408] sm:$0xf]  ;;  %v2980_v14 = vor.u32 %v3568_v6, %v2979_v4 }
  0x8b   :  { %1487 = vmatpush.bf16.msra.mxu2 %v2424_v11  ;;  %1500 = vmatpush.bf16.msra.mxu3 %v2552_v16  ;;  %v2852_v11 = vor.u32 %v3536_v3, %v2851_v2  ;;  %v3532_v13 = vld [vmem:[%s5450_s3 + $0x414] sm:$0xf0]  ;;  %v2344_v16 = vor.u32 %v3406_v7, %v2341_v8  ;;  %v2963_v18 = vld [vmem:[%s5450_s3 + $0x508] sm:$0xf]  ;;  %v2472_v21 = vor.u32 %v3438_v9, %v2469_v10  ;;  %v3526_v27 = vld [vmem:[%s5450_s3 + $0x3ec] sm:$0xf] }
  0x8c   :  { %v3564_v19 = vld [vmem:[%s5450_s3 + $0x514] sm:$0xf0]  ;;  %v2836_v28 = vor.u32 %v3532_v13, %v2835_v12  ;;  %v3558_v30 = vld [vmem:[%s5450_s3 + $0x4ec] sm:$0xf]  ;;  %v2949_v33 = vld [vmem:[%s5450_s3 + $0x4f8] sm:$0xf0] }
  0x8d   :  { %v2964_v34 = vor.u32 %v3564_v19, %v2963_v18  ;;  %v3590_v36 = vld [vmem:[%s5450_s3 + $0x5ec] sm:$0xf]  ;;  %v2952_v43 = vor.u32 %v3558_v30, %v2949_v33  ;;  %v2805_v48 = vld [vmem:[%s5450_s3 + $0x3d8] sm:$0xf0]  ;;  %s2304_s27 = sshll.u32 %s5456_s9, 4  ;;  %s2305_s27 = int_to_ptr.hbm [resolvable:$true] %s2304_s27 }
  0x8e   :  { %1462 = vmatpush.bf16.msra.mxu0 %v2916_v23  ;;  %1475 = vmatpush.bf16.msra.mxu1 %v3044_v24  ;;  %v3434_v23 = vld [vmem:[%s5450_s3 + $0x10c] sm:$0xf]  ;;  %v2453_v24 = vld [vmem:[%s5450_s3 + $0x118] sm:$0xf0] }
  0x8f   :  { %1488 = vmatpush.bf16.msra.mxu2 %v2408_v25  ;;  %1501 = vmatpush.bf16.msra.mxu3 %v2536_v29  ;;  %v3494_v25 = vld [vmem:[%s5450_s3 + $0x2ec] sm:$0xf]  ;;  %v2821_v29 = vld [vmem:[%s5450_s3 + $0x3f8] sm:$0xf0] }
  0x90   :  { %v2824_v42 = vor.u32 %v3526_v27, %v2821_v29  ;;  %v3490_v44 = vld [vmem:[%s5450_s3 + $0x2cc] sm:$0xf]  ;;  %v2933_v50 = vld [vmem:[%s5450_s3 + $0x4d8] sm:$0xf0] }
  0x91   :  { %v3522_v46 = vld [vmem:[%s5450_s3 + $0x3cc] sm:$0xf]  ;;  %v2789_v60 = vld [vmem:[%s5450_s3 + $0x3b8] sm:$0xf0] }
  0x92   :  { %1463 = vmatpush.bf16.msra.mxu0 %v2900_v39  ;;  %1476 = vmatpush.bf16.msra.mxu1 %v3028_v40  ;;  %v3077_v39 = vld [vmem:[%s5450_s3 + $0x5f8] sm:$0xf0]  ;;  %v2456_v40 = vor.u32 %v3434_v23, %v2453_v24  ;;  %v3554_v49 = vld [vmem:[%s5450_s3 + $0x4cc] sm:$0xf]  ;;  %v2808_v54 = vor.u32 %v3522_v46, %v2805_v48 }
  0x93   :  { %1489 = vmatpush.bf16.msra.mxu2 %v2392_v41  ;;  %1502 = vmatpush.bf16.msra.mxu3 %v2520_v45  ;;  %v2696_v41 = vor.u32 %v3494_v25, %v2693_v26  ;;  %v2677_v45 = vld [vmem:[%s5450_s3 + $0x2d8] sm:$0xf0]  ;;  %v3080_v47 = vor.u32 %v3590_v36, %v3077_v39  ;;  %v2936_v55 = vor.u32 %v3554_v49, %v2933_v50  ;;  %v3486_v56 = vld [vmem:[%s5450_s3 + $0x2ac] sm:$0xf] }
  0x94   :  { %v3518_v58 = vld [vmem:[%s5450_s3 + $0x3ac] sm:$0xf]  ;;  %v2917_v62 = vld [vmem:[%s5450_s3 + $0x4b8] sm:$0xf0] }
  0x95   :  { %v3550_v61 = vld [vmem:[%s5450_s3 + $0x4ac] sm:$0xf]  ;;  %v2792_v2 = vor.u32 %v3518_v58, %v2789_v60  ;;  %v2645_v4 = vld [vmem:[%s5450_s3 + $0x298] sm:$0xf0] }
  0x96   :  { %1464 = vmatpush.bf16.msra.mxu0 %v2884_v51  ;;  %1477 = vmatpush.bf16.msra.mxu1 %v3012_v52  ;;  %v3586_v51 = vld [vmem:[%s5450_s3 + $0x5cc] sm:$0xf]  ;;  %v3061_v52 = vld [vmem:[%s5450_s3 + $0x5d8] sm:$0xf0]  ;;  %v2920_v3 = vor.u32 %v3550_v61, %v2917_v62 }
  0x97   :  { %1490 = vmatpush.bf16.msra.mxu2 %v2376_v53  ;;  %1503 = vmatpush.bf16.msra.mxu3 %v2504_v57  ;;  %v2680_v53 = vor.u32 %v3490_v44, %v2677_v45  ;;  %v2661_v57 = vld [vmem:[%s5450_s3 + $0x2b8] sm:$0xf0]  ;;  %v3064_v59 = vor.u32 %v3586_v51, %v3061_v52  ;;  %v3546_v7 = vld [vmem:[%s5450_s3 + $0x48c] sm:$0xf] }
  0x98   :  { %v2901_v8 = vld [vmem:[%s5450_s3 + $0x498] sm:$0xf0]  ;;  %v3578_v9 = vld [vmem:[%s5450_s3 + $0x58c] sm:$0xf] }
  0x99   :  { %v3029_v10 = vld [vmem:[%s5450_s3 + $0x598] sm:$0xf0]  ;;  %v2904_v13 = vor.u32 %v3546_v7, %v2901_v8  ;;  %v3510_v18 = vld [vmem:[%s5450_s3 + $0x36c] sm:$0xf] }
  0x9a   :  { %1465 = vmatpush.bf16.msra.mxu0 %v2868_v63  ;;  %1478 = vmatpush.bf16.msra.mxu1 %v2996_v0  ;;  %v3582_v63 = vld [vmem:[%s5450_s3 + $0x5ac] sm:$0xf]  ;;  %v3045_v0 = vld [vmem:[%s5450_s3 + $0x5b8] sm:$0xf0]  ;;  %v3032_v19 = vor.u32 %v3578_v9, %v3029_v10 }
  0x9b   :  { %1491 = vmatpush.bf16.msra.mxu2 %v2360_v1  ;;  %1504 = vmatpush.bf16.msra.mxu3 %v2488_v5  ;;  %v2664_v1 = vor.u32 %v3486_v56, %v2661_v57  ;;  %v3514_v5 = vld [vmem:[%s5450_s3 + $0x38c] sm:$0xf]  ;;  %v3048_v6 = vor.u32 %v3582_v63, %v3045_v0  ;;  %v2757_v20 = vld [vmem:[%s5450_s3 + $0x378] sm:$0xf0] }
  0x9c   :  { %v2885_v22 = vld [vmem:[%s5450_s3 + $0x478] sm:$0xf0]  ;;  %v3574_v23 = vld [vmem:[%s5450_s3 + $0x56c] sm:$0xf]  ;;  %v2760_v26 = vor.u32 %v3510_v18, %v2757_v20 }
  0x9d   :  { %v3013_v24 = vld [vmem:[%s5450_s3 + $0x578] sm:$0xf0]  ;;  %v3506_v30 = vld [vmem:[%s5450_s3 + $0x34c] sm:$0xf] }
  0x9e   :  { %1466 = vmatpush.bf16.msra.mxu0 %v2852_v11  ;;  %1479 = vmatpush.bf16.msra.mxu1 %v2980_v14  ;;  %v3478_v14 = vld [vmem:[%s5450_s3 + $0x26c] sm:$0xf]  ;;  %v2613_v29 = vld [vmem:[%s5450_s3 + $0x258] sm:$0xf0]  ;;  %v3016_v33 = vor.u32 %v3574_v23, %v3013_v24 }
  0x9f   :  { %1492 = vmatpush.bf16.msra.mxu2 %v2344_v16  ;;  %1505 = vmatpush.bf16.msra.mxu3 %v2472_v21  ;;  %v2629_v16 = vld [vmem:[%s5450_s3 + $0x278] sm:$0xf0]  ;;  %v3542_v21 = vld [vmem:[%s5450_s3 + $0x46c] sm:$0xf] }
  0xa0   :  { %v2632_v25 = vor.u32 %v3478_v14, %v2629_v16  ;;  %v2888_v27 = vor.u32 %v3542_v21, %v2885_v22  ;;  %v2869_v36 = vld [vmem:[%s5450_s3 + $0x458] sm:$0xf0]  ;;  %v3570_v39 = vld [vmem:[%s5450_s3 + $0x54c] sm:$0xf] }
  0xa1   :  { %v3470_v44 = vld [vmem:[%s5450_s3 + $0x22c] sm:$0xf]  ;;  %v2597_v45 = vld [vmem:[%s5450_s3 + $0x238] sm:$0xf0] }
  0xa2   :  { %1467 = vmatpush.bf16.msra.mxu0 %v2836_v28  ;;  %1480 = vmatpush.bf16.msra.mxu1 %v2964_v34  ;;  %v3474_v28 = vld [vmem:[%s5450_s3 + $0x24c] sm:$0xf]  ;;  %v2741_v34 = vld [vmem:[%s5450_s3 + $0x358] sm:$0xf0] }
  0xa3   :  { %1493 = vmatpush.bf16.msra.mxu2 %v2328_v35  ;;  %1506 = vmatpush.bf16.msra.mxu3 %v2456_v40  ;;  %v3538_v35 = vld [vmem:[%s5450_s3 + $0x44c] sm:$0xf]  ;;  %v2997_v40 = vld [vmem:[%s5450_s3 + $0x558] sm:$0xf0] }
  0xa4   :  { %v3502_v46 = vld [vmem:[%s5450_s3 + $0x32c] sm:$0xf]  ;;  %v2725_v48 = vld [vmem:[%s5450_s3 + $0x338] sm:$0xf0] }
  0xa5   :  { %1468 = vmatmul.bf16.vlgmr.msra.gmra.mxu0 %v4266_v15  ;;  %1481 = vmatmul.bf16.vlgmr.msra.gmra.mxu1 %v4268_v17  ;;  %v3534_v49 = vld [vmem:[%s5450_s3 + $0x42c] sm:$0xf]  ;;  %v2853_v50 = vld [vmem:[%s5450_s3 + $0x438] sm:$0xf0] }
  0xa6   :  { %1512 = vmatpush.bf16.msrb.mxu0 %v2696_v41  ;;  %1525 = vmatpush.bf16.msrb.mxu1 %v2824_v42  ;;  %v2616_v41 = vor.u32 %v3474_v28, %v2613_v29  ;;  %v2744_v42 = vor.u32 %v3506_v30, %v2741_v34  ;;  %v3566_v51 = vld [vmem:[%s5450_s3 + $0x52c] sm:$0xf]  ;;  %v2981_v52 = vld [vmem:[%s5450_s3 + $0x538] sm:$0xf0] }
  0xa7   :  { %1538 = vmatpush.bf16.msrb.mxu2 %v2952_v43  ;;  %1551 = vmatpush.bf16.msrb.mxu3 %v3080_v47  ;;  %v2872_v43 = vor.u32 %v3538_v35, %v2869_v36  ;;  %v3000_v47 = vor.u32 %v3570_v39, %v2997_v40  ;;  %v3466_v56 = vld [vmem:[%s5450_s3 + $0x20c] sm:$0xf]  ;;  %v2581_v57 = vld [vmem:[%s5450_s3 + $0x218] sm:$0xf0] }
  0xa8   :  { %1494 = vmatmul.bf16.vlgmr.msra.gmra.mxu2 %v4182_v31  ;;  %1507 = vmatmul.bf16.vlgmr.msra.gmra.mxu3 %v4186_v37  ;;  %v3482_v31 = vld [vmem:[%s5450_s3 + $0x28c] sm:$0xf]  ;;  %v2773_v37 = vld [vmem:[%s5450_s3 + $0x398] sm:$0xf0] }
  0xa9   :  { %v2648_v11 = vor.u32 %v3482_v31, %v2645_v4  ;;  %v2776_v12 = vor.u32 %v3514_v5, %v2773_v37  ;;  %v3498_v58 = vld [vmem:[%s5450_s3 + $0x30c] sm:$0xf]  ;;  %v2709_v60 = vld [vmem:[%s5450_s3 + $0x318] sm:$0xf0] }
  0xaa   :  { %1513 = vmatpush.bf16.msrb.mxu0 %v2680_v53  ;;  %1526 = vmatpush.bf16.msrb.mxu1 %v2808_v54  ;;  %v2600_v53 = vor.u32 %v3470_v44, %v2597_v45  ;;  %v2728_v54 = vor.u32 %v3502_v46, %v2725_v48  ;;  %v3530_v61 = vld [vmem:[%s5450_s3 + $0x40c] sm:$0xf]  ;;  %v2837_v62 = vld [vmem:[%s5450_s3 + $0x418] sm:$0xf0]  ;;  %v3139_v44 = vld [vmem:[%s5452_s5 + $0x70] sm:$0xf] }
  0xab   :  { %1539 = vmatpush.bf16.msrb.mxu2 %v2936_v55  ;;  %1552 = vmatpush.bf16.msrb.mxu3 %v3064_v59  ;;  %v2856_v55 = vor.u32 %v3534_v49, %v2853_v50  ;;  %v2984_v59 = vor.u32 %v3566_v51, %v2981_v52  ;;  %v3562_v63 = vld [vmem:[%s5450_s3 + $0x50c] sm:$0xf]  ;;  %v2965_v0 = vld [vmem:[%s5450_s3 + $0x518] sm:$0xf0]  ;;  %v3608_v45 = vld [vmem:[%s5452_s5 + $0x74] sm:$0xf0] }
  0xac   :  { %v2968_v31 = vor.u32 %v3562_v63, %v2965_v0  ;;  %v3203_v46 = vld [vmem:[%s5452_s5 + $0xf0] sm:$0xf]  ;;  %v3140_v49 = vor.u32 %v3608_v45, %v3139_v44  ;;  %v3624_v50 = vld [vmem:[%s5452_s5 + $0xf4] sm:$0xf0]  ;;  %v3622_v63 = vld [vmem:[%s5452_s5 + $0xe4] sm:$0xf0] }
  0xad   :  { %v3267_v51 = vld [vmem:[%s5452_s5 + $0x170] sm:$0xf]  ;;  %v3640_v52 = vld [vmem:[%s5452_s5 + $0x174] sm:$0xf0]  ;;  %v3259_v0 = vld [vmem:[%s5452_s5 + $0x160] sm:$0xf] }
  0xae   :  { %1514 = vmatpush.bf16.msrb.mxu0 %v2664_v1  ;;  %1527 = vmatpush.bf16.msrb.mxu1 %v2792_v2  ;;  %v2584_v1 = vor.u32 %v3466_v56, %v2581_v57  ;;  %v2712_v2 = vor.u32 %v3498_v58, %v2709_v60  ;;  %v3331_v56 = vld [vmem:[%s5452_s5 + $0x1f0] sm:$0xf]  ;;  %v3656_v57 = vld [vmem:[%s5452_s5 + $0x1f4] sm:$0xf0]  ;;  %v3606_v60 = vld [vmem:[%s5452_s5 + $0x64] sm:$0xf0] }
  0xaf   :  { %1540 = vmatpush.bf16.msrb.mxu2 %v2920_v3  ;;  %1553 = vmatpush.bf16.msrb.mxu3 %v3048_v6  ;;  %v2840_v3 = vor.u32 %v3530_v61, %v2837_v62  ;;  %v3332_v58 = vor.u32 %v3656_v57, %v3331_v56  ;;  %v3195_v61 = vld [vmem:[%s5452_s5 + $0xe0] sm:$0xf]  ;;  %v3614_v56 = vld [vmem:[%s5452_s5 + $0xa4] sm:$0xf0] }
  0xb0   :  { %v3227_v57 = vld [vmem:[%s5452_s5 + $0x120] sm:$0xf] }
  0xb2   :  { %1515 = vmatpush.bf16.msrb.mxu0 %v2648_v11  ;;  %1528 = vmatpush.bf16.msrb.mxu1 %v2776_v12 }
  0xb3   :  { %1541 = vmatpush.bf16.msrb.mxu2 %v2904_v13  ;;  %1554 = vmatpush.bf16.msrb.mxu3 %v3032_v19 }
  0xb6   :  { %1516 = vmatpush.bf16.msrb.mxu0 %v2632_v25  ;;  %1529 = vmatpush.bf16.msrb.mxu1 %v2760_v26 }
  0xb7   :  { %1542 = vmatpush.bf16.msrb.mxu2 %v2888_v27  ;;  %1555 = vmatpush.bf16.msrb.mxu3 %v3016_v33 }
  0xba   :  { %1517 = vmatpush.bf16.msrb.mxu0 %v2616_v41  ;;  %1530 = vmatpush.bf16.msrb.mxu1 %v2744_v42 }
  0xbb   :  { %1543 = vmatpush.bf16.msrb.mxu2 %v2872_v43  ;;  %1556 = vmatpush.bf16.msrb.mxu3 %v3000_v47 }
  0xbd   :  { %v1261_v4 = vpop.f32.mrf.mxu0 }
  0xbe   :  { %1518 = vmatpush.bf16.msrb.mxu0 %v2600_v53  ;;  %1531 = vmatpush.bf16.msrb.mxu1 %v2728_v54  ;;  %v1274_v5 = vpop.f32.mrf.mxu1  ;;  %v3204_v54 = vor.u32 %v3624_v50, %v3203_v46 }
  0xbf   :  { %1544 = vmatpush.bf16.msrb.mxu2 %v2856_v55  ;;  %1557 = vmatpush.bf16.msrb.mxu3 %v2984_v59  ;;  %v1275_v6 = vadd.f32 %v1274_v5, %v1261_v4  ;;  %v3268_v55 = vor.u32 %v3640_v52, %v3267_v51  ;;  %v3131_v59 = vld [vmem:[%s5452_s5 + $0x60] sm:$0xf]  ;;  %v3654_v5 = vld [vmem:[%s5452_s5 + $0x1e4] sm:$0xf0] }
  0xc0   :  { %v3132_v62 = vor.u32 %v3606_v60, %v3131_v59  ;;  %v3323_v4 = vld [vmem:[%s5452_s5 + $0x1e0] sm:$0xf] }
  0xc1   :  { %v3099_v52 = vld [vmem:[%s5452_s5 + $0x20] sm:$0xf] }
  0xc2   :  { %1519 = vmatpush.bf16.msrb.mxu0 %v2584_v1  ;;  %1532 = vmatpush.bf16.msrb.mxu1 %v2712_v2  ;;  %v3638_v1 = vld [vmem:[%s5452_s5 + $0x164] sm:$0xf0] }
  0xc3   :  { %1545 = vmatpush.bf16.msrb.mxu2 %v2840_v3  ;;  %1558 = vmatpush.bf16.msrb.mxu3 %v2968_v31  ;;  %v1287_v37 = vpop.f32.mrf.mxu2  ;;  %v3196_v3 = vor.u32 %v3622_v63, %v3195_v61  ;;  %v3260_v31 = vor.u32 %v3638_v1, %v3259_v0  ;;  %v3291_v61 = vld [vmem:[%s5452_s5 + $0x1a0] sm:$0xf]  ;;  %v3091_v0 = vld [vmem:[%s5452_s5 + $0x10] sm:$0xf]  ;;  %v3596_v1 = vld [vmem:[%s5452_s5 + $0x14] sm:$0xf0] }
  0xc4   :  { %v1288_v7 = vadd.f32 %v1287_v37, %v1275_v6  ;;  %v1300_v8 = vpop.f32.mrf.mxu3  ;;  %v3123_v6 = vld [vmem:[%s5452_s5 + $0x50] sm:$0xf] }
  0xc5   :  { %1520 = vmatmul.bf16.vlgmr.msrb.gmra.mxu0 %v4184_v32  ;;  %1533 = vmatmul.bf16.vlgmr.msrb.gmra.mxu1 %v4188_v38  ;;  %v1263_v9 = vpop.f32.mrf.mxu0 }
  0xc6   :  { %1546 = vmatmul.bf16.vlgmr.msrb.gmra.mxu2 %v4266_v15  ;;  %1559 = vmatmul.bf16.vlgmr.msrb.gmra.mxu3 %v4268_v17  ;;  %v1301_v10 = vadd.f32 %v1300_v8, %v1288_v7  ;;  %v1276_v11 = vpop.f32.mrf.mxu1  ;;  %v3324_v7 = vor.u32 %v3654_v5, %v3323_v4  ;;  %v3604_v8 = vld [vmem:[%s5452_s5 + $0x54] sm:$0xf0]  ;;  %v3187_v9 = vld [vmem:[%s5452_s5 + $0xd0] sm:$0xf] }
  0xc7   :  { %2002 = vmatpush.bf16.msra.mxu0 %v3140_v49  ;;  %2015 = vmatpush.bf16.msra.mxu1 %v3204_v54  ;;  %v3124_v11 = vor.u32 %v3604_v8, %v3123_v6  ;;  %v3648_v49 = vld [vmem:[%s5452_s5 + $0x1b4] sm:$0xf0]  ;;  %v3163_v54 = vld [vmem:[%s5452_s5 + $0xa0] sm:$0xf]  ;;  %v3219_v5 = vld [vmem:[%s5452_s5 + $0x110] sm:$0xf] }
  0xc8   :  { %2028 = vmatpush.bf16.msra.mxu2 %v3268_v55  ;;  %2041 = vmatpush.bf16.msra.mxu3 %v3332_v58  ;;  %v3630_v58 = vld [vmem:[%s5452_s5 + $0x124] sm:$0xf0]  ;;  %v3164_v59 = vor.u32 %v3614_v56, %v3163_v54  ;;  %v3612_v4 = vld [vmem:[%s5452_s5 + $0x94] sm:$0xf0]  ;;  %v3637_v54 = vld [vmem:[%s5452_s5 + $0x164] sm:$0xf] }
  0xc9   :  { %v3228_v60 = vor.u32 %v3630_v58, %v3227_v57  ;;  %v3628_v8 = vld [vmem:[%s5452_s5 + $0x114] sm:$0xf0]  ;;  %v3653_v58 = vld [vmem:[%s5452_s5 + $0x1e4] sm:$0xf] }
  0xcb   :  { %v1289_v12 = vpop.f32.mrf.mxu2  ;;  %2003 = vmatpush.bf16.msra.mxu0 %v3132_v62  ;;  %2016 = vmatpush.bf16.msra.mxu1 %v3196_v3  ;;  %v3646_v62 = vld [vmem:[%s5452_s5 + $0x1a4] sm:$0xf0] }
  0xcc   :  { %v1302_v13 = vpop.f32.mrf.mxu3  ;;  %2029 = vmatpush.bf16.msra.mxu2 %v3260_v31  ;;  %2042 = vmatpush.bf16.msra.mxu3 %v3324_v7  ;;  %v3292_v63 = vor.u32 %v3646_v62, %v3291_v61  ;;  %v3092_v31 = vor.u32 %v3596_v1, %v3091_v0  ;;  %v3125_v62 = vld [vmem:[%s5452_s5 + $0x58] sm:$0xf0]  ;;  %v5236_v1 = vld [vmem:[%s5451_s4] sm:$0xf] }
  0xcd   :  { %v1313_v14 = vpop.f32.mrf.mxu0  ;;  %v3251_v13 = vld [vmem:[%s5452_s5 + $0x150] sm:$0xf]  ;;  %v3189_v0 = vld [vmem:[%s5452_s5 + $0xd8] sm:$0xf0] }
  0xce   :  { %v1314_v16 = vadd.f32 %v1313_v14, %v1301_v10  ;;  %v1326_v18 = vpop.f32.mrf.mxu1  ;;  %v3620_v10 = vld [vmem:[%s5452_s5 + $0xd4] sm:$0xf0] }
  0xcf   :  { %v3188_v12 = vor.u32 %v3620_v10, %v3187_v9  ;;  %v3636_v14 = vld [vmem:[%s5452_s5 + $0x154] sm:$0xf0]  ;;  %2004 = vmatpush.bf16.msra.mxu0 %v3124_v11  ;;  %v3220_v10 = vor.u32 %v3628_v8, %v3219_v5  ;;  %v3283_v11 = vld [vmem:[%s5452_s5 + $0x190] sm:$0xf]  ;;  %v3651_v5 = vld [vmem:[%s5452_s5 + $0x1d4] sm:$0xf] }
  0xd0   :  { %v1327_v32 = vadd.f32 %v1326_v18, %v1314_v16  ;;  %v3315_v16 = vld [vmem:[%s5452_s5 + $0x1d0] sm:$0xf]  ;;  %v3252_v18 = vor.u32 %v3636_v14, %v3251_v13  ;;  %v3083_v13 = vld [vmem:[%s5452_s5] sm:$0xf]  ;;  %v3317_v8 = vld [vmem:[%s5452_s5 + $0x1d8] sm:$0xf0] }
  0xd1   :  { %2017 = vmatpush.bf16.msra.mxu1 %v3188_v12  ;;  %v3644_v12 = vld [vmem:[%s5452_s5 + $0x194] sm:$0xf0] }
  0xd2   :  { %2030 = vmatpush.bf16.msra.mxu2 %v3252_v18  ;;  %v3284_v14 = vor.u32 %v3644_v12, %v3283_v11  ;;  %v3147_v18 = vld [vmem:[%s5452_s5 + $0x80] sm:$0xf]  ;;  %v3320_v12 = vor.u32 %v3651_v5, %v3317_v8  ;;  %v3221_v5 = vld [vmem:[%s5452_s5 + $0x118] sm:$0xf0] }
  0xd3   :  { %v1339_v38 = vpop.f32.mrf.mxu2 }
  0xd4   :  { %v1352_v20 = vpop.f32.mrf.mxu3 }
  0xd5   :  { %v1315_v19 = vpop.f32.mrf.mxu0  ;;  %v1353_v15 = vadd.f32 %v1352_v20, %v1339_v38  ;;  %v3602_v38 = vld [vmem:[%s5452_s5 + $0x44] sm:$0xf0] }
  0xd6   :  { %v1328_v21 = vpop.f32.mrf.mxu1  ;;  %v3115_v19 = vld [vmem:[%s5452_s5 + $0x40] sm:$0xf] }
  0xd7   :  { %v3618_v21 = vld [vmem:[%s5452_s5 + $0xc4] sm:$0xf0] }
  0xdb   :  { %v1341_v22 = vpop.f32.mrf.mxu2 }
  0xdc   :  { %v1354_v17 = vpop.f32.mrf.mxu3  ;;  %v3243_v22 = vld [vmem:[%s5452_s5 + $0x140] sm:$0xf] }
  0xdd   :  { %v3116_v17 = vor.u32 %v3602_v38, %v3115_v19 }
  0xdf   :  { %2005 = vmatpush.bf16.msra.mxu0 %v3116_v17  ;;  %v3642_v17 = vld [vmem:[%s5452_s5 + $0x184] sm:$0xf0] }
  0xe2   :  { %v1365_v23 = vpop.f32.mrf.mxu0  ;;  %v1378_v25 = vpop.f32.mrf.mxu1 }
  0xe3   :  { %v1366_v24 = vadd.f32 %v1365_v23, %v1353_v15  ;;  %v3179_v15 = vld [vmem:[%s5452_s5 + $0xc0] sm:$0xf]  ;;  %v3634_v23 = vld [vmem:[%s5452_s5 + $0x144] sm:$0xf0] }
  0xe5   :  { %v1379_v26 = vadd.f32 %v1378_v25, %v1366_v24  ;;  %v3307_v24 = vld [vmem:[%s5452_s5 + $0x1c0] sm:$0xf]  ;;  %v3650_v25 = vld [vmem:[%s5452_s5 + $0x1c4] sm:$0xf0] }
  0xea   :  { %v1367_v30 = vpop.f32.mrf.mxu0  ;;  %v1380_v35 = vpop.f32.mrf.mxu1 }
  0xeb   :  { %v1391_v27 = vpop.f32.mrf.mxu2  ;;  %v1404_v28 = vpop.f32.mrf.mxu3  ;;  %v3600_v30 = vld [vmem:[%s5452_s5 + $0x34] sm:$0xf0] }
  0xec   :  { %v1392_v29 = vadd.f32 %v1391_v27, %v1379_v26  ;;  %v3180_v26 = vor.u32 %v3618_v21, %v3179_v15  ;;  %v3244_v27 = vor.u32 %v3634_v23, %v3243_v22  ;;  %v3616_v35 = vld [vmem:[%s5452_s5 + $0xb4] sm:$0xf0]  ;;  %v3626_v15 = vld [vmem:[%s5452_s5 + $0x104] sm:$0xf0]  ;;  %v3275_v21 = vld [vmem:[%s5452_s5 + $0x180] sm:$0xf] }
  0xed   :  { %v3607_v23 = vld [vmem:[%s5452_s5 + $0x74] sm:$0xf] }
  0xee   :  { %v1405_v33 = vadd.f32 %v1404_v28, %v1392_v29  ;;  %v3308_v28 = vor.u32 %v3650_v25, %v3307_v24  ;;  %2018 = vmatpush.bf16.msra.mxu1 %v3180_v26  ;;  %2031 = vmatpush.bf16.msra.mxu2 %v3244_v27  ;;  %v3107_v29 = vld [vmem:[%s5452_s5 + $0x30] sm:$0xf]  ;;  %v3141_v24 = vld [vmem:[%s5452_s5 + $0x78] sm:$0xf0]  ;;  %v3276_v25 = vor.u32 %v3642_v17, %v3275_v21  ;;  %v3623_v27 = vld [vmem:[%s5452_s5 + $0xf4] sm:$0xf] }
  0xef   :  { %v3144_v26 = vor.u32 %v3607_v23, %v3141_v24  ;;  %v1586_v21 = vperm.slane %v5236_v1, 3  ;;  %v3599_v23 = vld [vmem:[%s5452_s5 + $0x34] sm:$0xf] }
  0xf0   :  { %v1568_v34 = vrot.slane %v1405_v33, 6  ;;  %v3171_v33 = vld [vmem:[%s5452_s5 + $0xb0] sm:$0xf]  ;;  %v3615_v24 = vld [vmem:[%s5452_s5 + $0xb4] sm:$0xf] }
  0xf1   :  { %v3172_v45 = vor.u32 %v3616_v35, %v3171_v33  ;;  %v3655_v35 = vld [vmem:[%s5452_s5 + $0x1f4] sm:$0xf] }
  0xf2   :  { %v4963_v36 = vsel %vm48_vm0, %v1327_v32, %v1568_v34  ;;  %v3652_v32 = vld [vmem:[%s5452_s5 + $0x1d4] sm:$0xf0]  ;;  %v3108_v34 = vor.u32 %v3600_v30, %v3107_v29  ;;  %v3639_v29 = vld [vmem:[%s5452_s5 + $0x174] sm:$0xf] }
  0xf3   :  { %v1393_v39 = vpop.f32.mrf.mxu2  ;;  %v1406_v40 = vpop.f32.mrf.mxu3  ;;  %v3316_v20 = vor.u32 %v3652_v32, %v3315_v16  ;;  %2019 = vmatpush.bf16.msra.mxu1 %v3172_v45  ;;  %v3594_v16 = vld [vmem:[%s5452_s5 + $0x4] sm:$0xf0] }
  0xf4   :  { %v3235_v39 = vld [vmem:[%s5452_s5 + $0x130] sm:$0xf]  ;;  %v3632_v40 = vld [vmem:[%s5452_s5 + $0x134] sm:$0xf0]  ;;  %2006 = vmatpush.bf16.msra.mxu0 %v3108_v34  ;;  %v3610_v32 = vld [vmem:[%s5452_s5 + $0x84] sm:$0xf0]  ;;  %v3084_v19 = vor.u32 %v3594_v16, %v3083_v13 }
  0xf5   :  { %2043 = vmatpush.bf16.msra.mxu3 %v3316_v20  ;;  %v3236_v46 = vor.u32 %v3632_v40, %v3235_v39  ;;  %v3148_v38 = vor.u32 %v3610_v32, %v3147_v18  ;;  %v3211_v20 = vld [vmem:[%s5452_s5 + $0x100] sm:$0xf]  ;;  %v3269_v34 = vld [vmem:[%s5452_s5 + $0x178] sm:$0xf0]  ;;  %v3633_v13 = vld [vmem:[%s5452_s5 + $0x144] sm:$0xf] }
  0xf6   :  { %v3212_v22 = vor.u32 %v3626_v15, %v3211_v20  ;;  %v3333_v39 = vld [vmem:[%s5452_s5 + $0x1f8] sm:$0xf0]  ;;  %v3272_v45 = vor.u32 %v3639_v29, %v3269_v34  ;;  %v3649_v16 = vld [vmem:[%s5452_s5 + $0x1c4] sm:$0xf]  ;;  %v3309_v18 = vld [vmem:[%s5452_s5 + $0x1c8] sm:$0xf0] }
  0xf7   :  { %2032 = vmatpush.bf16.msra.mxu2 %v3236_v46  ;;  %2020 = vmatpush.bf16.msra.mxu1 %v3164_v59  ;;  %v3336_v46 = vor.u32 %v3655_v35, %v3333_v39  ;;  %v3325_v59 = vld [vmem:[%s5452_s5 + $0x1e8] sm:$0xf0]  ;;  %v1585_v15 = vperm.slane %v5236_v1, 2  ;;  %v3312_v17 = vor.u32 %v3649_v16, %v3309_v18  ;;  %v3647_v35 = vld [vmem:[%s5452_s5 + $0x1b4] sm:$0xf] }
  0xf8   :  { %v3328_v61 = vor.u32 %v3653_v58, %v3325_v59  ;;  %v3301_v39 = vld [vmem:[%s5452_s5 + $0x1b8] sm:$0xf0] }
  0xf9   :  { %2044 = vmatpush.bf16.msra.mxu3 %v3308_v28  ;;  %v3205_v28 = vld [vmem:[%s5452_s5 + $0xf8] sm:$0xf0]  ;;  %v1588_v59 = vrot.slane %v1585_v15, 4 }
  0xfa   :  { %v3208_v33 = vor.u32 %v3623_v27, %v3205_v28  ;;  %v3631_v27 = vld [vmem:[%s5452_s5 + $0x134] sm:$0xf]  ;;  %v3237_v28 = vld [vmem:[%s5452_s5 + $0x138] sm:$0xf0] }
  0xfb   :  { %2033 = vmatpush.bf16.msra.mxu2 %v3228_v60  ;;  %v3603_v60 = vld [vmem:[%s5452_s5 + $0x54] sm:$0xf] }
  0xff   :  { %2034 = vmatpush.bf16.msra.mxu2 %v3220_v10  ;;  %v3117_v10 = vld [vmem:[%s5452_s5 + $0x48] sm:$0xf0] }
 0x102   :  { %v4965_v41 = vpop.f32.mrf.mxu0  ;;  %v4967_v42 = vpop.f32.mrf.mxu1 }
 0x103   :  { %2035 = vmatpush.bf16.msra.mxu2 %v3212_v22 }
 0x107   :  { %2080 = vmatpush.bf16.msrb.mxu2 %v3272_v45 }
 0x10a   :  { %v1419_v47 = vpop.f32.mrf.mxu0  ;;  %v1432_v53 = vpop.f32.mrf.mxu1 }
 0x10b   :  { %v4969_v43 = vpop.f32.mrf.mxu2  ;;  %v4980_v48 = vpop.f32.mrf.mxu3  ;;  %v3299_v47 = vld [vmem:[%s5452_s5 + $0x1b0] sm:$0xf]  ;;  %v3598_v53 = vld [vmem:[%s5452_s5 + $0x24] sm:$0xf0] }
 0x10c   :  { %v3300_v51 = vor.u32 %v3648_v49, %v3299_v47  ;;  %v3100_v55 = vor.u32 %v3598_v53, %v3099_v52  ;;  %v3605_v47 = vld [vmem:[%s5452_s5 + $0x64] sm:$0xf]  ;;  %v3133_v49 = vld [vmem:[%s5452_s5 + $0x68] sm:$0xf0] }
 0x10d   :  { %v3136_v52 = vor.u32 %v3605_v47, %v3133_v49  ;;  %v3197_v53 = vld [vmem:[%s5452_s5 + $0xe8] sm:$0xf0] }
 0x10e   :  { %2045 = vmatpush.bf16.msra.mxu3 %v3300_v51  ;;  %2007 = vmatpush.bf16.msra.mxu0 %v3100_v55  ;;  %v3621_v51 = vld [vmem:[%s5452_s5 + $0xe4] sm:$0xf]  ;;  %v3261_v55 = vld [vmem:[%s5452_s5 + $0x168] sm:$0xf0] }
 0x10f   :  { %v3200_v56 = vor.u32 %v3621_v51, %v3197_v53  ;;  %v3264_v57 = vor.u32 %v3637_v54, %v3261_v55  ;;  %v3165_v47 = vld [vmem:[%s5452_s5 + $0xa8] sm:$0xf0]  ;;  %v3629_v51 = vld [vmem:[%s5452_s5 + $0x124] sm:$0xf]  ;;  %v1583_v54 = vperm.slane %v5236_v1, 0 }
 0x110   :  { %v3645_v53 = vld [vmem:[%s5452_s5 + $0x1a4] sm:$0xf] }
 0x111   :  { %2081 = vmatpush.bf16.msrb.mxu2 %v3264_v57  ;;  %v3293_v57 = vld [vmem:[%s5452_s5 + $0x1a8] sm:$0xf0] }
 0x112   :  { %2046 = vmatpush.bf16.msra.mxu3 %v3292_v63  ;;  %2008 = vmatpush.bf16.msra.mxu0 %v3092_v31  ;;  %v3619_v63 = vld [vmem:[%s5452_s5 + $0xd4] sm:$0xf] }
 0x113   :  { %v1445_v2 = vpop.f32.mrf.mxu2  ;;  %v1458_v37 = vpop.f32.mrf.mxu3  ;;  %v3635_v31 = vld [vmem:[%s5452_s5 + $0x154] sm:$0xf] }
 0x114   :  { %v3155_v2 = vld [vmem:[%s5452_s5 + $0x90] sm:$0xf] }
 0x115   :  { %v3156_v7 = vor.u32 %v3612_v4, %v3155_v2  ;;  %v3128_v2 = vor.u32 %v3603_v60, %v3125_v62  ;;  %v3253_v4 = vld [vmem:[%s5452_s5 + $0x158] sm:$0xf0]  ;;  %v1589_v60 = vrot.slane %v1586_v21, 2  ;;  %v3595_v62 = vld [vmem:[%s5452_s5 + $0x14] sm:$0xf] }
 0x116   :  { %2047 = vmatpush.bf16.msra.mxu3 %v3284_v14  ;;  %2009 = vmatpush.bf16.msra.mxu0 %v3084_v19  ;;  %v3256_v11 = vor.u32 %v3635_v31, %v3253_v4  ;;  %v3245_v14 = vld [vmem:[%s5452_s5 + $0x148] sm:$0xf0]  ;;  %v3627_v31 = vld [vmem:[%s5452_s5 + $0x114] sm:$0xf] }
 0x117   :  { %2021 = vmatpush.bf16.msra.mxu1 %v3156_v7  ;;  %v3192_v7 = vor.u32 %v3619_v63, %v3189_v0  ;;  %v3248_v22 = vor.u32 %v3633_v13, %v3245_v14  ;;  %v3093_v63 = vld [vmem:[%s5452_s5 + $0x18] sm:$0xf0]  ;;  %v3593_v13 = vld [vmem:[%s5452_s5 + $0x4] sm:$0xf]  ;;  %v3085_v14 = vld [vmem:[%s5452_s5 + $0x8] sm:$0xf0]  ;;  %v3224_v18 = vor.u32 %v3627_v31, %v3221_v5  ;;  %v1591_v21 = vsel %vm50_vm1, %v1588_v59, %v1589_v60 }
 0x118   :  { %2082 = vmatpush.bf16.msrb.mxu2 %v3256_v11  ;;  %v3671_v59 = vld [vmem:[%s5454_s7 + $0x70] sm:$0xff]  ;;  %v3658_v60 = vld [vmem:[%s5454_s7 + $0x8] sm:$0xff]  ;;  %v3665_v31 = vld [vmem:[%s5454_s7 + $0x40] sm:$0xff] }
 0x11a   :  { %2054 = vmatpush.bf16.msrb.mxu0 %v3144_v26  ;;  %2048 = vmatpush.bf16.msra.mxu3 %v3276_v25  ;;  %v3173_v26 = vld [vmem:[%s5452_s5 + $0xb8] sm:$0xf0] }
 0x11b   :  { %2022 = vmatpush.bf16.msra.mxu1 %v3148_v38  ;;  %v1584_v38 = vperm.slane %v5236_v1, 1  ;;  %v3176_v34 = vor.u32 %v3615_v24, %v3173_v26  ;;  %v3296_v1 = vor.u32 %v3645_v53, %v3293_v57  ;;  %v3663_v53 = vld [vmem:[%s5454_s7 + $0x30] sm:$0xff]  ;;  %v3672_v57 = vld [vmem:[%s5454_s7 + $0x78] sm:$0xff] }
 0x11c   :  { %2083 = vmatpush.bf16.msrb.mxu2 %v3248_v22  ;;  %v3213_v22 = vld [vmem:[%s5452_s5 + $0x108] sm:$0xf0] }
 0x11d   :  { %v1587_v55 = vrot.slane %v1584_v38, 6  ;;  %v3625_v38 = vld [vmem:[%s5452_s5 + $0x104] sm:$0xf] }
 0x11e   :  { %2093 = vmatpush.bf16.msrb.mxu3 %v3336_v46  ;;  %2055 = vmatpush.bf16.msrb.mxu0 %v3136_v52  ;;  %v3613_v46 = vld [vmem:[%s5452_s5 + $0xa4] sm:$0xf]  ;;  %v3229_v52 = vld [vmem:[%s5452_s5 + $0x128] sm:$0xf0] }
 0x11f   :  { %2067 = vmatpush.bf16.msrb.mxu1 %v3208_v33  ;;  %v3232_v0 = vor.u32 %v3629_v51, %v3229_v52  ;;  %v1590_v15 = vsel %vm48_vm0, %v1583_v54, %v1587_v55  ;;  %v3662_v54 = vld [vmem:[%s5454_s7 + $0x28] sm:$0xff]  ;;  %v3661_v55 = vld [vmem:[%s5454_s7 + $0x20] sm:$0xff] }
 0x122   :  { %v5087_v44 = vpop.f32.mrf.mxu0  ;;  %v5095_v50 = vpop.f32.mrf.mxu1  ;;  %2094 = vmatpush.bf16.msrb.mxu3 %v3328_v61  ;;  %2056 = vmatpush.bf16.msrb.mxu0 %v3128_v2  ;;  %v3168_v61 = vor.u32 %v3613_v46, %v3165_v47  ;;  %v3157_v2 = vld [vmem:[%s5452_s5 + $0x98] sm:$0xf0] }
 0x123   :  { %2068 = vmatpush.bf16.msrb.mxu1 %v3200_v56 }
 0x126   :  { %2095 = vmatpush.bf16.msrb.mxu3 %v3320_v12 }
 0x127   :  { %2069 = vmatpush.bf16.msrb.mxu1 %v3192_v7  ;;  %v3285_v7 = vld [vmem:[%s5452_s5 + $0x198] sm:$0xf0] }
 0x12a   :  { %v1471_v37 = vpop.f32.mrf.mxu0  ;;  %v1484_v9 = vpop.f32.mrf.mxu1  ;;  %2096 = vmatpush.bf16.msrb.mxu3 %v3312_v17  ;;  %v3641_v17 = vld [vmem:[%s5452_s5 + $0x184] sm:$0xf] }
 0x12b   :  { %v5130_v3 = vpop.f32.mrf.mxu2  ;;  %v5138_v6 = vpop.f32.mrf.mxu3  ;;  %v1431_v37 = vadd.f32 %v4967_v42, %v4965_v41  ;;  %v3601_v9 = vld [vmem:[%s5452_s5 + $0x44] sm:$0xf]  ;;  %v3181_v42 = vld [vmem:[%s5452_s5 + $0xc8] sm:$0xf0] }
 0x12c   :  { %v3617_v41 = vld [vmem:[%s5452_s5 + $0xc4] sm:$0xf]  ;;  %v3120_v32 = vor.u32 %v3601_v9, %v3117_v10  ;;  %v3096_v9 = vor.u32 %v3595_v62, %v3093_v63 }
 0x12d   :  { %v1444_v19 = vadd.f32 %v4969_v43, %v1431_v37  ;;  %v3184_v20 = vor.u32 %v3617_v41, %v3181_v42  ;;  %v3109_v43 = vld [vmem:[%s5452_s5 + $0x38] sm:$0xf0]  ;;  %v3643_v37 = vld [vmem:[%s5452_s5 + $0x194] sm:$0xf]  ;;  %v3657_v62 = vld [vmem:[%s5454_s7] sm:$0xff] }
 0x12e   :  { %2057 = vmatpush.bf16.msrb.mxu0 %v3120_v32  ;;  %v3112_v25 = vor.u32 %v3599_v23, %v3109_v43  ;;  %v3288_v32 = vor.u32 %v3643_v37, %v3285_v7  ;;  %v3277_v23 = vld [vmem:[%s5452_s5 + $0x188] sm:$0xf0]  ;;  %v3088_v43 = vor.u32 %v3593_v13, %v3085_v14  ;;  %v3669_v63 = vld [vmem:[%s5454_s7 + $0x60] sm:$0xff] }
 0x12f   :  { %v1457_v29 = vadd.f32 %v4980_v48, %v1444_v19  ;;  %2070 = vmatpush.bf16.msrb.mxu1 %v3184_v20  ;;  %v3240_v48 = vor.u32 %v3631_v27, %v3237_v28  ;;  %v3149_v19 = vld [vmem:[%s5452_s5 + $0x88] sm:$0xf0]  ;;  %v1592_v27 = vsel %vm52_vm2, %v1590_v15, %v1591_v21  ;;  %v3216_v28 = vor.u32 %v3625_v38, %v3213_v22 }
 0x131   :  { %v1470_v58 = vadd.f32 %v5087_v44, %v1457_v29  ;;  %2084 = vmatpush.bf16.msrb.mxu2 %v3240_v48  ;;  %v3611_v44 = vld [vmem:[%s5452_s5 + $0x94] sm:$0xf]  ;;  %v3280_v29 = vor.u32 %v3641_v17, %v3277_v23  ;;  %v3664_v48 = vld [vmem:[%s5454_s7 + $0x38] sm:$0xff] }
 0x132   :  { %2058 = vmatpush.bf16.msrb.mxu0 %v3112_v25  ;;  %v3160_v42 = vor.u32 %v3611_v44, %v3157_v2  ;;  %v3666_v44 = vld [vmem:[%s5454_s7 + $0x48] sm:$0xff]  ;;  %v1676_v2 = vld [vmem:[%s5453_s6] sm:$0x3] }
 0x133   :  { %v1497_v30 = vpop.f32.mrf.mxu2  ;;  %v1510_v40 = vpop.f32.mrf.mxu3  ;;  %2071 = vmatpush.bf16.msrb.mxu1 %v3176_v34  ;;  %v1483_v10 = vadd.f32 %v5095_v50, %v1470_v58  ;;  %v3609_v50 = vld [vmem:[%s5452_s5 + $0x84] sm:$0xf]  ;;  %v3659_v58 = vld [vmem:[%s5454_s7 + $0x10] sm:$0xff] }
 0x134   :  { %v1509_v30 = vadd.f32 %v5138_v6, %v5130_v3  ;;  %v3597_v40 = vld [vmem:[%s5452_s5 + $0x24] sm:$0xf]  ;;  %v3304_v3 = vor.u32 %v3647_v35, %v3301_v39  ;;  %v3101_v6 = vld [vmem:[%s5452_s5 + $0x28] sm:$0xf0]  ;;  %v3152_v26 = vor.u32 %v3609_v50, %v3149_v19 }
 0x135   :  { %v3104_v56 = vor.u32 %v3597_v40, %v3101_v6  ;;  %2085 = vmatpush.bf16.msrb.mxu2 %v3232_v0  ;;  %v1569_v24 = vrot.slane %v1483_v10, 4  ;;  %v3668_v0 = vld [vmem:[%s5454_s7 + $0x58] sm:$0xff] }
 0x136   :  { %2097 = vmatpush.bf16.msrb.mxu3 %v3304_v3 }
 0x137   :  { %2059 = vmatpush.bf16.msrb.mxu0 %v3104_v56  ;;  %2072 = vmatpush.bf16.msrb.mxu1 %v3168_v61  ;;  %v3660_v56 = vld [vmem:[%s5454_s7 + $0x18] sm:$0xff]  ;;  %v3670_v61 = vld [vmem:[%s5454_s7 + $0x68] sm:$0xff] }
 0x139   :  { %2086 = vmatpush.bf16.msrb.mxu2 %v3224_v18 }
 0x13a   :  { %2098 = vmatpush.bf16.msrb.mxu3 %v3296_v1  ;;  %v3667_v1 = vld [vmem:[%s5454_s7 + $0x50] sm:$0xff] }
 0x13b   :  { %2060 = vmatpush.bf16.msrb.mxu0 %v3096_v9  ;;  %2073 = vmatpush.bf16.msrb.mxu1 %v3160_v42 }
 0x13d   :  { %2087 = vmatpush.bf16.msrb.mxu2 %v3216_v28 }
 0x13e   :  { %2099 = vmatpush.bf16.msrb.mxu3 %v3288_v32 }
 0x13f   :  { %2061 = vmatpush.bf16.msrb.mxu0 %v3088_v43  ;;  %2074 = vmatpush.bf16.msrb.mxu1 %v3152_v26 }
 0x142   :  { %v1521_v33 = vpop.f32.mrf.mxu0  ;;  %v1534_v45 = vpop.f32.mrf.mxu1  ;;  %2100 = vmatpush.bf16.msrb.mxu3 %v3280_v29 }
 0x143   :  { %v1522_v49 = vadd.f32 %v1521_v33, %v1509_v30 }
 0x145   :  { %v1535_v4 = vadd.f32 %v1534_v45, %v1522_v49 }
 0x149   :  { %v1547_v8 = vpop.f32.mrf.mxu2  ;;  %v1560_v12 = vpop.f32.mrf.mxu3 }
 0x14a   :  { %v1548_v11 = vadd.f32 %v1547_v8, %v1535_v4  ;;  %v1523_v41 = vpop.f32.mrf.mxu0  ;;  %v1536_v16 = vpop.f32.mrf.mxu1  ;;  %v1678_v4 = vperm.slane %v1676_v2, 0 }
 0x14b   :  { %v1679_v16 = vperm.slane %v1676_v2, 1 }
 0x14c   :  { %v1561_v20 = vadd.f32 %v1560_v12, %v1548_v11 }
 0x14e   :  { %v1570_v25 = vrot.slane %v1561_v20, 2 }
 0x150   :  { %v1572_v30 = vsel %vm50_vm1, %v1569_v24, %v1570_v25 }
 0x151   :  { %v1573_v33 = vsel %vm52_vm2, %v4963_v36, %v1572_v30  ;;  %v1549_v34 = vpop.f32.mrf.mxu2  ;;  %v1562_v39 = vpop.f32.mrf.mxu3 }
 0x152   :  { %v1594_v35 = vadd.f32 %v1592_v27, %v1573_v33  ;;  %v3676_v34 = vld [vmem:[%s5455_s8] ss:$0 sm:$0xff]  ;;  %s3707_s8 = smov [#allocation3]  }
 0x153   :  { %s2302_s24 = sshll.u32 %s3707_s8, 4  ;;  %s2303_s24 = int_to_ptr.vmem [resolvable:$true] %s2302_s24 }
 0x154   :  { %vm1595_vm5 = vcmp.gt.f32.partialorder %v1594_v35, 0.0  ;;  %v1596_v40 = vmul.f32 0.2, %v1594_v35 }
 0x156   :  { %v1597_v45 = vsel %vm1595_vm5, %v1594_v35, %v1596_v40 }
 0x157   :  { %1599 = vst [vmem:[#allocation1] ss:$4 sm:$0xff] %v1597_v45 }
 0x15e   :  { %v1600_v3 = vld.sshfl [vmem:[#allocation1] sm:$0xff pattern:$0x73625140]  ;;  %v1601_v6 = vld.sshfl [vmem:[#allocation1 + $0x8] sm:$0xff pattern:$0x73625140] }
 0x15f   :  { %v1608_v46 = vpack.c.bf16 %v1600_v3, %v1600_v3  ;;  %v1609_v47 = vpack.c.bf16 %v1601_v6, %v1601_v6  ;;  %v1602_v36 = vld.sshfl [vmem:[#allocation1 + $0x10] sm:$0xff pattern:$0x73625140]  ;;  %v1603_v49 = vld.sshfl [vmem:[#allocation1 + $0x18] sm:$0xff pattern:$0x73625140] }
 0x160   :  { %v1610_v51 = vpack.c.bf16 %v1602_v36, %v1602_v36  ;;  %v1611_v52 = vpack.c.bf16 %v1603_v49, %v1603_v49 }
 0x161   :  { %2010 = vmatmul.bf16.vlgmr.msra.gmra.mxu0 %v1608_v46  ;;  %2023 = vmatmul.bf16.vlgmr.msra.gmra.mxu1 %v1609_v47 }
 0x162   :  { %2036 = vmatmul.bf16.vlgmr.msra.gmra.mxu2 %v1610_v51  ;;  %2049 = vmatmul.bf16.vlgmr.msra.gmra.mxu3 %v1611_v52 }
 0x163   :  { %2246 = vmatpush.bf16.msra.mxu0 %v3664_v48  ;;  %2259 = vmatpush.bf16.msra.mxu1 %v3672_v57 }
 0x167   :  { %2247 = vmatpush.bf16.msra.mxu0 %v3663_v53  ;;  %2260 = vmatpush.bf16.msra.mxu1 %v3671_v59 }
 0x16b   :  { %2248 = vmatpush.bf16.msra.mxu0 %v3662_v54  ;;  %2261 = vmatpush.bf16.msra.mxu1 %v3670_v61 }
 0x16f   :  { %2249 = vmatpush.bf16.msra.mxu0 %v3661_v55  ;;  %2262 = vmatpush.bf16.msra.mxu1 %v3669_v63 }
 0x171   :  { %2062 = vmatmul.bf16.vlgmr.msrb.gmra.mxu0 %v1608_v46  ;;  %2075 = vmatmul.bf16.vlgmr.msrb.gmra.mxu1 %v1609_v47 }
 0x172   :  { %2088 = vmatmul.bf16.vlgmr.msrb.gmra.mxu2 %v1610_v51  ;;  %2101 = vmatmul.bf16.vlgmr.msrb.gmra.mxu3 %v1611_v52 }
 0x173   :  { %2250 = vmatpush.bf16.msra.mxu0 %v3660_v56  ;;  %2263 = vmatpush.bf16.msra.mxu1 %v3668_v0 }
 0x177   :  { %2251 = vmatpush.bf16.msra.mxu0 %v3659_v58  ;;  %2264 = vmatpush.bf16.msra.mxu1 %v3667_v1 }
 0x17b   :  { %2252 = vmatpush.bf16.msra.mxu0 %v3658_v60  ;;  %2265 = vmatpush.bf16.msra.mxu1 %v3666_v44 }
 0x17f   :  { %2253 = vmatpush.bf16.msra.mxu0 %v3657_v62  ;;  %2266 = vmatpush.bf16.msra.mxu1 %v3665_v31 }
 0x1de   :  { %v2011_v5 = vpop.f32.mrf.mxu0  ;;  %v2024_v37 = vpop.f32.mrf.mxu1 }
 0x1df   :  { %v2012_v7 = vadd.f32 %v2011_v5, %v1678_v4 }
 0x1e1   :  { %v2025_v8 = vadd.f32 %v2024_v37, %v2012_v7 }
 0x1e5   :  { %v2037_v9 = vpop.f32.mrf.mxu2  ;;  %v2050_v10 = vpop.f32.mrf.mxu3 }
 0x1e6   :  { %v2038_v11 = vadd.f32 %v2037_v9, %v2025_v8  ;;  %v2013_v12 = vpop.f32.mrf.mxu0  ;;  %v2026_v41 = vpop.f32.mrf.mxu1 }
 0x1e8   :  { %v2051_v42 = vadd.f32 %v2050_v10, %v2038_v11 }
 0x1ea   :  { %vm2106_vm6 = vcmp.gt.f32.partialorder %v2051_v42, 0.0  ;;  %v2108_v13 = vmul.f32 0.2, %v2051_v42 }
 0x1ec   :  { %v2110_v14 = vsel %vm2106_vm6, %v2051_v42, %v2108_v13 }
 0x1ed   :  { %v2112_v18 = vpack.c.bf16 %v2110_v14, %v2110_v14  ;;  %v2039_v32 = vpop.f32.mrf.mxu2  ;;  %v2052_v50 = vpop.f32.mrf.mxu3 }
 0x1ee   :  { %v2063_v19 = vpop.f32.mrf.mxu0  ;;  %v2076_v38 = vpop.f32.mrf.mxu1 }
 0x1ef   :  { %2254 = vmatmul.bf16.vlgmr.msra.gmra.mxu0 %v2112_v18  ;;  %v2064_v20 = vadd.f32 %v2063_v19, %v1679_v16 }
 0x1f1   :  { %v2077_v15 = vadd.f32 %v2076_v38, %v2064_v20 }
 0x1f5   :  { %v2089_v21 = vpop.f32.mrf.mxu2  ;;  %v2102_v22 = vpop.f32.mrf.mxu3 }
 0x1f6   :  { %v2090_v17 = vadd.f32 %v2089_v21, %v2077_v15  ;;  %v2065_v23 = vpop.f32.mrf.mxu0  ;;  %v2078_v43 = vpop.f32.mrf.mxu1 }
 0x1f8   :  { %v2103_v24 = vadd.f32 %v2102_v22, %v2090_v17 }
 0x1fa   :  { %vm2107_vm7 = vcmp.gt.f32.partialorder %v2103_v24, 0.0  ;;  %v2109_v25 = vmul.f32 0.2, %v2103_v24 }
 0x1fc   :  { %v2111_v26 = vsel %vm2107_vm7, %v2103_v24, %v2109_v25 }
 0x1fd   :  { %v2113_v27 = vpack.c.bf16 %v2111_v26, %v2111_v26  ;;  %v2091_v28 = vpop.f32.mrf.mxu2  ;;  %v2104_v29 = vpop.f32.mrf.mxu3 }
 0x1ff   :  { %2267 = vmatmul.bf16.vlgmr.msra.gmra.mxu1 %v2113_v27 }
 0x26c   :  { %v2255_v30 = vpop.f32.mrf.mxu0 }
 0x26d   :  { %v2256_v35 = vadd.f32 %v3676_v34, %v2255_v30 }
 0x274   :  { %v2257_v33 = vpop.f32.mrf.mxu0 }
 0x27c   :  { %v2268_v39 = vpop.f32.mrf.mxu1 }
 0x27d   :  { %v2269_v40 = vadd.f32 %v2268_v39, %v2256_v35 }
 0x27f   :  { %v2272_v45 = vsel %vm48_vm0, %v2269_v40, -inf }
 0x280   :  { %2273 = vmax.xlane.f32.xlu0 %v2272_v45 }
 0x284   :  { %v2270_v48 = vpop.f32.mrf.mxu1 }
 0x2f3   :  { %v2274_v3 = vpop.xlane.xlu0 %2273 }
 0x2f4   :  { %v2275_v6 = vsub.f32 %v2269_v40, %v2274_v3 }
 0x2f6   :  { %v2276_v46 = vmul.f32 1.442695, %v2275_v6 }
 0x2f8   :  { %3677 = vpow2.f32 %v2276_v46 }
 0x2fe   :  { %v3678_v47 = vpop.eup %3677 }
 0x2ff   :  { %v2278_v36 = vsel %vm48_vm0, %v3678_v47, 0.0 }
 0x300   :  { %2279 = vadd.xlane.f32.xlu0 %v2278_v36 }
 0x373   :  { %v2280_v49 = vpop.xlane.xlu0 %2279 }
 0x374   :  { %3679 = vrcp.f32 %v2280_v49  ;;  %v2292_v54 = vand.u32 2147483648, %v2280_v49  ;;  %v2290_v56 = vand.u32 2147483647, %v2280_v49  ;;  %vm2286_vm9 = vweird.f32 %v2280_v49 }
 0x376   :  { %v2293_v58 = vor.u32 1.1754944e-38, %v2292_v54  ;;  %vm2291_vm11 = vcmp.eq.f32.partialorder %v2290_v56, 8.507059e+37 }
 0x37a   :  { %v3680_v51 = vpop.eup %3679 }
 0x37b   :  { %v2282_v52 = vmul.f32 %v3680_v51, %v2280_v49  ;;  %vm2287_vm8 = vweird.f32 %v3680_v51 }
 0x37c   :  { %vm2288_vm10 = vmor %vm2286_vm9, %vm2287_vm8 }
 0x37d   :  { %v2283_v53 = vsub.f32 1.0, %v2282_v52 }
 0x37f   :  { %v2284_v55 = vmul.f32 %v3680_v51, %v2283_v53 }
 0x381   :  { %v2285_v57 = vadd.f32 %v3680_v51, %v2284_v55 }
 0x383   :  { %v2289_v59 = vsel %vm2288_vm10, %v3680_v51, %v2285_v57 }
 0x384   :  { %v2294_v60 = vsel %vm2291_vm11, %v2293_v58, %v2289_v59 }
 0x385   :  { %v2295_v61 = vmul.f32 %v3678_v47, %v2294_v60 }
 0x387   :  { %2296 = vst [vmem:[#allocation3] sm:$0x3] %v2295_v61 }
 0x388   :  { %2307 = dma.vmem_to_hbm [thread:$0]  %s2303_s24, 32, %s2305_s27, [#allocation4]  }
 0x389   :  { %3705 = dma.done.wait [#allocation4], 32  }
 0x38a   :  { %3706 = vsyncadd [#allocation4], 4294967264 }
 0x38b   :  { %2312 = vsyncpa [#allocation4], 1 }

</bundles_post_ra>
